<compile_context>
chip_gen: v7x
topology: tpu7x:2x2x1
jax: 0.10.0
libtpu: 0.0.40
codegen_flags: <defaults>
</compile_context>

<pallas_src>
import jax
import jax.numpy as jnp
from jax import lax
from jax.experimental import pallas as pl
from jax.experimental.pallas import tpu as pltpu


# ----------------------------------------------------------------------------
# Kernel 1: ConvTranspose2d(kernel=2, stride=2) as a single MXU matmul.
# ----------------------------------------------------------------------------
def _deconv2x2_kernel(x_ref, w_ref, b_ref, o_ref):
    # x_ref: (1, Hh, Wh, Cin) bf16
    # w_ref: (Cin, 4*Cout)    bf16, column = (dy*2+dx)*Cout + co
    # b_ref: (1, 4*Cout)      f32  (bias replicated per tap)
    # o_ref: (1, Hh, Wh, 4*Cout) bf16
    Hh, Wh, Cin = x_ref.shape[1], x_ref.shape[2], x_ref.shape[3]
    C4 = w_ref.shape[1]
    x = x_ref[0].reshape(Hh * Wh, Cin)
    y = jnp.dot(x, w_ref[...], preferred_element_type=jnp.float32) + b_ref[...]
    o_ref[...] = y.reshape(1, Hh, Wh, C4).astype(o_ref.dtype)


# ----------------------------------------------------------------------------
# Kernel 2: fused [zero-pad + concat(up, skip) + conv3x3 + ReLU + conv3x3 + ReLU]
# ----------------------------------------------------------------------------
def _up_conv2_kernel(up_ref, low_ref, w1_ref, b1_ref, w2_ref, b2_ref,
                     out_ref, cat_pad, mid_pad, col1, col2):
    # up_ref : (1, H, W, Cup) bf16   (interleaved deconv output)
    # low_ref: (1, H, W, Cs)  bf16   (skip feature)
    # w1_ref : (9*(Cup+Cs), Cm) bf16 ; b1_ref: (1, Cm) f32
    # w2_ref : (9*Cm, Co)       bf16 ; b2_ref: (1, Co) f32
    # out_ref: (1, H, W, Co) f32
    # scratches: cat_pad (H+2, W+2, Cup+Cs) bf16, mid_pad (H+2, W+2, Cm) bf16,
    #            col1 (H*W, 9*(Cup+Cs)) bf16, col2 (H*W, 9*Cm) bf16
    H, W = out_ref.shape[1], out_ref.shape[2]
    Cup = up_ref.shape[3]
    Cs = low_ref.shape[3]
    Cin1 = Cup + Cs
    Cm = mid_pad.shape[-1]
    Co = out_ref.shape[3]

    # ---- fused concat + halo pad, entirely in VMEM (no jnp.pad / HBM trip)
    cat_pad[...] = jnp.zeros(cat_pad.shape, cat_pad.dtype)
    cat_pad[1:H + 1, 1:W + 1, 0:Cup] = up_ref[0]
    cat_pad[1:H + 1, 1:W + 1, Cup:Cin1] = low_ref[0]

    # ---- conv1: im2col scratch once, one MXU matmul with K = 9*Cin1
    for ty in range(3):
        for tx in range(3):
            k = ty * 3 + tx
            col1[:, k * Cin1:(k + 1) * Cin1] = (
                cat_pad[ty:ty + H, tx:tx + W, :].reshape(H * W, Cin1))
    acc1 = jnp.dot(col1[...], w1_ref[...], preferred_element_type=jnp.float32)
    acc1 = jnp.maximum(acc1 + b1_ref[...], 0.0)                 # ReLU

    mid_pad[...] = jnp.zeros(mid_pad.shape, mid_pad.dtype)
    mid_pad[1:H + 1, 1:W + 1, :] = acc1.reshape(H, W, Cm).astype(mid_pad.dtype)

    # ---- conv2: same im2col + single matmul
    for ty in range(3):
        for tx in range(3):
            k = ty * 3 + tx
            col2[:, k * Cm:(k + 1) * Cm] = (
                mid_pad[ty:ty + H, tx:tx + W, :].reshape(H * W, Cm))
    acc2 = jnp.dot(col2[...], w2_ref[...], preferred_element_type=jnp.float32)
    acc2 = jnp.maximum(acc2 + b2_ref[...], 0.0)                 # ReLU
    out_ref[...] = acc2.reshape(1, H, W, Co).astype(out_ref.dtype)


# ----------------------------------------------------------------------------
# Forward wrapper (NCHW in / NCHW out, like PyTorch)
# ----------------------------------------------------------------------------
def unet_up_forward(prepared, high_nchw, low_nchw):
    high = jnp.transpose(high_nchw, (0, 2, 3, 1)).astype(jnp.bfloat16)  # NHWC
    low = jnp.transpose(low_nchw, (0, 2, 3, 1)).astype(jnp.bfloat16)
    N, Hh, Wh, Cin = high.shape
    _, H, W, Cs = low.shape
    Cup = prepared['up_b4'].shape[1] // 4
    Cm = prepared['b1'].shape[1]
    Co = prepared['b2'].shape[1]
    Cin1 = Cup + Cs

    # --- kernel 1: deconv, all 4 sub-pixel taps from one matmul
    y4 = pl.pallas_call(
        _deconv2x2_kernel,
        grid=(N,),
        in_specs=[pl.BlockSpec((1, Hh, Wh, Cin), lambda n: (n, 0, 0, 0)),
                  pl.BlockSpec((Cin, 4 * Cup), lambda n: (0, 0)),
                  pl.BlockSpec((1, 4 * Cup), lambda n: (0, 0))],
        out_specs=pl.BlockSpec((1, Hh, Wh, 4 * Cup), lambda n: (n, 0, 0, 0)),
        out_shape=jax.ShapeDtypeStruct((N, Hh, Wh, 4 * Cup), jnp.bfloat16),
        compiler_params=pltpu.CompilerParams(dimension_semantics=("parallel",)),
    )(high, prepared['up_w'], prepared['up_b4'])

    # Sub-pixel interleave (N,Hh,Wh,2,2,C) -> (N,2Hh,2Wh,C): 32 KB layout glue.
    # TODO(synk): doing this interleave in-kernel needs a lane->sublane relayout
    # or strided scatter stores; kept as a tiny XLA reshape/transpose instead.
    up = y4.reshape(N, Hh, Wh, 2, 2, Cup)
    up = jnp.transpose(up, (0, 1, 3, 2, 4, 5)).reshape(N, 2 * Hh, 2 * Wh, Cup)

    # --- kernel 2: pad + concat + conv3x3 + ReLU + conv3x3 + ReLU, fully fused
    out = pl.pallas_call(
        _up_conv2_kernel,
        grid=(N,),
        in_specs=[pl.BlockSpec((1, H, W, Cup), lambda n: (n, 0, 0, 0)),
                  pl.BlockSpec((1, H, W, Cs), lambda n: (n, 0, 0, 0)),
                  pl.BlockSpec((9 * Cin1, Cm), lambda n: (0, 0)),
                  pl.BlockSpec((1, Cm), lambda n: (0, 0)),
                  pl.BlockSpec((9 * Cm, Co), lambda n: (0, 0)),
                  pl.BlockSpec((1, Co), lambda n: (0, 0))],
        out_specs=pl.BlockSpec((1, H, W, Co), lambda n: (n, 0, 0, 0)),
        out_shape=jax.ShapeDtypeStruct((N, H, W, Co), jnp.float32),
        scratch_shapes=[pltpu.VMEM((H + 2, W + 2, Cin1), jnp.bfloat16),
                        pltpu.VMEM((H + 2, W + 2, Cm), jnp.bfloat16),
                        pltpu.VMEM((H * W, 9 * Cin1), jnp.bfloat16),
                        pltpu.VMEM((H * W, 9 * Cm), jnp.bfloat16)],
        compiler_params=pltpu.CompilerParams(dimension_semantics=("parallel",)),
    )(up, low, prepared['w1'], prepared['b1'], prepared['w2'], prepared['b2'])

    return jnp.transpose(out, (0, 3, 1, 2))                      # NHWC -> NCHW


# ----------------------------------------------------------------------------
# Parameters: PyTorch-layout init + one-time kernel-layout (bf16) preparation
# ----------------------------------------------------------------------------
def _kaiming(key, shape, fan_in):
    return ((2.0 / float(fan_in)) ** 0.5) * jax.random.normal(key, shape, jnp.float32)


def init_unet_up_params(key, in_size, out_size):
    """PyTorch-layout f32 params for unetUp(in_size, out_size, is_deconv=True)."""
    k1, k2, k3, kb1, kb2, kb3 = jax.random.split(key, 6)
    return {
        # ConvTranspose2d(in_size, out_size, 2, 2): weight (Cin, Cout, 2, 2)
        'up_w': _kaiming(k1, (in_size, out_size, 2, 2), in_size * 4),
        'up_b': 0.1 * jax.random.normal(kb1, (out_size,), jnp.float32),
        # unetConv2(in_size, out_size, is_batchnorm=False): 2 x (conv3x3 + ReLU)
        'w1': _kaiming(k2, (out_size, in_size, 3, 3), in_size * 9),
        'b1': 0.1 * jax.random.normal(kb2, (out_size,), jnp.float32),
        'w2': _kaiming(k3, (out_size, out_size, 3, 3), out_size * 9),
        'b2': 0.1 * jax.random.normal(kb3, (out_size,), jnp.float32),
    }
    # TODO(synk): is_deconv=False branch (bilinear upsample + 1x1 conv) and
    # n_concat > 2 (multiple skip features) are not implemented.


def prepare_params(p):
    """One-time conversion to kernel-friendly im2col / channels-last bf16 layouts."""
    cin, cout = p['up_w'].shape[0], p['up_w'].shape[1]
    up_w = jnp.transpose(p['up_w'], (0, 2, 3, 1)).reshape(cin, 4 * cout)
    up_b4 = jnp.tile(p['up_b'].reshape(1, cout), (1, 4))

    def conv_w(w):  # (Co, Ci, 3, 3) -> ((ty*3+tx)*Ci + ci, Co)
        co, ci = w.shape[0], w.shape[1]
        return jnp.transpose(w, (2, 3, 1, 0)).reshape(9 * ci, co)

    return {
        'up_w': up_w.astype(jnp.bfloat16),
        'up_b4': up_b4.astype(jnp.float32),
        'w1': conv_w(p['w1']).astype(jnp.bfloat16),
        'b1': p['b1'].reshape(1, -1).astype(jnp.float32),
        'w2': conv_w(p['w2']).astype(jnp.bfloat16),
        'b2': p['b2'].reshape(1, -1).astype(jnp.float32),
    }


# ----------------------------------------------------------------------------
# Pure-JAX (f32) reference of the PyTorch module, for a numerical sanity check
# ----------------------------------------------------------------------------
def _ref_unet_up(p, high_nchw, low_nchw):
    t = jnp.einsum('nihw,iodk->nohdwk', high_nchw, p['up_w'])
    N, Co, Hh, _, Wh, _ = t.shape
    up = t.reshape(N, Co, 2 * Hh, 2 * Wh) + p['up_b'][None, :, None, None]
    cat = jnp.concatenate([up, low_nchw], axis=1)

    def conv3x3(x, w, b):
        y = lax.conv_general_dilated(x, w, (1, 1), ((1, 1), (1, 1)),
                                     dimension_numbers=('NCHW', 'OIHW', 'NCHW'))
        return jnp.maximum(y + b[None, :, None, None], 0.0)

    return conv3x3(conv3x3(cat, p['w1'], p['b1']), p['w2'], p['b2'])


if __name__ == "__main__":
    key = jax.random.PRNGKey(0)
    kp, kh, kl = jax.random.split(key, 3)

    in_size, out_size = 64, 32          # skip feature has in_size - out_size channels
    N, Hh, Wh = 2, 8, 8                 # high-level feature spatial size
    H, W = 2 * Hh, 2 * Wh

    params = init_unet_up_params(kp, in_size, out_size)
    prepared = prepare_params(params)

    high = jax.random.normal(kh, (N, in_size, Hh, Wh), jnp.float32)              # NCHW
    low = jax.random.normal(kl, (N, in_size - out_size, H, W), jnp.float32)      # NCHW

    out = jax.jit(unet_up_forward)(prepared, high, low)
    out = jax.block_until_ready(out)
    assert out.shape == (N, out_size, H, W), out.shape
    assert bool(jnp.all(jnp.isfinite(out)))

    ref = _ref_unet_up(params, high, low)
    err = float(jnp.max(jnp.abs(out - ref)) / (jnp.max(jnp.abs(ref)) + 1e-6))
    assert err < 0.08, f"mismatch vs reference: max-err/peak = {err}"

    print("KERNEL_OK")
</pallas_src>

<mosaic_0001>
module attributes {stable_mosaic.version = 11 : i64} {
  func.func @_deconv2x2_kernel(%arg0: i32, %arg1: memref<1x8x8x64xbf16, #tpu.memory_space<vmem>>, %arg2: memref<64x128xbf16, #tpu.memory_space<vmem>>, %arg3: memref<1x128xf32, #tpu.memory_space<vmem>>, %arg4: memref<1x8x8x128xbf16, #tpu.memory_space<vmem>>) attributes {dimension_semantics = [#tpu.dimension_semantics<parallel>], iteration_bounds = array<i64: 2>, scalar_prefetch = 0 : i64, scratch_operands = 0 : i64, tpu.core_type = #tpu.core_type<tc>, window_params = [{transform_indices = @transform_0, window_bounds = array<i64: 1, 8, 8, 64>}, {pipeline_mode = #tpu.pipeline_mode<synchronous>, transform_indices = @transform_1, window_bounds = array<i64: 64, 128>}, {pipeline_mode = #tpu.pipeline_mode<synchronous>, transform_indices = @transform_2, window_bounds = array<i64: 1, 128>}, {transform_indices = @transform_3, window_bounds = array<i64: 1, 8, 8, 128>}]} {
    %c0 = arith.constant 0 : index
    %c0_0 = arith.constant 0 : index
    %c0_1 = arith.constant 0 : index
    %c0_2 = arith.constant 0 : index
    %0 = vector.load %arg1[%c0, %c0_0, %c0_1, %c0_2] : memref<1x8x8x64xbf16, #tpu.memory_space<vmem>>, vector<1x8x8x64xbf16>
    %1 = vector.shape_cast %0 : vector<1x8x8x64xbf16> to vector<8x8x64xbf16>
    %2 = vector.shape_cast %1 : vector<8x8x64xbf16> to vector<64x64xbf16>
    %c0_3 = arith.constant 0 : index
    %c0_4 = arith.constant 0 : index
    %3 = vector.load %arg2[%c0_3, %c0_4] : memref<64x128xbf16, #tpu.memory_space<vmem>>, vector<64x128xbf16>
    %cst = arith.constant dense<0.000000e+00> : vector<64x128xf32>
    %4 = tpu.matmul %2, %3, %cst {dimension_numbers = #tpu.dot_dimension_numbers<[1], [0], [0], [1], [0, 0, 1, 1], [], []>} : vector<64x64xbf16>, vector<64x128xbf16>, vector<64x128xf32> -> vector<64x128xf32>
    %c0_5 = arith.constant 0 : index
    %c0_6 = arith.constant 0 : index
    %5 = vector.load %arg3[%c0_5, %c0_6] : memref<1x128xf32, #tpu.memory_space<vmem>>, vector<1x128xf32>
    %6 = vector.broadcast %5 : vector<1x128xf32> to vector<64x128xf32>
    %7 = arith.addf %4, %6 : vector<64x128xf32>
    %8 = vector.shape_cast %7 : vector<64x128xf32> to vector<1x8x8x128xf32>
    %9 = arith.truncf %8 : vector<1x8x8x128xf32> to vector<1x8x8x128xbf16>
    %c0_7 = arith.constant 0 : index
    %c0_8 = arith.constant 0 : index
    %c0_9 = arith.constant 0 : index
    %c0_10 = arith.constant 0 : index
    %10 = vector.load %arg4[%c0_7, %c0_8, %c0_9, %c0_10] : memref<1x8x8x128xbf16, #tpu.memory_space<vmem>>, vector<1x8x8x128xbf16>
    tpu.vector_store %arg4[%c0_7, %c0_8, %c0_9, %c0_10], %9 {strides = array<i32>} : memref<1x8x8x128xbf16, #tpu.memory_space<vmem>>, vector<1x8x8x128xbf16>,
    return
  }
  func.func @transform_0(%arg0: i32) -> (i32, i32, i32, i32) {
    %c0_i32 = arith.constant 0 : i32
    %c0_i32_0 = arith.constant 0 : i32
    %c0_i32_1 = arith.constant 0 : i32
    %c0_i32_2 = arith.constant 0 : i32
    return %arg0, %c0_i32, %c0_i32_0, %c0_i32_1 : i32, i32, i32, i32
  }
  func.func @transform_1(%arg0: i32) -> (i32, i32) {
    %c0_i32 = arith.constant 0 : i32
    %c0_i32_0 = arith.constant 0 : i32
    %c0_i32_1 = arith.constant 0 : i32
    return %c0_i32, %c0_i32_0 : i32, i32
  }
  func.func @transform_2(%arg0: i32) -> (i32, i32) {
    %c0_i32 = arith.constant 0 : i32
    %c0_i32_0 = arith.constant 0 : i32
    %c0_i32_1 = arith.constant 0 : i32
    return %c0_i32, %c0_i32_0 : i32, i32
  }
  func.func @transform_3(%arg0: i32) -> (i32, i32, i32, i32) {
    %c0_i32 = arith.constant 0 : i32
    %c0_i32_0 = arith.constant 0 : i32
    %c0_i32_1 = arith.constant 0 : i32
    %c0_i32_2 = arith.constant 0 : i32
    return %arg0, %c0_i32, %c0_i32_0, %c0_i32_1 : i32, i32, i32, i32
  }
}

module attributes {stable_mosaic.version = 11 : i64} {
  func.func @_up_conv2_kernel(%arg0: i32, %arg1: memref<1x16x16x32xbf16, #tpu.memory_space<vmem>>, %arg2: memref<1x16x16x32xbf16, #tpu.memory_space<vmem>>, %arg3: memref<576x32xbf16, #tpu.memory_space<vmem>>, %arg4: memref<1x32xf32, #tpu.memory_space<vmem>>, %arg5: memref<288x32xbf16, #tpu.memory_space<vmem>>, %arg6: memref<1x32xf32, #tpu.memory_space<vmem>>, %arg7: memref<1x16x16x32xf32, #tpu.memory_space<vmem>>, %arg8: memref<18x18x64xbf16, #tpu.memory_space<vmem>>, %arg9: memref<18x18x32xbf16, #tpu.memory_space<vmem>>, %arg10: memref<256x576xbf16, #tpu.memory_space<vmem>>, %arg11: memref<256x288xbf16, #tpu.memory_space<vmem>>) attributes {dimension_semantics = [#tpu.dimension_semantics<parallel>], iteration_bounds = array<i64: 2>, scalar_prefetch = 0 : i64, scratch_operands = 4 : i64, tpu.core_type = #tpu.core_type<tc>, window_params = [{transform_indices = @transform_0, window_bounds = array<i64: 1, 16, 16, 32>}, {transform_indices = @transform_1, window_bounds = array<i64: 1, 16, 16, 32>}, {pipeline_mode = #tpu.pipeline_mode<synchronous>, transform_indices = @transform_2, window_bounds = array<i64: 576, 32>}, {pipeline_mode = #tpu.pipeline_mode<synchronous>, transform_indices = @transform_3, window_bounds = array<i64: 1, 32>}, {pipeline_mode = #tpu.pipeline_mode<synchronous>, transform_indices = @transform_4, window_bounds = array<i64: 288, 32>}, {pipeline_mode = #tpu.pipeline_mode<synchronous>, transform_indices = @transform_5, window_bounds = array<i64: 1, 32>}, {transform_indices = @transform_6, window_bounds = array<i64: 1, 16, 16, 32>}]} {
    %cst = arith.constant 0.000000e+00 : bf16
    %0 = vector.broadcast %cst : bf16 to vector<18x18x64xbf16>
    %c0 = arith.constant 0 : index
    %c0_0 = arith.constant 0 : index
    %c0_1 = arith.constant 0 : index
    %1 = vector.load %arg8[%c0, %c0_0, %c0_1] : memref<18x18x64xbf16, #tpu.memory_space<vmem>>, vector<18x18x64xbf16>
    tpu.vector_store %arg8[%c0, %c0_0, %c0_1], %0 {strides = array<i32>} : memref<18x18x64xbf16, #tpu.memory_space<vmem>>, vector<18x18x64xbf16>,
    %c0_2 = arith.constant 0 : index
    %c0_3 = arith.constant 0 : index
    %c0_4 = arith.constant 0 : index
    %c0_5 = arith.constant 0 : index
    %2 = vector.load %arg1[%c0_2, %c0_3, %c0_4, %c0_5] : memref<1x16x16x32xbf16, #tpu.memory_space<vmem>>, vector<1x16x16x32xbf16>
    %3 = vector.shape_cast %2 : vector<1x16x16x32xbf16> to vector<16x16x32xbf16>
    %c1 = arith.constant 1 : index
    %c1_6 = arith.constant 1 : index
    %c0_7 = arith.constant 0 : index
    %4 = vector.load %arg8[%c1, %c1_6, %c0_7] : memref<18x18x64xbf16, #tpu.memory_space<vmem>>, vector<16x16x32xbf16>
    tpu.vector_store %arg8[%c1, %c1_6, %c0_7], %3 {strides = array<i32>} : memref<18x18x64xbf16, #tpu.memory_space<vmem>>, vector<16x16x32xbf16>,
    %c0_8 = arith.constant 0 : index
    %c0_9 = arith.constant 0 : index
    %c0_10 = arith.constant 0 : index
    %c0_11 = arith.constant 0 : index
    %5 = vector.load %arg2[%c0_8, %c0_9, %c0_10, %c0_11] : memref<1x16x16x32xbf16, #tpu.memory_space<vmem>>, vector<1x16x16x32xbf16>
    %6 = vector.shape_cast %5 : vector<1x16x16x32xbf16> to vector<16x16x32xbf16>
    %c1_12 = arith.constant 1 : index
    %c1_13 = arith.constant 1 : index
    %c32 = arith.constant 32 : index
    %7 = vector.load %arg8[%c1_12, %c1_13, %c32] : memref<18x18x64xbf16, #tpu.memory_space<vmem>>, vector<16x16x32xbf16>
    tpu.vector_store %arg8[%c1_12, %c1_13, %c32], %6 {strides = array<i32>} : memref<18x18x64xbf16, #tpu.memory_space<vmem>>, vector<16x16x32xbf16>,
    %c0_14 = arith.constant 0 : index
    %c0_15 = arith.constant 0 : index
    %c0_16 = arith.constant 0 : index
    %8 = vector.load %arg8[%c0_14, %c0_15, %c0_16] : memref<18x18x64xbf16, #tpu.memory_space<vmem>>, vector<16x16x64xbf16>
    %9 = vector.shape_cast %8 : vector<16x16x64xbf16> to vector<256x64xbf16>
    %c0_17 = arith.constant 0 : index
    %c0_18 = arith.constant 0 : index
    %10 = vector.load %arg10[%c0_17, %c0_18] : memref<256x576xbf16, #tpu.memory_space<vmem>>, vector<256x64xbf16>
    tpu.vector_store %arg10[%c0_17, %c0_18], %9 {strides = array<i32>} : memref<256x576xbf16, #tpu.memory_space<vmem>>, vector<256x64xbf16>,
    %c0_19 = arith.constant 0 : index
    %c1_20 = arith.constant 1 : index
    %c0_21 = arith.constant 0 : index
    %11 = vector.load %arg8[%c0_19, %c1_20, %c0_21] : memref<18x18x64xbf16, #tpu.memory_space<vmem>>, vector<16x16x64xbf16>
    %12 = vector.shape_cast %11 : vector<16x16x64xbf16> to vector<256x64xbf16>
    %c0_22 = arith.constant 0 : index
    %c64 = arith.constant 64 : index
    %13 = vector.load %arg10[%c0_22, %c64] : memref<256x576xbf16, #tpu.memory_space<vmem>>, vector<256x64xbf16>
    tpu.vector_store %arg10[%c0_22, %c64], %12 {strides = array<i32>} : memref<256x576xbf16, #tpu.memory_space<vmem>>, vector<256x64xbf16>,
    %c0_23 = arith.constant 0 : index
    %c2 = arith.constant 2 : index
    %c0_24 = arith.constant 0 : index
    %14 = vector.load %arg8[%c0_23, %c2, %c0_24] : memref<18x18x64xbf16, #tpu.memory_space<vmem>>, vector<16x16x64xbf16>
    %15 = vector.shape_cast %14 : vector<16x16x64xbf16> to vector<256x64xbf16>
    %c0_25 = arith.constant 0 : index
    %c128 = arith.constant 128 : index
    %16 = vector.load %arg10[%c0_25, %c128] : memref<256x576xbf16, #tpu.memory_space<vmem>>, vector<256x64xbf16>
    tpu.vector_store %arg10[%c0_25, %c128], %15 {strides = array<i32>} : memref<256x576xbf16, #tpu.memory_space<vmem>>, vector<256x64xbf16>,
    %c1_26 = arith.constant 1 : index
    %c0_27 = arith.constant 0 : index
    %c0_28 = arith.constant 0 : index
    %17 = vector.load %arg8[%c1_26, %c0_27, %c0_28] : memref<18x18x64xbf16, #tpu.memory_space<vmem>>, vector<16x16x64xbf16>
    %18 = vector.shape_cast %17 : vector<16x16x64xbf16> to vector<256x64xbf16>
    %c0_29 = arith.constant 0 : index
    %c192 = arith.constant 192 : index
    %19 = vector.load %arg10[%c0_29, %c192] : memref<256x576xbf16, #tpu.memory_space<vmem>>, vector<256x64xbf16>
    tpu.vector_store %arg10[%c0_29, %c192], %18 {strides = array<i32>} : memref<256x576xbf16, #tpu.memory_space<vmem>>, vector<256x64xbf16>,
    %c1_30 = arith.constant 1 : index
    %c1_31 = arith.constant 1 : index
    %c0_32 = arith.constant 0 : index
    %20 = vector.load %arg8[%c1_30, %c1_31, %c0_32] : memref<18x18x64xbf16, #tpu.memory_space<vmem>>, vector<16x16x64xbf16>
    %21 = vector.shape_cast %20 : vector<16x16x64xbf16> to vector<256x64xbf16>
    %c0_33 = arith.constant 0 : index
    %c256 = arith.constant 256 : index
    %22 = vector.load %arg10[%c0_33, %c256] : memref<256x576xbf16, #tpu.memory_space<vmem>>, vector<256x64xbf16>
    tpu.vector_store %arg10[%c0_33, %c256], %21 {strides = array<i32>} : memref<256x576xbf16, #tpu.memory_space<vmem>>, vector<256x64xbf16>,
    %c1_34 = arith.constant 1 : index
    %c2_35 = arith.constant 2 : index
    %c0_36 = arith.constant 0 : index
    %23 = vector.load %arg8[%c1_34, %c2_35, %c0_36] : memref<18x18x64xbf16, #tpu.memory_space<vmem>>, vector<16x16x64xbf16>
    %24 = vector.shape_cast %23 : vector<16x16x64xbf16> to vector<256x64xbf16>
    %c0_37 = arith.constant 0 : index
    %c320 = arith.constant 320 : index
    %25 = vector.load %arg10[%c0_37, %c320] : memref<256x576xbf16, #tpu.memory_space<vmem>>, vector<256x64xbf16>
    tpu.vector_store %arg10[%c0_37, %c320], %24 {strides = array<i32>} : memref<256x576xbf16, #tpu.memory_space<vmem>>, vector<256x64xbf16>,
    %c2_38 = arith.constant 2 : index
    %c0_39 = arith.constant 0 : index
    %c0_40 = arith.constant 0 : index
    %26 = vector.load %arg8[%c2_38, %c0_39, %c0_40] : memref<18x18x64xbf16, #tpu.memory_space<vmem>>, vector<16x16x64xbf16>
    %27 = vector.shape_cast %26 : vector<16x16x64xbf16> to vector<256x64xbf16>
    %c0_41 = arith.constant 0 : index
    %c384 = arith.constant 384 : index
    %28 = vector.load %arg10[%c0_41, %c384] : memref<256x576xbf16, #tpu.memory_space<vmem>>, vector<256x64xbf16>
    tpu.vector_store %arg10[%c0_41, %c384], %27 {strides = array<i32>} : memref<256x576xbf16, #tpu.memory_space<vmem>>, vector<256x64xbf16>,
    %c2_42 = arith.constant 2 : index
    %c1_43 = arith.constant 1 : index
    %c0_44 = arith.constant 0 : index
    %29 = vector.load %arg8[%c2_42, %c1_43, %c0_44] : memref<18x18x64xbf16, #tpu.memory_space<vmem>>, vector<16x16x64xbf16>
    %30 = vector.shape_cast %29 : vector<16x16x64xbf16> to vector<256x64xbf16>
    %c0_45 = arith.constant 0 : index
    %c448 = arith.constant 448 : index
    %31 = vector.load %arg10[%c0_45, %c448] : memref<256x576xbf16, #tpu.memory_space<vmem>>, vector<256x64xbf16>
    tpu.vector_store %arg10[%c0_45, %c448], %30 {strides = array<i32>} : memref<256x576xbf16, #tpu.memory_space<vmem>>, vector<256x64xbf16>,
    %c2_46 = arith.constant 2 : index
    %c2_47 = arith.constant 2 : index
    %c0_48 = arith.constant 0 : index
    %32 = vector.load %arg8[%c2_46, %c2_47, %c0_48] : memref<18x18x64xbf16, #tpu.memory_space<vmem>>, vector<16x16x64xbf16>
    %33 = vector.shape_cast %32 : vector<16x16x64xbf16> to vector<256x64xbf16>
    %c0_49 = arith.constant 0 : index
    %c512 = arith.constant 512 : index
    %34 = vector.load %arg10[%c0_49, %c512] : memref<256x576xbf16, #tpu.memory_space<vmem>>, vector<256x64xbf16>
    tpu.vector_store %arg10[%c0_49, %c512], %33 {strides = array<i32>} : memref<256x576xbf16, #tpu.memory_space<vmem>>, vector<256x64xbf16>,
    %c0_50 = arith.constant 0 : index
    %c0_51 = arith.constant 0 : index
    %35 = vector.load %arg10[%c0_50, %c0_51] : memref<256x576xbf16, #tpu.memory_space<vmem>>, vector<256x576xbf16>
    %c0_52 = arith.constant 0 : index
    %c0_53 = arith.constant 0 : index
    %36 = vector.load %arg3[%c0_52, %c0_53] : memref<576x32xbf16, #tpu.memory_space<vmem>>, vector<576x32xbf16>
    %cst_54 = arith.constant dense<0.000000e+00> : vector<256x32xf32>
    %37 = tpu.matmul %35, %36, %cst_54 {dimension_numbers = #tpu.dot_dimension_numbers<[1], [0], [0], [1], [0, 0, 1, 1], [], []>} : vector<256x576xbf16>, vector<576x32xbf16>, vector<256x32xf32> -> vector<256x32xf32>
    %c0_55 = arith.constant 0 : index
    %c0_56 = arith.constant 0 : index
    %38 = vector.load %arg4[%c0_55, %c0_56] : memref<1x32xf32, #tpu.memory_space<vmem>>, vector<1x32xf32>
    %39 = vector.broadcast %38 : vector<1x32xf32> to vector<256x32xf32>
    %40 = arith.addf %37, %39 : vector<256x32xf32>
    %cst_57 = arith.constant 0.000000e+00 : f32
    %41 = vector.broadcast %cst_57 : f32 to vector<256x32xf32>
    %42 = arith.maximumf %40, %41 : vector<256x32xf32>
    %cst_58 = arith.constant 0.000000e+00 : bf16
    %43 = vector.broadcast %cst_58 : bf16 to vector<18x18x32xbf16>
    %c0_59 = arith.constant 0 : index
    %c0_60 = arith.constant 0 : index
    %c0_61 = arith.constant 0 : index
    %44 = vector.load %arg9[%c0_59, %c0_60, %c0_61] : memref<18x18x32xbf16, #tpu.memory_space<vmem>>, vector<18x18x32xbf16>
    tpu.vector_store %arg9[%c0_59, %c0_60, %c0_61], %43 {strides = array<i32>} : memref<18x18x32xbf16, #tpu.memory_space<vmem>>, vector<18x18x32xbf16>,
    %45 = vector.shape_cast %42 : vector<256x32xf32> to vector<16x16x32xf32>
    %46 = arith.truncf %45 : vector<16x16x32xf32> to vector<16x16x32xbf16>
    %c1_62 = arith.constant 1 : index
    %c1_63 = arith.constant 1 : index
    %c0_64 = arith.constant 0 : index
    %47 = vector.load %arg9[%c1_62, %c1_63, %c0_64] : memref<18x18x32xbf16, #tpu.memory_space<vmem>>, vector<16x16x32xbf16>
    tpu.vector_store %arg9[%c1_62, %c1_63, %c0_64], %46 {strides = array<i32>} : memref<18x18x32xbf16, #tpu.memory_space<vmem>>, vector<16x16x32xbf16>,
    %c0_65 = arith.constant 0 : index
    %c0_66 = arith.constant 0 : index
    %c0_67 = arith.constant 0 : index
    %48 = vector.load %arg9[%c0_65, %c0_66, %c0_67] : memref<18x18x32xbf16, #tpu.memory_space<vmem>>, vector<16x16x32xbf16>
    %49 = vector.shape_cast %48 : vector<16x16x32xbf16> to vector<256x32xbf16>
    %c0_68 = arith.constant 0 : index
    %c0_69 = arith.constant 0 : index
    %50 = vector.load %arg11[%c0_68, %c0_69] : memref<256x288xbf16, #tpu.memory_space<vmem>>, vector<256x32xbf16>
    tpu.vector_store %arg11[%c0_68, %c0_69], %49 {strides = array<i32>} : memref<256x288xbf16, #tpu.memory_space<vmem>>, vector<256x32xbf16>,
    %c0_70 = arith.constant 0 : index
    %c1_71 = arith.constant 1 : index
    %c0_72 = arith.constant 0 : index
    %51 = vector.load %arg9[%c0_70, %c1_71, %c0_72] : memref<18x18x32xbf16, #tpu.memory_space<vmem>>, vector<16x16x32xbf16>
    %52 = vector.shape_cast %51 : vector<16x16x32xbf16> to vector<256x32xbf16>
    %c0_73 = arith.constant 0 : index
    %c32_74 = arith.constant 32 : index
    %53 = vector.load %arg11[%c0_73, %c32_74] : memref<256x288xbf16, #tpu.memory_space<vmem>>, vector<256x32xbf16>
    tpu.vector_store %arg11[%c0_73, %c32_74], %52 {strides = array<i32>} : memref<256x288xbf16, #tpu.memory_space<vmem>>, vector<256x32xbf16>,
    %c0_75 = arith.constant 0 : index
    %c2_76 = arith.constant 2 : index
    %c0_77 = arith.constant 0 : index
    %54 = vector.load %arg9[%c0_75, %c2_76, %c0_77] : memref<18x18x32xbf16, #tpu.memory_space<vmem>>, vector<16x16x32xbf16>
    %55 = vector.shape_cast %54 : vector<16x16x32xbf16> to vector<256x32xbf16>
    %c0_78 = arith.constant 0 : index
    %c64_79 = arith.constant 64 : index
    %56 = vector.load %arg11[%c0_78, %c64_79] : memref<256x288xbf16, #tpu.memory_space<vmem>>, vector<256x32xbf16>
    tpu.vector_store %arg11[%c0_78, %c64_79], %55 {strides = array<i32>} : memref<256x288xbf16, #tpu.memory_space<vmem>>, vector<256x32xbf16>,
    %c1_80 = arith.constant 1 : index
    %c0_81 = arith.constant 0 : index
    %c0_82 = arith.constant 0 : index
    %57 = vector.load %arg9[%c1_80, %c0_81, %c0_82] : memref<18x18x32xbf16, #tpu.memory_space<vmem>>, vector<16x16x32xbf16>
    %58 = vector.shape_cast %57 : vector<16x16x32xbf16> to vector<256x32xbf16>
    %c0_83 = arith.constant 0 : index
    %c96 = arith.constant 96 : index
    %59 = vector.load %arg11[%c0_83, %c96] : memref<256x288xbf16, #tpu.memory_space<vmem>>, vector<256x32xbf16>
    tpu.vector_store %arg11[%c0_83, %c96], %58 {strides = array<i32>} : memref<256x288xbf16, #tpu.memory_space<vmem>>, vector<256x32xbf16>,
    %c1_84 = arith.constant 1 : index
    %c1_85 = arith.constant 1 : index
    %c0_86 = arith.constant 0 : index
    %60 = vector.load %arg9[%c1_84, %c1_85, %c0_86] : memref<18x18x32xbf16, #tpu.memory_space<vmem>>, vector<16x16x32xbf16>
    %61 = vector.shape_cast %60 : vector<16x16x32xbf16> to vector<256x32xbf16>
    %c0_87 = arith.constant 0 : index
    %c128_88 = arith.constant 128 : index
    %62 = vector.load %arg11[%c0_87, %c128_88] : memref<256x288xbf16, #tpu.memory_space<vmem>>, vector<256x32xbf16>
    tpu.vector_store %arg11[%c0_87, %c128_88], %61 {strides = array<i32>} : memref<256x288xbf16, #tpu.memory_space<vmem>>, vector<256x32xbf16>,
    %c1_89 = arith.constant 1 : index
    %c2_90 = arith.constant 2 : index
    %c0_91 = arith.constant 0 : index
    %63 = vector.load %arg9[%c1_89, %c2_90, %c0_91] : memref<18x18x32xbf16, #tpu.memory_space<vmem>>, vector<16x16x32xbf16>
    %64 = vector.shape_cast %63 : vector<16x16x32xbf16> to vector<256x32xbf16>
    %c0_92 = arith.constant 0 : index
    %c160 = arith.constant 160 : index
    %65 = vector.load %arg11[%c0_92, %c160] : memref<256x288xbf16, #tpu.memory_space<vmem>>, vector<256x32xbf16>
    tpu.vector_store %arg11[%c0_92, %c160], %64 {strides = array<i32>} : memref<256x288xbf16, #tpu.memory_space<vmem>>, vector<256x32xbf16>,
    %c2_93 = arith.constant 2 : index
    %c0_94 = arith.constant 0 : index
    %c0_95 = arith.constant 0 : index
    %66 = vector.load %arg9[%c2_93, %c0_94, %c0_95] : memref<18x18x32xbf16, #tpu.memory_space<vmem>>, vector<16x16x32xbf16>
    %67 = vector.shape_cast %66 : vector<16x16x32xbf16> to vector<256x32xbf16>
    %c0_96 = arith.constant 0 : index
    %c192_97 = arith.constant 192 : index
    %68 = vector.load %arg11[%c0_96, %c192_97] : memref<256x288xbf16, #tpu.memory_space<vmem>>, vector<256x32xbf16>
    tpu.vector_store %arg11[%c0_96, %c192_97], %67 {strides = array<i32>} : memref<256x288xbf16, #tpu.memory_space<vmem>>, vector<256x32xbf16>,
    %c2_98 = arith.constant 2 : index
    %c1_99 = arith.constant 1 : index
    %c0_100 = arith.constant 0 : index
    %69 = vector.load %arg9[%c2_98, %c1_99, %c0_100] : memref<18x18x32xbf16, #tpu.memory_space<vmem>>, vector<16x16x32xbf16>
    %70 = vector.shape_cast %69 : vector<16x16x32xbf16> to vector<256x32xbf16>
    %c0_101 = arith.constant 0 : index
    %c224 = arith.constant 224 : index
    %71 = vector.load %arg11[%c0_101, %c224] : memref<256x288xbf16, #tpu.memory_space<vmem>>, vector<256x32xbf16>
    tpu.vector_store %arg11[%c0_101, %c224], %70 {strides = array<i32>} : memref<256x288xbf16, #tpu.memory_space<vmem>>, vector<256x32xbf16>,
    %c2_102 = arith.constant 2 : index
    %c2_103 = arith.constant 2 : index
    %c0_104 = arith.constant 0 : index
    %72 = vector.load %arg9[%c2_102, %c2_103, %c0_104] : memref<18x18x32xbf16, #tpu.memory_space<vmem>>, vector<16x16x32xbf16>
    %73 = vector.shape_cast %72 : vector<16x16x32xbf16> to vector<256x32xbf16>
    %c0_105 = arith.constant 0 : index
    %c256_106 = arith.constant 256 : index
    %74 = vector.load %arg11[%c0_105, %c256_106] : memref<256x288xbf16, #tpu.memory_space<vmem>>, vector<256x32xbf16>
    tpu.vector_store %arg11[%c0_105, %c256_106], %73 {strides = array<i32>} : memref<256x288xbf16, #tpu.memory_space<vmem>>, vector<256x32xbf16>,
    %c0_107 = arith.constant 0 : index
    %c0_108 = arith.constant 0 : index
    %75 = vector.load %arg11[%c0_107, %c0_108] : memref<256x288xbf16, #tpu.memory_space<vmem>>, vector<256x288xbf16>
    %c0_109 = arith.constant 0 : index
    %c0_110 = arith.constant 0 : index
    %76 = vector.load %arg5[%c0_109, %c0_110] : memref<288x32xbf16, #tpu.memory_space<vmem>>, vector<288x32xbf16>
    %cst_111 = arith.constant dense<0.000000e+00> : vector<256x32xf32>
    %77 = tpu.matmul %75, %76, %cst_111 {dimension_numbers = #tpu.dot_dimension_numbers<[1], [0], [0], [1], [0, 0, 1, 1], [], []>} : vector<256x288xbf16>, vector<288x32xbf16>, vector<256x32xf32> -> vector<256x32xf32>
    %c0_112 = arith.constant 0 : index
    %c0_113 = arith.constant 0 : index
    %78 = vector.load %arg6[%c0_112, %c0_113] : memref<1x32xf32, #tpu.memory_space<vmem>>, vector<1x32xf32>
    %79 = vector.broadcast %78 : vector<1x32xf32> to vector<256x32xf32>
    %80 = arith.addf %77, %79 : vector<256x32xf32>
    %cst_114 = arith.constant 0.000000e+00 : f32
    %81 = vector.broadcast %cst_114 : f32 to vector<256x32xf32>
    %82 = arith.maximumf %80, %81 : vector<256x32xf32>
    %83 = vector.shape_cast %82 : vector<256x32xf32> to vector<1x16x16x32xf32>
    %c0_115 = arith.constant 0 : index
    %c0_116 = arith.constant 0 : index
    %c0_117 = arith.constant 0 : index
    %c0_118 = arith.constant 0 : index
    %84 = vector.load %arg7[%c0_115, %c0_116, %c0_117, %c0_118] : memref<1x16x16x32xf32, #tpu.memory_space<vmem>>, vector<1x16x16x32xf32>
    tpu.vector_store %arg7[%c0_115, %c0_116, %c0_117, %c0_118], %83 {strides = array<i32>} : memref<1x16x16x32xf32, #tpu.memory_space<vmem>>, vector<1x16x16x32xf32>,
    return
  }
  func.func @transform_0(%arg0: i32) -> (i32, i32, i32, i32) {
    %c0_i32 = arith.constant 0 : i32
    %c0_i32_0 = arith.constant 0 : i32
    %c0_i32_1 = arith.constant 0 : i32
    %c0_i32_2 = arith.constant 0 : i32
    return %arg0, %c0_i32, %c0_i32_0, %c0_i32_1 : i32, i32, i32, i32
  }
  func.func @transform_1(%arg0: i32) -> (i32, i32, i32, i32) {
    %c0_i32 = arith.constant 0 : i32
    %c0_i32_0 = arith.constant 0 : i32
    %c0_i32_1 = arith.constant 0 : i32
    %c0_i32_2 = arith.constant 0 : i32
    return %arg0, %c0_i32, %c0_i32_0, %c0_i32_1 : i32, i32, i32, i32
  }
  func.func @transform_2(%arg0: i32) -> (i32, i32) {
    %c0_i32 = arith.constant 0 : i32
    %c0_i32_0 = arith.constant 0 : i32
    %c0_i32_1 = arith.constant 0 : i32
    return %c0_i32, %c0_i32_0 : i32, i32
  }
  func.func @transform_3(%arg0: i32) -> (i32, i32) {
    %c0_i32 = arith.constant 0 : i32
    %c0_i32_0 = arith.constant 0 : i32
    %c0_i32_1 = arith.constant 0 : i32
    return %c0_i32, %c0_i32_0 : i32, i32
  }
  func.func @transform_4(%arg0: i32) -> (i32, i32) {
    %c0_i32 = arith.constant 0 : i32
    %c0_i32_0 = arith.constant 0 : i32
    %c0_i32_1 = arith.constant 0 : i32
    return %c0_i32, %c0_i32_0 : i32, i32
  }
  func.func @transform_5(%arg0: i32) -> (i32, i32) {
    %c0_i32 = arith.constant 0 : i32
    %c0_i32_0 = arith.constant 0 : i32
    %c0_i32_1 = arith.constant 0 : i32
    return %c0_i32, %c0_i32_0 : i32, i32
  }
  func.func @transform_6(%arg0: i32) -> (i32, i32, i32, i32) {
    %c0_i32 = arith.constant 0 : i32
    %c0_i32_0 = arith.constant 0 : i32
    %c0_i32_1 = arith.constant 0 : i32
    %c0_i32_2 = arith.constant 0 : i32
    return %arg0, %c0_i32, %c0_i32_0, %c0_i32_1 : i32, i32, i32, i32
  }
}

</mosaic_0001>

<bundles_post_ra>
// kernel: unet_up_forward.2
= control target key start
LH: loop header
LB: loop body
LE: loop exit
PB: predicated region body
PF: predicated region fallthrough
CT: control target
= control target key end

     0   :  { %s513_s12 = smov 0   ;;  %s556_s0 = inlined_call_operand.vmem [shape: bf16[2,8,8,64], index: 0, kind: input, shape index: {}]   ;;  %s557_s1 = inlined_call_operand.vmem [shape: bf16[64,128], index: 1, kind: input, shape index: {}]   ;;  %s558_s2 = inlined_call_operand.vmem [shape: f32[1,128], index: 2, kind: input, shape index: {}]   ;;  %s559_s3 = inlined_call_operand.vmem [shape: bf16[2,8,8,128], index: 3, kind: output, shape index: {}]  }
   0x1 LB: > { %s388_s13 = sadd.s32 4294967295, %s491_s12   ;;  %p392_p0 = scmp.ge.s32.totalorder %s491_s12, 1  ;;  %s491_s12 = sphi %s513_s12, %s13_s12  }
   0x2   : > { %p137_p1 = scmp.lt.s32.totalorder %s491_s12, 3 }
   0x4   : > { %p138_p2 = pnand %p392_p0, %p137_p1 }
   0x5   : > { %v477_v0 = vld [vmem:[%s557_s1] sm:$0xff] (!%p138_p2)   ;;  %p161_p3 = scmp.lt.s32.totalorder (!%p138_p2), %s388_s13, 1  ;;  %v478_v1 = vld [vmem:[%s557_s1 + $0x8] sm:$0xff] (!%p138_p2)   ;;  %v479_v2 = vld [vmem:[%s557_s1 + $0x10] sm:$0xff] (!%p138_p2)   ;;  %vm239_vm0 = vcmask (!%p138_p2), 523264  }
   0x6   : > { %141 = sbr.rel (%p138_p2) target bundleno = 242 (0xf2), region = 32  ;;  %445 = vmatprep.subr.bf16.mxu0 (!%p138_p2), %v477_v0  ;;  %461 = vmatprep.subr.bf16.mxu1 (!%p138_p2), %v477_v0  ;;  %v480_v5 = vld [vmem:[%s557_s1 + $0x18] sm:$0xff] (!%p138_p2)   ;;  %v397_v9 = vld [vmem:[%s558_s2] ss:$0 sm:$0xff] (!%p138_p2) }
   0x7   : > { %446 = vmatpush3.bf16.msra.mxu0 (!%p138_p2), %v477_v0  ;;  %465 = vmatpush3.bf16.msra.mxu1 (!%p138_p2), %v477_v0 }
   0x8   : > { %447 = vmatprep.subr.bf16.mxu0 (!%p138_p2), %v478_v1  ;;  %462 = vmatprep.subr.bf16.mxu1 (!%p138_p2), %v478_v1 }
   0xb   : > { %448 = vmatpush3.bf16.msra.mxu0 (!%p138_p2), %v478_v1  ;;  %466 = vmatpush3.bf16.msra.mxu1 (!%p138_p2), %v478_v1 }
   0xc   : > { %449 = vmatprep.subr.bf16.mxu0 (!%p138_p2), %v479_v2  ;;  %463 = vmatprep.subr.bf16.mxu1 (!%p138_p2), %v479_v2 }
   0xd   : > { %s561_s13 = smov (!%p161_p3, %s388_s13), 1 }
   0xe   : > { %s412_s20 = sshll.u32 %s561_s13, 5 }
   0xf   : > { %s165_s23 = scalar_lea.vmem %s556_s0, %s412_s20  ;;  %450 = vmatpush3.bf16.msra.mxu0 %v479_v2  ;;  %467 = vmatpush3.bf16.msra.mxu1 %v479_v2  ;;  %s170_s30 = scalar_lea.vmem %s559_s3, %s412_s20 }
  0x10   : > { %v481_v3 = vld [vmem:[%s165_s23] sm:$0xff]   ;;  %v482_v4 = vld [vmem:[%s165_s23 + $0x10] sm:$0xff]   ;;  %451 = vmatprep.subr.bf16.mxu0 %v480_v5  ;;  %464 = vmatprep.subr.bf16.mxu1 %v480_v5  ;;  %v483_v6 = vld [vmem:[%s165_s23 + $0x8] sm:$0xff]  }
  0x11   : > { %453 = vmatprep.mubr.msk.bf16.mxu0 %vm239_vm0, %v481_v3  ;;  %457 = vmatprep.mubr.msk.bf16.mxu1 %vm239_vm0, %v482_v4  ;;  %v484_v7 = vld [vmem:[%s165_s23 + $0x18] sm:$0xff]  }
  0x13   : > { %452 = vmatpush3.bf16.msra.mxu0 %v480_v5  ;;  %468 = vmatpush3.bf16.msra.mxu1 %v480_v5 }
  0x16   : > { %454 = vmatmul.mubr.msk.bf16.vlgmr.msra.gmra.mrb[0].mxu0 %vm239_vm0, %v483_v6  ;;  %458 = vmatmul.mubr.msk.bf16.vlgmr.msra.gmra.mrb[0].mxu1 %vm239_vm0, %v484_v7 }
  0xe9   : > { %v455_v8 = vpop.f32.mrb[0].mxu0  ;;  %v459_v10 = vpop.f32.mrb[0].mxu1 }
  0xea   : > { %v286_v11 = vpop.f32.mrb[1].mxu0  ;;  %v302_v12 = vpop.f32.mrb[1].mxu1  ;;  %v295_v15 = vadd.f32 %v455_v8, %v397_v9  ;;  %v311_v16 = vadd.f32 %v459_v10, %v397_v9 }
  0xeb   : > { %v456_v13 = vpop.f32.mrb[2].mxu0  ;;  %v460_v14 = vpop.f32.mrb[2].mxu1  ;;  %v287_v21 = vadd.f32 %v397_v9, %v286_v11  ;;  %v303_v22 = vadd.f32 %v397_v9, %v302_v12 }
  0xec   : > { %v298_v17 = vadd.f32 %v456_v13, %v397_v9  ;;  %v314_v18 = vadd.f32 %v460_v14, %v397_v9  ;;  %v289_v19 = vpop.f32.mrb[3].mxu0  ;;  %v305_v20 = vpop.f32.mrb[3].mxu1 }
  0xed   : > { %v290_v23 = vadd.f32 %v397_v9, %v289_v19  ;;  %v306_v24 = vadd.f32 %v397_v9, %v305_v20 }
  0xee   : > { %v422_v25 = vpack.c.bf16 %v298_v17, %v295_v15  ;;  %v432_v26 = vpack.c.bf16 %v314_v18, %v311_v16 }
  0xef   : > { %v417_v27 = vpack.c.bf16 %v290_v23, %v287_v21  ;;  %v427_v28 = vpack.c.bf16 %v306_v24, %v303_v22 }
  0xf0   : > { %434 = vst [vmem:[%s170_s30 + $0x8] sm:$0xff] %v422_v25   ;;  %436 = vst [vmem:[%s170_s30 + $0x18] sm:$0xff] %v432_v26  }
  0xf1   : > { %418 = vst [vmem:[%s170_s30] sm:$0xff] %v417_v27   ;;  %435 = vst [vmem:[%s170_s30 + $0x10] sm:$0xff] %v427_v28  }
  0xf2 PF: > { %s13_s12 = sadd.s32 1, %s491_s12  }
  0xf3   : > { %p10_p4 = scmp.ge.s32.totalorder %s13_s12, 4  }
  0xf5   :  { %12 = sbr.rel (!%p10_p4) target bundleno = 1 (0x1), region = 62 }

// kernel: unet_up_forward.3
= control target key start
LH: loop header
LB: loop body
LE: loop exit
PB: predicated region body
PF: predicated region fallthrough
CT: control target
= control target key end

     0   :  { %11 = vsyncpa [#allocation7], 0  ;;  %s14887_s0 = inlined_call_operand.vmem [shape: bf16[2,16,16,32], index: 0, kind: input, shape index: {}]   ;;  %s14888_s1 = inlined_call_operand.vmem [shape: bf16[2,16,16,32], index: 1, kind: input, shape index: {}]   ;;  %s14889_s2 = inlined_call_operand.vmem [shape: bf16[576,32], index: 2, kind: input, shape index: {}]   ;;  %s14890_s3 = inlined_call_operand.vmem [shape: f32[1,32], index: 3, kind: input, shape index: {}]   ;;  %s14891_s4 = inlined_call_operand.vmem [shape: bf16[288,32], index: 4, kind: input, shape index: {}]   ;;  %s14892_s5 = inlined_call_operand.vmem [shape: f32[1,32], index: 5, kind: input, shape index: {}]   ;;  %s14893_s6 = inlined_call_operand.hbm [shape: f32[2,16,16,32], index: 6, kind: output, shape index: {}]  }
   0x1   :  { %13 = vsyncpa [#allocation7 + $0x1], 0  ;;  %s10911_s21 = smov 0   ;;  %s10913_s22 = smov 0  }
   0x2   :  { %s10915_s23 = smov 0   ;;  %s10917_s24 = smov 0  }
   0x3 LB: > { %s10932_s25 = sadd.s32 4294967295, %s10867_s24   ;;  %s9607_s26 = sadd.s32 4294967294, %s10867_s24   ;;  %s10867_s24 = sphi %s10917_s24, %s15047_s24   ;;  %s10863_s23 = sphi %s10915_s23, %s15046_s23   ;;  %s10859_s22 = sphi %s10913_s22, %s15045_s22   ;;  %s10855_s21 = sphi %s10911_s21, %s15044_s21  }
   0x4   : > { %s10936_s27 = sadd.s32 1, %s10867_s24   ;;  %s162_s28 = sadd.s32 1, %s10863_s23 }
   0x5   : > { %s159_s29 = ssub.s32 %s10867_s24, %s10936_s27  ;;  %p172_p0 = scmp.ne.s32.totalorder %s10863_s23, %s10859_s22 }
   0x6   : > { %p160_p1 = scmp.eq.s32.totalorder %s159_s29, 0  ;;  %p173_p2 = scmp.eq.s32.totalorder %s10932_s25, 1 }
   0x7   : > { %p178_p3 = scmp.ne.s32.totalorder %s10859_s22, %s10855_s21  ;;  %p179_p4 = scmp.eq.s32.totalorder %s9607_s26, 1 }
   0x8   : > { %s10947_s30 = scalar_select %p160_p1, %s10863_s23, %s162_s28  }
   0x9   : > { %p10949_p5 = por %p173_p2, %p172_p0  ;;  %p10953_p6 = por %p179_p4, %p178_p3 }
   0xa   : > { %p9610_p7 = scmp.ge.s32.totalorder %s10867_s24, 1  ;;  %p225_p8 = scmp.lt.s32.totalorder %s10867_s24, 3 }
   0xc   : > { %p226_p9 = pnand %p9610_p7, %p225_p8 }
   0xe   : > { %229 = sbr.rel (%p226_p9) target bundleno = 1447 (0x5a7), region = 44 }
  0x15   : > { %p260_p10 = scmp.lt.s32.totalorder %s10932_s25, 1  ;;  %vm274_vm0 = vcmask 516096   ;;  %vm691_vm1 = vcmask 253952   ;;  %v10869_v0 = vmov 0   ;;  %vm271_vm2 = vcmask 519168   ;;  %s10870_s14 = smov 32  }
  0x16   : > { %278 = vst.msk [vmem:[#allocation2 + $0x14] sm:$0x1] %vm274_vm0, %v10869_v0  ;;  %275 = vst.msk [vmem:[#allocation2 + $0x8] sm:$0x1] %vm274_vm0, %v10869_v0  ;;  %vm683_vm3 = vcmask 257024   ;;  %v14928_v25 = vmov 0 }
  0x17   : > { %s10961_s9 = scalar_select %p260_p10, %s10932_s25, 1  ;;  %281 = vst.msk [vmem:[#allocation2 + $0x20] sm:$0x1] %vm274_vm0, %v10869_v0  ;;  %284 = vst.msk [vmem:[#allocation2 + $0x2c] sm:$0x1] %vm274_vm0, %v10869_v0  ;;  %vm2155_vm13 = vcmask 1042432  }
  0x18   : > { %287 = vst.msk [vmem:[#allocation2 + $0x38] sm:$0x1] %vm274_vm0, %v10869_v0  ;;  %290 = vst.msk [vmem:[#allocation2 + $0x44] sm:$0x1] %vm274_vm0, %v10869_v0  ;;  %vm359_vm4 = vsmask.f32 256 }
  0x19   : > { %293 = vst.msk [vmem:[#allocation2 + $0x50] sm:$0x1] %vm274_vm0, %v10869_v0  ;;  %296 = vst.msk [vmem:[#allocation2 + $0x5c] sm:$0x1] %vm274_vm0, %v10869_v0  ;;  %s10125_s10 = sshll.u32 %s10961_s9, 7  ;;  %s10871_s18 = smov 64  }
  0x1a   : > { %299 = vst.msk [vmem:[#allocation2 + $0x68] sm:$0x1] %vm274_vm0, %v10869_v0  ;;  %302 = vst.msk [vmem:[#allocation2 + $0x74] sm:$0x1] %vm274_vm0, %v10869_v0  ;;  %s11185_s13 = scalar_lea.vmem %s14888_s1, %s10125_s10  ;;  %vm360_vm5 = vsmask.f32 4368  ;;  %s11223_s17 = scalar_lea.vmem %s14887_s0, %s10125_s10 }
  0x1b   : > { %305 = vst.msk [vmem:[#allocation2 + $0x80] sm:$0x1] %vm274_vm0, %v10869_v0  ;;  %308 = vst.msk [vmem:[#allocation2 + $0x8c] sm:$0x1] %vm274_vm0, %v10869_v0  ;;  %v802_v1 = vld [vmem:[%s11185_s13 + $0x4] sm:$0xf] }
  0x1c   : > { %311 = vst.msk [vmem:[#allocation2 + $0x98] sm:$0x1] %vm274_vm0, %v10869_v0  ;;  %314 = vst.msk [vmem:[#allocation2 + $0xa4] sm:$0x1] %vm274_vm0, %v10869_v0  ;;  %v801_v2 = vld [vmem:[%s11185_s13] sm:$0xf] }
  0x1d   : > { %317 = vst.msk [vmem:[#allocation2 + $0xb0] sm:$0x1] %vm274_vm0, %v10869_v0  ;;  %320 = vst.msk [vmem:[#allocation2 + $0xbc] sm:$0x1] %vm274_vm0, %v10869_v0  ;;  %v803_v3 = vld [vmem:[%s11185_s13 + $0x8] sm:$0xf] }
  0x1e   : > { %323 = vst.msk [vmem:[#allocation2 + $0xc8] sm:$0x1] %vm274_vm0, %v10869_v0  ;;  %326 = vst.msk [vmem:[#allocation2 + $0xd4] sm:$0x1] %vm274_vm0, %v10869_v0  ;;  %v842_v4 = vshrl.u32 %v802_v1, 16  ;;  %v845_v5 = vshll.u32 %v802_v1, 16 }
  0x1f   : > { %5276 = vst.msk [vmem:[#allocation3 + $0x8] sm:$0x1] %vm691_vm1, %v10869_v0  ;;  %5279 = vst.msk [vmem:[#allocation3 + $0x14] sm:$0x1] %vm691_vm1, %v10869_v0  ;;  %v834_v6 = vshrl.u32 %v801_v2, 16  ;;  %v837_v7 = vshll.u32 %v801_v2, 16 }
  0x20   : > { %5282 = vst.msk [vmem:[#allocation3 + $0x20] sm:$0x1] %vm691_vm1, %v10869_v0  ;;  %5285 = vst.msk [vmem:[#allocation3 + $0x2c] sm:$0x1] %vm691_vm1, %v10869_v0  ;;  %v804_v8 = vld [vmem:[%s11185_s13 + $0xc] sm:$0xf] }
  0x21   : > { %5288 = vst.msk [vmem:[#allocation3 + $0x38] sm:$0x1] %vm691_vm1, %v10869_v0  ;;  %5291 = vst.msk [vmem:[#allocation3 + $0x44] sm:$0x1] %vm691_vm1, %v10869_v0  ;;  %v851_v9 = vshrl.u32 %v803_v3, 16  ;;  %v859_v10 = vshrl.u32 %v804_v8, 16 }
  0x22   : > { %5294 = vst.msk [vmem:[#allocation3 + $0x50] sm:$0x1] %vm691_vm1, %v10869_v0  ;;  %5297 = vst.msk [vmem:[#allocation3 + $0x5c] sm:$0x1] %vm691_vm1, %v10869_v0  ;;  %v805_v11 = vld [vmem:[%s11185_s13 + $0x10] sm:$0xf] }
  0x23   : > { %5300 = vst.msk [vmem:[#allocation3 + $0x68] sm:$0x1] %vm691_vm1, %v10869_v0  ;;  %5303 = vst.msk [vmem:[#allocation3 + $0x74] sm:$0x1] %vm691_vm1, %v10869_v0  ;;  %v844_v12 = vrot.slane %v842_v4, 7  ;;  %v836_v13 = vrot.slane %v834_v6, 7 }
  0x24   : > { %5306 = vst.msk [vmem:[#allocation3 + $0x80] sm:$0x1] %vm691_vm1, %v10869_v0  ;;  %5309 = vst.msk [vmem:[#allocation3 + $0x8c] sm:$0x1] %vm691_vm1, %v10869_v0  ;;  %v854_v14 = vshll.u32 %v803_v3, 16  ;;  %v862_v15 = vshll.u32 %v804_v8, 16 }
  0x25   : > { %5312 = vst.msk [vmem:[#allocation3 + $0x98] sm:$0x1] %vm691_vm1, %v10869_v0  ;;  %5315 = vst.msk [vmem:[#allocation3 + $0xa4] sm:$0x1] %vm691_vm1, %v10869_v0  ;;  %v806_v16 = vld [vmem:[%s11185_s13 + $0x14] sm:$0xf]  ;;  %v847_v22 = vor.u32 %v845_v5, %v844_v12  ;;  %v839_v23 = vor.u32 %v837_v7, %v836_v13 }
  0x26   : > { %5318 = vst.msk [vmem:[#allocation3 + $0xb0] sm:$0x1] %vm691_vm1, %v10869_v0  ;;  %5321 = vst.msk [vmem:[#allocation3 + $0xbc] sm:$0x1] %vm691_vm1, %v10869_v0  ;;  %v853_v17 = vrot.slane %v851_v9, 7  ;;  %v861_v18 = vrot.slane %v859_v10, 7 }
  0x27   : > { %5324 = vst.msk [vmem:[#allocation3 + $0xc8] sm:$0x1] %vm691_vm1, %v10869_v0  ;;  %5327 = vst.msk [vmem:[#allocation3 + $0xd4] sm:$0x1] %vm691_vm1, %v10869_v0  ;;  %v868_v19 = vshrl.u32 %v805_v11, 16  ;;  %v876_v20 = vshrl.u32 %v806_v16, 16  ;;  %1105 = vrot.lane.b32.xlu0 %v839_v23, %s10870_s14 }
  0x28   : > { %276 = vst.msk [vmem:[#allocation2 + $0xc] sm:$0xf] %vm271_vm2, %v10869_v0  ;;  %272 = vst.msk [vmem:[#allocation2] sm:$0xf] %vm271_vm2, %v10869_v0  ;;  %v849_v21 = vrot.slane %v844_v12, 4  ;;  %v840_v24 = vrot.slane %v836_v13, 4  ;;  %v856_v26 = vor.u32 %v854_v14, %v853_v17  ;;  %v864_v31 = vor.u32 %v862_v15, %v861_v18 }
  0x29   : > { %273 = vst.msk [vmem:[#allocation2 + $0x4] sm:$0xf] %vm271_vm2, %v10869_v0  ;;  %277 = vst.msk [vmem:[#allocation2 + $0x10] sm:$0xf] %vm271_vm2, %v10869_v0  ;;  %v857_v27 = vrot.slane %v853_v17, 4  ;;  %v879_v28 = vshll.u32 %v806_v16, 16 }
  0x2a   : > { %279 = vst.msk [vmem:[#allocation2 + $0x18] sm:$0xf] %vm271_vm2, %v10869_v0  ;;  %280 = vst.msk [vmem:[#allocation2 + $0x1c] sm:$0xf] %vm271_vm2, %v10869_v0  ;;  %1109 = vrot.lane.b32.xlu1 %v849_v21, %s10870_s14  ;;  %v808_v29 = vld [vmem:[%s11185_s13 + $0x1c] sm:$0xf] }
  0x2b   : > { %282 = vst.msk [vmem:[#allocation2 + $0x24] sm:$0xf] %vm271_vm2, %v10869_v0  ;;  %283 = vst.msk [vmem:[#allocation2 + $0x28] sm:$0xf] %vm271_vm2, %v10869_v0  ;;  %v870_v32 = vrot.slane %v868_v19, 7  ;;  %v878_v33 = vrot.slane %v876_v20, 7 }
  0x2c   : > { %285 = vst.msk [vmem:[#allocation2 + $0x30] sm:$0xf] %vm271_vm2, %v10869_v0  ;;  %286 = vst.msk [vmem:[#allocation2 + $0x34] sm:$0xf] %vm271_vm2, %v10869_v0  ;;  %v807_v34 = vld [vmem:[%s11185_s13 + $0x18] sm:$0xf] }
  0x2d   : > { %288 = vst.msk [vmem:[#allocation2 + $0x3c] sm:$0xf] %vm271_vm2, %v10869_v0  ;;  %289 = vst.msk [vmem:[#allocation2 + $0x40] sm:$0xf] %vm271_vm2, %v10869_v0  ;;  %v893_v35 = vshrl.u32 %v808_v29, 16  ;;  %v866_v36 = vrot.slane %v861_v18, 4  ;;  %v881_v42 = vor.u32 %v879_v28, %v878_v33 }
  0x2e   : > { %291 = vst.msk [vmem:[#allocation2 + $0x48] sm:$0xf] %vm271_vm2, %v10869_v0  ;;  %292 = vst.msk [vmem:[#allocation2 + $0x4c] sm:$0xf] %vm271_vm2, %v10869_v0  ;;  %1111 = vrot.lane.b32.xlu1 %v856_v26, %s10870_s14  ;;  %v871_v37 = vshll.u32 %v805_v11, 16  ;;  %v885_v38 = vshrl.u32 %v807_v34, 16 }
  0x2f   : > { %294 = vst.msk [vmem:[#allocation2 + $0x54] sm:$0xf] %vm271_vm2, %v10869_v0  ;;  %295 = vst.msk [vmem:[#allocation2 + $0x58] sm:$0xf] %vm271_vm2, %v10869_v0  ;;  %v809_v39 = vld [vmem:[%s11185_s13 + $0x20] sm:$0xf] }
  0x30   : > { %297 = vst.msk [vmem:[#allocation2 + $0x60] sm:$0xf] %vm271_vm2, %v10869_v0  ;;  %298 = vst.msk [vmem:[#allocation2 + $0x64] sm:$0xf] %vm271_vm2, %v10869_v0  ;;  %v874_v41 = vrot.slane %v870_v32, 4  ;;  %v888_v45 = vshll.u32 %v807_v34, 16  ;;  %v873_v50 = vor.u32 %v871_v37, %v870_v32 }
  0x31   : > { %300 = vst.msk [vmem:[#allocation2 + $0x6c] sm:$0xf] %vm271_vm2, %v10869_v0  ;;  %301 = vst.msk [vmem:[#allocation2 + $0x70] sm:$0xf] %vm271_vm2, %v10869_v0  ;;  %v810_v43 = vld [vmem:[%s11185_s13 + $0x24] sm:$0xf] }
  0x32   : > { %303 = vst.msk [vmem:[#allocation2 + $0x78] sm:$0xf] %vm271_vm2, %v10869_v0  ;;  %304 = vst.msk [vmem:[#allocation2 + $0x7c] sm:$0xf] %vm271_vm2, %v10869_v0  ;;  %v811_v44 = vld [vmem:[%s11185_s13 + $0x28] sm:$0xf]  ;;  %1115 = vrot.lane.b32.xlu1 %v866_v36, %s10870_s14 }
  0x33   : > { %306 = vst.msk [vmem:[#allocation2 + $0x84] sm:$0xf] %vm271_vm2, %v10869_v0  ;;  %307 = vst.msk [vmem:[#allocation2 + $0x88] sm:$0xf] %vm271_vm2, %v10869_v0  ;;  %v895_v46 = vrot.slane %v893_v35, 7  ;;  %v896_v47 = vshll.u32 %v808_v29, 16 }
  0x34   : > { %309 = vst.msk [vmem:[#allocation2 + $0x90] sm:$0xf] %vm271_vm2, %v10869_v0  ;;  %310 = vst.msk [vmem:[#allocation2 + $0x94] sm:$0xf] %vm271_vm2, %v10869_v0  ;;  %v902_v48 = vshrl.u32 %v809_v39, 16  ;;  %v887_v51 = vrot.slane %v885_v38, 7 }
  0x35   : > { %312 = vst.msk [vmem:[#allocation2 + $0x9c] sm:$0xf] %vm271_vm2, %v10869_v0  ;;  %313 = vst.msk [vmem:[#allocation2 + $0xa0] sm:$0xf] %vm271_vm2, %v10869_v0  ;;  %v812_v49 = vld [vmem:[%s11185_s13 + $0x2c] sm:$0xf]  ;;  %v898_v59 = vor.u32 %v896_v47, %v895_v46 }
  0x36   : > { %315 = vst.msk [vmem:[#allocation2 + $0xa8] sm:$0xf] %vm271_vm2, %v10869_v0  ;;  %316 = vst.msk [vmem:[#allocation2 + $0xac] sm:$0xf] %vm271_vm2, %v10869_v0  ;;  %v910_v52 = vshrl.u32 %v810_v43, 16  ;;  %v919_v53 = vshrl.u32 %v811_v44, 16  ;;  %v890_v63 = vor.u32 %v888_v45, %v887_v51 }
  0x37   : > { %318 = vst.msk [vmem:[#allocation2 + $0xb4] sm:$0xf] %vm271_vm2, %v10869_v0  ;;  %319 = vst.msk [vmem:[#allocation2 + $0xb8] sm:$0xf] %vm271_vm2, %v10869_v0  ;;  %v883_v55 = vrot.slane %v878_v33, 4  ;;  %v927_v56 = vshrl.u32 %v812_v49, 16 }
  0x38   : > { %321 = vst.msk [vmem:[#allocation2 + $0xc0] sm:$0xf] %vm271_vm2, %v10869_v0  ;;  %322 = vst.msk [vmem:[#allocation2 + $0xc4] sm:$0xf] %vm271_vm2, %v10869_v0  ;;  %v813_v57 = vld [vmem:[%s11185_s13 + $0x30] sm:$0xf] }
  0x39   : > { %324 = vst.msk [vmem:[#allocation2 + $0xcc] sm:$0xf] %vm271_vm2, %v10869_v0  ;;  %325 = vst.msk [vmem:[#allocation2 + $0xd0] sm:$0xf] %vm271_vm2, %v10869_v0  ;;  %v891_v58 = vrot.slane %v887_v51, 4  ;;  %v904_v60 = vrot.slane %v902_v48, 7 }
  0x3a   : > { %5273 = vst.msk [vmem:[#allocation3] sm:$0xf] %vm683_vm3, %v10869_v0  ;;  %5274 = vst.msk [vmem:[#allocation3 + $0x4] sm:$0xf] %vm683_vm3, %v10869_v0  ;;  %v905_v61 = vshll.u32 %v809_v39, 16  ;;  %v913_v1 = vshll.u32 %v810_v43, 16 }
  0x3b   : > { %5277 = vst.msk [vmem:[#allocation3 + $0xc] sm:$0xf] %vm683_vm3, %v10869_v0  ;;  %5278 = vst.msk [vmem:[#allocation3 + $0x10] sm:$0xf] %vm683_vm3, %v10869_v0  ;;  %v814_v62 = vld [vmem:[%s11185_s13 + $0x34] sm:$0xf] }
  0x3c   : > { %5280 = vst.msk [vmem:[#allocation3 + $0x18] sm:$0xf] %vm683_vm3, %v10869_v0  ;;  %5281 = vst.msk [vmem:[#allocation3 + $0x1c] sm:$0xf] %vm683_vm3, %v10869_v0  ;;  %v921_v2 = vrot.slane %v919_v53, 7  ;;  %v936_v3 = vshrl.u32 %v813_v57, 16  ;;  %v907_v11 = vor.u32 %v905_v61, %v904_v60 }
  0x3d   : > { %5283 = vst.msk [vmem:[#allocation3 + $0x24] sm:$0xf] %vm683_vm3, %v10869_v0  ;;  %5284 = vst.msk [vmem:[#allocation3 + $0x28] sm:$0xf] %vm683_vm3, %v10869_v0  ;;  %v815_v4 = vld [vmem:[%s11185_s13 + $0x38] sm:$0xf] }
  0x3e   : > { %5286 = vst.msk [vmem:[#allocation3 + $0x30] sm:$0xf] %vm683_vm3, %v10869_v0  ;;  %5287 = vst.msk [vmem:[#allocation3 + $0x34] sm:$0xf] %vm683_vm3, %v10869_v0  ;;  %vm684_vm7 = vsmask.f32 7938 }
  0x3f   : > { %5289 = vst.msk [vmem:[#allocation3 + $0x3c] sm:$0xf] %vm683_vm3, %v10869_v0  ;;  %5290 = vst.msk [vmem:[#allocation3 + $0x40] sm:$0xf] %vm683_vm3, %v10869_v0  ;;  %v11231_v5 = vrot.slane %v927_v56, 7  ;;  %v930_v6 = vshll.u32 %v812_v49, 16 }
  0x40   : > { %5292 = vst.msk [vmem:[#allocation3 + $0x48] sm:$0xf] %vm683_vm3, %v10869_v0  ;;  %5293 = vst.msk [vmem:[#allocation3 + $0x4c] sm:$0xf] %vm683_vm3, %v10869_v0  ;;  %v944_v7 = vshrl.u32 %v814_v62, 16  ;;  %v900_v10 = vrot.slane %v895_v46, 4 }
  0x41   : > { %5295 = vst.msk [vmem:[#allocation3 + $0x54] sm:$0xf] %vm683_vm3, %v10869_v0  ;;  %5296 = vst.msk [vmem:[#allocation3 + $0x58] sm:$0xf] %vm683_vm3, %v10869_v0  ;;  %v11234_v8 = vld [vmem:[%s11223_s17 + $0x4] sm:$0xf]  ;;  %v932_v23 = vor.u32 %v930_v6, %v11231_v5 }
  0x42   : > { %5298 = vst.msk [vmem:[#allocation3 + $0x60] sm:$0xf] %vm683_vm3, %v10869_v0  ;;  %5299 = vst.msk [vmem:[#allocation3 + $0x64] sm:$0xf] %vm683_vm3, %v10869_v0  ;;  %v922_v12 = vshll.u32 %v811_v44, 16  ;;  %v908_v14 = vrot.slane %v904_v60, 4 }
  0x43   : > { %5301 = vst.msk [vmem:[#allocation3 + $0x6c] sm:$0xf] %vm683_vm3, %v10869_v0  ;;  %5302 = vst.msk [vmem:[#allocation3 + $0x70] sm:$0xf] %vm683_vm3, %v10869_v0  ;;  %v327_v13 = vld [vmem:[%s11223_s17] sm:$0xf] }
  0x44   : > { %5304 = vst.msk [vmem:[#allocation3 + $0x78] sm:$0xf] %vm683_vm3, %v10869_v0  ;;  %5305 = vst.msk [vmem:[#allocation3 + $0x7c] sm:$0xf] %vm683_vm3, %v10869_v0  ;;  %v925_v16 = vrot.slane %v921_v2, 4  ;;  %v953_v17 = vshrl.u32 %v815_v4, 16 }
  0x45   : > { %5307 = vst.msk [vmem:[#allocation3 + $0x84] sm:$0xf] %vm683_vm3, %v10869_v0  ;;  %5308 = vst.msk [vmem:[#allocation3 + $0x88] sm:$0xf] %vm683_vm3, %v10869_v0  ;;  %v816_v18 = vld [vmem:[%s11185_s13 + $0x3c] sm:$0xf] }
  0x46   : > { %5310 = vst.msk [vmem:[#allocation3 + $0x90] sm:$0xf] %vm683_vm3, %v10869_v0  ;;  %5311 = vst.msk [vmem:[#allocation3 + $0x94] sm:$0xf] %vm683_vm3, %v10869_v0  ;;  %v938_v19 = vrot.slane %v936_v3, 7  ;;  %v939_v20 = vshll.u32 %v813_v57, 16 }
  0x47   : > { %5313 = vst.msk [vmem:[#allocation3 + $0x9c] sm:$0xf] %vm683_vm3, %v10869_v0  ;;  %5314 = vst.msk [vmem:[#allocation3 + $0xa0] sm:$0xf] %vm683_vm3, %v10869_v0  ;;  %v947_v21 = vshll.u32 %v814_v62, 16  ;;  %v366_v28 = vshll.u32 %v327_v13, 16 }
  0x48   : > { %5316 = vst.msk [vmem:[#allocation3 + $0xa8] sm:$0xf] %vm683_vm3, %v10869_v0  ;;  %5317 = vst.msk [vmem:[#allocation3 + $0xac] sm:$0xf] %vm683_vm3, %v10869_v0  ;;  %v11248_v26 = vld [vmem:[%s11185_s13 + $0x40] sm:$0xf] }
  0x49   : > { %5319 = vst.msk [vmem:[#allocation3 + $0xb4] sm:$0xf] %vm683_vm3, %v10869_v0  ;;  %5320 = vst.msk [vmem:[#allocation3 + $0xb8] sm:$0xf] %vm683_vm3, %v10869_v0  ;;  %v693_v32 = vld [vmem:[#allocation2 + $0x14] sm:$0x1] }
  0x4a   : > { %5322 = vst.msk [vmem:[#allocation3 + $0xc0] sm:$0xf] %vm683_vm3, %v10869_v0  ;;  %5323 = vst.msk [vmem:[#allocation3 + $0xc4] sm:$0xf] %vm683_vm3, %v10869_v0  ;;  %v11255_v35 = vrot.slane %v953_v17, 7  ;;  %v956_v36 = vshll.u32 %v815_v4, 16 }
  0x4b   : > { %5325 = vst.msk [vmem:[#allocation3 + $0xcc] sm:$0xf] %vm683_vm3, %v10869_v0  ;;  %5326 = vst.msk [vmem:[#allocation3 + $0xd0] sm:$0xf] %vm683_vm3, %v10869_v0  ;;  %v11228_v0 = vrot.slane %v910_v52, 7  ;;  %v14931_v37 = vmov 0 }
  0x4c   : > { %vm11195_vm6 = vmor %vm359_vm4, %vm360_vm5  ;;  %v686_v38 = vld [vmem:[#allocation2 + $0xc] sm:$0xf]  ;;  %v14934_v44 = vmov 0  ;;  %v329_v45 = vld [vmem:[%s11223_s17 + $0x8] sm:$0xf]  ;;  %v970_v48 = vshrl.u32 %v11248_v26, 16 }
  0x4d   : > { %v14929_v25 = vsel %vm11195_vm6, 4294967295, %v14928_v25  ;;  %v848_v30 = vsel %vm11195_vm6, %v840_v24, %v847_v22  ;;  %v865_v40 = vsel %vm11195_vm6, %v857_v27, %v864_v31  ;;  %v882_v54 = vsel %vm11195_vm6, %v874_v41, %v881_v42  ;;  %vm11259_vm8 = vmand %vm691_vm1, %vm359_vm4  ;;  %v11278_v49 = vld [vmem:[%s11185_s13 + $0x44] sm:$0xf]  ;;  %s10872_s29 = smov 96   ;;  %s10159_s26 = sshll.u32 %s10932_s25, 12 }
  0x4e   : > { %14930 = vst [vmem:[#allocation9_spill] sm:$0xff] %v14929_v25  ;;  %1107 = vrot.lane.b32.xlu0 %v848_v30, %s10870_s14  ;;  %1119 = vrot.lane.b32.xlu1 %v882_v54, %s10870_s14  ;;  %v899_v9 = vsel %vm11195_vm6, %v891_v58, %v898_v59  ;;  %v915_v15 = vor.u32 %v913_v1, %v11228_v0  ;;  %v371_v22 = vshrl.u32 %v11234_v8, 16  ;;  %v11245_v24 = vrot.slane %v944_v7, 7  ;;  %vm11268_vm9 = vmand %vm683_vm3, %vm684_vm7  ;;  %v1511_v58 = vld [vmem:[#allocation2] sm:$0xf]  ;;  %s14836_s11 = scalar_lea.hbm %s14893_s6, %s10159_s26  ;;  %s10873_s15 = smov [#allocation6]  }
  0x4f   : > { %v363_v27 = vshrl.u32 %v327_v13, 16  ;;  %v917_v29 = vrot.slane %v11228_v0, 4  ;;  %v924_v30 = vor.u32 %v922_v12, %v921_v2  ;;  %v961_v31 = vshrl.u32 %v816_v18, 16  ;;  %v1512_v59 = vld [vmem:[#allocation2 + $0x4] sm:$0xf] }
  0x50   : > { %v373_v33 = vrot.slane %v371_v22, 7  ;;  %v916_v34 = vsel %vm11195_vm6, %v908_v14, %v915_v15  ;;  %v14932_v37 = vsel %vm11259_vm8, 4294967295, %v14931_v37  ;;  %v11264_v41 = vor.u32 %v939_v20, %v938_v19  ;;  %v330_v1 = vld [vmem:[%s11223_s17 + $0xc] sm:$0xf] }
  0x51   : > { %14933 = vst [vmem:[#allocation10_spill] sm:$0xff] %v14932_v37  ;;  %v365_v39 = vrot.slane %v363_v27, 7  ;;  %v942_v42 = vrot.slane %v938_v19, 4  ;;  %v14935_v44 = vsel %vm11268_vm9, 4294967295, %v14934_v44  ;;  %v933_v46 = vsel %vm11195_vm6, %v925_v16, %v932_v23  ;;  %v11308_v19 = vld [vmem:[%s11185_s13 + $0x48] sm:$0xf] }
  0x52   : > { %1113 = vrot.lane.b32.xlu0 %v865_v40, %s10870_s14  ;;  %1123 = vrot.lane.b32.xlu1 %v890_v63, %s10870_s14  ;;  %v934_v40 = vrot.slane %v11231_v5, 4  ;;  %v378_v43 = vrot.slane %v373_v33, 4  ;;  %14936 = vst [vmem:[#allocation11_spill] sm:$0xff] %v14935_v44  ;;  %v949_v47 = vor.u32 %v947_v21, %v11245_v24  ;;  %v951_v51 = vrot.slane %v11245_v24, 4  ;;  %v333_v5 = vld [vmem:[%s11223_s17 + $0x18] sm:$0xf] }
  0x53   : > { %v11281_v52 = vrot.slane %v961_v31, 7  ;;  %v964_v53 = vshll.u32 %v816_v18, 16  ;;  %v973_v56 = vshll.u32 %v11248_v26, 16  ;;  %v380_v60 = vshrl.u32 %v329_v45, 16 }
  0x54   : > { %v694_v54 = vsel %vm11259_vm8, %v378_v43, %v693_v32  ;;  %v978_v61 = vshrl.u32 %v11278_v49, 16  ;;  %v383_v62 = vshll.u32 %v329_v45, 16  ;;  %v369_v63 = vrot.slane %v365_v39, 4 }
  0x55   : > { %695 = vst [vmem:[#allocation2 + $0x14] sm:$0x1] %v694_v54  ;;  %v374_v0 = vshll.u32 %v11234_v8, 16  ;;  %v950_v2 = vsel %vm11195_vm6, %v942_v42, %v949_v47  ;;  %v959_v3 = vrot.slane %v11255_v35, 4  ;;  %v11299_v4 = vrot.slane %v970_v48, 7 }
  0x56   : > { %1117 = vrot.lane.b32.xlu0 %v873_v50, %s10870_s14  ;;  %1127 = vrot.lane.b32.xlu1 %v900_v10, %s10870_s14  ;;  %v368_v50 = vor.u32 %v366_v28, %v365_v39  ;;  %v382_v6 = vrot.slane %v380_v60, 7  ;;  %v966_v7 = vor.u32 %v964_v53, %v11281_v52  ;;  %v1566_v10 = vshll.u32 %v1511_v58, 16  ;;  %v1513_v8 = vld [vmem:[#allocation2 + $0x8] sm:$0x1]  ;;  %v332_v42 = vld [vmem:[%s11223_s17 + $0x14] sm:$0xf] }
  0x57   : > { %v376_v12 = vor.u32 %v374_v0, %v373_v33  ;;  %v1572_v13 = vshll.u32 %v1512_v59, 16  ;;  %v1576_v14 = vshrl.u32 %v1512_v59, 16  ;;  %v388_v16 = vshrl.u32 %v330_v1, 16  ;;  %v334_v59 = vld [vmem:[%s11223_s17 + $0x1c] sm:$0xf] }
  0x58   : > { %v687_v57 = vsel %vm11268_vm9, %v368_v50, %v686_v38  ;;  %v385_v15 = vor.u32 %v383_v62, %v382_v6  ;;  %v11304_v17 = vrot.slane %v978_v61, 7  ;;  %v981_v18 = vshll.u32 %v11278_v49, 16  ;;  %v11349_v62 = vld [vmem:[%s11185_s13 + $0x4c] sm:$0xf]  ;;  %v703_v0 = vld [vmem:[#allocation2 + $0x24] sm:$0xf] }
  0x59   : > { %688 = vst [vmem:[#allocation2 + $0xc] sm:$0xf] %v687_v57  ;;  %v377_v20 = vsel %vm11195_vm6, %v369_v63, %v376_v12  ;;  %v391_v21 = vshll.u32 %v330_v1, 16  ;;  %v968_v22 = vrot.slane %v11281_v52, 4  ;;  %v386_v27 = vrot.slane %v382_v6, 4 }
  0x5a   : > { %1121 = vrot.lane.b32.xlu0 %v883_v55, %s10870_s14  ;;  %1131 = vrot.lane.b32.xlu1 %v916_v34, %s10870_s14  ;;  %v11288_v55 = vor.u32 %v956_v36, %v11255_v35  ;;  %690 = vst.msk [vmem:[#allocation2 + $0x10] sm:$0xf] %vm683_vm3, %v377_v20  ;;  %v390_v28 = vrot.slane %v388_v16, 7  ;;  %v1568_v32 = vrot.slane %v1566_v10, 5  ;;  %v1582_v33 = vshll.u32 %v1513_v8, 16 }
  0x5b   : > { %v700_v34 = vld [vmem:[#allocation2 + $0x20] sm:$0x1]  ;;  %vm1559_vm10 = vsmask.f32 3328  ;;  %vm1560_vm11 = vsmask.f32 7440  ;;  %v11327_v43 = vsel %vm11195_vm6, %v959_v3, %v966_v7  ;;  %v11330_v45 = vor.u32 %v981_v18, %v11304_v17 }
  0x5c   : > { %v11322_v35 = vrot.slane %v1572_v13, 5  ;;  %v1578_v36 = vrot.slane %v1576_v14, 4  ;;  %v393_v38 = vor.u32 %v391_v21, %v390_v28  ;;  %v395_v39 = vrot.slane %v390_v28, 4  ;;  %v11352_v63 = vld [vmem:[%s11185_s13 + $0x50] sm:$0xf]  ;;  %vm11387_vm12 = vmor %vm1559_vm10, %vm1560_vm11 }
  0x5d   : > { %v987_v48 = vshrl.u32 %v11308_v19, 16  ;;  %v11339_v54 = vrot.slane %v1582_v33, 5  ;;  %v990_v61 = vshll.u32 %v11308_v19, 16  ;;  %v408_v1 = vshll.u32 %v332_v42, 16  ;;  %v11355_v6 = vld [vmem:[%s11185_s13 + $0x54] sm:$0xf] }
  0x5e   : > { %1125 = vrot.lane.b32.xlu0 %v899_v9, %s10870_s14  ;;  %v1563_v9 = vshrl.u32 %v1511_v58, 16  ;;  %1135 = vrot.lane.b32.xlu1 %v924_v30, %s10870_s14  ;;  %v976_v30 = vrot.slane %v11299_v4, 4  ;;  %v394_v49 = vsel %vm11195_vm6, %v386_v27, %v393_v38  ;;  %v701_v50 = vsel %vm11259_vm8, %v395_v39, %v700_v34  ;;  %v714_v20 = vld [vmem:[#allocation2 + $0x38] sm:$0x1] }
  0x5f   : > { %699 = vst.msk [vmem:[#allocation2 + $0x1c] sm:$0xf] %vm683_vm3, %v394_v49  ;;  %702 = vst [vmem:[#allocation2 + $0x20] sm:$0x1] %v701_v50  ;;  %v405_v58 = vshrl.u32 %v332_v42, 16  ;;  %v1579_v60 = vor.u32 %v1578_v36, %v11322_v35  ;;  %v414_v3 = vshrl.u32 %v333_v5, 16  ;;  %v975_v39 = vor.u32 %v973_v56, %v11299_v4 }
  0x60   : > { %v1565_v31 = vrot.slane %v1563_v9, 4  ;;  %v11357_v12 = vrot.slane %v987_v48, 7  ;;  %v422_v13 = vshrl.u32 %v334_v59, 16  ;;  %v425_v14 = vshll.u32 %v334_v59, 16 }
  0x61   : > { %v407_v10 = vrot.slane %v405_v58, 7  ;;  %v416_v8 = vrot.slane %v414_v3, 7  ;;  %v11368_v21 = vrot.slane %v1579_v60, 4  ;;  %v984_v50 = vsel %vm11195_vm6, %v976_v30, %v11330_v45  ;;  %v338_v58 = vld [vmem:[%s11223_s17 + $0x2c] sm:$0xf] }
  0x62   : > { %1129 = vrot.lane.b32.xlu0 %v907_v11, %s10870_s14  ;;  %v696_v11 = vld [vmem:[#allocation2 + $0x18] sm:$0xf]  ;;  %1139 = vrot.lane.b32.xlu1 %v934_v40, %s10870_s14  ;;  %v985_v40 = vrot.slane %v11304_v17, 4  ;;  %v1569_v53 = vor.u32 %v1568_v32, %v1565_v31  ;;  %v424_v28 = vrot.slane %v422_v13, 7  ;;  %v995_v31 = vshrl.u32 %v11349_v62, 16 }
  0x63   : > { %v697_v23 = vsel %vm11268_vm9, %v385_v15, %v696_v11  ;;  %v707_v11 = vld [vmem:[#allocation2 + $0x2c] sm:$0x1]  ;;  %v410_v18 = vor.u32 %v408_v1, %v407_v10  ;;  %v412_v19 = vrot.slane %v407_v10, 4  ;;  %v420_v27 = vrot.slane %v416_v8, 4  ;;  %v339_v13 = vld [vmem:[%s11223_s17 + $0x30] sm:$0xf] }
  0x64   : > { %698 = vst [vmem:[#allocation2 + $0x18] sm:$0xf] %v697_v23  ;;  %v11359_v15 = vrot.slane %v1569_v53, 4  ;;  %v1004_v32 = vshrl.u32 %v11352_v63, 16  ;;  %v427_v36 = vor.u32 %v425_v14, %v424_v28  ;;  %v429_v38 = vrot.slane %v424_v28, 4 }
  0x65   : > { %v708_v24 = vsel %vm11259_vm8, %v412_v19, %v707_v11  ;;  %v998_v52 = vshll.u32 %v11349_v62, 16  ;;  %v1585_v4 = vsel %vm11387_vm12, %v11368_v21, %v11339_v54  ;;  %v997_v30 = vrot.slane %v995_v31, 7  ;;  %v721_v62 = vld [vmem:[#allocation2 + $0x44] sm:$0x1]  ;;  %v728_v21 = vld [vmem:[#allocation2 + $0x50] sm:$0x1] }
  0x66   : > { %1133 = vrot.lane.b32.xlu0 %v917_v29, %s10870_s14  ;;  %v331_v29 = vld [vmem:[%s11223_s17 + $0x10] sm:$0xf]  ;;  %1143 = vrot.lane.b32.xlu1 %v950_v2, %s10870_s14  ;;  %709 = vst [vmem:[#allocation2 + $0x2c] sm:$0x1] %v708_v24  ;;  %v428_v26 = vsel %vm11195_vm6, %v420_v27, %v427_v36  ;;  %v715_v56 = vsel %vm11259_vm8, %v429_v38, %v714_v20  ;;  %v1015_v59 = vshll.u32 %v11355_v6, 16  ;;  %v993_v11 = vrot.slane %v11357_v12, 4 }
  0x67   : > { %v400_v47 = vshll.u32 %v331_v29, 16  ;;  %v710_v2 = vld [vmem:[#allocation2 + $0x30] sm:$0xf]  ;;  %713 = vst.msk [vmem:[#allocation2 + $0x34] sm:$0xf] %vm683_vm3, %v428_v26  ;;  %v1002_v14 = vrot.slane %v997_v30, 4 }
  0x68   : > { %716 = vst [vmem:[#allocation2 + $0x38] sm:$0x1] %v715_v56  ;;  %v459_v20 = vshll.u32 %v338_v58, 16  ;;  %v735_v56 = vld [vmem:[#allocation2 + $0x5c] sm:$0x1]  ;;  %vm2156_vm14 = vcmask 1046532  }
  0x69   : > { %vm1494_vm15 = vcmask 523264   ;;  %vm11529_vm0 = vmor %vm2155_vm13, %vm2156_vm14  ;;  %vm1256_vm1 = vcmask 516352   ;;  %vm1249_vm2 = vcmask 519424   ;;  %vm6530_vm11 = vcmask 523520  }
  0x6a   : > { %1137 = vrot.lane.b32.xlu0 %v933_v46, %s10870_s14  ;;  %v397_v46 = vshrl.u32 %v331_v29, 16  ;;  %1147 = vrot.lane.b32.xlu1 %v11288_v55, %s10870_s14  ;;  %v335_v29 = vld [vmem:[%s11223_s17 + $0x20] sm:$0xf]  ;;  %v1012_v55 = vshrl.u32 %v11355_v6, 16  ;;  %v456_v6 = vshrl.u32 %v338_v58, 16  ;;  %vm11549_vm5 = vmand %vm1256_vm1, %vm359_vm4  ;;  %vm2042_vm4 = vcmask 1048064  }
  0x6b   : > { %v10663_v58 = vld [vmem:[%s14889_s2 + $0x40] sm:$0xff]   ;;  %vm11555_vm10 = vmand %vm1249_vm2, %vm684_vm7  ;;  %vm5985_vm7 = vcmask 261120   ;;  %vm6851_vm13 = vcmask 785920   ;;  %vm7028_vm14 = vcmask 1048320  }
  0x6c   : > { %v399_v57 = vrot.slane %v397_v46, 7  ;;  %v431_v46 = vshrl.u32 %v335_v29, 16  ;;  %v11421_v1 = vrot.slane %v1012_v55, 7  ;;  %10160 = vmatprep.subr.bf16.mxu0 %v10663_v58  ;;  %v759_v58 = vld [vmem:[#allocation2 + $0x84] sm:$0xf] }
  0x6e   : > { %1141 = vrot.lane.b32.xlu0 %v11264_v41, %s10870_s14  ;;  %v402_v7 = vor.u32 %v400_v47, %v399_v57  ;;  %v403_v9 = vrot.slane %v399_v57, 4  ;;  %v417_v41 = vshll.u32 %v333_v5, 16  ;;  %v434_v47 = vshll.u32 %v335_v29, 16  ;;  %v337_v5 = vld [vmem:[%s11223_s17 + $0x28] sm:$0xf]  ;;  %1151 = vrot.lane.b32.xlu1 %v968_v22, %s10870_s14 }
  0x6f   : > { %v717_v22 = vld [vmem:[#allocation2 + $0x3c] sm:$0xf]  ;;  %v433_v53 = vrot.slane %v431_v46, 7  ;;  %v1575_v57 = vsel %vm11387_vm12, %v11359_v15, %v11322_v35  ;;  %v1006_v35 = vrot.slane %v1004_v32, 7  ;;  %v451_v10 = vshll.u32 %v337_v5, 16 }
  0x70   : > { %v704_v16 = vsel %vm11268_vm9, %v402_v7, %v703_v0  ;;  %v419_v23 = vor.u32 %v417_v41, %v416_v8  ;;  %v411_v33 = vsel %vm11195_vm6, %v403_v9, %v410_v18  ;;  %v448_v0 = vshrl.u32 %v337_v5, 16  ;;  %v724_v8 = vld [vmem:[#allocation2 + $0x48] sm:$0xf]  ;;  %v341_v5 = vld [vmem:[%s11223_s17 + $0x38] sm:$0xf] }
  0x71   : > { %705 = vst [vmem:[#allocation2 + $0x24] sm:$0xf] %v704_v16  ;;  %706 = vst.msk [vmem:[#allocation2 + $0x28] sm:$0xf] %vm683_vm3, %v411_v33  ;;  %v436_v60 = vor.u32 %v434_v47, %v433_v53  ;;  %v458_v16 = vrot.slane %v456_v6, 7  ;;  %v1000_v18 = vor.u32 %v998_v52, %v997_v30  ;;  %v1010_v27 = vrot.slane %v1006_v35, 4 }
  0x72   : > { %1145 = vrot.lane.b32.xlu0 %v951_v51, %s10870_s14  ;;  %v336_v51 = vld [vmem:[%s11223_s17 + $0x24] sm:$0xf]  ;;  %v711_v34 = vsel %vm11268_vm9, %v419_v23, %v710_v2  ;;  %1155 = vrot.lane.b32.xlu1 %v984_v50, %s10870_s14  ;;  %v450_v9 = vrot.slane %v448_v0, 7  ;;  %v340_v23 = vld [vmem:[%s11223_s17 + $0x34] sm:$0xf]  ;;  %v1017_v28 = vor.u32 %v1015_v59, %v11421_v1  ;;  %v465_v33 = vshrl.u32 %v339_v13, 16 }
  0x73   : > { %712 = vst [vmem:[#allocation2 + $0x30] sm:$0xf] %v711_v34  ;;  %v439_v48 = vshrl.u32 %v336_v51, 16  ;;  %v442_v49 = vshll.u32 %v336_v51, 16  ;;  %v718_v54 = vsel %vm11268_vm9, %v436_v60, %v717_v22  ;;  %v463_v31 = vrot.slane %v458_v16, 4  ;;  %v10666_v6 = vld [vmem:[%s14889_s2 + $0x8] sm:$0xff]  }
  0x74   : > { %719 = vst [vmem:[#allocation2 + $0x3c] sm:$0xf] %v718_v54  ;;  %v453_v15 = vor.u32 %v451_v10, %v450_v9  ;;  %v454_v19 = vrot.slane %v450_v9, 4  ;;  %v461_v32 = vor.u32 %v459_v20, %v458_v16  ;;  %v473_v24 = vshrl.u32 %v340_v23, 16  ;;  %v342_v50 = vld [vmem:[%s11223_s17 + $0x3c] sm:$0xf] }
  0x75   : > { %v441_v45 = vrot.slane %v439_v48, 7  ;;  %v729_v17 = vsel %vm11259_vm8, %v463_v31, %v728_v21  ;;  %v1007_v51 = vshll.u32 %v11352_v63, 16  ;;  %v467_v34 = vrot.slane %v465_v33, 7  ;;  %v738_v59 = vld [vmem:[#allocation2 + $0x60] sm:$0xf]  ;;  %v10665_v54 = vld [vmem:[%s14889_s2 + $0x48] sm:$0xff]  }
  0x76   : > { %1149 = vrot.lane.b32.xlu0 %v11327_v43, %s10870_s14  ;;  %v992_v43 = vor.u32 %v990_v61, %v11357_v12  ;;  %v437_v61 = vrot.slane %v433_v53, 4  ;;  %v9632_v12 = vcombine.low %v1575_v57, %v1585_v4  ;;  %v725_v29 = vsel %vm11268_vm9, %v453_v15, %v724_v8  ;;  %730 = vst [vmem:[#allocation2 + $0x50] sm:$0x1] %v729_v17  ;;  %v742_v9 = vld [vmem:[#allocation2 + $0x68] sm:$0x1]  ;;  %v10668_v8 = vld [vmem:[#allocation2] sm:$0xff]  }
  0x77   : > { %v444_v3 = vor.u32 %v442_v49, %v441_v45  ;;  %v446_v7 = vrot.slane %v441_v45, 4  ;;  %726 = vst [vmem:[#allocation2 + $0x48] sm:$0xf] %v725_v29  ;;  %v462_v55 = vsel %vm11195_vm6, %v454_v19, %v461_v32  ;;  %v1001_v36 = vsel %vm11195_vm6, %v993_v11, %v1000_v18  ;;  %v344_v10 = vld [vmem:[%s11223_s17 + $0x44] sm:$0xf]  ;;  %1495 = vst.msk [vmem:[#allocation4] sm:$0xff] %vm1494_vm15, %v10668_v8 }
  0x78   : > { %1159 = vrot.lane.b32.xlu1 %v992_v43, %s10870_s14  ;;  %v1018_v38 = vsel %vm11195_vm6, %v1010_v27, %v1017_v28  ;;  %727 = vst.msk [vmem:[#allocation2 + $0x4c] sm:$0xf] %vm683_vm3, %v462_v55  ;;  %v475_v46 = vrot.slane %v473_v24, 7  ;;  %v476_v47 = vshll.u32 %v340_v23, 16  ;;  %v471_v63 = vrot.slane %v467_v34, 4  ;;  %v10669_v23 = vld [vmem:[%s14889_s2 + $0x10] sm:$0xff]  }
  0x79   : > { %v445_v41 = vsel %vm11195_vm6, %v437_v61, %v444_v3  ;;  %v722_v2 = vsel %vm11259_vm8, %v446_v7, %v721_v62  ;;  %v1009_v43 = vor.u32 %v1007_v51, %v1006_v35  ;;  %v482_v22 = vshrl.u32 %v341_v5, 16  ;;  %v10664_v61 = vld [vmem:[%s14889_s2] sm:$0xff]   ;;  %v345_v18 = vld [vmem:[%s11223_s17 + $0x48] sm:$0xf]  ;;  %v745_v19 = vld [vmem:[#allocation2 + $0x6c] sm:$0xf] }
  0x7a   : > { %1153 = vrot.lane.b32.xlu0 %v975_v39, %s10870_s14  ;;  %720 = vst.msk [vmem:[#allocation2 + $0x40] sm:$0xf] %vm683_vm3, %v445_v41  ;;  %723 = vst [vmem:[#allocation2 + $0x44] sm:$0x1] %v722_v2  ;;  %v731_v39 = vld [vmem:[#allocation2 + $0x54] sm:$0xf]  ;;  %v478_v48 = vor.u32 %v476_v47, %v475_v46  ;;  %10161 = vmatpush3.bf16.msra.mxu0 %v10664_v61 }
  0x7b   : > { %v480_v49 = vrot.slane %v475_v46, 4  ;;  %v485_v53 = vshll.u32 %v341_v5, 16  ;;  %v484_v30 = vrot.slane %v482_v22, 7  ;;  %v490_v45 = vshrl.u32 %v342_v50, 16  ;;  %v343_v7 = vld [vmem:[%s11223_s17 + $0x40] sm:$0xf]  ;;  %10162 = vmatprep.subr.bf16.mxu0 %v10665_v54 }
  0x7c   : > { %1163 = vrot.lane.b32.xlu1 %v1002_v14, %s10870_s14  ;;  %v479_v57 = vsel %vm11195_vm6, %v471_v63, %v478_v48  ;;  %v493_v60 = vshll.u32 %v342_v50, 16  ;;  %v1019_v62 = vrot.slane %v11421_v1, 4  ;;  %v10667_v2 = vld [vmem:[%s14889_s2 + $0x50] sm:$0xff]   ;;  %v502_v14 = vshll.u32 %v343_v7, 16  ;;  %v10670_v31 = vld [vmem:[%s14889_s2 + $0x58] sm:$0xff]   ;;  %v10674_v61 = vld [vmem:[%s14889_s2 + $0x20] sm:$0xff]  }
  0x7d   : > { %v736_v4 = vsel %vm11259_vm8, %v480_v49, %v735_v56  ;;  %734 = vst.msk [vmem:[#allocation2 + $0x58] sm:$0xf] %vm683_vm3, %v479_v57  ;;  %v487_v0 = vor.u32 %v485_v53, %v484_v30  ;;  %v488_v35 = vrot.slane %v484_v30, 4  ;;  %v492_v3 = vrot.slane %v490_v45, 7  ;;  %v346_v32 = vld [vmem:[%s11223_s17 + $0x4c] sm:$0xf] }
  0x7e   : > { %1157 = vrot.lane.b32.xlu0 %v985_v40, %s10870_s14  ;;  %v468_v40 = vshll.u32 %v339_v13, 16  ;;  %737 = vst [vmem:[#allocation2 + $0x5c] sm:$0x1] %v736_v4  ;;  %v499_v13 = vshrl.u32 %v343_v7, 16  ;;  %v510_v21 = vshll.u32 %v344_v10, 16  ;;  %10163 = vmatpush3.bf16.msra.mxu0 %v10666_v6  ;;  %v516_v28 = vshrl.u32 %v345_v18, 16 }
  0x7f   : > { %v739_v1 = vsel %vm11268_vm9, %v487_v0, %v738_v59  ;;  %v495_v11 = vor.u32 %v493_v60, %v492_v3  ;;  %v497_v41 = vrot.slane %v492_v3, 4  ;;  %10164 = vmatprep.subr.bf16.mxu0 %v10667_v2  ;;  %v519_v29 = vshll.u32 %v345_v18, 16  ;;  %v10671_v47 = vld [vmem:[%s14889_s2 + $0x18] sm:$0xff]   ;;  %v347_v5 = vld [vmem:[%s11223_s17 + $0x50] sm:$0xf] }
  0x80   : > { %v470_v26 = vor.u32 %v468_v40, %v467_v34  ;;  %1167 = vrot.lane.b32.xlu1 %v1018_v38, %s10870_s14  ;;  %740 = vst [vmem:[#allocation2 + $0x60] sm:$0xf] %v739_v1  ;;  %v501_v20 = vrot.slane %v499_v13, 7  ;;  %v749_v40 = vld [vmem:[#allocation2 + $0x74] sm:$0x1]  ;;  %v524_v24 = vshrl.u32 %v346_v32, 16 }
  0x81   : > { %v496_v15 = vsel %vm11195_vm6, %v488_v35, %v495_v11  ;;  %v743_v16 = vsel %vm11259_vm8, %v497_v41, %v742_v9  ;;  %v527_v51 = vshll.u32 %v346_v32, 16  ;;  %v518_v38 = vrot.slane %v516_v28, 7  ;;  %v756_v50 = vld [vmem:[#allocation2 + $0x80] sm:$0x1]  ;;  %v10675_v35 = vld [vmem:[%s14889_s2 + $0x68] sm:$0xff]  }
  0x82   : > { %1994 = vrot.lane.b32.xlu0 %v9632_v12, %s10871_s18  ;;  %v732_v52 = vsel %vm11268_vm9, %v470_v26, %v731_v39  ;;  %v507_v12 = vshrl.u32 %v344_v10, 16  ;;  %741 = vst.msk [vmem:[#allocation2 + $0x64] sm:$0xf] %vm683_vm3, %v496_v15  ;;  %744 = vst [vmem:[#allocation2 + $0x68] sm:$0x1] %v743_v16  ;;  %v504_v33 = vor.u32 %v502_v14, %v501_v20  ;;  %v505_v17 = vrot.slane %v501_v20, 4 }
  0x83   : > { %733 = vst [vmem:[#allocation2 + $0x54] sm:$0xf] %v732_v52  ;;  %10165 = vmatpush3.bf16.msra.mxu0 %v10669_v23  ;;  %v526_v46 = vrot.slane %v524_v24, 7  ;;  %v348_v26 = vld [vmem:[%s11223_s17 + $0x54] sm:$0xf]  ;;  %v521_v48 = vor.u32 %v519_v29, %v518_v38  ;;  %v522_v49 = vrot.slane %v518_v38, 4 }
  0x84   : > { %v509_v27 = vrot.slane %v507_v12, 7  ;;  %v746_v39 = vsel %vm11268_vm9, %v504_v33, %v745_v19  ;;  %10166 = vmatprep.subr.bf16.mxu0 %v10670_v31  ;;  %v533_v53 = vshrl.u32 %v347_v5, 16  ;;  %v536_v57 = vshll.u32 %v347_v5, 16  ;;  %v763_v3 = vld [vmem:[#allocation2 + $0x8c] sm:$0x1]  ;;  %v10680_v5 = vld [vmem:[%s14889_s2 + $0x78] sm:$0xff]  }
  0x85   : > { %747 = vst [vmem:[#allocation2 + $0x6c] sm:$0xf] %v746_v39  ;;  %v529_v52 = vor.u32 %v527_v51, %v526_v46  ;;  %v531_v22 = vrot.slane %v526_v46, 4  ;;  %v541_v30 = vshrl.u32 %v348_v26, 16  ;;  %v544_v45 = vshll.u32 %v348_v26, 16  ;;  %v10676_v15 = vld [vmem:[%s14889_s2 + $0x28] sm:$0xff]  }
  0x86   : > { %1161 = vrot.lane.b32.xlu0 %v1001_v36, %s10870_s14  ;;  %v512_v55 = vor.u32 %v510_v21, %v509_v27  ;;  %v514_v34 = vrot.slane %v509_v27, 4  ;;  %v752_v36 = vld [vmem:[#allocation2 + $0x78] sm:$0xf]  ;;  %v2059_v7 = vld [vmem:[#allocation2] sm:$0xe]  ;;  %v10678_v51 = vld [vmem:[%s14889_s2 + $0x70] sm:$0xff]  }
  0x87   : > { %v753_v4 = vsel %vm11268_vm9, %v521_v48, %v752_v36  ;;  %v530_v59 = vsel %vm11195_vm6, %v522_v49, %v529_v52  ;;  %10167 = vmatpush3.bf16.msra.mxu0 %v10671_v47  ;;  %v757_v60 = vsel %vm11259_vm8, %v531_v22, %v756_v50  ;;  %v543_v0 = vrot.slane %v541_v30, 7  ;;  %v2060_v10 = vld [vmem:[#allocation2 + $0x4] sm:$0xf]  ;;  %v2061_v6 = vld [vmem:[#allocation2 + $0x8] sm:$0x1]  ;;  %v10681_v26 = vld [vmem:[%s14889_s2 + $0x38] sm:$0xff]  }
  0x88   : > { %v513_v63 = vsel %vm11195_vm6, %v505_v17, %v512_v55  ;;  %v750_v56 = vsel %vm11259_vm8, %v514_v34, %v749_v40  ;;  %754 = vst [vmem:[#allocation2 + $0x78] sm:$0xf] %v753_v4  ;;  %755 = vst.msk [vmem:[#allocation2 + $0x7c] sm:$0xf] %vm683_vm3, %v530_v59  ;;  %v9648_v1 = vrot.slane %v2059_v7, 9  ;;  %v2160_v8 = vrot.slane %v2060_v10, 5 }
  0x89   : > { %748 = vst.msk [vmem:[#allocation2 + $0x70] sm:$0xf] %vm683_vm3, %v513_v63  ;;  %751 = vst [vmem:[#allocation2 + $0x74] sm:$0x1] %v750_v56  ;;  %v546_v41 = vor.u32 %v544_v45, %v543_v0  ;;  %v548_v2 = vrot.slane %v543_v0, 4  ;;  %v2163_v13 = vrot.slane %v2061_v6, 5 }
  0x8a   : > { %1165 = vrot.lane.b32.xlu0 %v1009_v43, %s10870_s14  ;;  %v10673_v43 = vld [vmem:[%s14889_s2 + $0x60] sm:$0xff]   ;;  %758 = vst [vmem:[#allocation2 + $0x80] sm:$0x1] %v757_v60  ;;  %v2161_v18 = vsel %vm11529_vm0, %v9648_v1, %v2160_v8  ;;  %v2162_v19 = vrot.slane %v2160_v8, 4  ;;  %v1258_v28 = vld [vmem:[#allocation2 + $0x14] sm:$0x1] }
  0x8b   : > { %10168 = vmatprep.subr.bf16.mxu0 %v10673_v43  ;;  %v764_v12 = vsel %vm11259_vm8, %v548_v2, %v763_v3  ;;  %v1251_v29 = vld [vmem:[#allocation2 + $0xc] sm:$0xf]  ;;  %v11560_v31 = vld [vmem:[%s11185_s13 + $0x58] sm:$0xf]  ;;  %v824_v32 = vld [vmem:[%s11185_s13 + $0x5c] sm:$0xf] }
  0x8c   : > { %10169 = vmatpush3.bf16.msra.mxu0 %v10674_v61  ;;  %765 = vst [vmem:[#allocation2 + $0x8c] sm:$0x1] %v764_v12  ;;  %v2164_v20 = vsel %vm11529_vm0, %v2162_v19, %v2163_v13  ;;  %v10679_v55 = vld [vmem:[%s14889_s2 + $0x30] sm:$0xff]   ;;  %v1261_v34 = vld [vmem:[#allocation2 + $0x18] sm:$0xf]  ;;  %v1021_v36 = vshrl.u32 %v11560_v31, 16 }
  0x8d   : > { %10170 = vmatprep.subr.bf16.mxu0 %v10675_v35  ;;  %v9664_v21 = vcombine.low %v2161_v18, %v2164_v20  ;;  %v1029_v38 = vshrl.u32 %v824_v32, 16  ;;  %v1265_v63 = vld [vmem:[#allocation2 + $0x20] sm:$0x1]  ;;  %v1032_v49 = vshll.u32 %v824_v32, 16  ;;  %v11591_v22 = vld [vmem:[%s11185_s13 + $0x64] sm:$0xf] }
  0x8e   : > { %1169 = vrot.lane.b32.xlu0 %v1019_v62, %s10870_s14  ;;  %v535_v62 = vrot.slane %v533_v53, 7  ;;  %v11583_v56 = vrot.slane %v1021_v36, 7  ;;  %v11588_v52 = vld [vmem:[%s11185_s13 + $0x60] sm:$0xf]  ;;  %v1268_v4 = vld [vmem:[#allocation2 + $0x24] sm:$0xf] }
  0x8f   : > { %2334 = vst.msk [vmem:[#allocation4 + $0x8] sm:$0xff] %vm1494_vm15, %v9664_v21  ;;  %v11585_v48 = vrot.slane %v1029_v38, 7  ;;  %v1024_v61 = vshll.u32 %v11560_v31, 16  ;;  %v1046_v0 = vshrl.u32 %v11591_v22, 16  ;;  %v1272_v6 = vld [vmem:[#allocation2 + $0x2c] sm:$0x1] }
  0x90   : > { %v538_v54 = vor.u32 %v536_v57, %v535_v62  ;;  %v539_v9 = vrot.slane %v535_v62, 4  ;;  %10171 = vmatpush3.bf16.msra.mxu0 %v10676_v15  ;;  %v1027_v30 = vrot.slane %v11583_v56, 4  ;;  %v1038_v62 = vshrl.u32 %v11588_v52, 16  ;;  %v11605_v2 = vld [vmem:[%s11185_s13 + $0x68] sm:$0xf] }
  0x91   : > { %10172 = vmatprep.subr.bf16.mxu0 %v10678_v51  ;;  %v1034_v45 = vor.u32 %v1032_v49, %v11585_v48  ;;  %v1275_v8 = vld [vmem:[#allocation2 + $0x30] sm:$0xf]  ;;  %v11612_v12 = vld [vmem:[%s11185_s13 + $0x6c] sm:$0xf]  ;;  %v1049_v51 = vshll.u32 %v11591_v22, 16 }
  0x92   : > { %v760_v14 = vsel %vm11268_vm9, %v538_v54, %v759_v58  ;;  %v547_v16 = vsel %vm11195_vm6, %v539_v9, %v546_v41  ;;  %v11622_v38 = vrot.slane %v1038_v62, 7  ;;  %v11684_v22 = vld [vmem:[%s11185_s13 + $0x78] sm:$0xf] }
  0x93   : > { %761 = vst [vmem:[#allocation2 + $0x84] sm:$0xf] %v760_v14  ;;  %762 = vst.msk [vmem:[#allocation2 + $0x88] sm:$0xf] %vm683_vm3, %v547_v16  ;;  %v1035_v13 = vsel %vm11195_vm6, %v1027_v30, %v1034_v45  ;;  %v1036_v16 = vrot.slane %v11585_v48, 4 }
  0x94   : > { %10173 = vmatpush3.bf16.msra.mxu0 %v10679_v55 }
  0x95   : > { %10174 = vmatprep.subr.bf16.mxu0 %v10680_v5 }
  0x98   : > { %10175 = vmatpush3.bf16.msra.mxu0 %v10681_v26 }
  0x99   : > { %v1106_v17 = vpop.permute.xlu0 %1105 }
  0x9a   : > { %v1252_v24 = vsel %vm11555_vm10, %v1106_v17, %v1251_v29 }
  0x9b   : > { %1253 = vst [vmem:[#allocation2 + $0xc] sm:$0xf] %v1252_v24  ;;  %v1041_v24 = vshll.u32 %v11588_v52, 16 }
  0x9c   : > { %v1110_v33 = vpop.permute.xlu1 %1109 }
  0x9d   : > { %v1259_v40 = vsel %vm11549_vm5, %v1110_v33, %v1258_v28 }
  0x9e   : > { %1260 = vst [vmem:[#allocation2 + $0x14] sm:$0x1] %v1259_v40 }
  0xa0   : > { %v1112_v39 = vpop.permute.xlu1 %1111 }
  0xa1   : > { %v1262_v47 = vsel %vm11555_vm10, %v1112_v39, %v1261_v34  ;;  %v11624_v39 = vrot.slane %v1046_v0, 7  ;;  %v1044_v0 = vrot.slane %v11622_v38, 4 }
  0xa2   : > { %1263 = vst [vmem:[#allocation2 + $0x18] sm:$0xf] %v1262_v47  ;;  %v1514_v57 = vld [vmem:[#allocation2 + $0xc] sm:$0xf] }
  0xa3   : > { %v1587_v58 = vshrl.u32 %v1514_v57, 16  ;;  %v1590_v59 = vshll.u32 %v1514_v57, 16 }
  0xa4   : > { %v1116_v43 = vpop.permute.xlu1 %1115 }
  0xa5   : > { %v1266_v53 = vsel %vm11549_vm5, %v1116_v43, %v1265_v63  ;;  %v1516_v60 = vld [vmem:[#allocation2 + $0x14] sm:$0x1]  ;;  %v1589_v9 = vrot.slane %v1587_v58, 4  ;;  %v1592_v1 = vrot.slane %v1590_v59, 5  ;;  %v1055_v63 = vshrl.u32 %v11605_v2, 16 }
  0xa6   : > { %1267 = vst [vmem:[#allocation2 + $0x20] sm:$0x1] %v1266_v53  ;;  %v1606_v19 = vshll.u32 %v1516_v60, 16  ;;  %v1063_v53 = vshrl.u32 %v11612_v12, 16  ;;  %v11632_v59 = vld [vmem:[%s11185_s13 + $0x70] sm:$0xf] }
  0xa7   : > { %v1593_v17 = vor.u32 %v1592_v1, %v1589_v9  ;;  %v1026_v9 = vor.u32 %v1024_v61, %v11583_v56 }
  0xa9   : > { %v1517_v15 = vld [vmem:[#allocation2 + $0x18] sm:$0xf]  ;;  %v1594_v30 = vrot.slane %v1593_v17, 4 }
  0xaa   : > { %v1611_v20 = vshrl.u32 %v1517_v15, 16  ;;  %v1614_v21 = vshll.u32 %v1517_v15, 16  ;;  %v11650_v15 = vrot.slane %v1055_v63, 7 }
  0xac   : > { %v1613_v5 = vrot.slane %v1611_v20, 4  ;;  %v1616_v26 = vrot.slane %v1614_v21, 5  ;;  %v1286_v20 = vld [vmem:[#allocation2 + $0x44] sm:$0x1]  ;;  %v11661_v21 = vor.u32 %v1041_v24, %v11622_v38 }
  0xad   : > { %v1519_v58 = vld [vmem:[#allocation2 + $0x20] sm:$0x1] }
  0xc0   : > { %v1108_v46 = vpop.permute.xlu0 %1107  ;;  %v1120_v3 = vpop.permute.xlu1 %1119 }
  0xc1   : > { %1255 = vst.msk [vmem:[#allocation2 + $0x10] sm:$0xf] %vm1249_vm2, %v1108_v46  ;;  %1271 = vst.msk [vmem:[#allocation2 + $0x28] sm:$0xf] %vm1249_vm2, %v1120_v3  ;;  %v1279_v46 = vld [vmem:[#allocation2 + $0x38] sm:$0x1] }
  0xc2   : > { %v1066_v3 = vshll.u32 %v11612_v12, 16 }
  0xc4   : > { %v1114_v50 = vpop.permute.xlu0 %1113  ;;  %v1124_v32 = vpop.permute.xlu1 %1123 }
  0xc5   : > { %1264 = vst.msk [vmem:[#allocation2 + $0x1c] sm:$0xf] %vm1249_vm2, %v1114_v50  ;;  %v1276_v34 = vsel %vm11555_vm10, %v1124_v32, %v1275_v8  ;;  %v1608_v50 = vrot.slane %v1606_v19, 5  ;;  %v11655_v19 = vld [vmem:[%s11185_s13 + $0x74] sm:$0xf] }
  0xc6   : > { %1277 = vst [vmem:[#allocation2 + $0x30] sm:$0xf] %v1276_v34 }
  0xc8   : > { %v1118_v35 = vpop.permute.xlu0 %1117  ;;  %v10655_v7 = vld [vmem:[#allocation2 + $0xc] sm:$0xff]  }
  0xc9   : > { %v1515_v54 = vld [vmem:[#allocation2 + $0x10] sm:$0xf]  ;;  %v1269_v10 = vsel %vm11555_vm10, %v1118_v35, %v1268_v4  ;;  %2462 = vrot.lane.b32.xlu1 %v10655_v7, %s10871_s18  ;;  %v1128_v4 = vpop.permute.xlu1 %1127  ;;  %v1053_v35 = vrot.slane %v11624_v39, 4 }
  0xca   : > { %v1596_v41 = vshll.u32 %v1515_v54, 16  ;;  %1270 = vst [vmem:[#allocation2 + $0x24] sm:$0xf] %v1269_v10  ;;  %v1600_v14 = vshrl.u32 %v1515_v54, 16  ;;  %v10683_v28 = vld [vmem:[#allocation2 + $0xc] sm:$0xff]   ;;  %v1280_v60 = vsel %vm11549_vm5, %v1128_v4, %v1279_v46  ;;  %v1617_v10 = vor.u32 %v1616_v26, %v1613_v5 }
  0xcb   : > { %1496 = vst.msk [vmem:[#allocation4 + $0x28] sm:$0xff] %vm1494_vm15, %v10683_v28  ;;  %1281 = vst [vmem:[#allocation2 + $0x38] sm:$0x1] %v1280_v60  ;;  %v1282_v54 = vld [vmem:[#allocation2 + $0x3c] sm:$0xf]  ;;  %v1061_v4 = vrot.slane %v11650_v15, 4 }
  0xcc   : > { %v11614_v18 = vrot.slane %v1596_v41, 5  ;;  %v1122_v29 = vpop.permute.xlu0 %1121  ;;  %v10656_v33 = vld [vmem:[#allocation2 + $0x18] sm:$0xff]   ;;  %v1602_v40 = vrot.slane %v1600_v14, 4  ;;  %v1630_v14 = vshll.u32 %v1519_v58, 16  ;;  %v1521_v28 = vld [vmem:[#allocation2 + $0x28] sm:$0xf] }
  0xcd   : > { %v1273_v55 = vsel %vm11549_vm5, %v1122_v29, %v1272_v6  ;;  %v1518_v36 = vld [vmem:[#allocation2 + $0x1c] sm:$0xf]  ;;  %2464 = vrot.lane.b32.xlu0 %v10656_v33, %s10871_s18  ;;  %v1132_v61 = vpop.permute.xlu1 %1131  ;;  %v1618_v34 = vrot.slane %v1617_v10, 4  ;;  %v1644_v63 = vshll.u32 %v1521_v28, 16 }
  0xce   : > { %1274 = vst [vmem:[#allocation2 + $0x2c] sm:$0x1] %v1273_v55  ;;  %v1603_v47 = vor.u32 %v1602_v40, %v11614_v18  ;;  %v10684_v49 = vld [vmem:[#allocation2 + $0x18] sm:$0xff]   ;;  %v1620_v43 = vshll.u32 %v1518_v36, 16  ;;  %v1624_v52 = vshrl.u32 %v1518_v36, 16  ;;  %v1599_v31 = vsel %vm11387_vm12, %v1594_v30, %v11614_v18 }
  0xcf   : > { %1497 = vst.msk [vmem:[#allocation4 + $0x50] sm:$0xff] %vm1494_vm15, %v10684_v49  ;;  %v1289_v18 = vld [vmem:[#allocation2 + $0x48] sm:$0xf]  ;;  %v1072_v55 = vshrl.u32 %v11632_v59, 16  ;;  %v1632_v26 = vrot.slane %v1630_v14, 5  ;;  %v1648_v49 = vshrl.u32 %v1521_v28, 16 }
  0xd0   : > { %v1126_v57 = vpop.permute.xlu0 %1125  ;;  %v1604_v45 = vrot.slane %v1603_v47, 4  ;;  %v11647_v6 = vrot.slane %v1620_v43, 5  ;;  %v1626_v8 = vrot.slane %v1624_v52, 4  ;;  %1285 = vst.msk [vmem:[#allocation2 + $0x40] sm:$0xf] %vm1249_vm2, %v1132_v61  ;;  %v1080_v47 = vshrl.u32 %v11655_v19, 16 }
  0xd1   : > { %1278 = vst.msk [vmem:[#allocation2 + $0x34] sm:$0xf] %vm1249_vm2, %v1126_v57  ;;  %v10657_v62 = vld [vmem:[#allocation2 + $0x24] sm:$0xff]   ;;  %1173 = vrot.lane.b32.xlu0 %v1035_v13, %s10870_s14  ;;  %v11652_v13 = vrot.slane %v1063_v53, 7  ;;  %v1051_v53 = vor.u32 %v1049_v51, %v11624_v39  ;;  %v1136_v57 = vpop.permute.xlu1 %1135  ;;  %v1058_v30 = vshll.u32 %v11605_v2, 16  ;;  %v1075_v14 = vshll.u32 %v11632_v59, 16 }
  0xd2   : > { %v1609_v7 = vsel %vm11387_vm12, %v1604_v45, %v1608_v50  ;;  %v1520_v1 = vld [vmem:[#allocation2 + $0x24] sm:$0xf]  ;;  %2466 = vrot.lane.b32.xlu1 %v10657_v62, %s10871_s18  ;;  %v1627_v40 = vor.u32 %v1626_v8, %v11647_v6  ;;  %v1523_v50 = vld [vmem:[#allocation2 + $0x30] sm:$0xf]  ;;  %v1290_v62 = vsel %vm11555_vm10, %v1136_v57, %v1289_v18  ;;  %v11694_v61 = vrot.slane %v1072_v55, 7 }
  0xd3   : > { %v10686_v41 = vld [vmem:[#allocation2 + $0x24] sm:$0xff]   ;;  %v1635_v29 = vshrl.u32 %v1520_v1, 16  ;;  %v1638_v32 = vshll.u32 %v1520_v1, 16  ;;  %v9633_v33 = vcombine.low %v1599_v31, %v1609_v7  ;;  %v1070_v45 = vrot.slane %v11652_v13, 4  ;;  %1291 = vst [vmem:[#allocation2 + $0x48] sm:$0xf] %v1290_v62 }
  0xd4   : > { %v1130_v56 = vpop.permute.xlu0 %1129  ;;  %1498 = vst.msk [vmem:[#allocation4 + $0x78] sm:$0xff] %vm1494_vm15, %v10686_v41  ;;  %v1628_v5 = vrot.slane %v1627_v40, 4  ;;  %v11687_v1 = vrot.slane %v1644_v63, 5  ;;  %v1293_v8 = vld [vmem:[#allocation2 + $0x50] sm:$0x1]  ;;  %v1623_v31 = vsel %vm11387_vm12, %v1618_v34, %v11647_v6 }
  0xd5   : > { %v1283_v17 = vsel %vm11555_vm10, %v1130_v56, %v1282_v54  ;;  %v1522_v24 = vld [vmem:[#allocation2 + $0x2c] sm:$0x1]  ;;  %v1637_v36 = vrot.slane %v1635_v29, 4  ;;  %v1640_v46 = vrot.slane %v1638_v32, 5  ;;  %v1659_v54 = vshrl.u32 %v1523_v50, 16 }
  0xd6   : > { %1284 = vst [vmem:[#allocation2 + $0x3c] sm:$0xf] %v1283_v17  ;;  %1996 = vrot.lane.b32.xlu1 %v9633_v33, %s10871_s18  ;;  %v1633_v58 = vsel %vm11387_vm12, %v1628_v5, %v1632_v26  ;;  %v1654_v41 = vshll.u32 %v1522_v24, 16  ;;  %v1650_v56 = vrot.slane %v1648_v49, 4  ;;  %v1052_v29 = vsel %vm11195_vm6, %v1044_v0, %v1051_v53  ;;  %v1140_v33 = vpop.permute.xlu1 %1139  ;;  %v1296_v34 = vld [vmem:[#allocation2 + $0x54] sm:$0xf] }
  0xd7   : > { %v1641_v10 = vor.u32 %v1640_v46, %v1637_v36  ;;  %v9634_v28 = vcombine.low %v1623_v31, %v1633_v58  ;;  %v1662_v17 = vshll.u32 %v1523_v50, 16  ;;  %v1294_v18 = vsel %vm11549_vm5, %v1140_v33, %v1293_v8  ;;  %v1527_v49 = vld [vmem:[#allocation2 + $0x40] sm:$0xf] }
  0xd8   : > { %v10658_v43 = vld [vmem:[#allocation2 + $0x30] sm:$0xff]   ;;  %v1134_v52 = vpop.permute.xlu0 %1133  ;;  %v1651_v6 = vor.u32 %v1650_v56, %v11687_v1  ;;  %v1661_v55 = vrot.slane %v1659_v54, 4  ;;  %v1089_v24 = vshrl.u32 %v11684_v22, 16  ;;  %v1656_v0 = vrot.slane %v1654_v41, 5  ;;  %1295 = vst [vmem:[#allocation2 + $0x50] sm:$0x1] %v1294_v18 }
  0xd9   : > { %v1287_v60 = vsel %vm11549_vm5, %v1134_v52, %v1286_v20  ;;  %v1524_v7 = vld [vmem:[#allocation2 + $0x34] sm:$0xf]  ;;  %2468 = vrot.lane.b32.xlu0 %v10658_v43, %s10871_s18  ;;  %v11696_v20 = vrot.slane %v1080_v47, 7  ;;  %v1642_v38 = vrot.slane %v1641_v10, 4  ;;  %v1664_v36 = vrot.slane %v1662_v17, 5 }
  0xda   : > { %v10687_v51 = vld [vmem:[#allocation2 + $0x30] sm:$0xff]   ;;  %1288 = vst [vmem:[#allocation2 + $0x44] sm:$0x1] %v1287_v60  ;;  %1171 = vrot.lane.b32.xlu1 %v1026_v9, %s10870_s14  ;;  %v1525_v9 = vld [vmem:[#allocation2 + $0x38] sm:$0x1]  ;;  %v1668_v40 = vshll.u32 %v1524_v7, 16  ;;  %v1068_v43 = vor.u32 %v1066_v3, %v11652_v13  ;;  %v1144_v57 = vpop.permute.xlu1 %1143 }
  0xdb   : > { %1499 = vst.msk [vmem:[#allocation4 + $0xa0] sm:$0xff] %vm1494_vm15, %v10687_v51  ;;  %v1672_v46 = vshrl.u32 %v1524_v7, 16  ;;  %v1652_v5 = vrot.slane %v1651_v6, 4  ;;  %v1678_v63 = vshll.u32 %v1525_v9, 16  ;;  %v1692_v60 = vshll.u32 %v1527_v49, 16 }
  0xdc   : > { %v1138_v32 = vpop.permute.xlu0 %1137  ;;  %v11712_v26 = vrot.slane %v1668_v40, 5  ;;  %v1665_v7 = vor.u32 %v1664_v36, %v1661_v55  ;;  %1299 = vst.msk [vmem:[#allocation2 + $0x58] sm:$0xf] %vm1249_vm2, %v1144_v57  ;;  %v1083_v54 = vshll.u32 %v11655_v19, 16  ;;  %v11723_v51 = vld [vmem:[%s11185_s13 + $0x7c] sm:$0xf]  ;;  %v1647_v12 = vsel %vm11387_vm12, %v1642_v38, %v11687_v1 }
  0xdd   : > { %1292 = vst.msk [vmem:[#allocation2 + $0x4c] sm:$0xf] %vm1249_vm2, %v1138_v32  ;;  %1998 = vrot.lane.b32.xlu0 %v9634_v28, %s10871_s18  ;;  %v1526_v47 = vld [vmem:[#allocation2 + $0x3c] sm:$0xf]  ;;  %v1674_v52 = vrot.slane %v1672_v46, 4  ;;  %v1657_v3 = vsel %vm11387_vm12, %v1652_v5, %v1656_v0  ;;  %v1087_v8 = vrot.slane %v11696_v20, 4 }
  0xde   : > { %1175 = vrot.lane.b32.xlu1 %v1036_v16, %s10870_s14  ;;  %v1683_v50 = vshrl.u32 %v1526_v47, 16  ;;  %v1686_v58 = vshll.u32 %v1526_v47, 16  ;;  %v10689_v62 = vld [vmem:[#allocation2 + $0x3c] sm:$0xff]   ;;  %v1078_v16 = vrot.slane %v11694_v61, 4  ;;  %v1696_v56 = vshrl.u32 %v1527_v49, 16  ;;  %v1148_v17 = vpop.permute.xlu1 %1147  ;;  %s10809_s13 = sshll.u32 %s10873_s15, 4  ;;  %s10810_s13 = int_to_ptr.vmem [resolvable:$false] %s10809_s13 }
  0xdf   : > { %v1300_v10 = vld [vmem:[#allocation2 + $0x5c] sm:$0x1]  ;;  %1500 = vst.msk [vmem:[#allocation4 + $0xc8] sm:$0xff] %vm1494_vm15, %v10689_v62  ;;  %v1675_v19 = vor.u32 %v1674_v52, %v11712_v26  ;;  %v1303_v28 = vld [vmem:[#allocation2 + $0x60] sm:$0xf]  ;;  %v1680_v32 = vrot.slane %v1678_v63, 5  ;;  %v9635_v6 = vcombine.low %v1647_v12, %v1657_v3  ;;  %v1069_v47 = vsel %vm11195_vm6, %v1061_v4, %v1068_v43 }
  0xe0   : > { %v1142_v53 = vpop.permute.xlu0 %1141  ;;  %v1685_v41 = vrot.slane %v1683_v50, 4  ;;  %v1688_v31 = vrot.slane %v1686_v58, 5  ;;  %v11741_v9 = vrot.slane %v1692_v60, 5  ;;  %v11743_v40 = vrot.slane %v1089_v24, 7  ;;  %v10659_v5 = vld [vmem:[#allocation2 + $0x3c] sm:$0xff]   ;;  %s10811_s16 = scalar_lea.vmem %s10810_s13, 8192 }
  0xe1   : > { %v1297_v48 = vsel %vm11555_vm10, %v1142_v53, %v1296_v34  ;;  %1177 = vrot.lane.b32.xlu0 %v11661_v21, %s10870_s14  ;;  %v11739_v21 = vor.u32 %v1058_v30, %v11650_v15  ;;  %v1528_v1 = vld [vmem:[#allocation2 + $0x44] sm:$0x1]  ;;  %v1666_v18 = vrot.slane %v1665_v7, 4  ;;  %v1676_v55 = vrot.slane %v1675_v19, 4  ;;  %v1529_v30 = vld [vmem:[#allocation2 + $0x48] sm:$0xf] }
  0xe2   : > { %1298 = vst [vmem:[#allocation2 + $0x54] sm:$0xf] %v1297_v48  ;;  %1179 = vrot.lane.b32.xlu1 %v1052_v29, %s10870_s14  ;;  %v1097_v29 = vshrl.u32 %v11723_v51, 16  ;;  %v1689_v34 = vor.u32 %v1688_v31, %v1685_v41  ;;  %v1698_v38 = vrot.slane %v1696_v56, 4  ;;  %v1702_v0 = vshll.u32 %v1528_v1, 16  ;;  %v1152_v15 = vpop.permute.xlu1 %1151 }
  0xe3   : > { %v1304_v24 = vsel %vm11555_vm10, %v1148_v17, %v1303_v28  ;;  %v1707_v39 = vshrl.u32 %v1529_v30, 16  ;;  %v1092_v63 = vshll.u32 %v11684_v22, 16  ;;  %v1307_v49 = vld [vmem:[#allocation2 + $0x68] sm:$0x1]  ;;  %v1085_v52 = vor.u32 %v1083_v54, %v11696_v20  ;;  %v1531_v57 = vld [vmem:[#allocation2 + $0x50] sm:$0x1] }
  0xe4   : > { %v1146_v33 = vpop.permute.xlu0 %1145  ;;  %v1530_v36 = vld [vmem:[#allocation2 + $0x4c] sm:$0xf]  ;;  %1305 = vst [vmem:[#allocation2 + $0x60] sm:$0xf] %v1304_v24  ;;  %v1699_v50 = vor.u32 %v1698_v38, %v11741_v9  ;;  %v1710_v58 = vshll.u32 %v1529_v30, 16  ;;  %v1671_v4 = vsel %vm11387_vm12, %v1666_v18, %v11712_v26  ;;  %v1681_v43 = vsel %vm11387_vm12, %v1676_v55, %v1680_v32 }
  0xe5   : > { %v1301_v2 = vsel %vm11549_vm5, %v1146_v33, %v1300_v10  ;;  %1181 = vrot.lane.b32.xlu0 %v1053_v35, %s10870_s14  ;;  %v10691_v46 = vld [vmem:[#allocation2 + $0x48] sm:$0xff]   ;;  %v1100_v35 = vshll.u32 %v11723_v51, 16  ;;  %v1716_v60 = vshll.u32 %v1530_v36, 16  ;;  %v1709_v62 = vrot.slane %v1707_v39, 4  ;;  %v1533_v33 = vld [vmem:[#allocation2 + $0x58] sm:$0xf] }
  0xe6   : > { %1302 = vst [vmem:[#allocation2 + $0x5c] sm:$0x1] %v1301_v2  ;;  %2000 = vrot.lane.b32.xlu1 %v9635_v6, %s10871_s18  ;;  %1501 = vst.msk [vmem:[#allocation4 + $0xf0] sm:$0xff] %vm1494_vm15, %v10691_v46  ;;  %v1720_v7 = vshrl.u32 %v1530_v36, 16  ;;  %v11770_v48 = vrot.slane %v1689_v34, 4  ;;  %v11772_v54 = vrot.slane %v1702_v0, 5  ;;  %v1308_v1 = vsel %vm11549_vm5, %v1152_v15, %v1307_v49  ;;  %v1156_v55 = vpop.permute.xlu1 %1155 }
  0xe7   : > { %v1712_v12 = vrot.slane %v1710_v58, 5  ;;  %v11774_v3 = vrot.slane %v1716_v60, 5  ;;  %v11777_v10 = vrot.slane %v1699_v50, 4  ;;  %v1726_v41 = vshll.u32 %v1531_v57, 16  ;;  %v1310_v31 = vld [vmem:[#allocation2 + $0x6c] sm:$0xf] }
  0xe8   : > { %v1150_v53 = vpop.permute.xlu0 %1149  ;;  %v1722_v26 = vrot.slane %v1720_v7, 4  ;;  %v9636_v28 = vcombine.low %v1671_v4, %v1681_v43  ;;  %1309 = vst [vmem:[#allocation2 + $0x68] sm:$0x1] %v1308_v1  ;;  %v1314_v2 = vld [vmem:[#allocation2 + $0x74] sm:$0x1]  ;;  %v11782_v34 = vrot.slane %v1097_v29, 7  ;;  %v1695_v49 = vsel %vm11387_vm12, %v11770_v48, %v11741_v9 }
  0xe9   : > { %1306 = vst.msk [vmem:[#allocation2 + $0x64] sm:$0xf] %vm1249_vm2, %v1150_v53  ;;  %1185 = vrot.lane.b32.xlu0 %v1069_v47, %s10870_s14  ;;  %v1532_v19 = vld [vmem:[#allocation2 + $0x54] sm:$0xf]  ;;  %v1713_v32 = vor.u32 %v1712_v12, %v1709_v62  ;;  %v1740_v38 = vshll.u32 %v1533_v33, 16  ;;  %v10660_v46 = vld [vmem:[#allocation2 + $0x48] sm:$0xff]   ;;  %v1077_v47 = vor.u32 %v1075_v14, %v11694_v61  ;;  %v11805_v50 = vsel %vm11195_vm6, %v1078_v16, %v1085_v52 }
  0xea   : > { %2470 = vrot.lane.b32.xlu1 %v10659_v5, %s10871_s18  ;;  %v10692_v56 = vld [vmem:[#allocation2 + $0x54] sm:$0xff]   ;;  %v1731_v17 = vshrl.u32 %v1532_v19, 16  ;;  %v1734_v6 = vshll.u32 %v1532_v19, 16  ;;  %v1723_v30 = vor.u32 %v1722_v26, %v11774_v3  ;;  %1313 = vst.msk [vmem:[#allocation2 + $0x70] sm:$0xf] %vm1249_vm2, %v1156_v55  ;;  %v1095_v29 = vrot.slane %v11743_v40, 4  ;;  %v1160_v52 = vpop.permute.xlu1 %1159 }
  0xeb   : > { %v1317_v0 = vld [vmem:[#allocation2 + $0x78] sm:$0xf]  ;;  %v11785_v24 = vld [vmem:[#allocation2 + $0xc] sm:$0xe]  ;;  %1502 = vst.msk [vmem:[#allocation4 + $0x118] sm:$0xff] %vm1494_vm15, %v10692_v56  ;;  %v11807_v14 = vrot.slane %v1740_v38, 5 }
  0xec   : > { %v1154_v18 = vpop.permute.xlu0 %1153  ;;  %v11788_v36 = vld [vmem:[#allocation2 + $0x18] sm:$0xe]  ;;  %v1733_v5 = vrot.slane %v1731_v17, 4  ;;  %v1736_v39 = vrot.slane %v1734_v6, 5  ;;  %v1744_v53 = vshrl.u32 %v1533_v33, 16  ;;  %v11815_v58 = vrot.slane %v1713_v32, 4 }
  0xed   : > { %2002 = vrot.lane.b32.xlu0 %v9636_v28, %s10871_s18  ;;  %v1534_v59 = vld [vmem:[#allocation2 + $0x5c] sm:$0x1]  ;;  %v11817_v9 = vrot.slane %v1726_v41, 5  ;;  %v1311_v61 = vsel %vm11555_vm10, %v1154_v18, %v1310_v31  ;;  %v11821_v60 = vld [vmem:[#allocation2 + $0x28] sm:$0xf]  ;;  %v11823_v15 = vrot.slane %v1723_v30, 4 }
  0xee   : > { %1183 = vrot.lane.b32.xlu1 %v11739_v21, %s10870_s14  ;;  %v11809_v57 = vld [vmem:[#allocation2 + $0x1c] sm:$0xf]  ;;  %v1705_v21 = vsel %vm11387_vm12, %v11777_v10, %v11772_v54  ;;  %v1737_v4 = vor.u32 %v1736_v39, %v1733_v5  ;;  %v1746_v43 = vrot.slane %v1744_v53, 4  ;;  %1312 = vst [vmem:[#allocation2 + $0x6c] sm:$0xf] %v1311_v61  ;;  %v1750_v48 = vshll.u32 %v1534_v59, 16  ;;  %v1164_v6 = vpop.permute.xlu1 %1163 }
  0xef   : > { %v1535_v7 = vld [vmem:[#allocation2 + $0x60] sm:$0xf]  ;;  %v1318_v54 = vsel %vm11555_vm10, %v1160_v52, %v1317_v0  ;;  %v9649_v10 = vrot.slane %v11785_v24, 9  ;;  %v14898_v41 = vrot.slane %v11809_v57, 5  ;;  %v11837_v56 = vld [vmem:[#allocation2 + $0x14] sm:$0x1]  ;;  %v9637_v32 = vcombine.low %v1695_v49, %v1705_v21 }
  0xf0   : > { %v1158_v16 = vpop.permute.xlu0 %1157  ;;  %v1321_v12 = vld [vmem:[#allocation2 + $0x80] sm:$0x1]  ;;  %v1747_v19 = vor.u32 %v1746_v43, %v11807_v14  ;;  %1319 = vst [vmem:[#allocation2 + $0x78] sm:$0xf] %v1318_v54  ;;  %v1536_v1 = vld [vmem:[#allocation2 + $0x64] sm:$0xf]  ;;  %v1719_v33 = vsel %vm11387_vm12, %v11815_v58, %v11774_v3  ;;  %v1729_v55 = vsel %vm11387_vm12, %v11823_v15, %v11817_v9 }
  0xf1   : > { %v1315_v62 = vsel %vm11549_vm5, %v1158_v16, %v1314_v2  ;;  %2472 = vrot.lane.b32.xlu0 %v10660_v46, %s10871_s18  ;;  %v1755_v31 = vshrl.u32 %v1535_v7, 16  ;;  %v14900_v28 = vrot.slane %v11821_v60, 5  ;;  %v1537_v18 = vld [vmem:[#allocation2 + $0x68] sm:$0x1]  ;;  %v1758_v13 = vshll.u32 %v1535_v7, 16 }
  0xf2   : > { %1316 = vst [vmem:[#allocation2 + $0x74] sm:$0x1] %v1315_v62  ;;  %1187 = vrot.lane.b32.xlu1 %v1070_v45, %s10870_s14  ;;  %v11844_v45 = vld [vmem:[#allocation2 + $0x20] sm:$0x1]  ;;  %v11850_v2 = vrot.slane %v1737_v4, 4  ;;  %v1322_v30 = vsel %vm11549_vm5, %v1164_v6, %v1321_v12  ;;  %v11858_v46 = vrot.slane %v1750_v48, 5  ;;  %v1168_v15 = vpop.permute.xlu1 %1167 }
  0xf3   : > { %v1757_v38 = vrot.slane %v1755_v31, 4  ;;  %v1539_v3 = vld [vmem:[#allocation2 + $0x70] sm:$0xf]  ;;  %v11855_v0 = vld [vmem:[#allocation2 + $0x24] sm:$0xe]  ;;  %v1760_v5 = vrot.slane %v1758_v13, 5  ;;  %v9638_v31 = vcombine.low %v1719_v33, %v1729_v55 }
  0xf4   : > { %v1995_v17 = vpop.permute.xlu0 %1994  ;;  %1323 = vst [vmem:[#allocation2 + $0x80] sm:$0x1] %v1322_v30  ;;  %v1764_v39 = vshll.u32 %v1536_v1, 16  ;;  %v1768_v49 = vshrl.u32 %v1536_v1, 16  ;;  %v1748_v59 = vrot.slane %v1747_v19, 4  ;;  %v1774_v53 = vshll.u32 %v1537_v18, 16 }
  0xf5   : > { %2043 = vst.msk [vmem:[#allocation4] sm:$0xff] %vm2042_vm4, %v1995_v17  ;;  %1189 = vrot.lane.b32.xlu0 %v1077_v47, %s10870_s14  ;;  %v1788_v21 = vshll.u32 %v1539_v3, 16  ;;  %v1792_v58 = vshrl.u32 %v1539_v3, 16  ;;  %v1761_v16 = vor.u32 %v1760_v5, %v1757_v38  ;;  %v1324_v47 = vld [vmem:[#allocation2 + $0x84] sm:$0xf]  ;;  %v2170_v4 = vrot.slane %v11837_v56, 5 }
  0xf6   : > { %2004 = vrot.lane.b32.xlu1 %v9637_v32, %s10871_s18  ;;  %v11862_v52 = vrot.slane %v1764_v39, 5  ;;  %v11867_v43 = vrot.slane %v14898_v41, 4  ;;  %v1770_v7 = vrot.slane %v1768_v49, 4  ;;  %1327 = vst.msk [vmem:[#allocation2 + $0x88] sm:$0xf] %vm1249_vm2, %v1168_v15  ;;  %v11876_v12 = vrot.slane %v14900_v28, 4 }
  0xf7   : > { %v11872_v48 = vrot.slane %v1788_v21, 5  ;;  %v2063_v54 = vld [vmem:[#allocation2 + $0x10] sm:$0xf]  ;;  %v11878_v19 = vld [vmem:[#allocation2 + $0x2c] sm:$0x1]  ;;  %v10661_v32 = vld [vmem:[#allocation2 + $0x54] sm:$0xff]   ;;  %v1102_v17 = vor.u32 %v1100_v35, %v11782_v34  ;;  %v1743_v6 = vsel %vm11387_vm12, %v11850_v2, %v11807_v14  ;;  %v1753_v18 = vsel %vm11387_vm12, %v1748_v59, %v11858_v46 }
  0xf8   : > { %v1162_v61 = vpop.permute.xlu0 %1161  ;;  %v11880_v1 = vld [vmem:[#allocation2 + $0x30] sm:$0xe]  ;;  %v1771_v20 = vor.u32 %v1770_v7, %v11862_v52  ;;  %v1538_v33 = vld [vmem:[#allocation2 + $0x6c] sm:$0xf]  ;;  %v1794_v55 = vrot.slane %v1792_v58, 4  ;;  %v1762_v35 = vrot.slane %v1761_v16, 4  ;;  %v9639_v22 = vcombine.low %v1743_v6, %v1753_v18 }
  0xf9   : > { %1320 = vst.msk [vmem:[#allocation2 + $0x7c] sm:$0xf] %vm1249_vm2, %v1162_v61  ;;  %1193 = vrot.lane.b32.xlu0 %v1087_v8, %s10870_s14  ;;  %v1776_v8 = vrot.slane %v1774_v53, 5  ;;  %v1540_v13 = vld [vmem:[#allocation2 + $0x74] sm:$0x1]  ;;  %v1779_v38 = vshrl.u32 %v1538_v33, 16  ;;  %v1103_v59 = vsel %vm11195_vm6, %v1095_v29, %v1102_v17  ;;  %v1094_v53 = vor.u32 %v1092_v63, %v11743_v40 }
  0xfa   : > { %1191 = vrot.lane.b32.xlu1 %v11805_v50, %s10870_s14  ;;  %v11898_v51 = vld [vmem:[#allocation2 + $0x34] sm:$0xf]  ;;  %v1782_v3 = vshll.u32 %v1538_v33, 16  ;;  %v1798_v14 = vshll.u32 %v1540_v13, 16  ;;  %v1772_v2 = vrot.slane %v1771_v20, 4  ;;  %v1795_v46 = vor.u32 %v1794_v55, %v11872_v48 }
  0xfb   : > { %v1328_v5 = vld [vmem:[#allocation2 + $0x8c] sm:$0x1]  ;;  %v2167_v39 = vrot.slane %v2063_v54, 5  ;;  %v2066_v49 = vld [vmem:[#allocation2 + $0x1c] sm:$0xf]  ;;  %v1781_v21 = vrot.slane %v1779_v38, 4  ;;  %v1767_v40 = vsel %vm11387_vm12, %v1762_v35, %v11862_v52 }
  0xfc   : > { %v1166_v30 = vpop.permute.xlu0 %1165  ;;  %v1784_v58 = vrot.slane %v1782_v3, 5  ;;  %v2067_v61 = vld [vmem:[#allocation2 + $0x20] sm:$0x1]  ;;  %v2065_v54 = vld [vmem:[#allocation2 + $0x18] sm:$0xe]  ;;  %v1777_v20 = vsel %vm11387_vm12, %v1772_v2, %v1776_v8  ;;  %v1800_v13 = vrot.slane %v1798_v14, 5 }
  0xfd   : > { %v1325_v50 = vsel %vm11555_vm10, %v1166_v30, %v1324_v47  ;;  %2006 = vrot.lane.b32.xlu0 %v9638_v31, %s10871_s18  ;;  %v14897_v47 = vrot.slane %v11898_v51, 5  ;;  %v2169_v7 = vrot.slane %v2167_v39, 4  ;;  %v11915_v31 = vld [vmem:[#allocation2 + $0x38] sm:$0x1]  ;;  %v11917_v29 = vld [vmem:[#allocation2 + $0x40] sm:$0xf]  ;;  %v2168_v52 = vsel %vm11529_vm0, %v9649_v10, %v2167_v39 }
  0xfe   : > { %1326 = vst [vmem:[#allocation2 + $0x84] sm:$0xf] %v1325_v50  ;;  %2474 = vrot.lane.b32.xlu1 %v10661_v32, %s10871_s18  ;;  %v1785_v17 = vor.u32 %v1784_v58, %v1781_v21  ;;  %v1796_v32 = vrot.slane %v1795_v46, 4  ;;  %v1541_v55 = vld [vmem:[#allocation2 + $0x78] sm:$0xf]  ;;  %v2174_v8 = vrot.slane %v2066_v49, 5  ;;  %v9640_v46 = vcombine.low %v1767_v40, %v1777_v20 }
  0xff   : > { %v2171_v18 = vsel %vm11529_vm0, %v2169_v7, %v2170_v4  ;;  %v11937_v35 = vrot.slane %v14897_v47, 4  ;;  %v10662_v38 = vld [vmem:[#allocation2 + $0x60] sm:$0xff]   ;;  %v2177_v3 = vrot.slane %v2067_v61, 5  ;;  %v349_v10 = vld [vmem:[%s11223_s17 + $0x58] sm:$0xf]  ;;  %v14896_v56 = vrot.slane %v11917_v29, 5 }
 0x100   : > { %v1170_v63 = vpop.permute.xlu0 %1169  ;;  %v1786_v6 = vrot.slane %v1785_v17, 4  ;;  %v9665_v24 = vcombine.low %v2168_v52, %v2171_v18  ;;  %v1542_v14 = vld [vmem:[#allocation2 + $0x7c] sm:$0xf]  ;;  %v9650_v2 = vrot.slane %v2065_v54, 9  ;;  %v2176_v50 = vrot.slane %v2174_v8, 4  ;;  %v10672_v40 = vld [vmem:[#allocation2 + $0x6c] sm:$0xff]  }
 0x101   : > { %v1329_v33 = vsel %vm11549_vm5, %v1170_v63, %v1328_v5  ;;  %1197 = vrot.lane.b32.xlu0 %v1103_v59, %s10870_s14  ;;  %v1543_v4 = vld [vmem:[#allocation2 + $0x80] sm:$0x1]  ;;  %v1803_v5 = vshrl.u32 %v1541_v55, 16  ;;  %v1801_v49 = vsel %vm11387_vm12, %v1796_v32, %v1800_v13  ;;  %v1806_v59 = vshll.u32 %v1541_v55, 16  ;;  %v2068_v54 = vld [vmem:[#allocation2 + $0x24] sm:$0xe] }
 0x102   : > { %1330 = vst [vmem:[#allocation2 + $0x8c] sm:$0x1] %v1329_v33  ;;  %1195 = vrot.lane.b32.xlu1 %v1094_v53, %s10870_s14  ;;  %v1791_v39 = vsel %vm11387_vm12, %v1786_v6, %v11872_v48  ;;  %2335 = vst.msk [vmem:[#allocation4 + $0x30] sm:$0xff] %vm1494_vm15, %v9665_v24  ;;  %v350_v53 = vld [vmem:[%s11223_s17 + $0x5c] sm:$0xf]  ;;  %v2175_v21 = vsel %vm11529_vm0, %v9650_v2, %v2174_v8  ;;  %v2178_v58 = vsel %vm11529_vm0, %v2176_v50, %v2177_v3  ;;  %v11958_v48 = vld [vmem:[%s14889_s2 + $0x100] sm:$0xff]  }
 0x103   : > { %v1805_v61 = vrot.slane %v1803_v5, 4  ;;  %v1812_v7 = vshll.u32 %v1542_v14, 16  ;;  %v9666_v63 = vcombine.low %v2175_v21, %v2178_v58  ;;  %v1808_v17 = vrot.slane %v1806_v59, 5  ;;  %v2069_v33 = vld [vmem:[#allocation2 + $0x28] sm:$0xf]  ;;  %10534 = vmatprep.subr.bf16.mxu0 %v11958_v48 }
 0x104   : > { %v1822_v20 = vshll.u32 %v1543_v4, 16  ;;  %v550_v13 = vshrl.u32 %v349_v10, 16  ;;  %v553_v55 = vshll.u32 %v349_v10, 16  ;;  %v558_v6 = vshrl.u32 %v350_v53, 16  ;;  %v2070_v52 = vld [vmem:[#allocation2 + $0x2c] sm:$0x1] }
 0x105   : > { %2008 = vrot.lane.b32.xlu0 %v9639_v22, %s10871_s18  ;;  %v1816_v22 = vshrl.u32 %v1542_v14, 16  ;;  %v1814_v32 = vrot.slane %v1812_v7, 5  ;;  %v9641_v18 = vcombine.low %v1791_v39, %v1801_v49  ;;  %2336 = vst.msk [vmem:[#allocation4 + $0x58] sm:$0xff] %vm1494_vm15, %v9666_v63  ;;  %v1809_v8 = vor.u32 %v1808_v17, %v1805_v61  ;;  %v1544_v5 = vld [vmem:[#allocation2 + $0x84] sm:$0xf]  ;;  %v10677_v10 = vld [vmem:[#allocation2 + $0x78] sm:$0xff]  }
 0x106   : > { %2476 = vrot.lane.b32.xlu1 %v10662_v38, %s10871_s18  ;;  %v561_v3 = vshll.u32 %v350_v53, 16  ;;  %v1545_v38 = vld [vmem:[#allocation2 + $0x88] sm:$0xf]  ;;  %v1824_v2 = vrot.slane %v1822_v20, 5  ;;  %v552_v14 = vrot.slane %v550_v13, 7  ;;  %v560_v50 = vrot.slane %v558_v6, 7 }
 0x107   : > { %v1818_v24 = vrot.slane %v1816_v22, 4  ;;  %v9651_v4 = vrot.slane %v2068_v54, 9  ;;  %v1810_v59 = vrot.slane %v1809_v8, 4  ;;  %v2181_v58 = vrot.slane %v2069_v33, 5  ;;  %v770_v20 = vld [vmem:[#allocation2 + $0x98] sm:$0x1] }
 0x108   : > { %v2184_v39 = vrot.slane %v2070_v52, 5  ;;  %v555_v49 = vor.u32 %v553_v55, %v552_v14  ;;  %v556_v7 = vrot.slane %v552_v14, 4  ;;  %v563_v61 = vor.u32 %v561_v3, %v560_v50  ;;  %v10682_v33 = vld [vmem:[#allocation2 + $0x84] sm:$0xff]   ;;  %v351_v8 = vld [vmem:[%s11223_s17 + $0x60] sm:$0xf] }
 0x109   : > { %2010 = vrot.lane.b32.xlu0 %v9640_v46, %s10871_s18  ;;  %v1819_v21 = vor.u32 %v1818_v24, %v1814_v32  ;;  %v565_v53 = vrot.slane %v560_v50, 4  ;;  %v1546_v63 = vld [vmem:[#allocation2 + $0x8c] sm:$0x1]  ;;  %v1815_v46 = vsel %vm11387_vm12, %v1810_v59, %v1814_v32  ;;  %v2182_v54 = vsel %vm11529_vm0, %v9651_v4, %v2181_v58  ;;  %v352_v14 = vld [vmem:[%s11223_s17 + $0x64] sm:$0xf] }
 0x10a   : > { %2478 = vrot.lane.b32.xlu1 %v10672_v40, %s10871_s18  ;;  %v2183_v22 = vrot.slane %v2181_v58, 4  ;;  %v766_v40 = vld [vmem:[#allocation2 + $0x90] sm:$0xf]  ;;  %v564_v13 = vsel %vm11195_vm6, %v556_v7, %v563_v61  ;;  %v1827_v55 = vshrl.u32 %v1544_v5, 16  ;;  %v1830_v6 = vshll.u32 %v1544_v5, 16 }
 0x10b   : > { %v1820_v17 = vrot.slane %v1819_v21, 4  ;;  %v1836_v52 = vshll.u32 %v1545_v38, 16  ;;  %769 = vst.msk [vmem:[#allocation2 + $0x94] sm:$0xf] %vm683_vm3, %v564_v13  ;;  %v1840_v24 = vshrl.u32 %v1545_v38, 16  ;;  %v1846_v3 = vshll.u32 %v1546_v63, 16 }
 0x10c   : > { %v1829_v59 = vrot.slane %v1827_v55, 4  ;;  %v1832_v5 = vrot.slane %v1830_v6, 5  ;;  %v353_v21 = vld [vmem:[%s11223_s17 + $0x68] sm:$0xf]  ;;  %v767_v61 = vsel %vm11268_vm9, %v555_v49, %v766_v40  ;;  %v771_v38 = vsel %vm11259_vm8, %v565_v53, %v770_v20  ;;  %v10696_v40 = vld [vmem:[#allocation2 + $0x60] sm:$0xff]  }
 0x10d   : > { %2012 = vrot.lane.b32.xlu0 %v9641_v18, %s10871_s18  ;;  %v1825_v32 = vsel %vm11387_vm12, %v1820_v17, %v1824_v2  ;;  %v2185_v18 = vsel %vm11529_vm0, %v2183_v22, %v2184_v39  ;;  %v1838_v58 = vrot.slane %v1836_v52, 5  ;;  %v1842_v7 = vrot.slane %v1840_v24, 4  ;;  %v354_v2 = vld [vmem:[%s11223_s17 + $0x6c] sm:$0xf]  ;;  %768 = vst [vmem:[#allocation2 + $0x90] sm:$0xf] %v767_v61 }
 0x10e   : > { %2480 = vrot.lane.b32.xlu1 %v10677_v10, %s10871_s18  ;;  %v9642_v50 = vcombine.low %v1815_v46, %v1825_v32  ;;  %v9667_v4 = vcombine.low %v2182_v54, %v2185_v18  ;;  %v1848_v10 = vrot.slane %v1846_v3, 5  ;;  %v1833_v39 = vor.u32 %v1832_v5, %v1829_v59  ;;  %772 = vst [vmem:[#allocation2 + $0x98] sm:$0x1] %v771_v38  ;;  %v773_v54 = vld [vmem:[#allocation2 + $0x9c] sm:$0xf] }
 0x10f   : > { %v567_v63 = vshrl.u32 %v351_v8, 16  ;;  %v570_v46 = vshll.u32 %v351_v8, 16  ;;  %v1843_v17 = vor.u32 %v1842_v7, %v1838_v58  ;;  %v575_v22 = vshrl.u32 %v352_v14, 16  ;;  %v777_v52 = vld [vmem:[#allocation2 + $0xa4] sm:$0x1]  ;;  %1503 = vst.msk [vmem:[#allocation4 + $0x140] sm:$0xff] %vm1494_vm15, %v10696_v40 }
 0x110   : > { %2337 = vst.msk [vmem:[#allocation4 + $0x80] sm:$0xff] %vm1494_vm15, %v9667_v4  ;;  %v578_v13 = vshll.u32 %v352_v14, 16  ;;  %v584_v49 = vshrl.u32 %v353_v21, 16  ;;  %v1834_v55 = vrot.slane %v1833_v39, 4  ;;  %v587_v32 = vshll.u32 %v353_v21, 16 }
 0x111   : > { %2014 = vrot.lane.b32.xlu0 %v9642_v50, %s10871_s18  ;;  %v569_v6 = vrot.slane %v567_v63, 7  ;;  %v592_v18 = vshrl.u32 %v354_v2, 16  ;;  %v2071_v24 = vld [vmem:[#allocation2 + $0x30] sm:$0xe]  ;;  %v1844_v3 = vrot.slane %v1843_v17, 4  ;;  %v577_v50 = vrot.slane %v575_v22, 7 }
 0x112   : > { %2482 = vrot.lane.b32.xlu1 %v10682_v33, %s10871_s18  ;;  %v586_v53 = vrot.slane %v584_v49, 7  ;;  %v595_v20 = vshll.u32 %v354_v2, 16  ;;  %v2072_v8 = vld [vmem:[#allocation2 + $0x34] sm:$0xf]  ;;  %v2073_v4 = vld [vmem:[#allocation2 + $0x38] sm:$0x1]  ;;  %v1839_v14 = vsel %vm11387_vm12, %v1834_v55, %v1838_v58 }
 0x113   : > { %v780_v33 = vld [vmem:[#allocation2 + $0xa8] sm:$0xf]  ;;  %v572_v59 = vor.u32 %v570_v46, %v569_v6  ;;  %v573_v5 = vrot.slane %v569_v6, 4  ;;  %v594_v7 = vrot.slane %v592_v18, 7  ;;  %v2074_v61 = vld [vmem:[#allocation2 + $0x3c] sm:$0xe]  ;;  %v1849_v21 = vsel %vm11387_vm12, %v1844_v3, %v1848_v10 }
 0x114   : > { %v2075_v39 = vld [vmem:[#allocation2 + $0x40] sm:$0xf]  ;;  %v580_v38 = vor.u32 %v578_v13, %v577_v50  ;;  %v582_v63 = vrot.slane %v577_v50, 4  ;;  %v589_v2 = vor.u32 %v587_v32, %v586_v53  ;;  %v2076_v17 = vld [vmem:[#allocation2 + $0x44] sm:$0x1]  ;;  %v9643_v49 = vcombine.low %v1839_v14, %v1849_v21  ;;  %v10698_v46 = vld [vmem:[#allocation2 + $0x6c] sm:$0xff]  }
 0x115   : > { %v784_v22 = vld [vmem:[#allocation2 + $0xb0] sm:$0x1]  ;;  %v774_v40 = vsel %vm11268_vm9, %v572_v59, %v773_v54  ;;  %v590_v30 = vrot.slane %v586_v53, 4  ;;  %v597_v58 = vor.u32 %v595_v20, %v594_v7  ;;  %v599_v13 = vrot.slane %v594_v7, 4  ;;  %v356_v53 = vld [vmem:[%s11223_s17 + $0x74] sm:$0xf] }
 0x116   : > { %775 = vst [vmem:[#allocation2 + $0x9c] sm:$0xf] %v774_v40  ;;  %v581_v55 = vsel %vm11195_vm6, %v573_v5, %v580_v38  ;;  %v778_v10 = vsel %vm11259_vm8, %v582_v63, %v777_v52  ;;  %v9652_v6 = vrot.slane %v2071_v24, 9  ;;  %v355_v32 = vld [vmem:[%s11223_s17 + $0x70] sm:$0xf]  ;;  %2016 = vrot.lane.b32.xlu0 %v9643_v49, %s10871_s18  ;;  %v2188_v18 = vrot.slane %v2072_v8, 5 }
 0x117   : > { %776 = vst.msk [vmem:[#allocation2 + $0xa0] sm:$0xf] %vm683_vm3, %v581_v55  ;;  %779 = vst [vmem:[#allocation2 + $0xa4] sm:$0x1] %v778_v10  ;;  %v598_v54 = vsel %vm11195_vm6, %v590_v30, %v597_v58  ;;  %v2191_v3 = vrot.slane %v2073_v4, 5  ;;  %v781_v50 = vsel %vm11268_vm9, %v589_v2, %v780_v33  ;;  %v9653_v52 = vrot.slane %v2074_v61, 9 }
 0x118   : > { %v2077_v20 = vld [vmem:[#allocation2 + $0x48] sm:$0xe]  ;;  %1504 = vst.msk [vmem:[#allocation4 + $0x168] sm:$0xff] %vm1494_vm15, %v10698_v46  ;;  %782 = vst [vmem:[#allocation2 + $0xa8] sm:$0xf] %v781_v50  ;;  %v2195_v24 = vrot.slane %v2075_v39, 5  ;;  %v785_v59 = vsel %vm11259_vm8, %v599_v13, %v784_v22  ;;  %v2189_v8 = vsel %vm11529_vm0, %v9652_v6, %v2188_v18 }
 0x119   : > { %783 = vst.msk [vmem:[#allocation2 + $0xac] sm:$0xf] %vm683_vm3, %v598_v54  ;;  %v2198_v14 = vrot.slane %v2076_v17, 5  ;;  %v2078_v30 = vld [vmem:[#allocation2 + $0x4c] sm:$0xf]  ;;  %v2190_v4 = vrot.slane %v2188_v18, 4 }
 0x11a   : > { %786 = vst [vmem:[#allocation2 + $0xb0] sm:$0x1] %v785_v59  ;;  %v601_v33 = vshrl.u32 %v355_v32, 16  ;;  %v604_v5 = vshll.u32 %v355_v32, 16  ;;  %v2079_v7 = vld [vmem:[#allocation2 + $0x50] sm:$0x1]  ;;  %v2196_v21 = vsel %vm11529_vm0, %v9653_v52, %v2195_v24 }
 0x11b   : > { %v2197_v61 = vrot.slane %v2195_v24, 4  ;;  %v787_v38 = vld [vmem:[#allocation2 + $0xb4] sm:$0xf]  ;;  %v609_v39 = vshrl.u32 %v356_v53, 16  ;;  %v612_v63 = vshll.u32 %v356_v53, 16  ;;  %v2192_v17 = vsel %vm11529_vm0, %v2190_v4, %v2191_v3  ;;  %v10699_v3 = vld [vmem:[#allocation2 + $0x78] sm:$0xff]  }
 0x11c   : > { %v357_v2 = vld [vmem:[%s11223_s17 + $0x78] sm:$0xf]  ;;  %v603_v22 = vrot.slane %v601_v33, 7  ;;  %v9654_v49 = vrot.slane %v2077_v20, 9  ;;  %v2202_v40 = vrot.slane %v2078_v30, 5  ;;  %v9668_v46 = vcombine.low %v2189_v8, %v2192_v17  ;;  %1505 = vst.msk [vmem:[#allocation4 + $0x190] sm:$0xff] %vm1494_vm15, %v10699_v3 }
 0x11d   : > { %v358_v58 = vld [vmem:[%s11223_s17 + $0x7c] sm:$0xf]  ;;  %v2199_v55 = vsel %vm11529_vm0, %v2197_v61, %v2198_v14  ;;  %v611_v10 = vrot.slane %v609_v39, 7  ;;  %v2205_v13 = vrot.slane %v2079_v7, 5  ;;  %v12022_v6 = vld [vmem:[#allocation2 + $0x4c] sm:$0xf] }
 0x11e   : > { %14945 = vst [vmem:[#allocation12_spill] sm:$0xff] %v12022_v6  ;;  %v9669_v32 = vcombine.low %v2196_v21, %v2199_v55  ;;  %v606_v54 = vor.u32 %v604_v5, %v603_v22  ;;  %v791_v18 = vld [vmem:[#allocation2 + $0xbc] sm:$0x1]  ;;  %v607_v50 = vrot.slane %v603_v22, 4  ;;  %v2203_v53 = vsel %vm11529_vm0, %v9654_v49, %v2202_v40  ;;  %2338 = vst.msk [vmem:[#allocation4 + $0xa8] sm:$0xff] %vm1494_vm15, %v9668_v46 }
 0x11f   : > { %v616_v20 = vrot.slane %v611_v10, 4  ;;  %v614_v52 = vor.u32 %v612_v63, %v611_v10  ;;  %v2204_v24 = vrot.slane %v2202_v40, 4  ;;  %v618_v59 = vshrl.u32 %v357_v2, 16  ;;  %v2080_v30 = vld [vmem:[#allocation2 + $0x54] sm:$0xe] }
 0x120   : > { %v12027_v14 = vld [vmem:[#allocation2 + $0x3c] sm:$0xe]  ;;  %v12029_v8 = vld [vmem:[#allocation2 + $0x58] sm:$0xf]  ;;  %2339 = vst.msk [vmem:[#allocation4 + $0xd0] sm:$0xff] %vm1494_vm15, %v9669_v32  ;;  %v788_v4 = vsel %vm11268_vm9, %v606_v54, %v787_v38  ;;  %v621_v33 = vshll.u32 %v357_v2, 16 }
 0x121   : > { %14946 = vst [vmem:[#allocation13_spill] sm:$0xff] %v12029_v8  ;;  %v626_v5 = vshrl.u32 %v358_v58, 16  ;;  %v629_v7 = vshll.u32 %v358_v58, 16  ;;  %v12035_v21 = vld [vmem:[#allocation2 + $0x44] sm:$0x1]  ;;  %v792_v61 = vsel %vm11259_vm8, %v616_v20, %v791_v18  ;;  %v615_v39 = vsel %vm11195_vm6, %v607_v50, %v614_v52 }
 0x122   : > { %789 = vst [vmem:[#allocation2 + $0xb4] sm:$0xf] %v788_v4  ;;  %v2206_v63 = vsel %vm11529_vm0, %v2204_v24, %v2205_v13  ;;  %v620_v17 = vrot.slane %v618_v59, 7  ;;  %v794_v22 = vld [vmem:[#allocation2 + $0xc0] sm:$0xf]  ;;  %v9655_v58 = vrot.slane %v2080_v30, 9 }
 0x123   : > { %v2081_v38 = vld [vmem:[#allocation2 + $0x58] sm:$0xf]  ;;  %793 = vst [vmem:[#allocation2 + $0xbc] sm:$0x1] %v792_v61  ;;  %790 = vst.msk [vmem:[#allocation2 + $0xb8] sm:$0xf] %vm683_vm3, %v615_v39  ;;  %v9670_v2 = vcombine.low %v2203_v53, %v2206_v63 }
 0x124   : > { %v12044_v49 = vrot.slane %v626_v5, 7  ;;  %v2082_v40 = vld [vmem:[#allocation2 + $0x5c] sm:$0x1]  ;;  %v2209_v46 = vrot.slane %v2081_v38, 5  ;;  %v12046_v55 = vld [vmem:[#allocation2 + $0x48] sm:$0xe]  ;;  %v623_v32 = vor.u32 %v621_v33, %v620_v17 }
 0x125   : > { %14948 = vst [vmem:[#allocation15_spill] sm:$0xff] %v12046_v55  ;;  %v14895_v10 = vrot.slane %v12022_v6, 5  ;;  %v624_v54 = vrot.slane %v620_v17, 4  ;;  %v2212_v18 = vrot.slane %v2082_v40, 5  ;;  %v12049_v13 = vld [vmem:[#allocation2 + $0x50] sm:$0x1] }
 0x126   : > { %14947 = vst [vmem:[#allocation14_spill] sm:$0xff] %v12044_v49  ;;  %14949 = vst [vmem:[#allocation16_spill] sm:$0xff] %v12049_v13  ;;  %v12051_v50 = vld [vmem:[#allocation2 + $0x54] sm:$0xe]  ;;  %v14894_v3 = vrot.slane %v12029_v8, 5  ;;  %v631_v53 = vor.u32 %v629_v7, %v12044_v49  ;;  %v2210_v20 = vsel %vm11529_vm0, %v9655_v58, %v2209_v46  ;;  %v2211_v52 = vrot.slane %v2209_v46, 4 }
 0x127   : > { %14950 = vst [vmem:[#allocation17_spill] sm:$0xff] %v12051_v50  ;;  %2340 = vst.msk [vmem:[#allocation4 + $0xf8] sm:$0xff] %vm1494_vm15, %v9670_v2  ;;  %v12061_v59 = vrot.slane %v14896_v56, 4  ;;  %v12063_v30 = vld [vmem:[#allocation2 + $0x5c] sm:$0x1]  ;;  %v795_v4 = vsel %vm11268_vm9, %v623_v32, %v794_v22  ;;  %v12077_v17 = vrot.slane %v14895_v10, 4 }
 0x128   : > { %14951 = vst [vmem:[#allocation18_spill] sm:$0xff] %v12063_v30  ;;  %v3504_v33 = vld [vmem:[#allocation2 + $0x1c] sm:$0xf]  ;;  %v12069_v61 = vld [vmem:[#allocation2 + $0x64] sm:$0xf]  ;;  %v632_v39 = vsel %vm11195_vm6, %v624_v54, %v631_v53  ;;  %v2213_v63 = vsel %vm11529_vm0, %v2211_v52, %v2212_v18  ;;  %v12084_v58 = vrot.slane %v14894_v3, 4 }
 0x129   : > { %14952 = vst [vmem:[#allocation19_spill] sm:$0xff] %v12069_v61  ;;  %796 = vst [vmem:[#allocation2 + $0xc0] sm:$0xf] %v795_v4  ;;  %v9671_v2 = vcombine.low %v2210_v20, %v2213_v63  ;;  %v3503_v40 = vld [vmem:[#allocation2 + $0x18] sm:$0xf]  ;;  %v3561_v32 = vshll.u32 %v3504_v33, 16 }
 0x12a   : > { %14953 = vst [vmem:[#allocation20_spill] sm:$0xff] %v12077_v17  ;;  %797 = vst.msk [vmem:[#allocation2 + $0xc4] sm:$0xf] %vm683_vm3, %v632_v39  ;;  %v3565_v54 = vshrl.u32 %v3504_v33, 16  ;;  %v12087_v18 = vld [vmem:[#allocation2 + $0x60] sm:$0xe] }
 0x12b   : > { %14954 = vst [vmem:[#allocation21_spill] sm:$0xff] %v12084_v58  ;;  %14955 = vst [vmem:[#allocation22_spill] sm:$0xff] %v12087_v18  ;;  %v14899_v53 = vrot.slane %v12069_v61, 5  ;;  %v12090_v52 = vld [vmem:[#allocation2 + $0x68] sm:$0x1]  ;;  %v3552_v39 = vshrl.u32 %v3503_v40, 16 }
 0x12c   : > { %14956 = vst [vmem:[#allocation23_spill] sm:$0xff] %v12090_v52  ;;  %2341 = vst.msk [vmem:[#allocation4 + $0x120] sm:$0xff] %vm1494_vm15, %v9671_v2  ;;  %v10700_v4 = vld [vmem:[#allocation2 + $0x84] sm:$0xff]   ;;  %v3555_v20 = vshll.u32 %v3503_v40, 16  ;;  %v12093_v22 = vld [vmem:[#allocation2 + $0x70] sm:$0xf] }
 0x12d   : > { %v3506_v63 = vld [vmem:[#allocation2 + $0x24] sm:$0xf]  ;;  %v3507_v38 = vld [vmem:[#allocation2 + $0x28] sm:$0xf]  ;;  %14957 = vst [vmem:[#allocation24_spill] sm:$0xff] %v12093_v22  ;;  %1506 = vst.msk [vmem:[#allocation4 + $0x1b8] sm:$0xff] %vm1494_vm15, %v10700_v4 }
 0x12e   : > { %v12095_v3 = vld [vmem:[#allocation2 + $0x10] sm:$0xf]  ;;  %v12097_v46 = vld [vmem:[#allocation2 + $0x1c] sm:$0xf]  ;;  %v12100_v33 = vrot.slane %v3561_v32, 5  ;;  %v3567_v7 = vrot.slane %v3565_v54, 4 }
 0x12f   : > { %v3576_v10 = vshrl.u32 %v3506_v63, 16  ;;  %v3579_v5 = vshll.u32 %v3506_v63, 16  ;;  %v10718_v24 = vld [vmem:[#allocation2 + $0x18] sm:$0xff]   ;;  %v12105_v40 = vrot.slane %v14899_v53, 4  ;;  %v3585_v56 = vshll.u32 %v3507_v38, 16 }
 0x130   : > { %v3589_v15 = vshrl.u32 %v3507_v38, 16  ;;  %v3136_v26 = vrot.slane %v12095_v3, 5  ;;  %v3554_v41 = vrot.slane %v3552_v39, 4  ;;  %v3557_v4 = vrot.slane %v3555_v20, 5  ;;  %3487 = vst.msk [vmem:[#allocation4 + $0x18] sm:$0xff] %vm1494_vm15, %v10718_v24 }
 0x131   : > { %14958 = vst [vmem:[#allocation25_spill] sm:$0xff] %v12105_v40  ;;  %v3040_v54 = vld [vmem:[#allocation2 + $0x14] sm:$0x1]  ;;  %v3505_v63 = vld [vmem:[#allocation2 + $0x20] sm:$0x1]  ;;  %v3143_v2 = vrot.slane %v12097_v46, 5  ;;  %v3568_v53 = vor.u32 %v3567_v7, %v12100_v33 }
 0x132   : > { %v3038_v9 = vld [vmem:[#allocation2 + $0xc] sm:$0xe]  ;;  %v3043_v16 = vld [vmem:[#allocation2 + $0x20] sm:$0x1]  ;;  %v3508_v62 = vld [vmem:[#allocation2 + $0x2c] sm:$0x1] }
 0x133   : > { %v3578_v38 = vrot.slane %v3576_v10, 4  ;;  %v3581_v28 = vrot.slane %v3579_v5, 5  ;;  %v14959_v47 = vrot.slane %v11821_v60, 5  ;;  %v14960_v3 = vrot.slane %v11855_v0, 9  ;;  %v3041_v7 = vld [vmem:[#allocation2 + $0x18] sm:$0xe] }
 0x134   : > { %v14961_v39 = vrot.slane %v11878_v19, 5  ;;  %v12128_v20 = vrot.slane %v3585_v56, 5  ;;  %v3591_v10 = vrot.slane %v3589_v15, 4  ;;  %v3509_v5 = vld [vmem:[#allocation2 + $0x30] sm:$0xf]  ;;  %v3138_v32 = vrot.slane %v3136_v26, 4 }
 0x135   : > { %v12119_v24 = vsel %vm11529_vm0, %v14960_v3, %v14959_v47  ;;  %v3558_v0 = vor.u32 %v3557_v4, %v3554_v41  ;;  %v3571_v25 = vshll.u32 %v3505_v63, 16  ;;  %v3510_v44 = vld [vmem:[#allocation2 + $0x34] sm:$0xf]  ;;  %v10724_v47 = vld [vmem:[#allocation2 + $0x24] sm:$0xff]   ;;  %v3139_v3 = vrot.slane %v3040_v54, 5 }
 0x136   : > { %v12126_v46 = vsel %vm11529_vm0, %v11876_v12, %v14961_v39  ;;  %v3145_v40 = vrot.slane %v3143_v2, 4  ;;  %v3146_v19 = vrot.slane %v3043_v16, 5  ;;  %v3595_v52 = vshll.u32 %v3508_v62, 16  ;;  %v3044_v18 = vld [vmem:[#allocation2 + $0x24] sm:$0xe]  ;;  %3488 = vst.msk [vmem:[#allocation4 + $0x40] sm:$0xff] %vm1494_vm15, %v10724_v47 }
 0x137   : > { %v3569_v61 = vrot.slane %v3568_v53, 4  ;;  %v3582_v12 = vor.u32 %v3581_v28, %v3578_v38  ;;  %v3045_v39 = vld [vmem:[#allocation2 + $0x28] sm:$0xf]  ;;  %v3600_v22 = vshrl.u32 %v3509_v5, 16  ;;  %v3603_v56 = vshll.u32 %v3509_v5, 16 }
 0x138   : > { %v9712_v15 = vrot.slane %v3038_v9, 9  ;;  %v3592_v60 = vor.u32 %v3591_v10, %v12128_v20  ;;  %v3609_v37 = vshll.u32 %v3510_v44, 16  ;;  %v3613_v41 = vshrl.u32 %v3510_v44, 16  ;;  %v3046_v63 = vld [vmem:[#allocation2 + $0x2c] sm:$0x1] }
 0x139   : > { %v12135_v4 = vsel %vm11529_vm0, %v3138_v32, %v3139_v3  ;;  %v3559_v54 = vrot.slane %v3558_v0, 4  ;;  %v3573_v16 = vrot.slane %v3571_v25, 5  ;;  %v9713_v62 = vrot.slane %v3041_v7, 9  ;;  %v3511_v9 = vld [vmem:[#allocation2 + $0x38] sm:$0x1] }
 0x13a   : > { %14962 = vst [vmem:[#allocation26_spill] sm:$0xff] %v12135_v4  ;;  %v12139_v28 = vsel %vm11529_vm0, %v3145_v40, %v3146_v19  ;;  %v3597_v53 = vrot.slane %v3595_v52, 5  ;;  %v9714_v38 = vrot.slane %v3044_v18, 9  ;;  %v3150_v5 = vrot.slane %v3045_v39, 5  ;;  %v12145_v7 = vld [vmem:[#allocation2 + $0x34] sm:$0xf] }
 0x13b   : > { %14963 = vst [vmem:[#allocation27_spill] sm:$0xff] %v12139_v28  ;;  %v3574_v10 = vsel %vm11387_vm12, %v3569_v61, %v3573_v16  ;;  %v3583_v44 = vrot.slane %v3582_v12, 4  ;;  %v3602_v47 = vrot.slane %v3600_v22, 4  ;;  %v3605_v49 = vrot.slane %v3603_v56, 5  ;;  %v2463_v58 = vpop.permute.xlu1 %2462  ;;  %v3512_v40 = vld [vmem:[#allocation2 + $0x3c] sm:$0xf] }
 0x13c   : > { %v3593_v32 = vrot.slane %v3592_v60, 4  ;;  %v3153_v3 = vrot.slane %v3046_v63, 5  ;;  %v12143_v0 = vrot.slane %v3609_v37, 5  ;;  %v3615_v25 = vrot.slane %v3613_v41, 4  ;;  %2510 = vst.msk [vmem:[#allocation4 + $0x8] sm:$0xff] %vm2042_vm4, %v2463_v58 }
 0x13d   : > { %v12149_v52 = vsel %vm11529_vm0, %v9712_v15, %v3136_v26  ;;  %v3564_v18 = vsel %vm11387_vm12, %v3559_v54, %v12100_v33  ;;  %v12156_v61 = vsel %vm11529_vm0, %v9713_v62, %v3143_v2  ;;  %v3619_v22 = vshll.u32 %v3511_v9, 16  ;;  %v3513_v12 = vld [vmem:[#allocation2 + $0x40] sm:$0xf]  ;;  %v3515_v56 = vld [vmem:[#allocation2 + $0x48] sm:$0xf]  ;;  %v10725_v9 = vld [vmem:[#allocation2 + $0x30] sm:$0xff]  }
 0x13e   : > { %14964 = vst [vmem:[#allocation28_spill] sm:$0xff] %v12149_v52  ;;  %14965 = vst [vmem:[#allocation29_spill] sm:$0xff] %v12156_v61  ;;  %v12161_v60 = vcombine.low %v3564_v18, %v3574_v10  ;;  %v3152_v19 = vrot.slane %v3150_v5, 4  ;;  %v3588_v33 = vsel %vm11387_vm12, %v3583_v44, %v12128_v20  ;;  %v12170_v2 = vsel %vm11529_vm0, %v9714_v38, %v3150_v5  ;;  %v3516_v15 = vld [vmem:[#allocation2 + $0x4c] sm:$0xf] }
 0x13f   : > { %14967 = vst [vmem:[#allocation31_spill] sm:$0xff] %v12170_v2  ;;  %v3606_v39 = vor.u32 %v3605_v49, %v3602_v47  ;;  %v3157_v58 = vrot.slane %v12145_v7, 5  ;;  %v3598_v41 = vsel %vm11387_vm12, %v3593_v32, %v3597_v53  ;;  %v3616_v16 = vor.u32 %v3615_v25, %v12143_v0  ;;  %v3047_v62 = vld [vmem:[#allocation2 + $0x30] sm:$0xe]  ;;  %v3049_v20 = vld [vmem:[#allocation2 + $0x38] sm:$0x1]  ;;  %v2465_v38 = vpop.permute.xlu0 %2464 }
 0x140   : > { %14966 = vst [vmem:[#allocation30_spill] sm:$0xff] %v12161_v60  ;;  %v12177_v54 = vsel %vm11529_vm0, %v3152_v19, %v3153_v3  ;;  %v3624_v63 = vshrl.u32 %v3512_v40, 16  ;;  %v12180_v5 = vrot.slane %v3619_v22, 5  ;;  %v3627_v49 = vshll.u32 %v3512_v40, 16  ;;  %2511 = vst.msk [vmem:[#allocation4 + $0x30] sm:$0xff] %vm2042_vm4, %v2465_v38  ;;  %v4335_v22 = vld [vmem:[#allocation4] sm:$0xff] }
 0x141   : > { %14968 = vst [vmem:[#allocation32_spill] sm:$0xff] %v12177_v54  ;;  %v3633_v10 = vshll.u32 %v3513_v12, 16  ;;  %v3637_v44 = vshrl.u32 %v3513_v12, 16  ;;  %v3514_v47 = vld [vmem:[#allocation2 + $0x44] sm:$0x1]  ;;  %v3648_v53 = vshrl.u32 %v3515_v56, 16  ;;  %v12188_v40 = vcombine.low %v3588_v33, %v3598_v41 }
 0x142   : > { %v3651_v32 = vshll.u32 %v3515_v56, 16  ;;  %v3657_v7 = vshll.u32 %v3516_v15, 16  ;;  %v3661_v3 = vshrl.u32 %v3516_v15, 16  ;;  %3489 = vst.msk [vmem:[#allocation4 + $0x68] sm:$0xff] %vm1494_vm15, %v10725_v9  ;;  %v12184_v25 = vrot.slane %v3606_v39, 4  ;;  %v10697_v33 = vld [vmem:[%s14889_s2 + $0x108] sm:$0xff]  }
 0x143   : > { %v9715_v18 = vrot.slane %v3047_v62, 9  ;;  %v3159_v19 = vrot.slane %v3157_v58, 4  ;;  %v3160_v26 = vrot.slane %v3049_v20, 5  ;;  %v12186_v37 = vld [vmem:[#allocation2 + $0x3c] sm:$0xe]  ;;  %14969 = vst [vmem:[#allocation33_spill] sm:$0xff] %v12188_v40  ;;  %v1174_v9 = vpop.permute.xlu0 %1173 }
 0x144   : > { %v12192_v38 = vrot.slane %v3616_v16, 4  ;;  %v3626_v56 = vrot.slane %v3624_v63, 4  ;;  %v3518_v28 = vld [vmem:[#allocation2 + $0x54] sm:$0xf]  ;;  %v3519_v15 = vld [vmem:[#allocation2 + $0x58] sm:$0xf]  ;;  %v2467_v41 = vpop.permute.xlu1 %2466 }
 0x145   : > { %v4336_v61 = vld [vmem:[#allocation4 + $0x8] sm:$0xff]  ;;  %v3629_v39 = vrot.slane %v3627_v49, 5  ;;  %v12194_v60 = vrot.slane %v3633_v10, 5  ;;  %v3639_v62 = vrot.slane %v3637_v44, 4  ;;  %v3643_v20 = vshll.u32 %v3514_v47, 16  ;;  %2512 = vst.msk [vmem:[#allocation4 + $0x58] sm:$0xff] %vm2042_vm4, %v2467_v41 }
 0x146   : > { %4790 = vmatprep.mubr.bf16.mxu0 %v4336_v61  ;;  %1334 = vst.msk [vmem:[#allocation2 + $0x94] sm:$0xf] %vm1249_vm2, %v1174_v9  ;;  %v12200_v16 = vld [vmem:[#allocation2 + $0x40] sm:$0xf]  ;;  %v3650_v63 = vrot.slane %v3648_v53, 4  ;;  %v3653_v12 = vrot.slane %v3651_v32, 5  ;;  %v12212_v53 = vsel %vm11529_vm0, %v9715_v18, %v3157_v58  ;;  %v12216_v32 = vsel %vm11529_vm0, %v3159_v19, %v3160_v26 }
 0x147   : > { %v12202_v54 = vrot.slane %v3657_v7, 5  ;;  %v3663_v2 = vrot.slane %v3661_v3, 4  ;;  %4791 = vmatmul.mubr.bf16.vlgmr.msra.gmra.mrb[0].mxu0 %v4335_v22  ;;  %v3517_v49 = vld [vmem:[#allocation2 + $0x50] sm:$0x1]  ;;  %v3672_v10 = vshrl.u32 %v3518_v28, 16  ;;  %v3675_v44 = vshll.u32 %v3518_v28, 16 }
 0x148   : > { %v3681_v47 = vshll.u32 %v3519_v15, 16  ;;  %v3685_v40 = vshrl.u32 %v3519_v15, 16  ;;  %10535 = vmatpush3.bf16.msra.mxu0 %v11958_v48  ;;  %v9716_v7 = vrot.slane %v12186_v37, 9  ;;  %v10701_v28 = vld [vmem:[%s14889_s2 + $0x110] sm:$0xff]   ;;  %v4341_v48 = vld [vmem:[#allocation4 + $0x30] sm:$0xff]  ;;  %v3630_v22 = vor.u32 %v3629_v39, %v3626_v56  ;;  %v1997_v37 = vpop.permute.xlu1 %1996 }
 0x149   : > { %v3640_v58 = vor.u32 %v3639_v62, %v12194_v60  ;;  %v3164_v18 = vrot.slane %v12200_v16, 5  ;;  %v3521_v15 = vld [vmem:[#allocation2 + $0x60] sm:$0xf]  ;;  %v3522_v26 = vld [vmem:[#allocation2 + $0x64] sm:$0xf]  ;;  %10536 = vmatprep.subr.bf16.mxu0 %v10697_v33  ;;  %4798 = vmatprep.mubr.bf16.mxu0 %v4341_v48  ;;  %v12228_v19 = vrot.slane %v3643_v20, 5  ;;  %v3654_v41 = vor.u32 %v3653_v12, %v3650_v63 }
 0x14a   : > { %v3052_v9 = vld [vmem:[#allocation2 + $0x44] sm:$0x1]  ;;  %v3664_v61 = vor.u32 %v3663_v2, %v12202_v54  ;;  %v3667_v4 = vshll.u32 %v3517_v49, 16  ;;  %2044 = vst.msk [vmem:[#allocation4 + $0x28] sm:$0xff] %vm2042_vm4, %v1997_v37  ;;  %v3520_v3 = vld [vmem:[#allocation2 + $0x5c] sm:$0x1] }
 0x14b   : > { %v3674_v56 = vrot.slane %v3672_v10, 4  ;;  %v3677_v39 = vrot.slane %v3675_v44, 5  ;;  %v12232_v62 = vrot.slane %v3681_v47, 5  ;;  %v3687_v16 = vrot.slane %v3685_v40, 4  ;;  %v1331_v52 = vld [vmem:[#allocation2 + $0x90] sm:$0xf]  ;;  %v2469_v20 = vpop.permute.xlu0 %2468 }
 0x14c   : > { %v3696_v30 = vshrl.u32 %v3521_v15, 16  ;;  %v3699_v50 = vshll.u32 %v3521_v15, 16  ;;  %v3705_v48 = vshll.u32 %v3522_v26, 16  ;;  %v3709_v8 = vshrl.u32 %v3522_v26, 16  ;;  %10537 = vmatpush3.bf16.msra.mxu0 %v10697_v33  ;;  %2513 = vst.msk [vmem:[#allocation4 + $0x80] sm:$0xff] %vm2042_vm4, %v2469_v20  ;;  %v1172_v49 = vpop.permute.xlu1 %1171 }
 0x14d   : > { %v3631_v17 = vrot.slane %v3630_v22, 4  ;;  %v3641_v12 = vrot.slane %v3640_v58, 4  ;;  %v3166_v63 = vrot.slane %v3164_v18, 4  ;;  %v3167_v2 = vrot.slane %v3052_v9, 5  ;;  %10538 = vmatprep.subr.bf16.mxu0 %v10701_v28  ;;  %v1548_v26 = vld [vmem:[#allocation2 + $0x94] sm:$0xf] }
 0x14e   : > { %v9731_v10 = vcombine.low %v12212_v53, %v12216_v32  ;;  %v3655_v44 = vrot.slane %v3654_v41, 4  ;;  %v3669_v40 = vrot.slane %v3667_v4, 5  ;;  %v3691_v47 = vshll.u32 %v3520_v3, 16  ;;  %v10726_v58 = vld [vmem:[#allocation2 + $0x3c] sm:$0xff]   ;;  %v1335_v9 = vld [vmem:[#allocation2 + $0x98] sm:$0x1] }
 0x14f   : > { %v1332_v15 = vsel %vm11555_vm10, %v1172_v49, %v1331_v52  ;;  %v3665_v33 = vrot.slane %v3664_v61, 4  ;;  %v3678_v37 = vor.u32 %v3677_v39, %v3674_v56  ;;  %v3688_v22 = vor.u32 %v3687_v16, %v12232_v62  ;;  %v1999_v41 = vpop.permute.xlu0 %1998  ;;  %3490 = vst.msk [vmem:[#allocation4 + $0x90] sm:$0xff] %vm1494_vm15, %v10726_v58  ;;  %v1338_v56 = vld [vmem:[#allocation2 + $0x9c] sm:$0xf] }
 0x150   : > { %1333 = vst [vmem:[#allocation2 + $0x90] sm:$0xf] %v1332_v15  ;;  %v3698_v13 = vrot.slane %v3696_v30, 4  ;;  %v3701_v20 = vrot.slane %v3699_v50, 5  ;;  %v12240_v55 = vrot.slane %v3705_v48, 5  ;;  %v3711_v6 = vrot.slane %v3709_v8, 4  ;;  %10539 = vmatpush3.bf16.msra.mxu0 %v10701_v28  ;;  %v1176_v8 = vpop.permute.xlu1 %1175 }
 0x151   : > { %v3636_v4 = vsel %vm11387_vm12, %v3631_v17, %v12194_v60  ;;  %v3646_v52 = vsel %vm11387_vm12, %v3641_v12, %v12228_v19  ;;  %v12250_v61 = vsel %vm11529_vm0, %v9716_v7, %v3164_v18  ;;  %v12254_v50 = vsel %vm11529_vm0, %v3166_v63, %v3167_v2  ;;  %v3523_v30 = vld [vmem:[#allocation2 + $0x68] sm:$0x1]  ;;  %2045 = vst.msk [vmem:[#allocation4 + $0x50] sm:$0xff] %vm2042_vm4, %v1999_v41  ;;  %v4340_v28 = vld [vmem:[#allocation4 + $0x28] sm:$0xff]  ;;  %v12272_v2 = vld [vmem:[#allocation2 + $0x48] sm:$0xe] }
 0x152   : > { %v1860_v17 = vshll.u32 %v1548_v26, 16  ;;  %v1864_v60 = vshrl.u32 %v1548_v26, 16  ;;  %v3660_v3 = vsel %vm11387_vm12, %v3655_v44, %v12202_v54  ;;  %v12261_v19 = vrot.slane %v3691_v47, 5  ;;  %4799 = vmatmul.mubr.bf16.gmra.mrb[4].mxu0 %v4340_v28  ;;  %v4346_v18 = vld [vmem:[#allocation4 + $0x58] sm:$0xff] }
 0x153   : > { %v1336_v7 = vsel %vm11549_vm5, %v1176_v8, %v1335_v9  ;;  %v3670_v39 = vsel %vm11387_vm12, %v3665_v33, %v3669_v40  ;;  %v12267_v16 = vrot.slane %v3678_v37, 4  ;;  %v12269_v48 = vrot.slane %v3688_v22, 4  ;;  %4806 = vmatprep.mubr.bf16.mxu0 %v4346_v18  ;;  %v1178_v47 = vpop.permute.xlu0 %1177  ;;  %v1342_v40 = vld [vmem:[#allocation2 + $0xa4] sm:$0x1]  ;;  %v12296_v33 = vld [vmem:[#allocation2 + $0x4c] sm:$0xf] }
 0x154   : > { %1337 = vst [vmem:[#allocation2 + $0x98] sm:$0x1] %v1336_v7  ;;  %v3702_v12 = vor.u32 %v3701_v20, %v3698_v13  ;;  %v3712_v54 = vor.u32 %v3711_v6, %v12240_v55  ;;  %v3715_v63 = vshll.u32 %v3523_v30, 16  ;;  %v14970_v49 = vrot.slane %v11844_v45, 5  ;;  %v10727_v9 = vld [vmem:[#allocation2 + $0x48] sm:$0xff]  }
 0x155   : > { %v14971_v15 = vsel %vm11387_vm12, %v12192_v38, %v12180_v5  ;;  %v14972_v6 = vsel %vm11387_vm12, %v12184_v25, %v12143_v0  ;;  %v12291_v26 = vcombine.low %v3636_v4, %v3646_v52  ;;  %v9732_v45 = vcombine.low %v12250_v61, %v12254_v50  ;;  %v1180_v5 = vpop.permute.xlu1 %1179  ;;  %v12315_v52 = vld [vmem:[#allocation2 + $0x50] sm:$0x1]  ;;  %3491 = vst.msk [vmem:[#allocation4 + $0xb8] sm:$0xff] %vm1494_vm15, %v10727_v9  ;;  %v12365_v9 = vld [vmem:[#allocation2 + $0x74] sm:$0x1] }
 0x156   : > { %v4149_v44 = vsel %vm11529_vm0, %v11867_v43, %v14970_v49  ;;  %v12289_v13 = vcombine.low %v14972_v6, %v14971_v15  ;;  %v1104_v43 = vrot.slane %v11782_v34, 4  ;;  %v1339_v37 = vsel %vm11555_vm10, %v1178_v47, %v1338_v56  ;;  %1341 = vst.msk [vmem:[#allocation2 + $0xa0] sm:$0xf] %vm1249_vm2, %v1180_v5  ;;  %v4351_v49 = vld [vmem:[#allocation4 + $0x80] sm:$0xff] }
 0x157   : > { %v12300_v38 = vrot.slane %v1860_v17, 5  ;;  %v1866_v22 = vrot.slane %v1864_v60, 4  ;;  %v14973_v0 = vrot.slane %v11809_v57, 5  ;;  %v14974_v25 = vrot.slane %v11788_v36, 9  ;;  %1340 = vst [vmem:[#allocation2 + $0x9c] sm:$0xf] %v1339_v37 }
 0x158   : > { %v10685_v20 = vld [vmem:[#allocation2 + $0x90] sm:$0xff]   ;;  %v12309_v41 = vcombine.low %v3660_v3, %v3670_v39  ;;  %v3684_v4 = vsel %vm11387_vm12, %v12267_v16, %v12232_v62  ;;  %v3524_v57 = vld [vmem:[#allocation2 + $0x6c] sm:$0xf]  ;;  %v9793_v36 = vcombine.low %v12119_v24, %v12126_v46  ;;  %v3694_v28 = vsel %vm11387_vm12, %v12269_v48, %v12261_v19  ;;  %v1182_v62 = vpop.permute.xlu0 %1181  ;;  %v4345_v7 = vld [vmem:[#allocation4 + $0x50] sm:$0xff] }
 0x159   : > { %v4146_v58 = vsel %vm11529_vm0, %v14974_v25, %v14973_v0  ;;  %v1547_v8 = vld [vmem:[#allocation2 + $0x90] sm:$0xf]  ;;  %v12323_v17 = vrot.slane %v3702_v12, 4  ;;  %v3713_v60 = vrot.slane %v3712_v54, 4  ;;  %v3717_v3 = vrot.slane %v3715_v63, 5  ;;  %2484 = vrot.lane.b32.xlu1 %v10685_v20, %s10871_s18  ;;  %v2001_v16 = vpop.permute.xlu1 %2000 }
 0x15a   : > { %v9792_v30 = vcombine.low %v4146_v58, %v4149_v44  ;;  %v1851_v18 = vshrl.u32 %v1547_v8, 16  ;;  %v1854_v56 = vshll.u32 %v1547_v8, 16  ;;  %v9717_v24 = vrot.slane %v12272_v2, 9  ;;  %v10702_v39 = vld [vmem:[#allocation2 + $0x90] sm:$0xff]   ;;  %4320 = vst.msk [vmem:[#allocation4 + $0x48] sm:$0xff] %vm1494_vm15, %v9793_v36  ;;  %v10703_v2 = vld [vmem:[%s14889_s2 + $0xc0] sm:$0xff]   ;;  %4807 = vmatmul.mubr.bf16.gmra.mrb[8].mxu0 %v4345_v7 }
 0x15b   : > { %v3171_v46 = vrot.slane %v12296_v33, 5  ;;  %v1343_v19 = vsel %vm11549_vm5, %v1182_v62, %v1342_v40  ;;  %v1867_v48 = vor.u32 %v1866_v22, %v12300_v38  ;;  %v12334_v12 = vld [vmem:[#allocation2 + $0x70] sm:$0xf]  ;;  %v3720_v54 = vshrl.u32 %v3524_v57, 16  ;;  %2046 = vst.msk [vmem:[#allocation4 + $0x78] sm:$0xff] %vm2042_vm4, %v2001_v16  ;;  %4814 = vmatprep.mubr.bf16.mxu0 %v4351_v49  ;;  %10272 = vmatprep.subr.bf16.mxu1 %v10703_v2 }
 0x15c   : > { %4319 = vst.msk [vmem:[#allocation4 + $0x20] sm:$0xff] %vm1494_vm15, %v9792_v30  ;;  %v3723_v63 = vshll.u32 %v3524_v57, 16  ;;  %1344 = vst [vmem:[#allocation2 + $0xa4] sm:$0x1] %v1343_v19  ;;  %v1549_v44 = vld [vmem:[#allocation2 + $0x98] sm:$0x1]  ;;  %v12352_v0 = vcombine.low %v3684_v4, %v3694_v28  ;;  %v1186_v25 = vpop.permute.xlu0 %1185 }
 0x15d   : > { %v1853_v47 = vrot.slane %v1851_v18, 4  ;;  %v1856_v15 = vrot.slane %v1854_v56, 5  ;;  %1507 = vst.msk [vmem:[#allocation4 + $0x1e0] sm:$0xff] %vm1494_vm15, %v10702_v39  ;;  %v14975_v40 = vrot.slane %v11898_v51, 5  ;;  %v14976_v6 = vrot.slane %v11880_v1, 9  ;;  %v2471_v4 = vpop.permute.xlu1 %2470 }
 0x15e   : > { %v14977_v37 = vrot.slane %v11915_v31, 5  ;;  %v1870_v22 = vshll.u32 %v1549_v44, 16  ;;  %v3708_v51 = vsel %vm11387_vm12, %v12323_v17, %v12240_v55  ;;  %v3174_v1 = vrot.slane %v12315_v52, 5  ;;  %v10704_v55 = vld [vmem:[%s14889_s2 + $0x80] sm:$0xff]   ;;  %1348 = vst.msk [vmem:[#allocation2 + $0xac] sm:$0xf] %vm1249_vm2, %v1186_v25 }
 0x15f   : > { %v4160_v33 = vsel %vm11529_vm0, %v14976_v6, %v14975_v40  ;;  %v1857_v58 = vor.u32 %v1856_v15, %v1853_v47  ;;  %v3718_v31 = vsel %vm11387_vm12, %v3713_v60, %v3717_v3  ;;  %v3729_v20 = vshll.u32 %v12334_v12, 16  ;;  %v1345_v57 = vld [vmem:[#allocation2 + $0xa8] sm:$0xf]  ;;  %v12373_v28 = vld [vmem:[#allocation2 + $0x78] sm:$0xf]  ;;  %2514 = vst.msk [vmem:[#allocation4 + $0xa8] sm:$0xff] %vm2042_vm4, %v2471_v4  ;;  %10273 = vmatpush3.bf16.msra.mxu1 %v10704_v55 }
 0x160   : > { %v4163_v5 = vsel %vm11529_vm0, %v11937_v35, %v14977_v37  ;;  %v12363_v35 = vsel %vm11529_vm0, %v9717_v24, %v3171_v46  ;;  %v1868_v30 = vrot.slane %v1867_v48, 4  ;;  %v3173_v36 = vrot.slane %v3171_v46, 4  ;;  %v10688_v60 = vld [vmem:[#allocation2 + $0x9c] sm:$0xff]   ;;  %v1349_v25 = vld [vmem:[#allocation2 + $0xb0] sm:$0x1] }
 0x161   : > { %v3733_v8 = vshrl.u32 %v12334_v12, 16  ;;  %v9794_v17 = vcombine.low %v4160_v33, %v4163_v5  ;;  %v1858_v3 = vrot.slane %v1857_v58, 4  ;;  %v12376_v62 = vrot.slane %v3720_v54, 4  ;;  %v1550_v39 = vld [vmem:[#allocation2 + $0x9c] sm:$0xf]  ;;  %v2003_v54 = vpop.permute.xlu0 %2002  ;;  %2486 = vrot.lane.b32.xlu1 %v10688_v60, %s10871_s18 }
 0x162   : > { %v12378_v7 = vrot.slane %v3723_v63, 5  ;;  %v14978_v18 = vrot.slane %v11917_v29, 5  ;;  %v14979_v56 = vrot.slane %v12027_v14, 9  ;;  %v1872_v46 = vrot.slane %v1870_v22, 5  ;;  %v1551_v19 = vld [vmem:[#allocation2 + $0xa0] sm:$0xf] }
 0x163   : > { %v12386_v16 = vcombine.low %v3708_v51, %v3718_v31  ;;  %v3739_v48 = vshll.u32 %v12365_v9, 16  ;;  %4321 = vst.msk [vmem:[#allocation4 + $0x70] sm:$0xff] %vm1494_vm15, %v9794_v17  ;;  %v14980_v12 = vrot.slane %v12035_v21, 5  ;;  %v1863_v14 = vsel %vm11387_vm12, %v1858_v3, %v12300_v38  ;;  %v12401_v44 = vld [vmem:[#allocation2 + $0x7c] sm:$0xf]  ;;  %v1184_v21 = vpop.permute.xlu1 %1183  ;;  %v4350_v15 = vld [vmem:[#allocation4 + $0x78] sm:$0xff] }
 0x164   : > { %v4167_v24 = vsel %vm11529_vm0, %v14979_v56, %v14978_v18  ;;  %v1875_v63 = vshrl.u32 %v1550_v39, 16  ;;  %v1878_v2 = vshll.u32 %v1550_v39, 16  ;;  %v12399_v49 = vrot.slane %v3729_v20, 5  ;;  %v10705_v47 = vld [vmem:[#allocation2 + $0x9c] sm:$0xff]   ;;  %2047 = vst.msk [vmem:[#allocation4 + $0xa0] sm:$0xff] %vm2042_vm4, %v2003_v54  ;;  %4815 = vmatmul.mubr.bf16.gmra.mrb[12].mxu0 %v4350_v15  ;;  %v14981_v39 = vld [vmem:[#allocation12_spill] sm:$0xff] }
 0x165   : > { %v4170_v29 = vsel %vm11529_vm0, %v12061_v59, %v14980_v12  ;;  %v1873_v59 = vsel %vm11387_vm12, %v1868_v30, %v1872_v46  ;;  %v1552_v40 = vld [vmem:[#allocation2 + $0xa4] sm:$0x1]  ;;  %v1884_v6 = vshll.u32 %v1551_v19, 16  ;;  %v12406_v33 = vrot.slane %v3733_v8, 4  ;;  %1508 = vst.msk [vmem:[#allocation4 + $0x208] sm:$0xff] %vm1494_vm15, %v10705_v47  ;;  %v2473_v4 = vpop.permute.xlu0 %2472  ;;  %v14988_v47 = vld [vmem:[#allocation13_spill] sm:$0xff] }
 0x166   : > { %v9795_v37 = vcombine.low %v4167_v24, %v4170_v29  ;;  %v1346_v38 = vsel %vm11555_vm10, %v1184_v21, %v1345_v57  ;;  %v9644_v5 = vcombine.low %v1863_v14, %v1873_v59  ;;  %v1877_v22 = vrot.slane %v1875_v63, 4  ;;  %v1554_v57 = vld [vmem:[#allocation2 + $0xac] sm:$0xf]  ;;  %2515 = vst.msk [vmem:[#allocation4 + $0xd0] sm:$0xff] %vm2042_vm4, %v2473_v4  ;;  %v4356_v18 = vld [vmem:[#allocation4 + $0xa8] sm:$0xff]  ;;  %v14990_v59 = vld [vmem:[#allocation17_spill] sm:$0xff] }
 0x167   : > { %v3744_v51 = vshrl.u32 %v12373_v28, 16  ;;  %1347 = vst [vmem:[#allocation2 + $0xa8] sm:$0xf] %v1346_v38  ;;  %v1880_v58 = vrot.slane %v1878_v2, 5  ;;  %v12412_v31 = vrot.slane %v1884_v6, 5  ;;  %v1888_v20 = vshrl.u32 %v1551_v19, 16  ;;  %v1188_v3 = vpop.permute.xlu1 %1187  ;;  %4822 = vmatprep.mubr.bf16.mxu0 %v4356_v18 }
 0x168   : > { %v1894_v55 = vshll.u32 %v1552_v40, 16  ;;  %4322 = vst.msk [vmem:[#allocation4 + $0x98] sm:$0xff] %vm1494_vm15, %v9795_v37  ;;  %2018 = vrot.lane.b32.xlu0 %v9644_v5, %s10871_s18  ;;  %v12420_v30 = vsel %vm11529_vm0, %v3173_v36, %v3174_v1  ;;  %v3726_v8 = vor.u32 %v12378_v7, %v12376_v62  ;;  %v3747_v17 = vshll.u32 %v12373_v28, 16  ;;  %v1352_v56 = vld [vmem:[#allocation2 + $0xb4] sm:$0xf]  ;;  %v14983_v19 = vld [vmem:[#allocation15_spill] sm:$0xff] }
 0x169   : > { %v3753_v60 = vshll.u32 %v12401_v44, 16  ;;  %v1881_v24 = vor.u32 %v1880_v58, %v1877_v22  ;;  %v1890_v46 = vrot.slane %v1888_v20, 4  ;;  %v14982_v52 = vrot.slane %v14981_v39, 5  ;;  %v14985_v36 = vld [vmem:[#allocation16_spill] sm:$0xff]  ;;  %v12440_v63 = vld [vmem:[#allocation2 + $0x54] sm:$0xe] }
 0x16a   : > { %v14984_v12 = vrot.slane %v14983_v19, 9  ;;  %v14986_v62 = vrot.slane %v14985_v36, 5  ;;  %v14987_v7 = vld [vmem:[#allocation20_spill] sm:$0xff]  ;;  %v1350_v29 = vsel %vm11549_vm5, %v1188_v3, %v1349_v25  ;;  %v1908_v54 = vshll.u32 %v1554_v57, 16  ;;  %v12452_v5 = vld [vmem:[#allocation2 + $0x58] sm:$0xf] }
 0x16b   : > { %v1912_v14 = vshrl.u32 %v1554_v57, 16  ;;  %v10706_v2 = vld [vmem:[%s14889_s2 + $0xc8] sm:$0xff]   ;;  %v14989_v21 = vrot.slane %v14988_v47, 5  ;;  %v14991_v15 = vrot.slane %v14990_v59, 9  ;;  %1351 = vst [vmem:[#allocation2 + $0xb0] sm:$0x1] %v1350_v29  ;;  %v1891_v37 = vor.u32 %v1890_v46, %v12412_v31  ;;  %v1190_v57 = vpop.permute.xlu0 %1189 }
 0x16c   : > { %v4174_v1 = vsel %vm11529_vm0, %v14984_v12, %v14982_v52  ;;  %v4177_v28 = vsel %vm11529_vm0, %v14987_v7, %v14986_v62  ;;  %v1882_v6 = vrot.slane %v1881_v24, 4  ;;  %v1896_v38 = vrot.slane %v1894_v55, 5  ;;  %v10707_v22 = vld [vmem:[%s14889_s2 + $0x88] sm:$0xff]   ;;  %v14992_v25 = vld [vmem:[#allocation18_spill] sm:$0xff]  ;;  %v14994_v20 = vld [vmem:[#allocation21_spill] sm:$0xff]  ;;  %10274 = vmatprep.subr.bf16.mxu1 %v10706_v2  ;;  %v2005_v62 = vpop.permute.xlu1 %2004 }
 0x16d   : > { %v4181_v40 = vsel %vm11529_vm0, %v14991_v15, %v14989_v21  ;;  %v14993_v58 = vrot.slane %v14992_v25, 5  ;;  %v4355_v3 = vld [vmem:[#allocation4 + $0xa0] sm:$0xff]  ;;  %v1356_v18 = vld [vmem:[#allocation2 + $0xbc] sm:$0x1]  ;;  %v12462_v39 = vrot.slane %v1908_v54, 5  ;;  %v12464_v24 = vrot.slane %v3744_v51, 4  ;;  %10275 = vmatpush3.bf16.msra.mxu1 %v10707_v22 }
 0x16e   : > { %v12466_v55 = vrot.slane %v3747_v17, 5  ;;  %v3757_v46 = vshrl.u32 %v12401_v44, 16  ;;  %v10708_v52 = vld [vmem:[%s14889_s2 + $0xd0] sm:$0xff]   ;;  %v1353_v19 = vsel %vm11555_vm10, %v1190_v57, %v1352_v56  ;;  %v1887_v12 = vsel %vm11387_vm12, %v1882_v6, %v12412_v31  ;;  %v12479_v17 = vld [vmem:[#allocation2 + $0x5c] sm:$0x1]  ;;  %2048 = vst.msk [vmem:[#allocation4 + $0xc8] sm:$0xff] %vm2042_vm4, %v2005_v62  ;;  %4823 = vmatmul.mubr.bf16.gmra.mrb[16].mxu0 %v4355_v3 }
 0x16f   : > { %v4184_v4 = vsel %vm11529_vm0, %v14994_v20, %v14993_v58  ;;  %v1892_v36 = vrot.slane %v1891_v37, 4  ;;  %v12477_v51 = vrot.slane %v1912_v14, 4  ;;  %v12481_v7 = vld [vmem:[#allocation2 + $0x80] sm:$0x1]  ;;  %v10709_v44 = vld [vmem:[%s14889_s2 + $0x90] sm:$0xff]   ;;  %v10690_v56 = vld [vmem:[#allocation2 + $0xa8] sm:$0xff]   ;;  %10276 = vmatprep.subr.bf16.mxu1 %v10708_v52  ;;  %v9796_v54 = vcombine.low %v4174_v1, %v4177_v28  ;;  %v1194_v37 = vpop.permute.xlu0 %1193 }
 0x170   : > { %1354 = vst [vmem:[#allocation2 + $0xb4] sm:$0xf] %v1353_v19  ;;  %v12487_v29 = vrot.slane %v3726_v8, 4  ;;  %v9718_v31 = vrot.slane %v12440_v63, 9  ;;  %v9797_v14 = vcombine.low %v4181_v40, %v4184_v4  ;;  %v1553_v47 = vld [vmem:[#allocation2 + $0xa8] sm:$0xf]  ;;  %v3736_v21 = vor.u32 %v12406_v33, %v12399_v49  ;;  %2488 = vrot.lane.b32.xlu1 %v10690_v56, %s10871_s18 }
 0x171   : > { %v1897_v2 = vsel %vm11387_vm12, %v1892_v36, %v1896_v38  ;;  %v12494_v59 = vrot.slane %v3753_v60, 5  ;;  %v3759_v15 = vrot.slane %v3757_v46, 4  ;;  %v10710_v8 = vld [vmem:[%s14889_s2 + $0xd8] sm:$0xff]   ;;  %v4361_v1 = vld [vmem:[#allocation4 + $0xd0] sm:$0xff]  ;;  %v1899_v28 = vshrl.u32 %v1553_v47, 16  ;;  %4323 = vst.msk [vmem:[#allocation4 + $0xc0] sm:$0xff] %vm1494_vm15, %v9796_v54  ;;  %v1192_v60 = vpop.permute.xlu1 %1191  ;;  %10277 = vmatpush3.bf16.msra.mxu1 %v10709_v44 }
 0x172   : > { %v9645_v6 = vcombine.low %v1887_v12, %v1897_v2  ;;  %v1902_v63 = vshll.u32 %v1553_v47, 16  ;;  %v3178_v40 = vrot.slane %v12452_v5, 5  ;;  %v3530_v38 = vld [vmem:[#allocation2 + $0x84] sm:$0xf]  ;;  %4324 = vst.msk [vmem:[#allocation4 + $0xe8] sm:$0xff] %vm1494_vm15, %v9797_v14  ;;  %v1357_v33 = vsel %vm11549_vm5, %v1194_v37, %v1356_v18  ;;  %4830 = vmatprep.mubr.bf16.mxu0 %v4361_v1  ;;  %10278 = vmatprep.subr.bf16.mxu1 %v10710_v8  ;;  %v10711_v52 = vld [vmem:[%s14889_s2 + $0x98] sm:$0xff]  }
 0x173   : > { %v1915_v22 = vor.u32 %v12477_v51, %v12462_v39  ;;  %v12509_v25 = vrot.slane %v3739_v48, 5  ;;  %v3750_v5 = vor.u32 %v12466_v55, %v12464_v24  ;;  %v12513_v58 = vld [vmem:[#allocation2 + $0x60] sm:$0xe]  ;;  %1358 = vst [vmem:[#allocation2 + $0xbc] sm:$0x1] %v1357_v33  ;;  %v1901_v4 = vrot.slane %v1899_v28, 4  ;;  %v2007_v19 = vpop.permute.xlu0 %2006 }
 0x174   : > { %2020 = vrot.lane.b32.xlu0 %v9645_v6, %s10871_s18  ;;  %1355 = vst.msk [vmem:[#allocation2 + $0xb8] sm:$0xf] %vm1249_vm2, %v1192_v60  ;;  %v1555_v20 = vld [vmem:[#allocation2 + $0xb0] sm:$0x1]  ;;  %v1904_v57 = vrot.slane %v1902_v63, 5  ;;  %v3181_v3 = vrot.slane %v12479_v17, 5  ;;  %v3732_v18 = vsel %vm11387_vm12, %v12487_v29, %v12399_v49  ;;  %v3760_v55 = vor.u32 %v3759_v15, %v12494_v59 }
 0x175   : > { %v3763_v9 = vshll.u32 %v12481_v7, 16  ;;  %v1918_v48 = vshll.u32 %v1555_v20, 16  ;;  %v12523_v24 = vrot.slane %v3736_v21, 4  ;;  %v12526_v46 = vld [vmem:[#allocation2 + $0x64] sm:$0xf]  ;;  %v3180_v36 = vrot.slane %v3178_v40, 4  ;;  %v2475_v44 = vpop.permute.xlu1 %2474  ;;  %10279 = vmatpush3.bf16.msra.mxu1 %v10711_v52 }
 0x176   : > { %v1905_v12 = vor.u32 %v1904_v57, %v1901_v4  ;;  %v12531_v62 = vld [vmem:[#allocation2 + $0x88] sm:$0xf]  ;;  %v3768_v51 = vshrl.u32 %v3530_v38, 16  ;;  %v3771_v17 = vshll.u32 %v3530_v38, 16  ;;  %v10712_v7 = vld [vmem:[%s14889_s2 + $0xe0] sm:$0xff]   ;;  %2049 = vst.msk [vmem:[#allocation4 + $0xf0] sm:$0xff] %vm2042_vm4, %v2007_v19  ;;  %v12539_v47 = vsel %vm11529_vm0, %v9718_v31, %v3178_v40 }
 0x177   : > { %v4360_v56 = vld [vmem:[#allocation4 + $0xc8] sm:$0xff]  ;;  %v1359_v54 = vld [vmem:[#allocation2 + $0xc0] sm:$0xf]  ;;  %v1916_v14 = vrot.slane %v1915_v22, 4  ;;  %v1920_v2 = vrot.slane %v1918_v48, 5  ;;  %v12541_v21 = vrot.slane %v3750_v5, 4  ;;  %10280 = vmatprep.subr.bf16.mxu1 %v10712_v7  ;;  %v1198_v33 = vpop.permute.xlu0 %1197 }
 0x178   : > { %2516 = vst.msk [vmem:[#allocation4 + $0xf8] sm:$0xff] %vm2042_vm4, %v2475_v44  ;;  %4831 = vmatmul.mubr.bf16.gmra.mrb[20].mxu0 %v4360_v56  ;;  %v1906_v15 = vrot.slane %v1905_v12, 4  ;;  %v1556_v8 = vld [vmem:[#allocation2 + $0xb4] sm:$0xf]  ;;  %v12544_v6 = vrot.slane %v3763_v9, 5  ;;  %v9719_v37 = vrot.slane %v12513_v58, 9  ;;  %v3742_v9 = vsel %vm11387_vm12, %v12523_v24, %v12509_v25 }
 0x179   : > { %v3185_v1 = vrot.slane %v12526_v46, 5  ;;  %v1921_v28 = vsel %vm11387_vm12, %v1916_v14, %v1920_v2  ;;  %v1923_v31 = vshrl.u32 %v1556_v8, 16  ;;  %v1926_v63 = vshll.u32 %v1556_v8, 16  ;;  %v3061_v38 = vld [vmem:[#allocation2 + $0x68] sm:$0x1]  ;;  %v10713_v20 = vld [vmem:[%s14889_s2 + $0x118] sm:$0xff]   ;;  %v1196_v4 = vpop.permute.xlu1 %1195 }
 0x17a   : > { %v12550_v40 = vrot.slane %v3760_v55, 4  ;;  %v1911_v60 = vsel %vm11387_vm12, %v1906_v15, %v12462_v39  ;;  %v3770_v22 = vrot.slane %v3768_v51, 4  ;;  %v3773_v5 = vrot.slane %v3771_v17, 5  ;;  %1362 = vst.msk [vmem:[#allocation2 + $0xc4] sm:$0xf] %vm1249_vm2, %v1198_v33  ;;  %10540 = vmatprep.subr.bf16.mxu0 %v10713_v20  ;;  %v10714_v56 = vld [vmem:[#allocation2 + $0xa8] sm:$0xff]  }
 0x17b   : > { %v3777_v58 = vshll.u32 %v12531_v62, 16  ;;  %v9646_v57 = vcombine.low %v1911_v60, %v1921_v28  ;;  %v12566_v39 = vsel %vm11529_vm0, %v3180_v36, %v3181_v3  ;;  %v3756_v48 = vsel %vm11387_vm12, %v12541_v21, %v12494_v59  ;;  %v3532_v55 = vld [vmem:[#allocation2 + $0x8c] sm:$0x1]  ;;  %v10693_v52 = vld [vmem:[#allocation2 + $0xb4] sm:$0xff]   ;;  %v12574_v7 = vld [vmem:[#allocation2 + $0x6c] sm:$0xe]  ;;  %10541 = vmatpush3.bf16.msra.mxu0 %v10713_v20  ;;  %v2009_v27 = vpop.permute.xlu0 %2008 }
 0x17c   : > { %v1360_v46 = vsel %vm11555_vm10, %v1196_v4, %v1359_v54  ;;  %v1557_v19 = vld [vmem:[#allocation2 + $0xb8] sm:$0xf]  ;;  %v1925_v12 = vrot.slane %v1923_v31, 4  ;;  %v3187_v51 = vrot.slane %v3185_v1, 4  ;;  %v3188_v17 = vrot.slane %v3061_v38, 5  ;;  %2490 = vrot.lane.b32.xlu1 %v10693_v52, %s10871_s18  ;;  %v10715_v28 = vld [vmem:[%s14889_s2 + $0xa0] sm:$0xff]  }
 0x17d   : > { %1361 = vst [vmem:[#allocation2 + $0xc0] sm:$0xf] %v1360_v46  ;;  %2022 = vrot.lane.b32.xlu0 %v9646_v57, %s10871_s18  ;;  %v1558_v25 = vld [vmem:[#allocation2 + $0xbc] sm:$0x1]  ;;  %v1928_v3 = vrot.slane %v1926_v63, 5  ;;  %v1932_v24 = vshll.u32 %v1557_v19, 16  ;;  %v3774_v44 = vor.u32 %v3773_v5, %v3770_v22  ;;  %v3766_v54 = vsel %vm11387_vm12, %v12550_v40, %v12544_v6  ;;  %v2477_v31 = vpop.permute.xlu1 %2476  ;;  %10281 = vmatpush3.bf16.msra.mxu1 %v10715_v28 }
 0x17e   : > { %v1936_v36 = vshrl.u32 %v1557_v19, 16  ;;  %v12584_v14 = vsel %vm11529_vm0, %v9719_v37, %v3185_v1  ;;  %v12586_v2 = vrot.slane %v3777_v58, 5  ;;  %v3781_v15 = vshrl.u32 %v12531_v62, 16  ;;  %v3063_v8 = vld [vmem:[#allocation2 + $0x70] sm:$0xf]  ;;  %2050 = vst.msk [vmem:[#allocation4 + $0x118] sm:$0xff] %vm2042_vm4, %v2009_v27 }
 0x17f   : > { %v4366_v63 = vld [vmem:[#allocation4 + $0xf8] sm:$0xff]  ;;  %v1929_v38 = vor.u32 %v1928_v3, %v1925_v12  ;;  %v1934_v33 = vrot.slane %v1932_v24, 5  ;;  %v1942_v40 = vshll.u32 %v1558_v25, 16  ;;  %1509 = vst.msk [vmem:[#allocation4 + $0x230] sm:$0xff] %vm1494_vm15, %v10714_v56  ;;  %v4365_v37 = vld [vmem:[#allocation4 + $0xf0] sm:$0xff]  ;;  %v12597_v62 = vsel %vm11529_vm0, %v3187_v51, %v3188_v17  ;;  %v14996_v20 = vld [vmem:[#allocation26_spill] sm:$0xff] }
 0x180   : > { %v1938_v6 = vrot.slane %v1936_v36, 4  ;;  %2517 = vst.msk [vmem:[#allocation4 + $0x120] sm:$0xff] %vm2042_vm4, %v2477_v31  ;;  %4838 = vmatprep.mubr.bf16.mxu0 %v4366_v63  ;;  %v3775_v1 = vrot.slane %v3774_v44, 4  ;;  %v3783_v60 = vrot.slane %v3781_v15, 4  ;;  %v3787_v22 = vshll.u32 %v3532_v55, 16  ;;  %v14995_v58 = vld [vmem:[#allocation28_spill] sm:$0xff] }
 0x181   : > { %v3064_v5 = vld [vmem:[#allocation2 + $0x74] sm:$0x1]  ;;  %v14997_v4 = vcombine.low %v14995_v58, %v14996_v20  ;;  %4839 = vmatmul.mubr.bf16.gmra.mrb[24].mxu0 %v4365_v37  ;;  %v1930_v57 = vrot.slane %v1929_v38, 4  ;;  %v9720_v52 = vrot.slane %v12574_v7, 9  ;;  %v3192_v19 = vrot.slane %v3063_v8, 5  ;;  %v14998_v51 = vld [vmem:[#allocation30_spill] sm:$0xff]  ;;  %v2011_v7 = vpop.permute.xlu0 %2010 }
 0x182   : > { %v1939_v46 = vor.u32 %v1938_v6, %v1934_v33  ;;  %v2083_v12 = vld [vmem:[#allocation2 + $0x60] sm:$0xe]  ;;  %3983 = vrot.lane.b32.xlu1 %v14998_v51, %s10871_s18  ;;  %v9733_v55 = vcombine.low %v12363_v35, %v12420_v30  ;;  %v12613_v17 = vcombine.low %v3732_v18, %v3742_v9  ;;  %v3784_v25 = vor.u32 %v3783_v60, %v12586_v2  ;;  %v2084_v24 = vld [vmem:[#allocation2 + $0x64] sm:$0xf]  ;;  %v2085_v15 = vld [vmem:[#allocation2 + $0x68] sm:$0x1] }
 0x183   : > { %3294 = vrot.lane.b32.xlu0 %v14997_v4, %s10871_s18  ;;  %v3789_v3 = vrot.slane %v3787_v22, 5  ;;  %v1944_v44 = vrot.slane %v1942_v40, 5  ;;  %v9734_v56 = vcombine.low %v12539_v47, %v12566_v39  ;;  %v3195_v27 = vrot.slane %v3064_v5, 5  ;;  %2051 = vst.msk [vmem:[#allocation4 + $0x140] sm:$0xff] %vm2042_vm4, %v2011_v7  ;;  %v3533_v28 = vld [vmem:[#allocation2 + $0x90] sm:$0xf] }
 0x184   : > { %v1940_v36 = vrot.slane %v1939_v46, 4  ;;  %v10694_v8 = vld [vmem:[#allocation2 + $0xc0] sm:$0xff]   ;;  %v12624_v49 = vcombine.low %v3756_v48, %v3766_v54  ;;  %v9735_v29 = vcombine.low %v12584_v14, %v12597_v62  ;;  %v3780_v18 = vsel %vm11387_vm12, %v3775_v1, %v12586_v2  ;;  %v3534_v31 = vld [vmem:[#allocation2 + $0x94] sm:$0xf]  ;;  %v3535_v48 = vld [vmem:[#allocation2 + $0x98] sm:$0x1] }
 0x185   : > { %v3785_v9 = vrot.slane %v3784_v25, 4  ;;  %v1935_v63 = vsel %vm11387_vm12, %v1930_v57, %v1934_v33  ;;  %v12637_v59 = vsel %vm11529_vm0, %v9720_v52, %v3192_v19  ;;  %v3194_v21 = vrot.slane %v3192_v19, 4  ;;  %v3065_v54 = vld [vmem:[#allocation2 + $0x78] sm:$0xe]  ;;  %v10716_v2 = vld [vmem:[%s14889_s2 + $0xe8] sm:$0xff]   ;;  %v2013_v60 = vpop.permute.xlu0 %2012  ;;  %v10719_v19 = vld [vmem:[%s14889_s2 + $0xf0] sm:$0xff]  }
 0x186   : > { %v1945_v38 = vsel %vm11387_vm12, %v1940_v36, %v1944_v44  ;;  %2492 = vrot.lane.b32.xlu1 %v10694_v8, %s10871_s18  ;;  %v9656_v40 = vrot.slane %v2083_v12, 9  ;;  %v2216_v37 = vrot.slane %v2084_v24, 5  ;;  %v3066_v1 = vld [vmem:[#allocation2 + $0x7c] sm:$0xf]  ;;  %v10717_v22 = vld [vmem:[%s14889_s2 + $0xa8] sm:$0xff]   ;;  %v2219_v57 = vrot.slane %v2085_v15, 5  ;;  %10282 = vmatprep.subr.bf16.mxu1 %v10716_v2  ;;  %v2479_v2 = vpop.permute.xlu1 %2478 }
 0x187   : > { %v9647_v6 = vcombine.low %v1935_v63, %v1945_v38  ;;  %v3790_v33 = vsel %vm11387_vm12, %v3785_v9, %v3789_v3  ;;  %v4371_v5 = vld [vmem:[#allocation4 + $0x120] sm:$0xff]  ;;  %v4370_v58 = vld [vmem:[#allocation4 + $0x118] sm:$0xff]  ;;  %v12652_v4 = vsel %vm11529_vm0, %v3194_v21, %v3195_v27  ;;  %v3792_v46 = vshrl.u32 %v3533_v28, 16  ;;  %v3067_v52 = vld [vmem:[#allocation2 + $0x80] sm:$0x1]  ;;  %2052 = vst.msk [vmem:[#allocation4 + $0x168] sm:$0xff] %vm2042_vm4, %v2013_v60  ;;  %10283 = vmatpush3.bf16.msra.mxu1 %v10717_v22 }
 0x188   : > { %v12648_v20 = vcombine.low %v3780_v18, %v3790_v33  ;;  %4846 = vmatprep.mubr.bf16.mxu0 %v4371_v5  ;;  %v9736_v12 = vcombine.low %v12637_v59, %v12652_v4  ;;  %v2217_v51 = vsel %vm11529_vm0, %v9656_v40, %v2216_v37  ;;  %v2218_v25 = vrot.slane %v2216_v37, 4  ;;  %v3536_v27 = vld [vmem:[#allocation2 + $0x9c] sm:$0xf]  ;;  %v14999_v15 = vld [vmem:[#allocation33_spill] sm:$0xff]  ;;  %v3537_v38 = vld [vmem:[#allocation2 + $0xa0] sm:$0xf]  ;;  %10284 = vmatprep.subr.bf16.mxu1 %v10719_v19 }
 0x189   : > { %2024 = vrot.lane.b32.xlu0 %v9647_v6, %s10871_s18  ;;  %v3795_v3 = vshll.u32 %v3533_v28, 16  ;;  %4847 = vmatmul.mubr.bf16.gmra.mrb[28].mxu0 %v4370_v58  ;;  %v3794_v24 = vrot.slane %v3792_v46, 4  ;;  %v3801_v7 = vshll.u32 %v3534_v31, 16  ;;  %v3805_v36 = vshrl.u32 %v3534_v31, 16  ;;  %v2015_v21 = vpop.permute.xlu0 %2014  ;;  %v10720_v40 = vld [vmem:[%s14889_s2 + $0xb0] sm:$0xff]   ;;  %v15001_v60 = vld [vmem:[#allocation27_spill] sm:$0xff] }
 0x18a   : > { %v3811_v44 = vshll.u32 %v3535_v48, 16  ;;  %3985 = vrot.lane.b32.xlu1 %v14999_v15, %s10871_s18  ;;  %v2220_v8 = vsel %vm11529_vm0, %v2218_v25, %v2219_v57  ;;  %v9721_v9 = vrot.slane %v3065_v54, 9  ;;  %v3199_v63 = vrot.slane %v3066_v1, 5  ;;  %v3538_v48 = vld [vmem:[#allocation2 + $0xa4] sm:$0x1]  ;;  %2053 = vst.msk [vmem:[#allocation4 + $0x190] sm:$0xff] %vm2042_vm4, %v2015_v21 }
 0x18b   : > { %v3797_v18 = vrot.slane %v3795_v3, 5  ;;  %v9672_v28 = vcombine.low %v2217_v51, %v2220_v8  ;;  %v3803_v6 = vrot.slane %v3801_v7, 5  ;;  %v3807_v33 = vrot.slane %v3805_v36, 4  ;;  %v15000_v37 = vld [vmem:[#allocation29_spill] sm:$0xff]  ;;  %v3068_v57 = vld [vmem:[#allocation2 + $0x84] sm:$0xe]  ;;  %10285 = vmatpush3.bf16.msra.mxu1 %v10720_v40 }
 0x18c   : > { %v3813_v31 = vrot.slane %v3811_v44, 5  ;;  %v15002_v54 = vcombine.low %v15000_v37, %v15001_v60  ;;  %v12677_v22 = vsel %vm11529_vm0, %v9721_v9, %v3199_v63  ;;  %v3201_v5 = vrot.slane %v3199_v63, 4  ;;  %v3069_v46 = vld [vmem:[#allocation2 + $0x88] sm:$0xf]  ;;  %v3070_v7 = vld [vmem:[#allocation2 + $0x8c] sm:$0x1] }
 0x18d   : > { %v3798_v1 = vor.u32 %v3797_v18, %v3794_v24  ;;  %v3202_v58 = vrot.slane %v3067_v52, 5  ;;  %2342 = vst.msk [vmem:[#allocation4 + $0x148] sm:$0xff] %vm1494_vm15, %v9672_v28  ;;  %v3808_v19 = vor.u32 %v3807_v33, %v3803_v6  ;;  %v3816_v51 = vshrl.u32 %v3536_v27, 16  ;;  %v2086_v36 = vld [vmem:[#allocation2 + $0x6c] sm:$0xe]  ;;  %v10721_v44 = vld [vmem:[#allocation2 + $0xb4] sm:$0xff]  }
 0x18e   : > { %3296 = vrot.lane.b32.xlu0 %v15002_v54, %s10871_s18  ;;  %v3819_v25 = vshll.u32 %v3536_v27, 16  ;;  %v3825_v3 = vshll.u32 %v3537_v38, 16  ;;  %3987 = vrot.lane.b32.xlu1 %v12289_v13, %s10871_s18  ;;  %2518 = vst.msk [vmem:[#allocation4 + $0x148] sm:$0xff] %vm2042_vm4, %v2479_v2  ;;  %v3829_v15 = vshrl.u32 %v3537_v38, 16  ;;  %v3835_v8 = vshll.u32 %v3538_v48, 16  ;;  %v10722_v13 = vld [vmem:[%s14889_s2 + $0xf8] sm:$0xff]  }
 0x18f   : > { %v3799_v24 = vrot.slane %v3798_v1, 4  ;;  %v12685_v52 = vsel %vm11529_vm0, %v3201_v5, %v3202_v58  ;;  %v3809_v18 = vrot.slane %v3808_v19, 4  ;;  %v3818_v9 = vrot.slane %v3816_v51, 4  ;;  %1510 = vst.msk [vmem:[#allocation4 + $0x258] sm:$0xff] %vm1494_vm15, %v10721_v44  ;;  %v15003_v21 = vld [vmem:[#allocation31_spill] sm:$0xff]  ;;  %v15004_v28 = vld [vmem:[#allocation32_spill] sm:$0xff]  ;;  %10286 = vmatprep.subr.bf16.mxu1 %v10722_v13 }
 0x190   : > { %v9737_v27 = vcombine.low %v12677_v22, %v12685_v52  ;;  %v3821_v63 = vrot.slane %v3819_v25, 5  ;;  %v15005_v2 = vcombine.low %v15003_v21, %v15004_v28  ;;  %v3827_v33 = vrot.slane %v3825_v3, 5  ;;  %v2087_v37 = vld [vmem:[#allocation2 + $0x70] sm:$0xf]  ;;  %v10723_v60 = vld [vmem:[%s14889_s2 + $0xb8] sm:$0xff]  }
 0x191   : > { %v3804_v38 = vsel %vm11387_vm12, %v3799_v24, %v3803_v6  ;;  %v3831_v48 = vrot.slane %v3829_v15, 4  ;;  %v3837_v40 = vrot.slane %v3835_v8, 5  ;;  %v3814_v54 = vsel %vm11387_vm12, %v3809_v18, %v3813_v31  ;;  %v2088_v19 = vld [vmem:[#allocation2 + $0x74] sm:$0x1]  ;;  %v3539_v51 = vld [vmem:[#allocation2 + $0xa8] sm:$0xf]  ;;  %v2017_v15 = vpop.permute.xlu0 %2016  ;;  %10287 = vmatpush3.bf16.msra.mxu1 %v10723_v60 }
 0x192   : > { %3298 = vrot.lane.b32.xlu0 %v15005_v2, %s10871_s18  ;;  %v3822_v1 = vor.u32 %v3821_v63, %v3818_v9  ;;  %v9722_v5 = vrot.slane %v3068_v57, 9  ;;  %v3206_v58 = vrot.slane %v3069_v46, 5  ;;  %3989 = vrot.lane.b32.xlu1 %v12291_v26, %s10871_s18  ;;  %v12706_v6 = vcombine.low %v3804_v38, %v3814_v54  ;;  %v3540_v24 = vld [vmem:[#allocation2 + $0xac] sm:$0xf]  ;;  %v3541_v18 = vld [vmem:[#allocation2 + $0xb0] sm:$0x1] }
 0x193   : > { %v3832_v25 = vor.u32 %v3831_v48, %v3827_v33  ;;  %v3209_v3 = vrot.slane %v3070_v7, 5  ;;  %v9657_v44 = vrot.slane %v2086_v36, 9  ;;  %v2223_v46 = vrot.slane %v2087_v37, 5  ;;  %v3071_v9 = vld [vmem:[#allocation2 + $0x90] sm:$0xe]  ;;  %2054 = vst.msk [vmem:[#allocation4 + $0x1b8] sm:$0xff] %vm2042_vm4, %v2017_v15 }
 0x194   : > { %v3823_v8 = vrot.slane %v3822_v1, 4  ;;  %v12710_v31 = vsel %vm11529_vm0, %v9722_v5, %v3206_v58  ;;  %v3208_v57 = vrot.slane %v3206_v58, 4  ;;  %v2226_v7 = vrot.slane %v2088_v19, 5  ;;  %v3072_v13 = vld [vmem:[#allocation2 + $0x94] sm:$0xf] }
 0x195   : > { %v3833_v26 = vrot.slane %v3832_v25, 4  ;;  %v3840_v36 = vshrl.u32 %v3539_v51, 16  ;;  %v3843_v63 = vshll.u32 %v3539_v51, 16  ;;  %v3073_v21 = vld [vmem:[#allocation2 + $0x98] sm:$0x1]  ;;  %v4375_v28 = vld [vmem:[#allocation4 + $0x140] sm:$0xff]  ;;  %v2224_v48 = vsel %vm11529_vm0, %v9657_v44, %v2223_v46 }
 0x196   : > { %3300 = vrot.lane.b32.xlu0 %v9731_v10, %s10871_s18  ;;  %v3828_v2 = vsel %vm11387_vm12, %v3823_v8, %v3827_v33  ;;  %v12721_v38 = vsel %vm11529_vm0, %v3208_v57, %v3209_v3  ;;  %v2225_v37 = vrot.slane %v2223_v46, 4  ;;  %v4376_v53 = vld [vmem:[#allocation4 + $0x148] sm:$0xff]  ;;  %3991 = vrot.lane.b32.xlu1 %v12309_v41, %s10871_s18  ;;  %v3849_v5 = vshll.u32 %v3540_v24, 16  ;;  %v3542_v19 = vld [vmem:[#allocation2 + $0xb4] sm:$0xf] }
 0x197   : > { %v3838_v32 = vsel %vm11387_vm12, %v3833_v26, %v3837_v40  ;;  %v9738_v10 = vcombine.low %v12710_v31, %v12721_v38  ;;  %4854 = vmatprep.mubr.bf16.mxu0 %v4376_v53  ;;  %v3842_v33 = vrot.slane %v3840_v36, 4  ;;  %v3845_v60 = vrot.slane %v3843_v63, 5  ;;  %v3543_v51 = vld [vmem:[#allocation2 + $0xb8] sm:$0xf]  ;;  %v2481_v40 = vpop.permute.xlu1 %2480  ;;  %v3544_v15 = vld [vmem:[#allocation2 + $0xbc] sm:$0x1] }
 0x198   : > { %v12731_v54 = vcombine.low %v3828_v2, %v3838_v32  ;;  %v2227_v1 = vsel %vm11529_vm0, %v2225_v37, %v2226_v7  ;;  %v3853_v58 = vshrl.u32 %v3540_v24, 16  ;;  %4855 = vmatmul.mubr.bf16.gmra.mrb[32].mxu0 %v4375_v28  ;;  %v3859_v3 = vshll.u32 %v3541_v18, 16  ;;  %v3074_v7 = vld [vmem:[#allocation2 + $0x9c] sm:$0xe]  ;;  %v3075_v36 = vld [vmem:[#allocation2 + $0xa0] sm:$0xf] }
 0x199   : > { %v9673_v41 = vcombine.low %v2224_v48, %v2227_v1  ;;  %v3846_v25 = vor.u32 %v3845_v60, %v3842_v33  ;;  %v9723_v44 = vrot.slane %v3071_v9, 9  ;;  %v3851_v8 = vrot.slane %v3849_v5, 5  ;;  %v2089_v28 = vld [vmem:[#allocation2 + $0x78] sm:$0xe]  ;;  %v2090_v37 = vld [vmem:[#allocation2 + $0x7c] sm:$0xf] }
 0x19a   : > { %3302 = vrot.lane.b32.xlu0 %v9732_v45, %s10871_s18  ;;  %v3855_v57 = vrot.slane %v3853_v58, 4  ;;  %v3213_v46 = vrot.slane %v3072_v13, 5  ;;  %v3216_v26 = vrot.slane %v3073_v21, 5  ;;  %1199 = vrot.lane.b32.xlu1 %v1104_v43, %s10870_s14  ;;  %v3861_v61 = vrot.slane %v3859_v3, 5  ;;  %v3076_v21 = vld [vmem:[#allocation2 + $0xa4] sm:$0x1] }
 0x19b   : > { %2343 = vst.msk [vmem:[#allocation4 + $0x170] sm:$0xff] %vm1494_vm15, %v9673_v41  ;;  %v3847_v24 = vrot.slane %v3846_v25, 4  ;;  %v3864_v50 = vshrl.u32 %v3542_v19, 16  ;;  %v3867_v45 = vshll.u32 %v3542_v19, 16  ;;  %v3873_v13 = vshll.u32 %v3543_v51, 16  ;;  %v10728_v32 = vld [vmem:[#allocation2 + $0x54] sm:$0xff]  }
 0x19c   : > { %2519 = vst.msk [vmem:[#allocation4 + $0x170] sm:$0xff] %vm2042_vm4, %v2481_v40  ;;  %v3856_v18 = vor.u32 %v3855_v57, %v3851_v8  ;;  %v12746_v9 = vsel %vm11529_vm0, %v9723_v44, %v3213_v46  ;;  %v3215_v63 = vrot.slane %v3213_v46, 4  ;;  %v3877_v48 = vshrl.u32 %v3543_v51, 16  ;;  %v2091_v53 = vld [vmem:[#allocation2 + $0x80] sm:$0x1] }
 0x19d   : > { %v3852_v34 = vsel %vm11387_vm12, %v3847_v24, %v3851_v8  ;;  %v3866_v43 = vrot.slane %v3864_v50, 4  ;;  %v3869_v2 = vrot.slane %v3867_v45, 5  ;;  %v3875_v1 = vrot.slane %v3873_v13, 5  ;;  %v3077_v58 = vld [vmem:[#allocation2 + $0xa8] sm:$0xe]  ;;  %v10729_v19 = vld [vmem:[#allocation2 + $0x60] sm:$0xff]  }
 0x19e   : > { %3993 = vrot.lane.b32.xlu0 %v12352_v0, %s10871_s18  ;;  %v3857_v33 = vrot.slane %v3856_v18, 4  ;;  %v12754_v60 = vsel %vm11529_vm0, %v3215_v63, %v3216_v26  ;;  %v3883_v5 = vshll.u32 %v3544_v15, 16  ;;  %3304 = vrot.lane.b32.xlu1 %v9733_v55, %s10871_s18  ;;  %v3879_v41 = vrot.slane %v3877_v48, 4  ;;  %v3078_v25 = vld [vmem:[#allocation2 + $0xac] sm:$0xf]  ;;  %3492 = vst.msk [vmem:[#allocation4 + $0xe0] sm:$0xff] %vm1494_vm15, %v10728_v32 }
 0x19f   : > { %v9739_v0 = vcombine.low %v12746_v9, %v12754_v60  ;;  %v3870_v51 = vor.u32 %v3869_v2, %v3866_v43  ;;  %v9724_v40 = vrot.slane %v3074_v7, 9  ;;  %v3079_v3 = vld [vmem:[#allocation2 + $0xb0] sm:$0x1]  ;;  %v3220_v8 = vrot.slane %v3075_v36, 5  ;;  %3493 = vst.msk [vmem:[#allocation4 + $0x108] sm:$0xff] %vm1494_vm15, %v10729_v19  ;;  %v4380_v36 = vld [vmem:[#allocation4 + $0x168] sm:$0xff] }
 0x1a0   : > { %v3862_v44 = vsel %vm11387_vm12, %v3857_v33, %v3861_v61  ;;  %v3885_v15 = vrot.slane %v3883_v5, 5  ;;  %v3223_v57 = vrot.slane %v3076_v21, 5  ;;  %v3880_v55 = vor.u32 %v3879_v41, %v3875_v1  ;;  %v3080_v26 = vld [vmem:[#allocation2 + $0xb4] sm:$0xe]  ;;  %v3081_v7 = vld [vmem:[#allocation2 + $0xb8] sm:$0xf] }
 0x1a1   : > { %v12768_v35 = vcombine.low %v3852_v34, %v3862_v44  ;;  %v3871_v30 = vrot.slane %v3870_v51, 4  ;;  %v9658_v46 = vrot.slane %v2089_v28, 9  ;;  %v12772_v24 = vsel %vm11529_vm0, %v9724_v40, %v3220_v8  ;;  %v3082_v18 = vld [vmem:[#allocation2 + $0xbc] sm:$0x1]  ;;  %v2092_v63 = vld [vmem:[#allocation2 + $0x84] sm:$0xe] }
 0x1a2   : > { %3995 = vrot.lane.b32.xlu0 %v12386_v16, %s10871_s18  ;;  %v3222_v61 = vrot.slane %v3220_v8, 4  ;;  %v2230_v50 = vrot.slane %v2090_v37, 5  ;;  %v2233_v45 = vrot.slane %v2091_v53, 5  ;;  %3306 = vrot.lane.b32.xlu1 %v9734_v56, %s10871_s18  ;;  %v3881_v13 = vrot.slane %v3880_v55, 4  ;;  %v2093_v43 = vld [vmem:[#allocation2 + $0x88] sm:$0xf] }
 0x1a3   : > { %v3876_v16 = vsel %vm11387_vm12, %v3871_v30, %v3875_v1  ;;  %v4381_v21 = vld [vmem:[#allocation4 + $0x170] sm:$0xff]  ;;  %v9725_v28 = vrot.slane %v3077_v58, 9  ;;  %v3227_v34 = vrot.slane %v3078_v25, 5  ;;  %v3230_v53 = vrot.slane %v3079_v3, 5  ;;  %v2094_v47 = vld [vmem:[#allocation2 + $0x8c] sm:$0x1] }
 0x1a4   : > { %v12782_v2 = vsel %vm11529_vm0, %v3222_v61, %v3223_v57  ;;  %v2231_v48 = vsel %vm11529_vm0, %v9658_v46, %v2230_v50  ;;  %v2232_v37 = vrot.slane %v2230_v50, 4  ;;  %4862 = vmatprep.mubr.bf16.mxu0 %v4381_v21  ;;  %v2095_v39 = vld [vmem:[#allocation2 + $0x90] sm:$0xe]  ;;  %v2096_v56 = vld [vmem:[#allocation2 + $0x94] sm:$0xf]  ;;  %v3886_v32 = vsel %vm11387_vm12, %v3881_v13, %v3885_v15  ;;  %v2483_v15 = vpop.permute.xlu1 %2482 }
 0x1a5   : > { %v9740_v33 = vcombine.low %v12772_v24, %v12782_v2  ;;  %v12794_v1 = vsel %vm11529_vm0, %v9725_v28, %v3227_v34  ;;  %v3229_v5 = vrot.slane %v3227_v34, 4  ;;  %4863 = vmatmul.mubr.bf16.gmra.mrb[36].mxu0 %v4380_v36  ;;  %v2097_v58 = vld [vmem:[#allocation2 + $0x98] sm:$0x1]  ;;  %v2098_v19 = vld [vmem:[#allocation2 + $0x9c] sm:$0xe]  ;;  %v10730_v51 = vld [vmem:[#allocation2 + $0x6c] sm:$0xff]   ;;  %v12796_v41 = vcombine.low %v3876_v16, %v3886_v32 }
 0x1a6   : > { %3997 = vrot.lane.b32.xlu0 %v12613_v17, %s10871_s18  ;;  %v2234_v17 = vsel %vm11529_vm0, %v2232_v37, %v2233_v45  ;;  %v9726_v40 = vrot.slane %v3080_v26, 9  ;;  %v3234_v25 = vrot.slane %v3081_v7, 5  ;;  %v2099_v3 = vld [vmem:[#allocation2 + $0xa0] sm:$0xf]  ;;  %3308 = vrot.lane.b32.xlu1 %v9735_v29, %s10871_s18  ;;  %v3237_v57 = vrot.slane %v3082_v18, 5  ;;  %3494 = vst.msk [vmem:[#allocation4 + $0x130] sm:$0xff] %vm1494_vm15, %v10730_v51 }
 0x1a7   : > { %v9674_v44 = vcombine.low %v2231_v48, %v2234_v17  ;;  %v12806_v8 = vsel %vm11529_vm0, %v3229_v5, %v3230_v53  ;;  %v9659_v30 = vrot.slane %v2092_v63, 9  ;;  %v2100_v55 = vld [vmem:[#allocation2 + $0xa4] sm:$0x1]  ;;  %v2237_v62 = vrot.slane %v2093_v43, 5  ;;  %v2101_v29 = vld [vmem:[#allocation2 + $0xa8] sm:$0xe] }
 0x1a8   : > { %v9741_v46 = vcombine.low %v12794_v1, %v12806_v8  ;;  %v12813_v26 = vsel %vm11529_vm0, %v9726_v40, %v3234_v25  ;;  %v3236_v14 = vrot.slane %v3234_v25, 4  ;;  %v2102_v7 = vld [vmem:[#allocation2 + $0xac] sm:$0xf]  ;;  %v2240_v61 = vrot.slane %v2094_v47, 5  ;;  %v2103_v18 = vld [vmem:[#allocation2 + $0xb0] sm:$0x1] }
 0x1a9   : > { %2344 = vst.msk [vmem:[#allocation4 + $0x198] sm:$0xff] %vm1494_vm15, %v9674_v44  ;;  %v9660_v50 = vrot.slane %v2095_v39, 9  ;;  %v2244_v45 = vrot.slane %v2096_v56, 5  ;;  %v2247_v36 = vrot.slane %v2097_v58, 5  ;;  %v2238_v16 = vsel %vm11529_vm0, %v9659_v30, %v2237_v62  ;;  %v2526_v28 = vld [vmem:[#allocation2 + $0xc] sm:$0xf] }
 0x1aa   : > { %3999 = vrot.lane.b32.xlu0 %v12624_v49, %s10871_s18  ;;  %2520 = vst.msk [vmem:[#allocation4 + $0x198] sm:$0xff] %vm2042_vm4, %v2483_v15  ;;  %v12821_v63 = vsel %vm11529_vm0, %v3236_v14, %v3237_v57  ;;  %v2239_v13 = vrot.slane %v2237_v62, 4  ;;  %v9661_v21 = vrot.slane %v2098_v19, 9  ;;  %3310 = vrot.lane.b32.xlu1 %v9736_v12, %s10871_s18  ;;  %v2251_v48 = vrot.slane %v2099_v3, 5  ;;  %v2527_v37 = vld [vmem:[#allocation2 + $0x10] sm:$0xf] }
 0x1ab   : > { %v9742_v49 = vcombine.low %v12813_v26, %v12821_v63  ;;  %v2245_v34 = vsel %vm11529_vm0, %v9660_v50, %v2244_v45  ;;  %v2246_v43 = vrot.slane %v2244_v45, 4  ;;  %v2528_v53 = vld [vmem:[#allocation2 + $0x14] sm:$0x1]  ;;  %v2254_v39 = vrot.slane %v2100_v55, 5  ;;  %v10731_v5 = vld [vmem:[#allocation2 + $0x78] sm:$0xff]   ;;  %v4385_v17 = vld [vmem:[#allocation4 + $0x190] sm:$0xff] }
 0x1ac   : > { %v2241_v47 = vsel %vm11529_vm0, %v2239_v13, %v2240_v61  ;;  %v9662_v56 = vrot.slane %v2101_v29, 9  ;;  %v2258_v32 = vrot.slane %v2102_v7, 5  ;;  %v2252_v12 = vsel %vm11529_vm0, %v9661_v21, %v2251_v48  ;;  %v2104_v19 = vld [vmem:[#allocation2 + $0xb4] sm:$0xe]  ;;  %v2105_v51 = vld [vmem:[#allocation2 + $0xb8] sm:$0xf] }
 0x1ad   : > { %v9675_v59 = vcombine.low %v2238_v16, %v2241_v47  ;;  %v2248_v4 = vsel %vm11529_vm0, %v2246_v43, %v2247_v36  ;;  %v2253_v58 = vrot.slane %v2251_v48, 4  ;;  %v2261_v44 = vrot.slane %v2103_v18, 5  ;;  %v2106_v15 = vld [vmem:[#allocation2 + $0xbc] sm:$0x1]  ;;  %v2529_v57 = vld [vmem:[#allocation2 + $0x18] sm:$0xf] }
 0x1ae   : > { %4001 = vrot.lane.b32.xlu0 %v12648_v20, %s10871_s18  ;;  %v9676_v40 = vcombine.low %v2245_v34, %v2248_v4  ;;  %v2259_v25 = vsel %vm11529_vm0, %v9662_v56, %v2258_v32  ;;  %v2260_v3 = vrot.slane %v2258_v32, 4  ;;  %3495 = vst.msk [vmem:[#allocation4 + $0x158] sm:$0xff] %vm1494_vm15, %v10731_v5  ;;  %3312 = vrot.lane.b32.xlu1 %v9737_v27, %s10871_s18  ;;  %v2575_v30 = vshrl.u32 %v2526_v28, 16  ;;  %v2530_v62 = vld [vmem:[#allocation2 + $0x1c] sm:$0xf]  ;;  %v10732_v29 = vld [vmem:[#allocation2 + $0x84] sm:$0xff]  }
 0x1af   : > { %2345 = vst.msk [vmem:[#allocation4 + $0x1c0] sm:$0xff] %vm1494_vm15, %v9675_v59  ;;  %v2255_v20 = vsel %vm11529_vm0, %v2253_v58, %v2254_v39  ;;  %v2578_v55 = vshll.u32 %v2526_v28, 16  ;;  %v2584_v14 = vshll.u32 %v2527_v37, 16  ;;  %v2588_v50 = vshrl.u32 %v2527_v37, 16  ;;  %3496 = vst.msk [vmem:[#allocation4 + $0x180] sm:$0xff] %vm1494_vm15, %v10732_v29 }
 0x1b0   : > { %2346 = vst.msk [vmem:[#allocation4 + $0x1e8] sm:$0xff] %vm1494_vm15, %v9676_v40  ;;  %v9677_v7 = vcombine.low %v2252_v12, %v2255_v20  ;;  %v2262_v61 = vsel %vm11529_vm0, %v2260_v3, %v2261_v44  ;;  %v2594_v45 = vshll.u32 %v2528_v53, 16  ;;  %v2577_v27 = vrot.slane %v2575_v30, 4  ;;  %v2531_v34 = vld [vmem:[#allocation2 + $0x20] sm:$0x1]  ;;  %v10733_v53 = vld [vmem:[#allocation2 + $0x90] sm:$0xff]  }
 0x1b1   : > { %v4386_v22 = vld [vmem:[#allocation4 + $0x198] sm:$0xff]  ;;  %v9678_v52 = vcombine.low %v2259_v25, %v2262_v61  ;;  %v2580_v36 = vrot.slane %v2578_v55, 5  ;;  %v2586_v18 = vrot.slane %v2584_v14, 5  ;;  %v2590_v16 = vrot.slane %v2588_v50, 4  ;;  %v2532_v5 = vld [vmem:[#allocation2 + $0x24] sm:$0xf] }
 0x1b2   : > { %4003 = vrot.lane.b32.xlu0 %v12706_v6, %s10871_s18  ;;  %4870 = vmatprep.mubr.bf16.mxu0 %v4386_v22  ;;  %2347 = vst.msk [vmem:[#allocation4 + $0x210] sm:$0xff] %vm1494_vm15, %v9677_v7  ;;  %v2596_v13 = vrot.slane %v2594_v45, 5  ;;  %v9663_v21 = vrot.slane %v2104_v19, 9  ;;  %v2265_v28 = vrot.slane %v2105_v51, 5  ;;  %v2268_v43 = vrot.slane %v2106_v15, 5  ;;  %3497 = vst.msk [vmem:[#allocation4 + $0x1a8] sm:$0xff] %vm1494_vm15, %v10733_v53 }
 0x1b3   : > { %3314 = vrot.lane.b32.xlu1 %v9738_v10, %s10871_s18  ;;  %4871 = vmatmul.mubr.bf16.gmra.mrb[40].mxu0 %v4385_v17  ;;  %2348 = vst.msk [vmem:[#allocation4 + $0x238] sm:$0xff] %vm1494_vm15, %v9678_v52  ;;  %v2581_v6 = vor.u32 %v2580_v36, %v2577_v27  ;;  %v2599_v48 = vshrl.u32 %v2529_v57, 16  ;;  %v2602_v37 = vshll.u32 %v2529_v57, 16  ;;  %v2591_v47 = vor.u32 %v2590_v16, %v2586_v18  ;;  %v2533_v4 = vld [vmem:[#allocation2 + $0x28] sm:$0xf]  ;;  %v10734_v40 = vld [vmem:[#allocation2 + $0x9c] sm:$0xff]  }
 0x1b4   : > { %v2266_v39 = vsel %vm11529_vm0, %v9663_v21, %v2265_v28  ;;  %v2267_v56 = vrot.slane %v2265_v28, 4  ;;  %v2608_v32 = vshll.u32 %v2530_v62, 16  ;;  %v2612_v59 = vshrl.u32 %v2530_v62, 16  ;;  %v2534_v17 = vld [vmem:[#allocation2 + $0x2c] sm:$0x1]  ;;  %3498 = vst.msk [vmem:[#allocation4 + $0x1d0] sm:$0xff] %vm1494_vm15, %v10734_v40 }
 0x1b5   : > { %v2582_v31 = vrot.slane %v2581_v6, 4  ;;  %v2601_v38 = vrot.slane %v2599_v48, 4  ;;  %v2604_v10 = vrot.slane %v2602_v37, 5  ;;  %v2592_v12 = vrot.slane %v2591_v47, 4  ;;  %v10735_v15 = vld [vmem:[#allocation2 + $0xa8] sm:$0xff]   ;;  %v10736_v62 = vld [vmem:[#allocation2 + $0xb4] sm:$0xff]  }
 0x1b6   : > { %4005 = vrot.lane.b32.xlu0 %v12731_v54, %s10871_s18  ;;  %v2269_v58 = vsel %vm11529_vm0, %v2267_v56, %v2268_v43  ;;  %v2610_v19 = vrot.slane %v2608_v32, 5  ;;  %v2618_v51 = vshll.u32 %v2531_v34, 16  ;;  %v2614_v44 = vrot.slane %v2612_v59, 4  ;;  %v2535_v14 = vld [vmem:[#allocation2 + $0x30] sm:$0xf]  ;;  %3499 = vst.msk [vmem:[#allocation4 + $0x1f8] sm:$0xff] %vm1494_vm15, %v10735_v15 }
 0x1b7   : > { %3316 = vrot.lane.b32.xlu1 %v9739_v0, %s10871_s18  ;;  %v2587_v54 = vsel %vm11387_vm12, %v2582_v31, %v2586_v18  ;;  %v9679_v25 = vcombine.low %v2266_v39, %v2269_v58  ;;  %v2605_v3 = vor.u32 %v2604_v10, %v2601_v38  ;;  %v2597_v57 = vsel %vm11387_vm12, %v2592_v12, %v2596_v13  ;;  %v2536_v7 = vld [vmem:[#allocation2 + $0x34] sm:$0xf]  ;;  %v2537_v52 = vld [vmem:[#allocation2 + $0x38] sm:$0x1]  ;;  %v2538_v34 = vld [vmem:[#allocation2 + $0x3c] sm:$0xf] }
 0x1b8   : > { %v2620_v20 = vrot.slane %v2618_v51, 5  ;;  %v2623_v30 = vshrl.u32 %v2532_v5, 16  ;;  %v2626_v55 = vshll.u32 %v2532_v5, 16  ;;  %v9696_v9 = vcombine.low %v2587_v54, %v2597_v57  ;;  %3500 = vst.msk [vmem:[#allocation4 + $0x220] sm:$0xff] %vm1494_vm15, %v10736_v62  ;;  %v2539_v47 = vld [vmem:[#allocation2 + $0x40] sm:$0xf] }
 0x1b9   : > { %2349 = vst.msk [vmem:[#allocation4 + $0x260] sm:$0xff] %vm1494_vm15, %v9679_v25  ;;  %v2606_v60 = vrot.slane %v2605_v3, 4  ;;  %v2615_v0 = vor.u32 %v2614_v44, %v2610_v19  ;;  %v2632_v29 = vshll.u32 %v2533_v4, 16  ;;  %v2636_v45 = vshrl.u32 %v2533_v4, 16  ;;  %v798_v51 = vld [vmem:[#allocation2 + $0xc8] sm:$0x1] }
 0x1ba   : > { %4007 = vrot.lane.b32.xlu0 %v12768_v35, %s10871_s18  ;;  %v2625_v61 = vrot.slane %v2623_v30, 4  ;;  %v2628_v50 = vrot.slane %v2626_v55, 5  ;;  %v2642_v22 = vshll.u32 %v2534_v17, 16  ;;  %3022 = vst.msk [vmem:[#allocation4 + $0x10] sm:$0xff] %vm1494_vm15, %v9696_v9  ;;  %v2647_v18 = vshrl.u32 %v2535_v14, 16  ;;  %v15006_v55 = vld [vmem:[#allocation14_spill] sm:$0xff] }
 0x1bb   : > { %3318 = vrot.lane.b32.xlu1 %v9740_v33, %s10871_s18  ;;  %v2611_v35 = vsel %vm11387_vm12, %v2606_v60, %v2610_v19  ;;  %v2616_v27 = vrot.slane %v2615_v0, 4  ;;  %v2634_v36 = vrot.slane %v2632_v29, 5  ;;  %v2638_v13 = vrot.slane %v2636_v45, 4  ;;  %v2541_v40 = vld [vmem:[#allocation2 + $0x48] sm:$0xf] }
 0x1bc   : > { %v2629_v16 = vor.u32 %v2628_v50, %v2625_v61  ;;  %v2644_v21 = vrot.slane %v2642_v22, 5  ;;  %v2650_v28 = vshll.u32 %v2535_v14, 16  ;;  %v2649_v2 = vrot.slane %v2647_v18, 4  ;;  %v2542_v15 = vld [vmem:[#allocation2 + $0x4c] sm:$0xf] }
 0x1bd   : > { %v2621_v24 = vsel %vm11387_vm12, %v2616_v27, %v2620_v20  ;;  %v2656_v33 = vshll.u32 %v2536_v7, 16  ;;  %v2660_v6 = vshrl.u32 %v2536_v7, 16  ;;  %v2639_v37 = vor.u32 %v2638_v13, %v2634_v36  ;;  %v2543_v60 = vld [vmem:[#allocation2 + $0x50] sm:$0x1]  ;;  %v2544_v29 = vld [vmem:[#allocation2 + $0x54] sm:$0xf] }
 0x1be   : > { %4009 = vrot.lane.b32.xlu0 %v12796_v41, %s10871_s18  ;;  %v9697_v43 = vcombine.low %v2611_v35, %v2621_v24  ;;  %v2630_v48 = vrot.slane %v2629_v16, 4  ;;  %v2652_v53 = vrot.slane %v2650_v28, 5  ;;  %v2666_v32 = vshll.u32 %v2537_v52, 16  ;;  %v2540_v41 = vld [vmem:[#allocation2 + $0x44] sm:$0x1] }
 0x1bf   : > { %3320 = vrot.lane.b32.xlu1 %v9741_v46, %s10871_s18  ;;  %v2658_v39 = vrot.slane %v2656_v33, 5  ;;  %v2662_v56 = vrot.slane %v2660_v6, 4  ;;  %v2671_v5 = vshrl.u32 %v2538_v34, 16  ;;  %v2640_v38 = vrot.slane %v2639_v37, 4  ;;  %v2547_v6 = vld [vmem:[#allocation2 + $0x60] sm:$0xf] }
 0x1c0   : > { %3023 = vst.msk [vmem:[#allocation4 + $0x38] sm:$0xff] %vm1494_vm15, %v9697_v43  ;;  %v2635_v31 = vsel %vm11387_vm12, %v2630_v48, %v2634_v36  ;;  %v2653_v10 = vor.u32 %v2652_v53, %v2649_v2  ;;  %v2674_v59 = vshll.u32 %v2538_v34, 16  ;;  %v2668_v12 = vrot.slane %v2666_v32, 5  ;;  %v2545_v36 = vld [vmem:[#allocation2 + $0x58] sm:$0xf] }
 0x1c1   : > { %v2663_v4 = vor.u32 %v2662_v56, %v2658_v39  ;;  %v2673_v58 = vrot.slane %v2671_v5, 4  ;;  %v2680_v19 = vshll.u32 %v2539_v47, 16  ;;  %v2645_v1 = vsel %vm11387_vm12, %v2640_v38, %v2644_v21  ;;  %v2546_v21 = vld [vmem:[#allocation2 + $0x5c] sm:$0x1] }
 0x1c2   : > { %v2654_v8 = vrot.slane %v2653_v10, 4  ;;  %v2676_v46 = vrot.slane %v2674_v59, 5  ;;  %v2684_v17 = vshrl.u32 %v2539_v47, 16  ;;  %v9698_v54 = vcombine.low %v2635_v31, %v2645_v1 }
 0x1c3   : > { %3322 = vrot.lane.b32.xlu1 %v9742_v49, %s10871_s18  ;;  %v2664_v25 = vrot.slane %v2663_v4, 4  ;;  %v2682_v3 = vrot.slane %v2680_v19, 5  ;;  %v2690_v44 = vshll.u32 %v2540_v41, 16  ;;  %v15007_v14 = vrot.slane %v15006_v55, 4  ;;  %v2548_v41 = vld [vmem:[#allocation2 + $0x64] sm:$0xf] }
 0x1c4   : > { %v2659_v57 = vsel %vm11387_vm12, %v2654_v8, %v2658_v39  ;;  %v2677_v20 = vor.u32 %v2676_v46, %v2673_v58  ;;  %v2686_v30 = vrot.slane %v2684_v17, 4  ;;  %3024 = vst.msk [vmem:[#allocation4 + $0x60] sm:$0xff] %vm1494_vm15, %v9698_v54  ;;  %v2695_v49 = vshrl.u32 %v2541_v40, 16  ;;  %v2549_v58 = vld [vmem:[#allocation2 + $0x68] sm:$0x1] }
 0x1c5   : > { %v799_v9 = vsel %vm11259_vm8, %v15007_v14, %v798_v51  ;;  %v2669_v26 = vsel %vm11387_vm12, %v2664_v25, %v2668_v12  ;;  %v2692_v63 = vrot.slane %v2690_v44, 5  ;;  %v2698_v0 = vshll.u32 %v2541_v40, 16  ;;  %v12925_v51 = vld [vmem:[#allocation2 + $0x6c] sm:$0xe]  ;;  %v12927_v40 = vld [vmem:[#allocation2 + $0x7c] sm:$0xf] }
 0x1c6   : > { %800 = vst [vmem:[#allocation2 + $0xc8] sm:$0x1] %v799_v9  ;;  %v9699_v7 = vcombine.low %v2659_v57, %v2669_v26  ;;  %v2678_v61 = vrot.slane %v2677_v20, 4  ;;  %v2687_v50 = vor.u32 %v2686_v30, %v2682_v3  ;;  %v2704_v45 = vshll.u32 %v2542_v15, 16  ;;  %v2550_v55 = vld [vmem:[#allocation2 + $0x6c] sm:$0xf] }
 0x1c7   : > { %v2697_v22 = vrot.slane %v2695_v49, 4  ;;  %v2700_v52 = vrot.slane %v2698_v0, 5  ;;  %v2708_v35 = vshrl.u32 %v2542_v15, 16  ;;  %v2714_v27 = vshll.u32 %v2543_v60, 16  ;;  %v15009_v14 = vld [vmem:[#allocation24_spill] sm:$0xff] }
 0x1c8   : > { %3025 = vst.msk [vmem:[#allocation4 + $0x88] sm:$0xff] %vm1494_vm15, %v9699_v7  ;;  %v2683_v18 = vsel %vm11387_vm12, %v2678_v61, %v2682_v3  ;;  %v2688_v16 = vrot.slane %v2687_v50, 4  ;;  %v2706_v13 = vrot.slane %v2704_v45, 5  ;;  %v2719_v28 = vshrl.u32 %v2544_v29, 16  ;;  %v12938_v7 = vld [vmem:[#allocation2 + $0x88] sm:$0xf] }
 0x1c9   : > { %v2701_v34 = vor.u32 %v2700_v52, %v2697_v22  ;;  %v2710_v24 = vrot.slane %v2708_v35, 4  ;;  %v2716_v2 = vrot.slane %v2714_v27, 5  ;;  %v2722_v33 = vshll.u32 %v2544_v29, 16  ;;  %v15011_v45 = vld [vmem:[#allocation19_spill] sm:$0xff]  ;;  %v15013_v52 = vld [vmem:[#allocation22_spill] sm:$0xff] }
 0x1ca   : > { %v2693_v43 = vsel %vm11387_vm12, %v2688_v16, %v2692_v63  ;;  %v2721_v48 = vrot.slane %v2719_v28, 4  ;;  %v2728_v37 = vshll.u32 %v2545_v36, 16  ;;  %v2732_v53 = vshrl.u32 %v2545_v36, 16  ;;  %v2551_v36 = vld [vmem:[#allocation2 + $0x70] sm:$0xf] }
 0x1cb   : > { %v9700_v47 = vcombine.low %v2683_v18, %v2693_v43  ;;  %v2702_v39 = vrot.slane %v2701_v34, 4  ;;  %v2711_v56 = vor.u32 %v2710_v24, %v2706_v13  ;;  %v2724_v32 = vrot.slane %v2722_v33, 5  ;;  %v2485_v26 = vpop.permute.xlu1 %2484  ;;  %v15017_v34 = vld [vmem:[#allocation25_spill] sm:$0xff] }
 0x1cc   : > { %v2730_v5 = vrot.slane %v2728_v37, 5  ;;  %v2734_v31 = vrot.slane %v2732_v53, 4  ;;  %v2738_v38 = vshll.u32 %v2546_v21, 16  ;;  %v2743_v10 = vshrl.u32 %v2547_v6, 16  ;;  %2521 = vst.msk [vmem:[#allocation4 + $0x1c0] sm:$0xff] %vm2042_vm4, %v2485_v26  ;;  %v15015_v21 = vld [vmem:[#allocation23_spill] sm:$0xff] }
 0x1cd   : > { %3026 = vst.msk [vmem:[#allocation4 + $0xb0] sm:$0xff] %vm1494_vm15, %v9700_v47  ;;  %v2707_v59 = vsel %vm11387_vm12, %v2702_v39, %v2706_v13  ;;  %v2712_v4 = vrot.slane %v2711_v56, 4  ;;  %v2725_v12 = vor.u32 %v2724_v32, %v2721_v48  ;;  %v2746_v19 = vshll.u32 %v2547_v6, 16  ;;  %v12955_v33 = vld [vmem:[#allocation2 + $0x74] sm:$0x1] }
 0x1ce   : > { %v2735_v1 = vor.u32 %v2734_v31, %v2730_v5  ;;  %v2740_v8 = vrot.slane %v2738_v38, 5  ;;  %v2745_v46 = vrot.slane %v2743_v10, 4  ;;  %v2752_v17 = vshll.u32 %v2548_v41, 16  ;;  %v12958_v37 = vld [vmem:[#allocation2 + $0x78] sm:$0xe] }
 0x1cf   : > { %v2717_v54 = vsel %vm11387_vm12, %v2712_v4, %v2716_v2  ;;  %v2726_v25 = vrot.slane %v2725_v12, 4  ;;  %v2748_v3 = vrot.slane %v2746_v19, 5  ;;  %v2756_v44 = vshrl.u32 %v2548_v41, 16  ;;  %v2552_v2 = vld [vmem:[#allocation2 + $0x74] sm:$0x1] }
 0x1d0   : > { %v9701_v15 = vcombine.low %v2707_v59, %v2717_v54  ;;  %v2736_v57 = vrot.slane %v2735_v1, 4  ;;  %v2754_v20 = vrot.slane %v2752_v17, 5  ;;  %v2762_v30 = vshll.u32 %v2549_v58, 16  ;;  %v12963_v32 = vld [vmem:[#allocation2 + $0x80] sm:$0x1] }
 0x1d1   : > { %v15010_v9 = vrot.slane %v15009_v14, 5  ;;  %v2731_v63 = vsel %vm11387_vm12, %v2726_v25, %v2730_v5  ;;  %v2749_v49 = vor.u32 %v2748_v3, %v2745_v46  ;;  %v2758_v0 = vrot.slane %v2756_v44, 4  ;;  %v2553_v12 = vld [vmem:[#allocation2 + $0x78] sm:$0xf]  ;;  %v2554_v58 = vld [vmem:[#allocation2 + $0x7c] sm:$0xf] }
 0x1d2   : > { %v9783_v29 = vrot.slane %v12925_v51, 9  ;;  %3027 = vst.msk [vmem:[#allocation4 + $0xd8] sm:$0xff] %vm1494_vm15, %v9701_v15  ;;  %v2741_v61 = vsel %vm11387_vm12, %v2736_v57, %v2740_v8  ;;  %v2764_v50 = vrot.slane %v2762_v30, 5  ;;  %v15012_v22 = vrot.slane %v15011_v45, 5  ;;  %v12974_v25 = vld [vmem:[#allocation2 + $0x84] sm:$0xe] }
 0x1d3   : > { %v12933_v60 = vrot.slane %v15010_v9, 4  ;;  %v15014_v35 = vrot.slane %v15013_v52, 9  ;;  %v9702_v18 = vcombine.low %v2731_v63, %v2741_v61  ;;  %v2750_v16 = vrot.slane %v2749_v49, 4  ;;  %v2487_v3 = vpop.permute.xlu1 %2486  ;;  %v4391_v44 = vld [vmem:[#allocation4 + $0x1c0] sm:$0xff]  ;;  %v4390_v30 = vld [vmem:[#allocation4 + $0x1b8] sm:$0xff] }
 0x1d4   : > { %v2759_v13 = vor.u32 %v2758_v0, %v2754_v20  ;;  %v15016_v28 = vrot.slane %v15015_v21, 5  ;;  %v4201_v6 = vrot.slane %v12927_v40, 5  ;;  %v2767_v48 = vshrl.u32 %v2550_v55, 16  ;;  %2522 = vst.msk [vmem:[#allocation4 + $0x1e8] sm:$0xff] %vm2042_vm4, %v2487_v3  ;;  %4878 = vmatprep.mubr.bf16.mxu0 %v4391_v44  ;;  %v12984_v0 = vld [vmem:[#allocation2 + $0x94] sm:$0xf] }
 0x1d5   : > { %v4188_v27 = vsel %vm11529_vm0, %v15014_v35, %v15012_v22  ;;  %3028 = vst.msk [vmem:[#allocation4 + $0x100] sm:$0xff] %vm1494_vm15, %v9702_v18  ;;  %v2755_v53 = vsel %vm11387_vm12, %v2750_v16, %v2754_v20  ;;  %v2770_v39 = vshll.u32 %v2550_v55, 16  ;;  %v2776_v56 = vshll.u32 %v2551_v36, 16  ;;  %v12976_v20 = vld [vmem:[#allocation2 + $0x8c] sm:$0x1]  ;;  %4879 = vmatmul.mubr.bf16.gmra.mrb[44].mxu0 %v4390_v30 }
 0x1d6   : > { %v4191_v24 = vsel %vm11529_vm0, %v15017_v34, %v15016_v28  ;;  %v2760_v47 = vrot.slane %v2759_v13, 4  ;;  %v4208_v41 = vrot.slane %v12938_v7, 5  ;;  %v2769_v5 = vrot.slane %v2767_v48, 4  ;;  %v12987_v22 = vld [vmem:[#allocation2 + $0xa0] sm:$0xf] }
 0x1d7   : > { %v9798_v43 = vcombine.low %v4188_v27, %v4191_v24  ;;  %v2780_v31 = vshrl.u32 %v2551_v36, 16  ;;  %v2786_v38 = vshll.u32 %v2552_v2, 16  ;;  %v2772_v59 = vrot.slane %v2770_v39, 5  ;;  %v2557_v39 = vld [vmem:[#allocation2 + $0x88] sm:$0xf] }
 0x1d8   : > { %v2765_v10 = vsel %vm11387_vm12, %v2760_v47, %v2764_v50  ;;  %v2778_v4 = vrot.slane %v2776_v56, 5  ;;  %v4197_v19 = vrot.slane %v12955_v33, 5  ;;  %v9784_v1 = vrot.slane %v12958_v37, 9  ;;  %v2555_v50 = vld [vmem:[#allocation2 + $0x80] sm:$0x1] }
 0x1d9   : > { %4325 = vst.msk [vmem:[#allocation4 + $0x110] sm:$0xff] %vm1494_vm15, %v9798_v43  ;;  %v9703_v8 = vcombine.low %v2755_v53, %v2765_v10  ;;  %v2782_v46 = vrot.slane %v2780_v31, 4  ;;  %v4203_v17 = vrot.slane %v4201_v6, 4  ;;  %v4204_v54 = vrot.slane %v12963_v32, 5  ;;  %v2556_v43 = vld [vmem:[#allocation2 + $0x84] sm:$0xf] }
 0x1da   : > { %v2773_v15 = vor.u32 %v2772_v59, %v2769_v5  ;;  %v2788_v57 = vrot.slane %v2786_v38, 5  ;;  %v2791_v9 = vshrl.u32 %v2553_v12, 16  ;;  %v2794_v26 = vshll.u32 %v2553_v12, 16  ;;  %v2019_v18 = vpop.permute.xlu0 %2018  ;;  %v13015_v12 = vld [vmem:[#allocation2 + $0x98] sm:$0x1] }
 0x1db   : > { %3029 = vst.msk [vmem:[#allocation4 + $0x128] sm:$0xff] %vm1494_vm15, %v9703_v8  ;;  %v2783_v55 = vor.u32 %v2782_v46, %v2778_v4  ;;  %v2800_v63 = vshll.u32 %v2554_v58, 16  ;;  %v12982_v49 = vrot.slane %v4208_v41, 4  ;;  %v9785_v45 = vrot.slane %v12974_v25, 9  ;;  %v4396_v31 = vld [vmem:[#allocation4 + $0x1e8] sm:$0xff] }
 0x1dc   : > { %v2774_v61 = vrot.slane %v2773_v15, 4  ;;  %v2793_v35 = vrot.slane %v2791_v9, 4  ;;  %v2796_v27 = vrot.slane %v2794_v26, 5  ;;  %v4211_v36 = vrot.slane %v12976_v20, 5  ;;  %2055 = vst.msk [vmem:[#allocation4 + $0x1e0] sm:$0xff] %vm2042_vm4, %v2019_v18  ;;  %4886 = vmatprep.mubr.bf16.mxu0 %v4396_v31 }
 0x1dd   : > { %v2784_v52 = vrot.slane %v2783_v55, 4  ;;  %v2802_v13 = vrot.slane %v2800_v63, 5  ;;  %v2804_v21 = vshrl.u32 %v2554_v58, 16  ;;  %v2810_v24 = vshll.u32 %v2555_v50, 16  ;;  %v13027_v44 = vld [vmem:[#allocation2 + $0x9c] sm:$0xe] }
 0x1de   : > { %v2779_v16 = vsel %vm11387_vm12, %v2774_v61, %v2778_v4  ;;  %v2797_v34 = vor.u32 %v2796_v27, %v2793_v35  ;;  %v15018_v2 = vrot.slane %v15009_v14, 5  ;;  %v4215_v48 = vrot.slane %v12984_v0, 5  ;;  %v2558_v14 = vld [vmem:[#allocation2 + $0x8c] sm:$0x1]  ;;  %v13030_v30 = vld [vmem:[#allocation2 + $0xa4] sm:$0x1] }
 0x1df   : > { %v2789_v28 = vsel %vm11387_vm12, %v2784_v52, %v2788_v57  ;;  %v4222_v37 = vrot.slane %v12987_v22, 5  ;;  %v2806_v47 = vrot.slane %v2804_v21, 4  ;;  %v2812_v32 = vrot.slane %v2810_v24, 5  ;;  %v2559_v61 = vld [vmem:[#allocation2 + $0x90] sm:$0xf]  ;;  %v10737_v24 = vld [vmem:[#allocation2 + $0xc0] sm:$0xff]  }
 0x1e0   : > { %v4195_v33 = vsel %vm11529_vm0, %v9783_v29, %v15018_v2  ;;  %v9704_v53 = vcombine.low %v2779_v16, %v2789_v28  ;;  %v2798_v56 = vrot.slane %v2797_v34, 4  ;;  %v4198_v5 = vsel %vm11529_vm0, %v12933_v60, %v4197_v19  ;;  %v13010_v29 = vld [vmem:[#allocation2 + $0x90] sm:$0xe]  ;;  %v13019_v19 = vld [vmem:[#allocation2 + $0xac] sm:$0xf]  ;;  %3501 = vst.msk [vmem:[#allocation4 + $0x248] sm:$0xff] %vm1494_vm15, %v10737_v24 }
 0x1e1   : > { %v4202_v51 = vsel %vm11529_vm0, %v9784_v1, %v4201_v6  ;;  %v2807_v38 = vor.u32 %v2806_v47, %v2802_v13  ;;  %v9799_v10 = vcombine.low %v4195_v33, %v4198_v5  ;;  %v4205_v59 = vsel %vm11529_vm0, %v4203_v17, %v4204_v54  ;;  %v2560_v18 = vld [vmem:[#allocation2 + $0x94] sm:$0xf]  ;;  %v13043_v33 = vld [vmem:[#allocation2 + $0xa8] sm:$0xe]  ;;  %v2563_v7 = vld [vmem:[#allocation2 + $0xa0] sm:$0xf] }
 0x1e2   : > { %3030 = vst.msk [vmem:[#allocation4 + $0x150] sm:$0xff] %vm1494_vm15, %v9704_v53  ;;  %v2815_v4 = vshrl.u32 %v2556_v43, 16  ;;  %v2803_v40 = vsel %vm11387_vm12, %v2798_v56, %v2802_v13  ;;  %v9800_v60 = vcombine.low %v4202_v51, %v4205_v59  ;;  %v2818_v6 = vshll.u32 %v2556_v43, 16  ;;  %v2489_v9 = vpop.permute.xlu1 %2488 }
 0x1e3   : > { %v2824_v58 = vshll.u32 %v2557_v39, 16  ;;  %v2808_v1 = vrot.slane %v2807_v38, 4  ;;  %4326 = vst.msk [vmem:[#allocation4 + $0x138] sm:$0xff] %vm1494_vm15, %v9799_v10  ;;  %v2828_v46 = vshrl.u32 %v2557_v39, 16  ;;  %v2834_v3 = vshll.u32 %v2558_v14, 16  ;;  %v4395_v55 = vld [vmem:[#allocation4 + $0x1e0] sm:$0xff] }
 0x1e4   : > { %v2817_v8 = vrot.slane %v2815_v4, 4  ;;  %v13024_v17 = vrot.slane %v4215_v48, 4  ;;  %v9786_v54 = vrot.slane %v13010_v29, 9  ;;  %4327 = vst.msk [vmem:[#allocation4 + $0x160] sm:$0xff] %vm1494_vm15, %v9800_v60  ;;  %v2820_v15 = vrot.slane %v2818_v6, 5  ;;  %4887 = vmatmul.mubr.bf16.gmra.mrb[48].mxu0 %v4395_v55 }
 0x1e5   : > { %v2826_v57 = vrot.slane %v2824_v58, 5  ;;  %v2813_v26 = vsel %vm11387_vm12, %v2808_v1, %v2812_v32  ;;  %v2830_v63 = vrot.slane %v2828_v46, 4  ;;  %v4218_v50 = vrot.slane %v13015_v12, 5  ;;  %2523 = vst.msk [vmem:[#allocation4 + $0x210] sm:$0xff] %vm2042_vm4, %v2489_v9  ;;  %v13047_v39 = vld [vmem:[#allocation2 + $0xb8] sm:$0xf] }
 0x1e6   : > { %v4229_v52 = vrot.slane %v13019_v19, 5  ;;  %v9705_v35 = vcombine.low %v2803_v40, %v2813_v26  ;;  %v2821_v27 = vor.u32 %v2820_v15, %v2817_v8  ;;  %v9787_v16 = vrot.slane %v13027_v44, 9  ;;  %v2021_v21 = vpop.permute.xlu0 %2020  ;;  %v2561_v32 = vld [vmem:[#allocation2 + $0x98] sm:$0x1]  ;;  %v13054_v14 = vld [vmem:[#allocation2 + $0xb0] sm:$0x1] }
 0x1e7   : > { %v13040_v13 = vrot.slane %v4222_v37, 4  ;;  %v2831_v28 = vor.u32 %v2830_v63, %v2826_v57  ;;  %v2836_v34 = vrot.slane %v2834_v3, 5  ;;  %v4225_v2 = vrot.slane %v13030_v30, 5  ;;  %2056 = vst.msk [vmem:[#allocation4 + $0x208] sm:$0xff] %vm2042_vm4, %v2021_v21  ;;  %v13059_v4 = vld [vmem:[#allocation2 + $0xbc] sm:$0x1] }
 0x1e8   : > { %3031 = vst.msk [vmem:[#allocation4 + $0x178] sm:$0xff] %vm1494_vm15, %v9705_v35  ;;  %v2822_v43 = vrot.slane %v2821_v27, 4  ;;  %v2839_v53 = vshrl.u32 %v2559_v61, 16  ;;  %v2842_v47 = vshll.u32 %v2559_v61, 16  ;;  %v2848_v5 = vshll.u32 %v2560_v18, 16 }
 0x1e9   : > { %v2832_v56 = vrot.slane %v2831_v28, 4  ;;  %v13052_v51 = vrot.slane %v4229_v52, 4  ;;  %v9788_v59 = vrot.slane %v13043_v33, 9  ;;  %v2852_v60 = vshrl.u32 %v2560_v18, 16  ;;  %v2562_v46 = vld [vmem:[#allocation2 + $0x9c] sm:$0xf] }
 0x1ea   : > { %v2827_v31 = vsel %vm11387_vm12, %v2822_v43, %v2826_v57  ;;  %v2841_v38 = vrot.slane %v2839_v53, 4  ;;  %v2844_v10 = vrot.slane %v2842_v47, 5  ;;  %v2850_v40 = vrot.slane %v2848_v5, 5  ;;  %v2570_v33 = vld [vmem:[#allocation2 + $0xbc] sm:$0x1] }
 0x1eb   : > { %v2837_v12 = vsel %vm11387_vm12, %v2832_v56, %v2836_v34  ;;  %v4236_v6 = vrot.slane %v13047_v39, 5  ;;  %v2858_v8 = vshll.u32 %v2561_v32, 16  ;;  %v4232_v3 = vrot.slane %v13054_v14, 5 }
 0x1ec   : > { %v9706_v58 = vcombine.low %v2827_v31, %v2837_v12  ;;  %v2845_v1 = vor.u32 %v2844_v10, %v2841_v38  ;;  %v4401_v15 = vld [vmem:[#allocation4 + $0x210] sm:$0xff]  ;;  %v2854_v57 = vrot.slane %v2852_v60, 4  ;;  %v4209_v55 = vsel %vm11529_vm0, %v9785_v45, %v4208_v41  ;;  %v2567_v38 = vld [vmem:[#allocation2 + $0xb0] sm:$0x1] }
 0x1ed   : > { %v4212_v9 = vsel %vm11529_vm0, %v12982_v49, %v4211_v36  ;;  %v4239_v26 = vrot.slane %v13059_v4, 5  ;;  %4894 = vmatprep.mubr.bf16.mxu0 %v4401_v15  ;;  %v2860_v61 = vrot.slane %v2858_v8, 5  ;;  %v4216_v41 = vsel %vm11529_vm0, %v9786_v54, %v4215_v48  ;;  %v2564_v49 = vld [vmem:[#allocation2 + $0xa4] sm:$0x1]  ;;  %v2565_v36 = vld [vmem:[#allocation2 + $0xa8] sm:$0xf] }
 0x1ee   : > { %3032 = vst.msk [vmem:[#allocation4 + $0x1a0] sm:$0xff] %vm1494_vm15, %v9706_v58  ;;  %v2846_v63 = vrot.slane %v2845_v1, 4  ;;  %v9801_v35 = vcombine.low %v4209_v55, %v4212_v9  ;;  %v4400_v27 = vld [vmem:[#allocation4 + $0x208] sm:$0xff]  ;;  %v2855_v25 = vor.u32 %v2854_v57, %v2850_v40  ;;  %v4219_v20 = vsel %vm11529_vm0, %v13024_v17, %v4218_v50  ;;  %v2566_v54 = vld [vmem:[#allocation2 + $0xac] sm:$0xf]  ;;  %v2491_v17 = vpop.permute.xlu1 %2490 }
 0x1ef   : > { %v2863_v45 = vshrl.u32 %v2562_v46, 16  ;;  %v13089_v18 = vrot.slane %v4236_v6, 4  ;;  %v2023_v21 = vpop.permute.xlu0 %2022  ;;  %4895 = vmatmul.mubr.bf16.gmra.mrb[52].mxu0 %v4400_v27  ;;  %v9802_v29 = vcombine.low %v4216_v41, %v4219_v20  ;;  %v2866_v48 = vshll.u32 %v2562_v46, 16  ;;  %2524 = vst.msk [vmem:[#allocation4 + $0x238] sm:$0xff] %vm2042_vm4, %v2491_v17  ;;  %v2568_v20 = vld [vmem:[#allocation2 + $0xb4] sm:$0xf] }
 0x1f0   : > { %v2851_v0 = vsel %vm11387_vm12, %v2846_v63, %v2850_v40  ;;  %4328 = vst.msk [vmem:[#allocation4 + $0x188] sm:$0xff] %vm1494_vm15, %v9801_v35  ;;  %v2856_v50 = vrot.slane %v2855_v25, 4  ;;  %v2872_v34 = vshll.u32 %v2563_v7, 16  ;;  %v2876_v24 = vshrl.u32 %v2563_v7, 16 }
 0x1f1   : > { %2057 = vst.msk [vmem:[#allocation4 + $0x230] sm:$0xff] %vm2042_vm4, %v2023_v21  ;;  %v2865_v28 = vrot.slane %v2863_v45, 4  ;;  %v2868_v43 = vrot.slane %v2866_v48, 5  ;;  %v2882_v53 = vshll.u32 %v2564_v49, 16  ;;  %v2887_v47 = vshrl.u32 %v2565_v36, 16 }
 0x1f2   : > { %4329 = vst.msk [vmem:[#allocation4 + $0x1b0] sm:$0xff] %vm1494_vm15, %v9802_v29  ;;  %v2890_v56 = vshll.u32 %v2565_v36, 16  ;;  %v2861_v32 = vsel %vm11387_vm12, %v2856_v50, %v2860_v61  ;;  %v2874_v5 = vrot.slane %v2872_v34, 5  ;;  %v2878_v31 = vrot.slane %v2876_v24, 4  ;;  %v2569_v49 = vld [vmem:[#allocation2 + $0xb8] sm:$0xf] }
 0x1f3   : > { %v2896_v10 = vshll.u32 %v2566_v54, 16  ;;  %v9707_v40 = vcombine.low %v2851_v0, %v2861_v32  ;;  %v2869_v60 = vor.u32 %v2868_v43, %v2865_v28  ;;  %v2884_v58 = vrot.slane %v2882_v53, 5  ;;  %v4086_v45 = vld [vmem:[#allocation2 + $0xb4] sm:$0xe] }
 0x1f4   : > { %v2889_v1 = vrot.slane %v2887_v47, 4  ;;  %v3984_v8 = vpop.permute.xlu1 %3983  ;;  %v2879_v46 = vor.u32 %v2878_v31, %v2874_v5  ;;  %v2892_v15 = vrot.slane %v2890_v56, 5  ;;  %v2900_v55 = vshrl.u32 %v2566_v54, 16 }
 0x1f5   : > { %v3295_v12 = vpop.permute.xlu0 %3294  ;;  %v2898_v57 = vrot.slane %v2896_v10, 5  ;;  %4031 = vst.msk [vmem:[#allocation4 + $0x18] sm:$0xff] %vm2042_vm4, %v3984_v8  ;;  %v2870_v9 = vrot.slane %v2869_v60, 4  ;;  %v2906_v63 = vshll.u32 %v2567_v38, 16  ;;  %v4223_v61 = vsel %vm11529_vm0, %v9787_v16, %v4222_v37 }
 0x1f6   : > { %3342 = vst.msk [vmem:[#allocation4 + $0x10] sm:$0xff] %vm2042_vm4, %v3295_v12  ;;  %v4226_v35 = vsel %vm11529_vm0, %v13040_v13, %v4225_v2  ;;  %v2880_v7 = vrot.slane %v2879_v46, 4  ;;  %v2893_v27 = vor.u32 %v2892_v15, %v2889_v1  ;;  %v2902_v25 = vrot.slane %v2900_v55, 4  ;;  %v4406_v13 = vld [vmem:[#allocation4 + $0x238] sm:$0xff]  ;;  %v4339_v15 = vld [vmem:[#allocation4 + $0x20] sm:$0xff] }
 0x1f7   : > { %3033 = vst.msk [vmem:[#allocation4 + $0x1c8] sm:$0xff] %vm1494_vm15, %v9707_v40  ;;  %v9803_v41 = vcombine.low %v4223_v61, %v4226_v35  ;;  %v2875_v22 = vsel %vm11387_vm12, %v2870_v9, %v2874_v5  ;;  %v2908_v44 = vrot.slane %v2906_v63, 5  ;;  %v4230_v37 = vsel %vm11529_vm0, %v9788_v59, %v4229_v52  ;;  %4902 = vmatprep.mubr.bf16.mxu0 %v4406_v13  ;;  %v3548_v61 = vld [vmem:[#allocation2 + $0xcc] sm:$0xf]  ;;  %v3549_v35 = vld [vmem:[#allocation2 + $0xd0] sm:$0xf] }
 0x1f8   : > { %v4233_v30 = vsel %vm11529_vm0, %v13052_v51, %v4232_v3  ;;  %v2493_v16 = vpop.permute.xlu1 %2492  ;;  %v2885_v2 = vsel %vm11387_vm12, %v2880_v7, %v2884_v58  ;;  %v2894_v36 = vrot.slane %v2893_v27, 4  ;;  %v2903_v21 = vor.u32 %v2902_v25, %v2898_v57  ;;  %v4405_v52 = vld [vmem:[#allocation4 + $0x230] sm:$0xff] }
 0x1f9   : > { %4330 = vst.msk [vmem:[#allocation4 + $0x1d8] sm:$0xff] %vm1494_vm15, %v9803_v41  ;;  %v9804_v19 = vcombine.low %v4230_v37, %v4233_v30  ;;  %v9708_v14 = vcombine.low %v2875_v22, %v2885_v2  ;;  %v2911_v59 = vshrl.u32 %v2568_v20, 16  ;;  %v2914_v0 = vshll.u32 %v2568_v20, 16  ;;  %4903 = vmatmul.mubr.bf16.gmra.mrb[56].mxu0 %v4405_v52  ;;  %v3546_v20 = vld [vmem:[#allocation2 + $0xc4] sm:$0xf]  ;;  %v4344_v2 = vld [vmem:[#allocation4 + $0x48] sm:$0xff] }
 0x1fa   : > { %2525 = vst.msk [vmem:[#allocation4 + $0x260] sm:$0xff] %vm2042_vm4, %v2493_v16  ;;  %v2920_v29 = vshll.u32 %v2569_v49, 16  ;;  %v9789_v51 = vrot.slane %v4086_v45, 9  ;;  %v2899_v48 = vsel %vm11387_vm12, %v2894_v36, %v2898_v57  ;;  %v2904_v54 = vrot.slane %v2903_v21, 4  ;;  %v3545_v57 = vld [vmem:[#allocation2 + $0xc0] sm:$0xf] }
 0x1fb   : > { %v2025_v3 = vpop.permute.xlu0 %2024  ;;  %4331 = vst.msk [vmem:[#allocation4 + $0x200] sm:$0xff] %vm1494_vm15, %v9804_v19  ;;  %v2924_v17 = vshrl.u32 %v2569_v49, 16  ;;  %3034 = vst.msk [vmem:[#allocation4 + $0x1f0] sm:$0xff] %vm1494_vm15, %v9708_v14  ;;  %v2913_v50 = vrot.slane %v2911_v59, 4  ;;  %v2916_v28 = vrot.slane %v2914_v0, 5  ;;  %v2930_v24 = vshll.u32 %v2570_v33, 16 }
 0x1fc   : > { %2058 = vst.msk [vmem:[#allocation4 + $0x258] sm:$0xff] %vm2042_vm4, %v2025_v3  ;;  %v2922_v34 = vrot.slane %v2920_v29, 5  ;;  %v4338_v43 = vld [vmem:[#allocation4 + $0x18] sm:$0xff]  ;;  %v3986_v53 = vpop.permute.xlu1 %3985  ;;  %v2909_v47 = vsel %vm11387_vm12, %v2904_v54, %v2908_v44  ;;  %v4237_v32 = vsel %vm11529_vm0, %v9789_v51, %v4236_v6  ;;  %v4240_v5 = vsel %vm11529_vm0, %v13089_v18, %v4239_v26  ;;  %v2571_v16 = vld [vmem:[#allocation2 + $0xc0] sm:$0xf] }
 0x1fd   : > { %v2926_v56 = vrot.slane %v2924_v17, 4  ;;  %4951 = vmatprep.mubr.bf16.mxu1 %v4338_v43  ;;  %4032 = vst.msk [vmem:[#allocation4 + $0x40] sm:$0xff] %vm2042_vm4, %v3986_v53  ;;  %v4337_v31 = vld [vmem:[#allocation4 + $0x10] sm:$0xff]  ;;  %v9709_v38 = vcombine.low %v2899_v48, %v2909_v47  ;;  %v2917_v10 = vor.u32 %v2916_v28, %v2913_v50  ;;  %v9805_v12 = vcombine.low %v4237_v32, %v4240_v5  ;;  %v1363_v36 = vld [vmem:[#allocation2 + $0xc8] sm:$0x1] }
 0x1fe   : > { %4952 = vmatmul.mubr.bf16.vlgmr.msra.gmra.mrb[0].mxu1 %v4337_v31  ;;  %v2932_v18 = vrot.slane %v2930_v24, 5  ;;  %v3888_v25 = vshrl.u32 %v3545_v57, 16  ;;  %v3891_v41 = vshll.u32 %v3545_v57, 16  ;;  %v3912_v49 = vshrl.u32 %v3548_v61, 16  ;;  %v13160_v13 = vld [vmem:[#allocation2 + $0xc4] sm:$0xf] }
 0x1ff   : > { %v2927_v60 = vor.u32 %v2926_v56, %v2922_v34  ;;  %3035 = vst.msk [vmem:[#allocation4 + $0x218] sm:$0xff] %vm1494_vm15, %v9709_v38  ;;  %v2918_v39 = vrot.slane %v2917_v10, 4  ;;  %4332 = vst.msk [vmem:[#allocation4 + $0x228] sm:$0xff] %vm1494_vm15, %v9805_v12  ;;  %v3915_v45 = vshll.u32 %v3548_v61, 16  ;;  %v3921_v37 = vshll.u32 %v3549_v35, 16  ;;  %v4349_v0 = vld [vmem:[#allocation4 + $0x70] sm:$0xff] }
 0x200   : > { %v3297_v40 = vpop.permute.xlu0 %3296  ;;  %v3988_v4 = vpop.permute.xlu1 %3987  ;;  %v3925_v30 = vshrl.u32 %v3549_v35, 16  ;;  %v3890_v19 = vrot.slane %v3888_v25, 4  ;;  %v3893_v33 = vrot.slane %v3891_v41, 5  ;;  %v3897_v52 = vshll.u32 %v3546_v20, 16  ;;  %v2572_v59 = vld [vmem:[#allocation2 + $0xc4] sm:$0xf] }
 0x201   : > { %3343 = vst.msk [vmem:[#allocation4 + $0x38] sm:$0xff] %vm2042_vm4, %v3297_v40  ;;  %v4411_v6 = vld [vmem:[#allocation4 + $0x260] sm:$0xff]  ;;  %v2928_v26 = vrot.slane %v2927_v60, 4  ;;  %4033 = vst.msk [vmem:[#allocation4 + $0x68] sm:$0xff] %vm2042_vm4, %v3988_v4  ;;  %v2923_v8 = vsel %vm11387_vm12, %v2918_v39, %v2922_v34  ;;  %v3901_v14 = vshrl.u32 %v3546_v20, 16  ;;  %v3914_v29 = vrot.slane %v3912_v49, 4 }
 0x202   : > { %4910 = vmatprep.mubr.bf16.mxu0 %v4411_v6  ;;  %v3917_v51 = vrot.slane %v3915_v45, 5  ;;  %v2935_v3 = vshrl.u32 %v2571_v16, 16  ;;  %v2938_v48 = vshll.u32 %v2571_v16, 16  ;;  %v13166_v17 = vrot.slane %v3921_v37, 5  ;;  %v3084_v34 = vld [vmem:[#allocation2 + $0xc4] sm:$0xf] }
 0x203   : > { %v4410_v1 = vld [vmem:[#allocation4 + $0x258] sm:$0xff]  ;;  %v2933_v46 = vsel %vm11387_vm12, %v2928_v26, %v2932_v18  ;;  %v3927_v50 = vrot.slane %v3925_v30, 4  ;;  %v3550_v24 = vld [vmem:[#allocation2 + $0xd4] sm:$0x1]  ;;  %v2944_v43 = vshll.u32 %v2572_v59, 16  ;;  %v2948_v53 = vshrl.u32 %v2572_v59, 16 }
 0x204   : > { %v3299_v58 = vpop.permute.xlu0 %3298  ;;  %4911 = vmatmul.mubr.bf16.gmra.mrb[60].mxu0 %v4410_v1  ;;  %v9710_v55 = vcombine.low %v2923_v8, %v2933_v46  ;;  %v3990_v9 = vpop.permute.xlu1 %3989  ;;  %v4343_v63 = vld [vmem:[#allocation4 + $0x40] sm:$0xff]  ;;  %v4243_v47 = vrot.slane %v13160_v13, 5  ;;  %v3083_v5 = vld [vmem:[#allocation2 + $0xc0] sm:$0xe]  ;;  %v3894_v31 = vor.u32 %v3893_v33, %v3890_v19  ;;  %v13171_v38 = vrot.slane %v3897_v52, 5  ;;  %v4354_v57 = vld [vmem:[#allocation4 + $0x98] sm:$0xff] }
 0x205   : > { %3344 = vst.msk [vmem:[#allocation4 + $0x60] sm:$0xff] %vm2042_vm4, %v3299_v58  ;;  %10542 = vmatprep.mubr.msk.bf16.mxu0 %vm1494_vm15, %v4339_v15  ;;  %4034 = vst.msk [vmem:[#allocation4 + $0x90] sm:$0xff] %vm2042_vm4, %v3990_v9  ;;  %4959 = vmatprep.mubr.bf16.mxu1 %v4343_v63  ;;  %v3903_v12 = vrot.slane %v3901_v14, 4  ;;  %v3918_v23 = vor.u32 %v3917_v51, %v3914_v29  ;;  %v2937_v40 = vrot.slane %v2935_v3, 4  ;;  %v2940_v60 = vrot.slane %v2938_v48, 5  ;;  %v10738_v18 = vld [vmem:[#allocation2 + $0xcc] sm:$0xff]  }
 0x206   : > { %3036 = vst.msk [vmem:[#allocation4 + $0x240] sm:$0xff] %vm1494_vm15, %v9710_v55  ;;  %v3241_v4 = vrot.slane %v3084_v34, 5  ;;  %v3928_v6 = vor.u32 %v3927_v50, %v13166_v17  ;;  %v3931_v26 = vshll.u32 %v3550_v24, 16  ;;  %v4089_v58 = vld [vmem:[#allocation2 + $0xc0] sm:$0xe]  ;;  %v9727_v1 = vrot.slane %v3083_v5, 9 }
 0x207   : > { %v13176_v8 = vrot.slane %v2944_v43, 5  ;;  %v2950_v46 = vrot.slane %v2948_v53, 4  ;;  %v3895_v55 = vrot.slane %v3894_v31, 4  ;;  %3502 = vst.msk [vmem:[#allocation4 + $0x270] sm:$0xff] %vm1494_vm15, %v10738_v18  ;;  %v4245_v9 = vrot.slane %v4243_v47, 4  ;;  %v4359_v63 = vld [vmem:[#allocation4 + $0xc0] sm:$0xff] }
 0x208   : > { %v3301_v7 = vpop.permute.xlu0 %3300  ;;  %v4342_v27 = vld [vmem:[#allocation4 + $0x38] sm:$0xff]  ;;  %v3992_v22 = vpop.permute.xlu1 %3991  ;;  %v4348_v44 = vld [vmem:[#allocation4 + $0x68] sm:$0xff]  ;;  %v3904_v61 = vor.u32 %v3903_v12, %v13171_v38  ;;  %v13184_v35 = vrot.slane %v3918_v23, 4  ;;  %v3243_v41 = vrot.slane %v3241_v4, 4  ;;  %v3929_v20 = vrot.slane %v3928_v6, 4  ;;  %v4369_v12 = vld [vmem:[#allocation4 + $0x110] sm:$0xff] }
 0x209   : > { %3345 = vst.msk [vmem:[#allocation4 + $0x88] sm:$0xff] %vm2042_vm4, %v3301_v7  ;;  %4960 = vmatmul.mubr.bf16.gmra.mrb[4].mxu1 %v4342_v27  ;;  %4035 = vst.msk [vmem:[#allocation4 + $0xb8] sm:$0xff] %vm2042_vm4, %v3992_v22  ;;  %v2941_v7 = vor.u32 %v2940_v60, %v2937_v40  ;;  %v9790_v27 = vrot.slane %v4089_v58, 9  ;;  %v3933_v49 = vrot.slane %v3931_v26, 5  ;;  %v2951_v30 = vor.u32 %v2950_v46, %v13176_v8  ;;  %v4092_v53 = vld [vmem:[#allocation2 + $0xcc] sm:$0xe] }
 0x20a   : > { %4967 = vmatprep.mubr.bf16.mxu1 %v4348_v44  ;;  %v3242_v44 = vsel %vm11529_vm0, %v9727_v1, %v3241_v4  ;;  %v3900_v19 = vsel %vm11387_vm12, %v3895_v55, %v13171_v38  ;;  %v3905_v59 = vrot.slane %v3904_v61, 4  ;;  %v4364_v5 = vld [vmem:[#allocation4 + $0xe8] sm:$0xff]  ;;  %v9791_v38 = vrot.slane %v4092_v53, 9 }
 0x20b   : > { %v2942_v29 = vrot.slane %v2941_v7, 4  ;;  %v4244_v50 = vsel %vm11529_vm0, %v9790_v27, %v4243_v47  ;;  %v2952_v24 = vrot.slane %v2951_v30, 4  ;;  %v3934_v13 = vsel %vm11387_vm12, %v3929_v20, %v3933_v49  ;;  %v4094_v47 = vld [vmem:[#allocation2 + $0xd4] sm:$0x1] }
 0x20c   : > { %v3303_v21 = vpop.permute.xlu0 %3302  ;;  %10543 = vmatmul.mubr.msk.bf16.vlgmr.msra.gmra.mrb[64].mxu0 %vm1494_vm15, %v4344_v2  ;;  %v1200_v54 = vpop.permute.xlu1 %1199  ;;  %v4347_v32 = vld [vmem:[#allocation4 + $0x60] sm:$0xff]  ;;  %v4353_v10 = vld [vmem:[#allocation4 + $0x90] sm:$0xff] }
 0x20d   : > { %3346 = vst.msk [vmem:[#allocation4 + $0xb0] sm:$0xff] %vm2042_vm4, %v3303_v21  ;;  %10546 = vmatprep.mubr.msk.bf16.mxu0 %vm1494_vm15, %v4349_v0  ;;  %v1364_v28 = vsel %vm11549_vm5, %v1200_v54, %v1363_v36  ;;  %v3924_v0 = vsel %vm11387_vm12, %v13184_v35, %v13166_v17  ;;  %v2947_v40 = vsel %vm11387_vm12, %v2942_v29, %v13176_v8  ;;  %v4379_v20 = vld [vmem:[#allocation4 + $0x160] sm:$0xff] }
 0x20e   : > { %1365 = vst [vmem:[#allocation2 + $0xc8] sm:$0x1] %v1364_v28  ;;  %v9775_v58 = vcombine.low %v3924_v0, %v3934_v13 }
 0x210   : > { %v3994_v56 = vpop.permute.xlu0 %3993  ;;  %v3305_v39 = vpop.permute.xlu1 %3304  ;;  %v4352_v36 = vld [vmem:[#allocation4 + $0x88] sm:$0xff]  ;;  %v4358_v14 = vld [vmem:[#allocation4 + $0xb8] sm:$0xff] }
 0x211   : > { %4036 = vst.msk [vmem:[#allocation4 + $0xe0] sm:$0xff] %vm2042_vm4, %v3994_v56  ;;  %4968 = vmatmul.mubr.bf16.gmra.mrb[8].mxu1 %v4347_v32  ;;  %3347 = vst.msk [vmem:[#allocation4 + $0xd8] sm:$0xff] %vm2042_vm4, %v3305_v39  ;;  %v4093_v56 = vld [vmem:[#allocation2 + $0xd0] sm:$0xf]  ;;  %v4253_v39 = vrot.slane %v4094_v47, 5 }
 0x212   : > { %4975 = vmatprep.mubr.bf16.mxu1 %v4353_v10  ;;  %v4250_v10 = vrot.slane %v4093_v56, 5 }
 0x214   : > { %v3996_v15 = vpop.permute.xlu0 %3995  ;;  %10547 = vmatmul.mubr.msk.bf16.gmra.mrb[68].mxu0 %vm1494_vm15, %v4354_v57  ;;  %v3307_v25 = vpop.permute.xlu1 %3306  ;;  %v4251_v26 = vsel %vm11529_vm0, %v9791_v38, %v4250_v10  ;;  %v4252_v18 = vrot.slane %v4250_v10, 4  ;;  %v4357_v46 = vld [vmem:[#allocation4 + $0xb0] sm:$0xff] }
 0x215   : > { %4037 = vst.msk [vmem:[#allocation4 + $0x108] sm:$0xff] %vm2042_vm4, %v3996_v15  ;;  %10550 = vmatprep.mubr.msk.bf16.mxu0 %vm1494_vm15, %v4359_v63  ;;  %v4091_v45 = vld [vmem:[#allocation2 + $0xc8] sm:$0x1]  ;;  %3348 = vst.msk [vmem:[#allocation4 + $0x100] sm:$0xff] %vm2042_vm4, %v3307_v25 }
 0x216   : > { %v3085_v22 = vld [vmem:[#allocation2 + $0xc8] sm:$0x1]  ;;  %v4246_v16 = vrot.slane %v4091_v45, 5  ;;  %v4254_v8 = vsel %vm11529_vm0, %v4252_v18, %v4253_v39 }
 0x217   : > { %v3547_v37 = vld [vmem:[#allocation2 + $0xc8] sm:$0x1]  ;;  %v3244_v21 = vrot.slane %v3085_v22, 5  ;;  %v9807_v55 = vcombine.low %v4251_v26, %v4254_v8 }
 0x218   : > { %v3998_v2 = vpop.permute.xlu0 %3997  ;;  %v3907_v33 = vshll.u32 %v3547_v37, 16  ;;  %v2573_v52 = vld [vmem:[#allocation2 + $0xc8] sm:$0x1]  ;;  %v3309_v3 = vpop.permute.xlu1 %3308  ;;  %v4247_v28 = vsel %vm11529_vm0, %v4245_v9, %v4246_v16  ;;  %v4363_v57 = vld [vmem:[#allocation4 + $0xe0] sm:$0xff]  ;;  %v4384_v16 = vld [vmem:[#allocation4 + $0x188] sm:$0xff] }
 0x219   : > { %4038 = vst.msk [vmem:[#allocation4 + $0x130] sm:$0xff] %vm2042_vm4, %v3998_v2  ;;  %4976 = vmatmul.mubr.bf16.gmra.mrb[12].mxu1 %v4352_v36  ;;  %v2954_v51 = vshll.u32 %v2573_v52, 16  ;;  %v3245_v48 = vsel %vm11529_vm0, %v3243_v41, %v3244_v21  ;;  %3349 = vst.msk [vmem:[#allocation4 + $0x128] sm:$0xff] %vm2042_vm4, %v3309_v3  ;;  %v9806_v17 = vcombine.low %v4244_v50, %v4247_v28  ;;  %v4374_v25 = vld [vmem:[#allocation4 + $0x138] sm:$0xff]  ;;  %v4389_v36 = vld [vmem:[#allocation4 + $0x1b0] sm:$0xff] }
 0x21a   : > { %4983 = vmatprep.mubr.bf16.mxu1 %v4358_v14  ;;  %v3909_v54 = vrot.slane %v3907_v33, 5  ;;  %v9743_v34 = vcombine.low %v3242_v44, %v3245_v48  ;;  %v10176_v15 = vpop.f32.mrb[0].mxu0  ;;  %4334 = vst.msk [vmem:[#allocation4 + $0x278] sm:$0xff] %vm1494_vm15, %v9807_v55  ;;  %v4362_v22 = vld [vmem:[#allocation4 + $0xd8] sm:$0xff]  ;;  %v4399_v50 = vld [vmem:[#allocation4 + $0x200] sm:$0xff] }
 0x21b   : > { %v2956_v43 = vrot.slane %v2954_v51, 5  ;;  %4333 = vst.msk [vmem:[#allocation4 + $0x250] sm:$0xff] %vm1494_vm15, %v9806_v17  ;;  %v10177_v9 = vpop.f32.mrb[1].mxu0  ;;  %v4394_v48 = vld [vmem:[#allocation4 + $0x1d8] sm:$0xff] }
 0x21c   : > { %v4000_v32 = vpop.permute.xlu0 %3999  ;;  %v3910_v31 = vsel %vm11387_vm12, %v3905_v59, %v3909_v54  ;;  %10551 = vmatmul.mubr.msk.bf16.gmra.mrb[72].mxu0 %vm1494_vm15, %v4364_v5  ;;  %3324 = vrot.lane.b32.xlu1 %v9743_v34, %s10871_s18  ;;  %v3311_v4 = vpop.permute.xlu1 %3310  ;;  %v13230_v61 = vadd.f32 %v10177_v9, %v10176_v15  ;;  %v4368_v44 = vld [vmem:[#allocation4 + $0x108] sm:$0xff]  ;;  %v4367_v0 = vld [vmem:[#allocation4 + $0x100] sm:$0xff] }
 0x21d   : > { %4039 = vst.msk [vmem:[#allocation4 + $0x158] sm:$0xff] %vm2042_vm4, %v4000_v32  ;;  %v9774_v23 = vcombine.low %v3900_v19, %v3910_v31  ;;  %v2957_v60 = vsel %vm11387_vm12, %v2952_v24, %v2956_v43  ;;  %10554 = vmatprep.mubr.msk.bf16.mxu0 %vm1494_vm15, %v4369_v12  ;;  %3350 = vst.msk [vmem:[#allocation4 + $0x150] sm:$0xff] %vm2042_vm4, %v3311_v4  ;;  %v10179_v35 = vpop.f32.mrb[2].mxu0  ;;  %v4404_v5 = vld [vmem:[#allocation4 + $0x228] sm:$0xff] }
 0x21e   : > { %v9711_v6 = vcombine.low %v2947_v40, %v2957_v60  ;;  %v10180_v27 = vpop.f32.mrb[3].mxu0 }
 0x21f   : > { %4011 = vrot.lane.b32.xlu0 %v9774_v23, %s10871_s18  ;;  %v13236_v41 = vadd.f32 %v10180_v27, %v10179_v35 }
 0x220   : > { %v4002_v1 = vpop.permute.xlu0 %4001  ;;  %3037 = vst.msk [vmem:[#allocation4 + $0x268] sm:$0xff] %vm1494_vm15, %v9711_v6  ;;  %v3313_v63 = vpop.permute.xlu1 %3312  ;;  %v4373_v51 = vld [vmem:[#allocation4 + $0x130] sm:$0xff]  ;;  %v4372_v53 = vld [vmem:[#allocation4 + $0x128] sm:$0xff] }
 0x221   : > { %4040 = vst.msk [vmem:[#allocation4 + $0x180] sm:$0xff] %vm2042_vm4, %v4002_v1  ;;  %4984 = vmatmul.mubr.bf16.gmra.mrb[16].mxu1 %v4357_v46  ;;  %3351 = vst.msk [vmem:[#allocation4 + $0x178] sm:$0xff] %vm2042_vm4, %v3313_v63  ;;  %v4414_v39 = vld [vmem:[#allocation4 + $0x278] sm:$0xff] }
 0x222   : > { %4991 = vmatprep.mubr.bf16.mxu1 %v4363_v57  ;;  %v4409_v13 = vld [vmem:[#allocation4 + $0x250] sm:$0xff] }
 0x223   : > { %4013 = vrot.lane.b32.xlu0 %v9775_v58, %s10871_s18 }
 0x224   : > { %v4004_v7 = vpop.permute.xlu0 %4003  ;;  %10555 = vmatmul.mubr.msk.bf16.gmra.mrb[76].mxu0 %vm1494_vm15, %v4374_v25  ;;  %v4378_v32 = vld [vmem:[#allocation4 + $0x158] sm:$0xff]  ;;  %v4377_v23 = vld [vmem:[#allocation4 + $0x150] sm:$0xff] }
 0x225   : > { %4041 = vst.msk [vmem:[#allocation4 + $0x1a8] sm:$0xff] %vm2042_vm4, %v4004_v7  ;;  %10558 = vmatprep.mubr.msk.bf16.mxu0 %vm1494_vm15, %v4379_v20  ;;  %v3315_v49 = vpop.permute.xlu1 %3314  ;;  %v10182_v2 = vpop.f32.mrb[4].mxu0 }
 0x226   : > { %3352 = vst.msk [vmem:[#allocation4 + $0x1a0] sm:$0xff] %vm2042_vm4, %v3315_v49  ;;  %v10183_v21 = vpop.f32.mrb[5].mxu0 }
 0x227   : > { %v13246_v33 = vadd.f32 %v10183_v21, %v10182_v2  ;;  %v10185_v52 = vpop.f32.mrb[6].mxu0 }
 0x228   : > { %v4006_v45 = vpop.permute.xlu0 %4005  ;;  %v10186_v59 = vpop.f32.mrb[7].mxu0  ;;  %v4383_v60 = vld [vmem:[#allocation4 + $0x180] sm:$0xff]  ;;  %v4382_v1 = vld [vmem:[#allocation4 + $0x178] sm:$0xff] }
 0x229   : > { %4042 = vst.msk [vmem:[#allocation4 + $0x1d0] sm:$0xff] %vm2042_vm4, %v4006_v45  ;;  %4992 = vmatmul.mubr.bf16.gmra.mrb[20].mxu1 %v4362_v22  ;;  %v3317_v37 = vpop.permute.xlu1 %3316  ;;  %v13250_v29 = vadd.f32 %v10186_v59, %v10185_v52 }
 0x22a   : > { %4999 = vmatprep.mubr.bf16.mxu1 %v4368_v44  ;;  %3353 = vst.msk [vmem:[#allocation4 + $0x1c8] sm:$0xff] %vm2042_vm4, %v3317_v37 }
 0x22c   : > { %v4008_v30 = vpop.permute.xlu0 %4007  ;;  %10559 = vmatmul.mubr.msk.bf16.gmra.mrb[80].mxu0 %vm1494_vm15, %v4384_v16  ;;  %v4388_v8 = vld [vmem:[#allocation4 + $0x1a8] sm:$0xff] }
 0x22d   : > { %4043 = vst.msk [vmem:[#allocation4 + $0x1f8] sm:$0xff] %vm2042_vm4, %v4008_v30  ;;  %10562 = vmatprep.mubr.msk.bf16.mxu0 %vm1494_vm15, %v4389_v36  ;;  %v3319_v19 = vpop.permute.xlu1 %3318  ;;  %v10188_v54 = vpop.f32.mrb[8].mxu0  ;;  %v4387_v35 = vld [vmem:[#allocation4 + $0x1a0] sm:$0xff] }
 0x22e   : > { %3354 = vst.msk [vmem:[#allocation4 + $0x1f0] sm:$0xff] %vm2042_vm4, %v3319_v19  ;;  %v10189_v28 = vpop.f32.mrb[9].mxu0 }
 0x22f   : > { %v13255_v17 = vadd.f32 %v10189_v28, %v10188_v54  ;;  %v10191_v24 = vpop.f32.mrb[10].mxu0 }
 0x230   : > { %v4010_v14 = vpop.permute.xlu0 %4009  ;;  %v10192_v43 = vpop.f32.mrb[11].mxu0  ;;  %v4393_v27 = vld [vmem:[#allocation4 + $0x1d0] sm:$0xff] }
 0x231   : > { %4044 = vst.msk [vmem:[#allocation4 + $0x220] sm:$0xff] %vm2042_vm4, %v4010_v14  ;;  %5000 = vmatmul.mubr.bf16.gmra.mrb[24].mxu1 %v4367_v0  ;;  %v3321_v3 = vpop.permute.xlu1 %3320  ;;  %v13258_v56 = vadd.f32 %v10192_v43, %v10191_v24  ;;  %v4392_v22 = vld [vmem:[#allocation4 + $0x1c8] sm:$0xff] }
 0x232   : > { %5007 = vmatprep.mubr.bf16.mxu1 %v4373_v51  ;;  %3355 = vst.msk [vmem:[#allocation4 + $0x218] sm:$0xff] %vm2042_vm4, %v3321_v3 }
 0x234   : > { %10563 = vmatmul.mubr.msk.bf16.gmra.mrb[84].mxu0 %vm1494_vm15, %v4394_v48  ;;  %v4398_v37 = vld [vmem:[#allocation4 + $0x1f8] sm:$0xff] }
 0x235   : > { %10566 = vmatprep.mubr.msk.bf16.mxu0 %vm1494_vm15, %v4399_v50  ;;  %v3323_v34 = vpop.permute.xlu1 %3322  ;;  %v4397_v19 = vld [vmem:[#allocation4 + $0x1f0] sm:$0xff] }
 0x236   : > { %3356 = vst.msk [vmem:[#allocation4 + $0x240] sm:$0xff] %vm2042_vm4, %v3323_v34 }
 0x237   : > { %v10194_v31 = vpop.f32.mrb[12].mxu0 }
 0x238   : > { %v10195_v47 = vpop.f32.mrb[13].mxu0  ;;  %v4403_v14 = vld [vmem:[#allocation4 + $0x220] sm:$0xff] }
 0x239   : > { %5008 = vmatmul.mubr.bf16.gmra.mrb[28].mxu1 %v4372_v53  ;;  %v13262_v38 = vadd.f32 %v10195_v47, %v10194_v31  ;;  %v10197_v10 = vpop.f32.mrb[14].mxu0  ;;  %v4402_v0 = vld [vmem:[#allocation4 + $0x218] sm:$0xff]  ;;  %v6002_v47 = vld [vmem:[#allocation3] sm:$0xf] }
 0x23a   : > { %5015 = vmatprep.mubr.bf16.mxu1 %v4378_v32  ;;  %v10198_v12 = vpop.f32.mrb[15].mxu0 }
 0x23b   : > { %v13264_v40 = vadd.f32 %v10198_v12, %v10197_v10  ;;  %v6003_v10 = vld [vmem:[#allocation3 + $0x4] sm:$0xf] }
 0x23c   : > { %10567 = vmatmul.mubr.msk.bf16.gmra.mrb[88].mxu0 %vm1494_vm15, %v4404_v5 }
 0x23d   : > { %10570 = vmatprep.mubr.msk.bf16.mxu0 %vm1494_vm15, %v4409_v13 }
 0x241   : > { %5016 = vmatmul.mubr.bf16.gmra.mrb[32].mxu1 %v4377_v23  ;;  %v10200_v4 = vpop.f32.mrb[16].mxu0 }
 0x242   : > { %5023 = vmatprep.mubr.bf16.mxu1 %v4383_v60  ;;  %v10201_v6 = vpop.f32.mrb[17].mxu0  ;;  %v6004_v60 = vld [vmem:[#allocation3 + $0x8] sm:$0x1] }
 0x243   : > { %v13267_v26 = vadd.f32 %v10201_v6, %v10200_v4  ;;  %v10203_v18 = vpop.f32.mrb[18].mxu0  ;;  %v6054_v4 = vshll.u32 %v6002_v47, 16  ;;  %v6060_v6 = vshll.u32 %v6003_v10, 16 }
 0x244   : > { %10571 = vmatmul.mubr.msk.bf16.gmra.mrb[92].mxu0 %vm1494_vm15, %v4414_v39  ;;  %v10204_v58 = vpop.f32.mrb[19].mxu0  ;;  %v6051_v39 = vshrl.u32 %v6002_v47, 16  ;;  %v10745_v47 = vld [vmem:[%s14891_s4 + $0x88] sm:$0xff]  }
 0x245   : > { %v13269_v46 = vadd.f32 %v10204_v58, %v10203_v18  ;;  %v6064_v58 = vshrl.u32 %v6003_v10, 16 }
 0x249   : > { %5024 = vmatmul.mubr.bf16.gmra.mrb[36].mxu1 %v4382_v1  ;;  %v6070_v1 = vshll.u32 %v6004_v60, 16 }
 0x24a   : > { %5031 = vmatprep.mubr.bf16.mxu1 %v4388_v8 }
 0x24b   : > { %v10206_v15 = vpop.f32.mrb[20].mxu0 }
 0x24c   : > { %v10207_v57 = vpop.f32.mrb[21].mxu0 }
 0x24d   : > { %v13271_v55 = vadd.f32 %v10207_v57, %v10206_v15  ;;  %v10209_v9 = vpop.f32.mrb[22].mxu0  ;;  %v6053_v15 = vrot.slane %v6051_v39, 4  ;;  %v6056_v57 = vrot.slane %v6054_v4, 5 }
 0x24e   : > { %v10210_v63 = vpop.f32.mrb[23].mxu0 }
 0x24f   : > { %v13273_v7 = vadd.f32 %v10210_v63, %v10209_v9  ;;  %v6547_v9 = vld [vmem:[#allocation3] sm:$0xe]  ;;  %v6062_v63 = vrot.slane %v6060_v6, 5 }
 0x251   : > { %5032 = vmatmul.mubr.bf16.gmra.mrb[40].mxu1 %v4387_v35  ;;  %v6066_v35 = vrot.slane %v6064_v58, 4 }
 0x252   : > { %5039 = vmatprep.mubr.bf16.mxu1 %v4393_v27  ;;  %v6548_v27 = vld [vmem:[#allocation3 + $0x4] sm:$0xf] }
 0x254   : > { %v10212_v25 = vpop.f32.mrb[24].mxu0 }
 0x255   : > { %v10213_v20 = vpop.f32.mrb[25].mxu0 }
 0x256   : > { %v13275_v49 = vadd.f32 %v10213_v20, %v10212_v25  ;;  %v10215_v45 = vpop.f32.mrb[26].mxu0  ;;  %v6057_v25 = vor.u32 %v6056_v57, %v6053_v15  ;;  %v6549_v20 = vld [vmem:[#allocation3 + $0x8] sm:$0x1] }
 0x257   : > { %v10216_v44 = vpop.f32.mrb[27].mxu0 }
 0x258   : > { %v13277_v30 = vadd.f32 %v10216_v44, %v10215_v45  ;;  %v6645_v45 = vrot.slane %v6548_v27, 5  ;;  %v6072_v44 = vrot.slane %v6070_v1, 5 }
 0x259   : > { %5040 = vmatmul.mubr.bf16.gmra.mrb[44].mxu1 %v4392_v22  ;;  %v6067_v22 = vor.u32 %v6066_v35, %v6062_v63 }
 0x25a   : > { %5047 = vmatprep.mubr.bf16.mxu1 %v4398_v37  ;;  %v9925_v37 = vrot.slane %v6547_v9, 9 }
 0x25c   : > { %v10218_v16 = vpop.f32.mrb[28].mxu0 }
 0x25d   : > { %v10219_v2 = vpop.f32.mrb[29].mxu0 }
 0x25e   : > { %v13279_v36 = vadd.f32 %v10219_v2, %v10218_v16  ;;  %v10221_v21 = vpop.f32.mrb[30].mxu0  ;;  %v6648_v16 = vrot.slane %v6549_v20, 5 }
 0x25f   : > { %v10222_v52 = vpop.f32.mrb[31].mxu0 }
 0x260   : > { %v13281_v59 = vadd.f32 %v10222_v52, %v10221_v21  ;;  %v6058_v21 = vrot.slane %v6057_v25, 4  ;;  %v6068_v52 = vrot.slane %v6067_v22, 4 }
 0x261   : > { %5048 = vmatmul.mubr.bf16.gmra.mrb[48].mxu1 %v4397_v19  ;;  %v6647_v19 = vrot.slane %v6645_v45, 4 }
 0x262   : > { %5055 = vmatprep.mubr.bf16.mxu1 %v4403_v14 }
 0x269   : > { %5056 = vmatmul.mubr.bf16.gmra.mrb[52].mxu1 %v4402_v0  ;;  %v6063_v0 = vsel %vm11387_vm12, %v6058_v21, %v6062_v63  ;;  %v13331_v21 = vld [vmem:[%s14890_s3] ss:$0 sm:$0xff] }
 0x26b   : > { %v10224_v51 = vpop.f32.mrb[32].mxu0 }
 0x26c   : > { %v10225_v3 = vpop.f32.mrb[33].mxu0 }
 0x26d   : > { %v13283_v48 = vadd.f32 %v10225_v3, %v10224_v51  ;;  %v10227_v54 = vpop.f32.mrb[34].mxu0  ;;  %v6073_v51 = vsel %vm11387_vm12, %v6068_v52, %v6072_v44  ;;  %v6646_v3 = vsel %vm11529_vm0, %v9925_v37, %v6645_v45 }
 0x26e   : > { %v10228_v50 = vpop.f32.mrb[35].mxu0 }
 0x26f   : > { %v13285_v28 = vadd.f32 %v10228_v50, %v10227_v54  ;;  %v6649_v54 = vsel %vm11529_vm0, %v6647_v19, %v6648_v16  ;;  %v9909_v50 = vcombine.low %v6063_v0, %v6073_v51  ;;  %v4793_v51 = vadd.f32 %v13230_v61, %v13331_v21 }
 0x270   : > { %v4801_v61 = vadd.f32 %v13246_v33, %v13331_v21 }
 0x271   : > { %6482 = vrot.lane.b32.xlu1 %v9909_v50, %s10870_s14 }
 0x278   : > { %v10230_v34 = vpop.f32.mrb[36].mxu0 }
 0x279   : > { %v10231_v24 = vpop.f32.mrb[37].mxu0 }
 0x27a   : > { %v13287_v43 = vadd.f32 %v10231_v24, %v10230_v34  ;;  %v10233_v53 = vpop.f32.mrb[38].mxu0  ;;  %v9941_v24 = vcombine.low %v6646_v3, %v6649_v54 }
 0x27b   : > { %v10234_v32 = vpop.f32.mrb[39].mxu0 }
 0x27c   : > { %v13289_v5 = vadd.f32 %v10234_v32, %v10233_v53  ;;  %6803 = vrot.lane.b32.xlu1 %v9941_v24, %s10871_s18  ;;  %v4407_v32 = vld [vmem:[#allocation4 + $0x240] sm:$0xff] }
 0x286   : > { %v10236_v31 = vpop.f32.mrb[40].mxu0 }
 0x287   : > { %v10237_v13 = vpop.f32.mrb[41].mxu0 }
 0x288   : > { %v13291_v12 = vadd.f32 %v10237_v13, %v10236_v31  ;;  %v10239_v23 = vpop.f32.mrb[42].mxu0  ;;  %v10742_v13 = vld [vmem:[%s14891_s4 + $0x80] sm:$0xff]  }
 0x289   : > { %v10240_v18 = vpop.f32.mrb[43].mxu0  ;;  %10574 = vmatprep.subr.bf16.mxu0 %v10742_v13 }
 0x28a   : > { %v13293_v8 = vadd.f32 %v10240_v18, %v10239_v23  ;;  %10575 = vmatpush3.bf16.msra.mxu0 %v10742_v13 }
 0x28b   : > { %10576 = vmatprep.subr.bf16.mxu0 %v10745_v47 }
 0x28e   : > { %v3325_v2 = vpop.permute.xlu1 %3324  ;;  %10577 = vmatpush3.bf16.msra.mxu0 %v10745_v47 }
 0x28f   : > { %3357 = vst.msk [vmem:[#allocation4 + $0x268] sm:$0xff] %vm2042_vm4, %v3325_v2 }
 0x291   : > { %v4012_v14 = vpop.permute.xlu0 %4011 }
 0x292   : > { %4045 = vst.msk [vmem:[#allocation4 + $0x248] sm:$0xff] %vm2042_vm4, %v4012_v14 }
 0x295   : > { %v4014_v34 = vpop.permute.xlu0 %4013 }
 0x296   : > { %4046 = vst.msk [vmem:[#allocation4 + $0x270] sm:$0xff] %vm2042_vm4, %v4014_v34  ;;  %v4412_v10 = vld [vmem:[#allocation4 + $0x268] sm:$0xff]  ;;  %v4796_v34 = vadd.f32 %v13236_v41, %v13331_v21  ;;  %v4804_v41 = vadd.f32 %v13250_v29, %v13331_v21 }
 0x299   : > { %v4408_v53 = vld [vmem:[#allocation4 + $0x248] sm:$0xff] }
 0x29a   : > { %5063 = vmatprep.mubr.bf16.mxu1 %v4408_v53 }
 0x29b   : > { %5064 = vmatmul.mubr.bf16.gmra.mrb[56].mxu1 %v4407_v32 }
 0x29d   : > { %v4413_v31 = vld [vmem:[#allocation4 + $0x270] sm:$0xff] }
 0x29e   : > { %5071 = vmatprep.mubr.bf16.mxu1 %v4413_v31 }
 0x2a3   : > { %5072 = vmatmul.mubr.bf16.gmra.mrb[60].mxu1 %v4412_v10 }
 0x2a8   : > { %v10242_v23 = vpop.f32.mrb[44].mxu0 }
 0x2a9   : > { %v10243_v60 = vpop.f32.mrb[45].mxu0 }
 0x2aa   : > { %v13314_v39 = vadd.f32 %v10243_v60, %v10242_v23  ;;  %v10245_v4 = vpop.f32.mrb[46].mxu0 }
 0x2ab   : > { %v10246_v6 = vpop.f32.mrb[47].mxu0 }
 0x2ac   : > { %v13316_v18 = vadd.f32 %v10246_v6, %v10245_v4 }
 0x2b7   : > { %v10248_v58 = vpop.f32.mrb[48].mxu0 }
 0x2b8   : > { %v10249_v1 = vpop.f32.mrb[49].mxu0 }
 0x2b9   : > { %v13318_v15 = vadd.f32 %v10249_v1, %v10248_v58  ;;  %v10251_v57 = vpop.f32.mrb[50].mxu0 }
 0x2ba   : > { %v10252_v9 = vpop.f32.mrb[51].mxu0 }
 0x2bb   : > { %v13320_v63 = vadd.f32 %v10252_v9, %v10251_v57 }
 0x2c2   : > { %v10254_v35 = vpop.f32.mrb[52].mxu0 }
 0x2c3   : > { %v10255_v27 = vpop.f32.mrb[53].mxu0 }
 0x2c4   : > { %v13322_v25 = vadd.f32 %v10255_v27, %v10254_v35  ;;  %v10257_v20 = vpop.f32.mrb[54].mxu0 }
 0x2c5   : > { %v10258_v45 = vpop.f32.mrb[55].mxu0 }
 0x2c6   : > { %v13324_v22 = vadd.f32 %v10258_v45, %v10257_v20  ;;  %v4809_v20 = vadd.f32 %v13255_v17, %v13331_v21  ;;  %v13351_v45 = vadd.f32 %v13258_v56, %v13331_v21  ;;  %v13363_v17 = vadd.f32 %v13267_v26, %v13331_v21 }
 0x2c7   : > { %v13367_v56 = vadd.f32 %v13269_v46, %v13331_v21  ;;  %v13379_v26 = vadd.f32 %v13275_v49, %v13331_v21  ;;  %v13383_v46 = vadd.f32 %v13277_v30, %v13331_v21  ;;  %v13395_v49 = vadd.f32 %v13283_v48, %v13331_v21 }
 0x2c8   : > { %v13399_v30 = vadd.f32 %v13285_v28, %v13331_v21 }
 0x2cc   : > { %v10260_v44 = vpop.f32.mrb[56].mxu0 }
 0x2cd   : > { %v10261_v37 = vpop.f32.mrb[57].mxu0 }
 0x2ce   : > { %v13326_v16 = vadd.f32 %v10261_v37, %v10260_v44  ;;  %v10263_v2 = vpop.f32.mrb[58].mxu0  ;;  %v13355_v44 = vadd.f32 %v13262_v38, %v13331_v21  ;;  %v13359_v37 = vadd.f32 %v13264_v40, %v13331_v21  ;;  %v13371_v38 = vadd.f32 %v13271_v55, %v13331_v21 }
 0x2cf   : > { %v10264_v19 = vpop.f32.mrb[59].mxu0  ;;  %v13375_v40 = vadd.f32 %v13273_v7, %v13331_v21  ;;  %v13387_v55 = vadd.f32 %v13279_v36, %v13331_v21  ;;  %v13391_v7 = vadd.f32 %v13281_v59, %v13331_v21  ;;  %v13403_v36 = vadd.f32 %v13287_v43, %v13331_v21 }
 0x2d0   : > { %v13333_v52 = vadd.f32 %v10264_v19, %v10263_v2 }
 0x2d1   : > { %v10288_v14 = vpop.f32.mrb[0].mxu1 }
 0x2d2   : > { %v10289_v0 = vpop.f32.mrb[1].mxu1 }
 0x2d3   : > { %v10290_v3 = vadd.f32 %v10289_v0, %v10288_v14  ;;  %v10291_v54 = vpop.f32.mrb[2].mxu1 }
 0x2d4   : > { %v10292_v50 = vpop.f32.mrb[3].mxu1 }
 0x2d5   : > { %v10293_v24 = vadd.f32 %v10292_v50, %v10291_v54  ;;  %v4954_v53 = vadd.f32 %v10290_v3, %v4793_v51 }
 0x2d7   : > { %v10266_v32 = vpop.f32.mrb[60].mxu0  ;;  %v4957_v13 = vadd.f32 %v10293_v24, %v4796_v34 }
 0x2d8   : > { %v10267_v31 = vpop.f32.mrb[61].mxu0 }
 0x2d9   : > { %v13339_v47 = vadd.f32 %v10267_v31, %v10266_v32  ;;  %v10269_v10 = vpop.f32.mrb[62].mxu0 }
 0x2da   : > { %v10270_v23 = vpop.f32.mrb[63].mxu0 }
 0x2db   : > { %v13341_v60 = vadd.f32 %v10270_v23, %v10269_v10 }
 0x2dc   : > { %v10294_v4 = vpop.f32.mrb[4].mxu1 }
 0x2dd   : > { %v10295_v6 = vpop.f32.mrb[5].mxu1 }
 0x2de   : > { %v10296_v58 = vadd.f32 %v10295_v6, %v10294_v4  ;;  %v10297_v1 = vpop.f32.mrb[6].mxu1  ;;  %v13407_v4 = vadd.f32 %v13289_v5, %v13331_v21  ;;  %v13411_v6 = vadd.f32 %v13291_v12, %v13331_v21  ;;  %v13417_v5 = vadd.f32 %v13293_v8, %v13331_v21  ;;  %v5745_v12 = vld [vmem:[#allocation3 + $0xc] sm:$0xf] }
 0x2df   : > { %v10298_v57 = vpop.f32.mrb[7].mxu1  ;;  %v10544_v27 = vpop.f32.mrb[64].mxu0 }
 0x2e0   : > { %v10299_v9 = vadd.f32 %v10298_v57, %v10297_v1  ;;  %v4962_v35 = vadd.f32 %v10296_v58, %v4801_v61  ;;  %v5114_v33 = vpop.f32.mrb[65].mxu0  ;;  %v5752_v1 = vld [vmem:[#allocation3 + $0x18] sm:$0xf] }
 0x2e1   : > { %v5115_v2 = vadd.f32 %v5114_v33, %v4954_v53  ;;  %v10545_v14 = vpop.f32.mrb[66].mxu0 }
 0x2e2   : > { %v5123_v29 = vadd.f32 %v10544_v27, %v4962_v35  ;;  %v4965_v19 = vadd.f32 %v10299_v9, %v4804_v41  ;;  %v5117_v0 = vpop.f32.mrb[67].mxu0 }
 0x2e3   : > { %v5241_v3 = vmax.f32 %v5115_v2, 0.0  ;;  %v5118_v50 = vadd.f32 %v5117_v0, %v4957_v13 }
 0x2e4   : > { %v5243_v51 = vmax.f32 %v5123_v29, 0.0  ;;  %v5126_v54 = vadd.f32 %v10545_v14, %v4965_v19  ;;  %v10300_v34 = vpop.f32.mrb[8].mxu1 }
 0x2e5   : > { %v10301_v24 = vpop.f32.mrb[9].mxu1  ;;  %v10127_v32 = vpack.c.bf16 %v5241_v3, %v5241_v3  ;;  %v5242_v13 = vmax.f32 %v5118_v50, 0.0 }
 0x2e6   : > { %v10129_v53 = vpack.c.bf16 %v5243_v51, %v5243_v51  ;;  %v5244_v31 = vmax.f32 %v5126_v54, 0.0  ;;  %v10303_v10 = vpop.f32.mrb[10].mxu1  ;;  %v10302_v59 = vadd.f32 %v10301_v24, %v10300_v34 }
 0x2e7   : > { %v10304_v23 = vpop.f32.mrb[11].mxu1  ;;  %v5425_v61 = vshrl.u32 %v10127_v32, 16  ;;  %v10548_v58 = vpop.f32.mrb[68].mxu0  ;;  %v10128_v57 = vpack.c.bf16 %v5242_v13, %v5242_v13  ;;  %v5428_v29 = vshll.u32 %v10127_v32, 16 }
 0x2e8   : > { %v5442_v48 = vshrl.u32 %v10129_v53, 16  ;;  %v10130_v28 = vpack.c.bf16 %v5244_v31, %v5244_v31  ;;  %v10305_v41 = vadd.f32 %v10304_v23, %v10303_v10  ;;  %v4970_v9 = vadd.f32 %v10302_v59, %v4809_v20  ;;  %v5130_v43 = vpop.f32.mrb[69].mxu0 }
 0x2e9   : > { %v5445_v27 = vshll.u32 %v10129_v53, 16  ;;  %v5427_v33 = vrot.slane %v5425_v61, 7  ;;  %v13413_v2 = vpop.f32.mrb[70].mxu0  ;;  %v5433_v0 = vshrl.u32 %v10128_v57, 16  ;;  %v5436_v20 = vshll.u32 %v10128_v57, 16 }
 0x2ea   : > { %v5444_v35 = vrot.slane %v5442_v48, 7  ;;  %v5450_v19 = vshrl.u32 %v10130_v28, 16  ;;  %v5453_v14 = vshll.u32 %v10130_v28, 16  ;;  %v5133_v51 = vpop.f32.mrb[71].mxu0  ;;  %v5131_v31 = vadd.f32 %v5130_v43, %v4970_v9  ;;  %v5756_v48 = vld [vmem:[#allocation3 + $0x20] sm:$0x1] }
 0x2eb   : > { %v5430_v50 = vor.u32 %v5428_v29, %v5427_v33  ;;  %v5435_v53 = vrot.slane %v5433_v0, 7  ;;  %v4973_v32 = vadd.f32 %v10305_v41, %v13351_v45  ;;  %v5431_v59 = vrot.slane %v5427_v33, 4  ;;  %v5749_v61 = vld [vmem:[#allocation3 + $0x14] sm:$0x1] }
 0x2ec   : > { %v5447_v3 = vor.u32 %v5445_v27, %v5444_v35  ;;  %v5448_v54 = vrot.slane %v5444_v35, 4  ;;  %v10306_v34 = vpop.f32.mrb[12].mxu1  ;;  %v5452_v24 = vrot.slane %v5450_v19, 7  ;;  %v5245_v45 = vmax.f32 %v5131_v31, 0.0 }
 0x2ed   : > { %v10307_v13 = vpop.f32.mrb[13].mxu1  ;;  %v5746_v23 = vsel %vm11268_vm9, %v5430_v50, %v5745_v12  ;;  %v5438_v29 = vor.u32 %v5436_v20, %v5435_v53  ;;  %v5440_v9 = vrot.slane %v5435_v53, 4  ;;  %v5134_v41 = vadd.f32 %v5133_v51, %v4973_v32 }
 0x2ee   : > { %v5753_v8 = vsel %vm11268_vm9, %v5447_v3, %v5752_v1  ;;  %v10308_v28 = vadd.f32 %v10307_v13, %v10306_v34  ;;  %v10309_v35 = vpop.f32.mrb[14].mxu1  ;;  %5747 = vst [vmem:[#allocation3 + $0xc] sm:$0xf] %v5746_v23  ;;  %v5455_v57 = vor.u32 %v5453_v14, %v5452_v24  ;;  %v5457_v27 = vrot.slane %v5452_v24, 4 }
 0x2ef   : > { %5754 = vst [vmem:[#allocation3 + $0x18] sm:$0xf] %v5753_v8  ;;  %v10310_v43 = vpop.f32.mrb[15].mxu1  ;;  %v13425_v33 = vpop.f32.mrb[72].mxu0  ;;  %v5439_v14 = vsel %vm11195_vm6, %v5431_v59, %v5438_v29  ;;  %v5750_v50 = vsel %vm11259_vm8, %v5440_v9, %v5749_v61  ;;  %v5246_v51 = vmax.f32 %v5134_v41, 0.0  ;;  %v13442_v53 = vadd.f32 %v13314_v39, %v13331_v21 }
 0x2f0   : > { %v4978_v19 = vadd.f32 %v10308_v28, %v13355_v44  ;;  %v10311_v1 = vadd.f32 %v10310_v43, %v10309_v35  ;;  %v5456_v12 = vsel %vm11195_vm6, %v5448_v54, %v5455_v57  ;;  %v5757_v3 = vsel %vm11259_vm8, %v5457_v27, %v5756_v48  ;;  %v5146_v20 = vpop.f32.mrb[73].mxu0  ;;  %5748 = vst.msk [vmem:[#allocation3 + $0x10] sm:$0xf] %vm683_vm3, %v5439_v14 }
 0x2f1   : > { %5755 = vst.msk [vmem:[#allocation3 + $0x1c] sm:$0xf] %vm683_vm3, %v5456_v12  ;;  %5758 = vst [vmem:[#allocation3 + $0x20] sm:$0x1] %v5757_v3  ;;  %v10131_v44 = vpack.c.bf16 %v5245_v45, %v5245_v45  ;;  %v13438_v24 = vpop.f32.mrb[74].mxu0  ;;  %v13446_v31 = vadd.f32 %v13316_v18, %v13331_v21  ;;  %v13450_v32 = vadd.f32 %v13318_v15, %v13331_v21 }
 0x2f2   : > { %5751 = vst [vmem:[#allocation3 + $0x14] sm:$0x1] %v5750_v50  ;;  %v5139_v34 = vadd.f32 %v10548_v58, %v4978_v19  ;;  %v4981_v54 = vadd.f32 %v10311_v1, %v13359_v37  ;;  %v13454_v13 = vadd.f32 %v13320_v63, %v13331_v21  ;;  %v5149_v58 = vpop.f32.mrb[75].mxu0  ;;  %v13458_v37 = vadd.f32 %v13322_v25, %v13331_v21  ;;  %v5759_v63 = vld [vmem:[#allocation3 + $0x24] sm:$0xf] }
 0x2f3   : > { %15021 = vst [vmem:[#allocation12_spill] sm:$0xff] %v13450_v32  ;;  %v5459_v8 = vshrl.u32 %v10131_v44, 16  ;;  %v10132_v39 = vpack.c.bf16 %v5246_v51, %v5246_v51  ;;  %v13462_v18 = vadd.f32 %v13324_v22, %v13331_v21  ;;  %v13466_v15 = vadd.f32 %v13326_v16, %v13331_v21  ;;  %v5763_v16 = vld [vmem:[#allocation3 + $0x2c] sm:$0x1] }
 0x2f4   : > { %15022 = vst [vmem:[#allocation15_spill] sm:$0xff] %v13454_v13  ;;  %15023 = vst [vmem:[#allocation16_spill] sm:$0xff] %v13458_v37  ;;  %v5247_v59 = vmax.f32 %v5139_v34, 0.0  ;;  %v10312_v23 = vpop.f32.mrb[16].mxu1  ;;  %v5462_v48 = vshll.u32 %v10131_v44, 16  ;;  %v5142_v61 = vadd.f32 %v13413_v2, %v4981_v54  ;;  %v13471_v9 = vadd.f32 %v13333_v52, %v13331_v21 }
 0x2f5   : > { %15024 = vst [vmem:[#allocation20_spill] sm:$0xff] %v13462_v18  ;;  %15025 = vst [vmem:[#allocation13_spill] sm:$0xff] %v13466_v15  ;;  %v10313_v28 = vpop.f32.mrb[17].mxu1  ;;  %v5461_v35 = vrot.slane %v5459_v8, 7  ;;  %v5467_v25 = vshrl.u32 %v10132_v39, 16  ;;  %v5470_v57 = vshll.u32 %v10132_v39, 16  ;;  %v13475_v22 = vadd.f32 %v13339_v47, %v13331_v21 }
 0x2f6   : > { %v10133_v27 = vpack.c.bf16 %v5247_v59, %v5247_v59  ;;  %v10315_v29 = vpop.f32.mrb[18].mxu1  ;;  %15026 = vst [vmem:[#allocation17_spill] sm:$0xff] %v13471_v9  ;;  %v5248_v43 = vmax.f32 %v5142_v61, 0.0  ;;  %v10314_v45 = vadd.f32 %v10313_v28, %v10312_v23  ;;  %v7560_v14 = vld [vmem:[#allocation3 + $0x18] sm:$0xe] }
 0x2f7   : > { %15027 = vst [vmem:[#allocation18_spill] sm:$0xff] %v13475_v22  ;;  %v10316_v41 = vpop.f32.mrb[19].mxu1  ;;  %v5464_v19 = vor.u32 %v5462_v48, %v5461_v35  ;;  %v5465_v2 = vrot.slane %v5461_v35, 4  ;;  %v5469_v1 = vrot.slane %v5467_v25, 7  ;;  %v13477_v3 = vpop.f32.mrb[76].mxu0 }
 0x2f8   : > { %v5476_v12 = vshrl.u32 %v10133_v27, 16  ;;  %v5479_v50 = vshll.u32 %v10133_v27, 16  ;;  %v5766_v44 = vld [vmem:[#allocation3 + $0x30] sm:$0xf]  ;;  %v10134_v51 = vpack.c.bf16 %v5248_v43, %v5248_v43  ;;  %v4986_v52 = vadd.f32 %v10314_v45, %v13363_v17  ;;  %v13480_v54 = vpop.f32.mrb[77].mxu0  ;;  %v10739_v47 = vld [vmem:[#allocation3 + $0x18] sm:$0xff]  }
 0x2f9   : > { %v10317_v34 = vadd.f32 %v10316_v41, %v10315_v29  ;;  %v10740_v8 = vld [vmem:[#allocation3 + $0x18] sm:$0xff]   ;;  %v5760_v39 = vsel %vm11268_vm9, %v5464_v19, %v5759_v63  ;;  %v5472_v59 = vor.u32 %v5470_v57, %v5469_v1  ;;  %v5474_v23 = vrot.slane %v5469_v1, 4  ;;  %v13484_v61 = vpop.f32.mrb[78].mxu0  ;;  %7990 = vrot.lane.b32.xlu0 %v10739_v47, %s10871_s18  ;;  %v5784_v18 = vld [vmem:[#allocation3 + $0x50] sm:$0x1] }
 0x2fa   : > { %v5478_v48 = vrot.slane %v5476_v12, 7  ;;  %5761 = vst [vmem:[#allocation3 + $0x24] sm:$0xf] %v5760_v39  ;;  %v5484_v28 = vshrl.u32 %v10134_v51, 16  ;;  %v5487_v35 = vshll.u32 %v10134_v51, 16  ;;  %v5147_v25 = vadd.f32 %v5146_v20, %v4986_v52  ;;  %v13487_v17 = vpop.f32.mrb[79].mxu0  ;;  %6982 = vrot.lane.b32.xlu1 %v10740_v8, %s10872_s29 }
 0x2fb   : > { %v4989_v27 = vadd.f32 %v10317_v34, %v13367_v56  ;;  %v5473_v63 = vsel %vm11195_vm6, %v5465_v2, %v5472_v59  ;;  %v5764_v57 = vsel %vm11259_vm8, %v5474_v23, %v5763_v16  ;;  %v7561_v41 = vld [vmem:[#allocation3 + $0x1c] sm:$0xf]  ;;  %v7562_v20 = vld [vmem:[#allocation3 + $0x20] sm:$0x1]  ;;  %v10741_v51 = vld [vmem:[#allocation3 + $0xc] sm:$0xff]   ;;  %v9990_v52 = vrot.slane %v7560_v14, 9 }
 0x2fc   : > { %v5481_v29 = vor.u32 %v5479_v50, %v5478_v48  ;;  %v5482_v43 = vrot.slane %v5478_v48, 4  ;;  %v10318_v45 = vpop.f32.mrb[20].mxu1  ;;  %5762 = vst.msk [vmem:[#allocation3 + $0x28] sm:$0xf] %vm683_vm3, %v5473_v63  ;;  %5765 = vst [vmem:[#allocation3 + $0x2c] sm:$0x1] %v5764_v57 }
 0x2fd   : > { %v5486_v56 = vrot.slane %v5484_v28, 7  ;;  %v5249_v19 = vmax.f32 %v5147_v25, 0.0  ;;  %v5150_v1 = vadd.f32 %v5149_v58, %v4989_v27  ;;  %v10319_v12 = vpop.f32.mrb[21].mxu1  ;;  %v5770_v34 = vld [vmem:[#allocation3 + $0x38] sm:$0x1]  ;;  %v7662_v50 = vrot.slane %v7561_v41, 5 }
 0x2fe   : > { %v5767_v2 = vsel %vm11268_vm9, %v5481_v29, %v5766_v44  ;;  %v10320_v47 = vadd.f32 %v10319_v12, %v10318_v45  ;;  %v10321_v16 = vpop.f32.mrb[22].mxu1  ;;  %v7665_v8 = vrot.slane %v7562_v20, 5  ;;  %6980 = vrot.lane.b32.xlu1 %v10741_v51, %s10872_s29  ;;  %v6553_v27 = vld [vmem:[#allocation3 + $0x18] sm:$0xe]  ;;  %v6554_v20 = vld [vmem:[#allocation3 + $0x1c] sm:$0xf] }
 0x2ff   : > { %5768 = vst [vmem:[#allocation3 + $0x30] sm:$0xf] %v5767_v2  ;;  %v5489_v39 = vor.u32 %v5487_v35, %v5486_v56  ;;  %v5491_v59 = vrot.slane %v5486_v56, 4  ;;  %v10135_v23 = vpack.c.bf16 %v5249_v19, %v5249_v19  ;;  %v5250_v48 = vmax.f32 %v5150_v1, 0.0  ;;  %v10322_v63 = vpop.f32.mrb[23].mxu1  ;;  %v13500_v14 = vpop.f32.mrb[80].mxu0 }
 0x300   : > { %v4994_v58 = vadd.f32 %v10320_v47, %v13371_v38  ;;  %v10323_v28 = vadd.f32 %v10322_v63, %v10321_v16  ;;  %v7663_v44 = vsel %vm11529_vm0, %v9990_v52, %v7662_v50  ;;  %v7664_v25 = vrot.slane %v7662_v50, 4  ;;  %v13508_v41 = vpop.f32.mrb[81].mxu0  ;;  %v10754_v38 = vld [vmem:[%s14891_s4 + $0x40] sm:$0xff]   ;;  %v5773_v19 = vld [vmem:[#allocation3 + $0x3c] sm:$0xf] }
 0x301   : > { %v5490_v57 = vsel %vm11195_vm6, %v5482_v43, %v5489_v39  ;;  %v5771_v35 = vsel %vm11259_vm8, %v5491_v59, %v5770_v34  ;;  %v5493_v29 = vshrl.u32 %v10135_v23, 16  ;;  %v5496_v45 = vshll.u32 %v10135_v23, 16  ;;  %v13513_v56 = vld [vmem:[#allocation3 + $0x24] sm:$0xe]  ;;  %v13520_v52 = vpop.f32.mrb[82].mxu0  ;;  %v10755_v34 = vld [vmem:[%s14891_s4] sm:$0xff]   ;;  %10404 = vmatprep.subr.bf16.mxu1 %v10754_v38 }
 0x302   : > { %5769 = vst.msk [vmem:[#allocation3 + $0x34] sm:$0xf] %vm683_vm3, %v5490_v57  ;;  %5772 = vst [vmem:[#allocation3 + $0x38] sm:$0x1] %v5771_v35  ;;  %v10136_v1 = vpack.c.bf16 %v5250_v48, %v5250_v48  ;;  %v5155_v43 = vadd.f32 %v13425_v33, %v4994_v58  ;;  %v4997_v12 = vadd.f32 %v10323_v28, %v13375_v40  ;;  %v6555_v2 = vld [vmem:[#allocation3 + $0x20] sm:$0x1]  ;;  %10405 = vmatpush3.bf16.msra.mxu1 %v10755_v34 }
 0x303   : > { %v7666_v51 = vsel %vm11529_vm0, %v7664_v25, %v7665_v8  ;;  %v5495_v16 = vrot.slane %v5493_v29, 7  ;;  %v13526_v39 = vpop.f32.mrb[83].mxu0  ;;  %v9927_v59 = vrot.slane %v6553_v27, 9  ;;  %v7557_v33 = vld [vmem:[#allocation3 + $0xc] sm:$0xe]  ;;  %v13530_v40 = vadd.f32 %v13341_v60, %v13331_v21 }
 0x304   : > { %v10006_v50 = vcombine.low %v7663_v44, %v7666_v51  ;;  %v13532_v8 = vld [vmem:[#allocation3 + $0x28] sm:$0xf]  ;;  %v13534_v23 = vld [vmem:[#allocation3 + $0x2c] sm:$0x1]  ;;  %v5501_v48 = vshrl.u32 %v10136_v1, 16  ;;  %v5504_v63 = vshll.u32 %v10136_v1, 16  ;;  %v5158_v58 = vadd.f32 %v13438_v24, %v4997_v12 }
 0x305   : > { %15028 = vst [vmem:[#allocation21_spill] sm:$0xff] %v13530_v40  ;;  %v7558_v28 = vld [vmem:[#allocation3 + $0x10] sm:$0xf]  ;;  %v14925_v44 = vrot.slane %v13532_v8, 5  ;;  %v5498_v27 = vor.u32 %v5496_v45, %v5495_v16  ;;  %v5499_v57 = vrot.slane %v5495_v16, 4  ;;  %v10324_v21 = vpop.f32.mrb[24].mxu1 }
 0x306   : > { %7815 = vrot.lane.b32.xlu0 %v10006_v50, %s10870_s14  ;;  %v7559_v60 = vld [vmem:[#allocation3 + $0x14] sm:$0x1]  ;;  %v5503_v35 = vrot.slane %v5501_v48, 7  ;;  %v5251_v29 = vmax.f32 %v5155_v43, 0.0  ;;  %v5252_v38 = vmax.f32 %v5158_v58, 0.0  ;;  %v6659_v51 = vrot.slane %v6554_v20, 5 }
 0x307   : > { %v10325_v47 = vpop.f32.mrb[25].mxu1  ;;  %v13542_v24 = vrot.slane %v14925_v44, 4  ;;  %v5774_v1 = vsel %vm11268_vm9, %v5498_v27, %v5773_v19  ;;  %v5777_v12 = vld [vmem:[#allocation3 + $0x44] sm:$0x1]  ;;  %v6662_v34 = vrot.slane %v6555_v2, 5  ;;  %v9989_v45 = vrot.slane %v7557_v33, 9 }
 0x308   : > { %v10327_v16 = vpop.f32.mrb[26].mxu1  ;;  %5775 = vst [vmem:[#allocation3 + $0x3c] sm:$0xf] %v5774_v1  ;;  %v5506_v50 = vor.u32 %v5504_v63, %v5503_v35  ;;  %v5508_v25 = vrot.slane %v5503_v35, 4  ;;  %v10137_v40 = vpack.c.bf16 %v5251_v29, %v5251_v29  ;;  %v10138_v48 = vpack.c.bf16 %v5252_v38, %v5252_v38  ;;  %v6550_v58 = vld [vmem:[#allocation3 + $0xc] sm:$0xe] }
 0x309   : > { %v10328_v43 = vpop.f32.mrb[27].mxu1  ;;  %v13546_v20 = vpop.f32.mrb[84].mxu0  ;;  %v6660_v44 = vsel %vm11529_vm0, %v9927_v59, %v6659_v51  ;;  %v6661_v22 = vrot.slane %v6659_v51, 4  ;;  %v7655_v9 = vrot.slane %v7558_v28, 5  ;;  %v7658_v15 = vrot.slane %v7559_v60, 5 }
 0x30a   : > { %v6551_v19 = vld [vmem:[#allocation3 + $0x10] sm:$0xf]  ;;  %v13550_v27 = vpop.f32.mrb[85].mxu0  ;;  %v5507_v2 = vsel %vm11195_vm6, %v5499_v57, %v5506_v50  ;;  %v5778_v33 = vsel %vm11259_vm8, %v5508_v25, %v5777_v12  ;;  %v5510_v63 = vshrl.u32 %v10137_v40, 16  ;;  %v5513_v35 = vshll.u32 %v10137_v40, 16 }
 0x30b   : > { %v13556_v29 = vpop.f32.mrb[86].mxu0  ;;  %5776 = vst.msk [vmem:[#allocation3 + $0x40] sm:$0xf] %vm683_vm3, %v5507_v2  ;;  %5779 = vst [vmem:[#allocation3 + $0x44] sm:$0x1] %v5778_v33  ;;  %v5518_v38 = vshrl.u32 %v10138_v48, 16  ;;  %v6663_v60 = vsel %vm11529_vm0, %v6661_v22, %v6662_v34  ;;  %v7656_v51 = vsel %vm11529_vm0, %v9989_v45, %v7655_v9  ;;  %v10326_v40 = vadd.f32 %v10325_v47, %v10324_v21 }
 0x30c   : > { %v5780_v59 = vld [vmem:[#allocation3 + $0x48] sm:$0xf]  ;;  %v5521_v28 = vshll.u32 %v10138_v48, 16  ;;  %v13563_v57 = vpop.f32.mrb[87].mxu0  ;;  %v5512_v1 = vrot.slane %v5510_v63, 7  ;;  %v9943_v25 = vcombine.low %v6660_v44, %v6663_v60  ;;  %v7657_v12 = vrot.slane %v7655_v9, 4 }
 0x30d   : > { %v5520_v50 = vrot.slane %v5518_v38, 7  ;;  %v10329_v37 = vadd.f32 %v10328_v43, %v10327_v16  ;;  %v9926_v2 = vrot.slane %v6550_v58, 9  ;;  %v6652_v33 = vrot.slane %v6551_v19, 5  ;;  %v10330_v13 = vpop.f32.mrb[28].mxu1  ;;  %v6552_v45 = vld [vmem:[#allocation3 + $0x14] sm:$0x1] }
 0x30e   : > { %v5515_v32 = vor.u32 %v5513_v35, %v5512_v1  ;;  %v5516_v48 = vrot.slane %v5512_v1, 4  ;;  %6807 = vrot.lane.b32.xlu1 %v9943_v25, %s10871_s18  ;;  %v7659_v22 = vsel %vm11529_vm0, %v7657_v12, %v7658_v15  ;;  %v5002_v34 = vadd.f32 %v10326_v40, %v13379_v26  ;;  %v8598_v63 = vld [vmem:[#allocation3 + $0x18] sm:$0xe]  ;;  %v10331_v44 = vpop.f32.mrb[29].mxu1  ;;  %v8599_v43 = vld [vmem:[#allocation3 + $0x1c] sm:$0xf] }
 0x30f   : > { %v5523_v9 = vor.u32 %v5521_v28, %v5520_v50  ;;  %v5525_v47 = vrot.slane %v5520_v50, 4  ;;  %v10005_v21 = vcombine.low %v7656_v51, %v7659_v22  ;;  %v5005_v16 = vadd.f32 %v10329_v37, %v13383_v46  ;;  %v8600_v58 = vld [vmem:[#allocation3 + $0x20] sm:$0x1]  ;;  %v10333_v19 = vpop.f32.mrb[30].mxu1  ;;  %v10743_v60 = vld [vmem:[#allocation3 + $0x30] sm:$0xff]   ;;  %v13575_v25 = vpop.f32.mrb[88].mxu0 }
 0x310   : > { %v5781_v35 = vsel %vm11268_vm9, %v5515_v32, %v5780_v59  ;;  %v5163_v38 = vadd.f32 %v13480_v54, %v5002_v34  ;;  %v6653_v15 = vsel %vm11529_vm0, %v9926_v2, %v6652_v33  ;;  %v6654_v26 = vrot.slane %v6652_v33, 4  ;;  %v10334_v1 = vpop.f32.mrb[31].mxu1  ;;  %v8054_v28 = vld [vmem:[#allocation3 + $0x18] sm:$0xf]  ;;  %15029 = vst [vmem:[#allocation28_spill] sm:$0xff] %v13575_v25  ;;  %v13583_v59 = vpop.f32.mrb[89].mxu0 }
 0x311   : > { %5782 = vst [vmem:[#allocation3 + $0x48] sm:$0xf] %v5781_v35  ;;  %v5524_v46 = vsel %vm11195_vm6, %v5516_v48, %v5523_v9  ;;  %v5785_v37 = vsel %vm11259_vm8, %v5525_v47, %v5784_v18  ;;  %7813 = vrot.lane.b32.xlu0 %v10005_v21, %s10870_s14  ;;  %v5166_v32 = vadd.f32 %v13487_v17, %v5005_v16  ;;  %v6655_v54 = vrot.slane %v6552_v45, 5  ;;  %v13586_v2 = vpop.f32.mrb[90].mxu0  ;;  %v10744_v16 = vld [vmem:[#allocation3 + $0x30] sm:$0xff]  }
 0x312   : > { %5783 = vst.msk [vmem:[#allocation3 + $0x4c] sm:$0xf] %vm683_vm3, %v5524_v46  ;;  %5786 = vst [vmem:[#allocation3 + $0x50] sm:$0x1] %v5785_v37  ;;  %v5253_v51 = vmax.f32 %v5163_v38, 0.0  ;;  %v10053_v12 = vrot.slane %v8598_v63, 9  ;;  %v10332_v48 = vadd.f32 %v10331_v44, %v10330_v13  ;;  %v10335_v22 = vadd.f32 %v10334_v1, %v10333_v19 }
 0x313   : > { %v8696_v40 = vrot.slane %v8599_v43, 5  ;;  %v8699_v50 = vrot.slane %v8600_v58, 5  ;;  %15030 = vst [vmem:[#allocation26_spill] sm:$0xff] %v13586_v2  ;;  %v5254_v33 = vmax.f32 %v5166_v32, 0.0  ;;  %v6656_v18 = vsel %vm11529_vm0, %v6654_v26, %v6655_v54  ;;  %v13590_v34 = vpop.f32.mrb[91].mxu0 }
 0x314   : > { %v10139_v17 = vpack.c.bf16 %v5253_v51, %v5253_v51  ;;  %v9942_v45 = vcombine.low %v6653_v15, %v6656_v18  ;;  %v13594_v21 = vpop.f32.mrb[32].mxu1  ;;  %v5010_v43 = vadd.f32 %v10332_v48, %v13387_v55  ;;  %v5013_v58 = vadd.f32 %v10335_v22, %v13391_v7  ;;  %v8055_v15 = vld [vmem:[#allocation3 + $0x1c] sm:$0xf]  ;;  %v7056_v62 = vld [vmem:[#allocation3 + $0x38] sm:$0x1] }
 0x315   : > { %v8697_v9 = vsel %vm11529_vm0, %v10053_v12, %v8696_v40  ;;  %v8698_v47 = vrot.slane %v8696_v40, 4  ;;  %v10140_v63 = vpack.c.bf16 %v5254_v33, %v5254_v33  ;;  %7994 = vrot.lane.b32.xlu0 %v10743_v60, %s10871_s18  ;;  %v8103_v13 = vshrl.u32 %v8054_v28, 16  ;;  %v13599_v44 = vpop.f32.mrb[33].mxu1  ;;  %v10758_v40 = vld [vmem:[%s14891_s4 + $0x48] sm:$0xff]  }
 0x316   : > { %v5527_v19 = vshrl.u32 %v10139_v17, 16  ;;  %v5530_v35 = vshll.u32 %v10139_v17, 16  ;;  %6805 = vrot.lane.b32.xlu1 %v9942_v45, %s10871_s18  ;;  %v8106_v26 = vshll.u32 %v8054_v28, 16  ;;  %v13604_v1 = vpop.f32.mrb[34].mxu1  ;;  %v5171_v55 = vadd.f32 %v13477_v3, %v5010_v43  ;;  %v5791_v17 = vld [vmem:[#allocation3 + $0x5c] sm:$0x1]  ;;  %10406 = vmatprep.subr.bf16.mxu1 %v10758_v40 }
 0x317   : > { %v8700_v38 = vsel %vm11529_vm0, %v8698_v47, %v8699_v50  ;;  %v5535_v60 = vshrl.u32 %v10140_v63, 16  ;;  %v5538_v46 = vshll.u32 %v10140_v63, 16  ;;  %v13607_v7 = vpop.f32.mrb[35].mxu1  ;;  %v5174_v54 = vadd.f32 %v13484_v61, %v5013_v58  ;;  %v5787_v50 = vld [vmem:[#allocation3 + $0x54] sm:$0xf] }
 0x318   : > { %v10069_v37 = vcombine.low %v8697_v9, %v8700_v38  ;;  %v5529_v32 = vrot.slane %v5527_v19, 7  ;;  %v8105_v51 = vrot.slane %v8103_v13, 4  ;;  %v8108_v12 = vrot.slane %v8106_v26, 5  ;;  %v8056_v19 = vld [vmem:[#allocation3 + $0x20] sm:$0x1] }
 0x319   : > { %v5537_v28 = vrot.slane %v5535_v60, 7  ;;  %v5255_v33 = vmax.f32 %v5171_v55, 0.0  ;;  %v8112_v18 = vshll.u32 %v8055_v15, 16  ;;  %v8116_v48 = vshrl.u32 %v8055_v15, 16  ;;  %v6008_v15 = vld [vmem:[#allocation3 + $0x18] sm:$0xf] }
 0x31a   : > { %8870 = vst.msk [vmem:[#allocation5 + $0x10] sm:$0xff] %vm5985_vm7, %v10069_v37  ;;  %v5532_v22 = vor.u32 %v5530_v35, %v5529_v32  ;;  %v5533_v3 = vrot.slane %v5529_v32, 4  ;;  %6986 = vrot.lane.b32.xlu1 %v10744_v16, %s10872_s29  ;;  %v5256_v45 = vmax.f32 %v5174_v54, 0.0  ;;  %v8109_v61 = vor.u32 %v8108_v12, %v8105_v51  ;;  %v6009_v37 = vld [vmem:[#allocation3 + $0x1c] sm:$0xf] }
 0x31b   : > { %v5540_v9 = vor.u32 %v5538_v46, %v5537_v28  ;;  %v5542_v47 = vrot.slane %v5537_v28, 4  ;;  %v10141_v63 = vpack.c.bf16 %v5255_v33, %v5255_v33  ;;  %v8114_v43 = vrot.slane %v8112_v18, 5  ;;  %v5794_v32 = vld [vmem:[#allocation3 + $0x60] sm:$0xf]  ;;  %v5798_v18 = vld [vmem:[#allocation3 + $0x68] sm:$0x1] }
 0x31c   : > { %v5788_v58 = vsel %vm11268_vm9, %v5532_v22, %v5787_v50  ;;  %v10142_v13 = vpack.c.bf16 %v5256_v45, %v5256_v45  ;;  %v8110_v38 = vrot.slane %v8109_v61, 4  ;;  %v8118_v26 = vrot.slane %v8116_v48, 4  ;;  %v13621_v55 = vpop.f32.mrb[36].mxu1  ;;  %v6010_v50 = vld [vmem:[#allocation3 + $0x20] sm:$0x1]  ;;  %v10759_v45 = vld [vmem:[%s14891_s4 + $0x8] sm:$0xff]  }
 0x31d   : > { %5789 = vst [vmem:[#allocation3 + $0x54] sm:$0xf] %v5788_v58  ;;  %v5541_v35 = vsel %vm11195_vm6, %v5533_v3, %v5540_v9  ;;  %v5792_v16 = vsel %vm11259_vm8, %v5542_v47, %v5791_v17  ;;  %v5544_v60 = vshrl.u32 %v10141_v63, 16  ;;  %v5547_v46 = vshll.u32 %v10141_v63, 16  ;;  %v13626_v28 = vpop.f32.mrb[37].mxu1  ;;  %10407 = vmatpush3.bf16.msra.mxu1 %v10759_v45 }
 0x31e   : > { %5790 = vst.msk [vmem:[#allocation3 + $0x58] sm:$0xf] %vm683_vm3, %v5541_v35  ;;  %5793 = vst [vmem:[#allocation3 + $0x5c] sm:$0x1] %v5792_v16  ;;  %v5552_v54 = vshrl.u32 %v10142_v13, 16  ;;  %v5555_v51 = vshll.u32 %v10142_v13, 16  ;;  %v8115_v12 = vsel %vm11387_vm12, %v8110_v38, %v8114_v43  ;;  %v8119_v40 = vor.u32 %v8118_v26, %v8114_v43 }
 0x31f   : > { %v5546_v33 = vrot.slane %v5544_v60, 7  ;;  %v8122_v48 = vshll.u32 %v8056_v19, 16  ;;  %v6099_v22 = vshrl.u32 %v6008_v15, 16  ;;  %v6102_v3 = vshll.u32 %v6008_v15, 16  ;;  %v13628_v17 = vpop.f32.mrb[38].mxu1 }
 0x320   : > { %v5554_v9 = vrot.slane %v5552_v54, 7  ;;  %v8120_v47 = vrot.slane %v8119_v40, 4  ;;  %v6108_v63 = vshll.u32 %v6009_v37, 16  ;;  %v6112_v58 = vshrl.u32 %v6009_v37, 16  ;;  %v13633_v43 = vpop.f32.mrb[39].mxu1 }
 0x321   : > { %v8888_v61 = vld [vmem:[#allocation5 + $0x10] sm:$0xff]  ;;  %v5549_v13 = vor.u32 %v5547_v46, %v5546_v33  ;;  %v5550_v38 = vrot.slane %v5546_v33, 4  ;;  %v8124_v19 = vrot.slane %v8122_v48, 5  ;;  %v6101_v26 = vrot.slane %v6099_v22, 4  ;;  %v7566_v22 = vld [vmem:[#allocation3 + $0x30] sm:$0xe] }
 0x322   : > { %10578 = vmatprep.mubr.msk.bf16.mxu0 %vm5985_vm7, %v8888_v61  ;;  %v5557_v15 = vor.u32 %v5555_v51, %v5554_v9  ;;  %v5559_v35 = vrot.slane %v5554_v9, 4  ;;  %v6104_v16 = vrot.slane %v6102_v3, 5  ;;  %v6110_v60 = vrot.slane %v6108_v63, 5  ;;  %v7567_v3 = vld [vmem:[#allocation3 + $0x34] sm:$0xf] }
 0x323   : > { %v5795_v2 = vsel %vm11268_vm9, %v5549_v13, %v5794_v32  ;;  %v8125_v54 = vsel %vm11387_vm12, %v8120_v47, %v8124_v19  ;;  %v6114_v37 = vrot.slane %v6112_v58, 4  ;;  %v6118_v40 = vshll.u32 %v6010_v50, 16  ;;  %v7568_v45 = vld [vmem:[#allocation3 + $0x38] sm:$0x1]  ;;  %v6006_v19 = vld [vmem:[#allocation3 + $0x10] sm:$0xf] }
 0x324   : > { %5796 = vst [vmem:[#allocation3 + $0x60] sm:$0xf] %v5795_v2  ;;  %v5558_v46 = vsel %vm11195_vm6, %v5550_v38, %v5557_v15  ;;  %v5799_v33 = vsel %vm11259_vm8, %v5559_v35, %v5798_v18  ;;  %v10037_v48 = vcombine.low %v8115_v12, %v8125_v54  ;;  %v6105_v51 = vor.u32 %v6104_v16, %v6101_v26  ;;  %v6005_v18 = vld [vmem:[#allocation3 + $0xc] sm:$0xf]  ;;  %v13656_v63 = vpop.f32.mrb[40].mxu1  ;;  %v10746_v38 = vld [vmem:[#allocation3 + $0x24] sm:$0xff]  }
 0x325   : > { %5797 = vst.msk [vmem:[#allocation3 + $0x64] sm:$0xf] %vm683_vm3, %v5558_v46  ;;  %5800 = vst [vmem:[#allocation3 + $0x68] sm:$0x1] %v5799_v33  ;;  %v6115_v32 = vor.u32 %v6114_v37, %v6110_v60  ;;  %v6120_v61 = vrot.slane %v6118_v40, 5  ;;  %v15031_v9 = vrot.slane %v13532_v8, 5  ;;  %v10341_v8 = vadd.f32 %v13607_v7, %v13604_v1 }
 0x326   : > { %v15032_v2 = vrot.slane %v13513_v56, 9  ;;  %v15033_v47 = vrot.slane %v13534_v23, 5  ;;  %8534 = vrot.lane.b32.xlu0 %v10037_v48, %s10872_s29  ;;  %v6106_v58 = vrot.slane %v6105_v51, 4  ;;  %v10338_v56 = vadd.f32 %v13599_v44, %v13594_v21  ;;  %v13663_v23 = vpop.f32.mrb[41].mxu1  ;;  %v6007_v46 = vld [vmem:[#allocation3 + $0x14] sm:$0x1] }
 0x327   : > { %v6116_v26 = vrot.slane %v6115_v32, 4  ;;  %v9992_v15 = vrot.slane %v7566_v22, 9  ;;  %v7679_v35 = vrot.slane %v7568_v45, 5  ;;  %v5021_v37 = vadd.f32 %v10341_v8, %v13399_v30  ;;  %v13670_v44 = vpop.f32.mrb[42].mxu1  ;;  %v8604_v22 = vld [vmem:[#allocation3 + $0x30] sm:$0xe] }
 0x328   : > { %v8704_v50 = vsel %vm11529_vm0, %v15032_v2, %v15031_v9  ;;  %v8707_v12 = vsel %vm11529_vm0, %v13542_v24, %v15033_v47  ;;  %v7676_v24 = vrot.slane %v7567_v3, 5  ;;  %v6111_v16 = vsel %vm11387_vm12, %v6106_v58, %v6110_v60  ;;  %v13676_v48 = vpop.f32.mrb[43].mxu1  ;;  %v8605_v3 = vld [vmem:[#allocation3 + $0x34] sm:$0xf]  ;;  %v8606_v2 = vld [vmem:[#allocation3 + $0x38] sm:$0x1] }
 0x329   : > { %v10070_v13 = vcombine.low %v8704_v50, %v8707_v12  ;;  %v5018_v54 = vadd.f32 %v10338_v56, %v13395_v49  ;;  %v6075_v21 = vshrl.u32 %v6005_v18, 16  ;;  %v6121_v1 = vsel %vm11387_vm12, %v6116_v26, %v6120_v61  ;;  %v10764_v50 = vld [vmem:[%s14891_s4 + $0x50] sm:$0xff]   ;;  %v10747_v47 = vld [vmem:[#allocation3 + $0x24] sm:$0xff]  }
 0x32a   : > { %v7677_v7 = vsel %vm11529_vm0, %v9992_v15, %v7676_v24  ;;  %v7678_v40 = vrot.slane %v7676_v24, 4  ;;  %v6078_v33 = vshll.u32 %v6005_v18, 16  ;;  %v9911_v60 = vcombine.low %v6111_v16, %v6121_v1  ;;  %7992 = vrot.lane.b32.xlu0 %v10746_v38, %s10871_s18  ;;  %v7563_v58 = vld [vmem:[#allocation3 + $0x24] sm:$0xe]  ;;  %10408 = vmatprep.subr.bf16.mxu1 %v10764_v50 }
 0x32b   : > { %8871 = vst.msk [vmem:[#allocation5 + $0x28] sm:$0xff] %vm5985_vm7, %v10070_v13  ;;  %v5179_v49 = vadd.f32 %v13508_v41, %v5018_v54  ;;  %v5182_v30 = vadd.f32 %v13526_v39, %v5021_v37  ;;  %v6077_v51 = vrot.slane %v6075_v21, 4  ;;  %v6084_v61 = vshll.u32 %v6006_v19, 16  ;;  %v7565_v37 = vld [vmem:[#allocation3 + $0x2c] sm:$0x1] }
 0x32c   : > { %v7680_v45 = vsel %vm11529_vm0, %v7678_v40, %v7679_v35  ;;  %v6080_v32 = vrot.slane %v6078_v33, 5  ;;  %v6088_v9 = vshrl.u32 %v6006_v19, 16  ;;  %6486 = vrot.lane.b32.xlu1 %v9911_v60, %s10870_s14  ;;  %v6094_v18 = vshll.u32 %v6007_v46, 16  ;;  %v13687_v13 = vpop.f32.mrb[44].mxu1  ;;  %v7564_v19 = vld [vmem:[#allocation3 + $0x28] sm:$0xf] }
 0x32d   : > { %v5257_v41 = vmax.f32 %v5179_v49, 0.0  ;;  %v5258_v12 = vmax.f32 %v5182_v30, 0.0  ;;  %v10008_v39 = vcombine.low %v7677_v7, %v7680_v45  ;;  %v6086_v56 = vrot.slane %v6084_v61, 5  ;;  %v13689_v15 = vpop.f32.mrb[45].mxu1  ;;  %v6559_v21 = vld [vmem:[#allocation3 + $0x30] sm:$0xe] }
 0x32e   : > { %v6081_v38 = vor.u32 %v6080_v32, %v6077_v51  ;;  %v6090_v8 = vrot.slane %v6088_v9, 4  ;;  %v10055_v26 = vrot.slane %v8604_v22, 9  ;;  %v6096_v16 = vrot.slane %v6094_v18, 5  ;;  %v6560_v60 = vld [vmem:[#allocation3 + $0x34] sm:$0xf]  ;;  %v13698_v9 = vpop.f32.mrb[46].mxu1 }
 0x32f   : > { %v10143_v24 = vpack.c.bf16 %v5257_v41, %v5257_v41  ;;  %v10144_v35 = vpack.c.bf16 %v5258_v12, %v5258_v12  ;;  %7819 = vrot.lane.b32.xlu0 %v10008_v39, %s10870_s14  ;;  %v8710_v54 = vrot.slane %v8605_v3, 5  ;;  %v8713_v46 = vrot.slane %v8606_v2, 5  ;;  %v13700_v39 = vpop.f32.mrb[47].mxu1  ;;  %v5805_v18 = vld [vmem:[#allocation3 + $0x74] sm:$0x1] }
 0x330   : > { %v6082_v7 = vrot.slane %v6081_v38, 4  ;;  %v6091_v40 = vor.u32 %v6090_v8, %v6086_v56  ;;  %v9991_v33 = vrot.slane %v7563_v58, 9  ;;  %6984 = vrot.lane.b32.xlu1 %v10747_v47, %s10872_s29  ;;  %v7669_v41 = vrot.slane %v7564_v19, 5  ;;  %v5801_v47 = vld [vmem:[#allocation3 + $0x6c] sm:$0xf] }
 0x331   : > { %v5561_v49 = vshrl.u32 %v10143_v24, 16  ;;  %v5564_v30 = vshll.u32 %v10143_v24, 16  ;;  %v5569_v51 = vshrl.u32 %v10144_v35, 16  ;;  %v5572_v22 = vshll.u32 %v10144_v35, 16 }
 0x332   : > { %v8891_v1 = vld [vmem:[#allocation5 + $0x28] sm:$0xff]  ;;  %v6087_v45 = vsel %vm11387_vm12, %v6082_v7, %v6086_v56  ;;  %v6092_v3 = vrot.slane %v6091_v40, 4  ;;  %v8711_v32 = vsel %vm11529_vm0, %v10055_v26, %v8710_v54  ;;  %v8712_v61 = vrot.slane %v8710_v54, 4 }
 0x333   : > { %10579 = vmatmul.mubr.msk.bf16.vlgmr.msra.gmra.mrb[96].mxu0 %vm5985_vm7, %v8891_v1  ;;  %v5563_v2 = vrot.slane %v5561_v49, 7  ;;  %v5571_v50 = vrot.slane %v5569_v51, 7  ;;  %v7672_v12 = vrot.slane %v7565_v37, 5  ;;  %v9929_v56 = vrot.slane %v6559_v21, 9  ;;  %v6561_v1 = vld [vmem:[#allocation3 + $0x38] sm:$0x1] }
 0x334   : > { %v6097_v58 = vsel %vm11387_vm12, %v6092_v3, %v6096_v16  ;;  %v8714_v38 = vsel %vm11529_vm0, %v8712_v61, %v8713_v46  ;;  %v6673_v8 = vrot.slane %v6560_v60, 5  ;;  %v7670_v37 = vsel %vm11529_vm0, %v9991_v33, %v7669_v41  ;;  %v6556_v49 = vld [vmem:[#allocation3 + $0x24] sm:$0xe]  ;;  %v6557_v51 = vld [vmem:[#allocation3 + $0x28] sm:$0xf]  ;;  %v13708_v25 = vpop.f32.mrb[48].mxu1 }
 0x335   : > { %v5566_v26 = vor.u32 %v5564_v30, %v5563_v2  ;;  %v5567_v24 = vrot.slane %v5563_v2, 4  ;;  %v5574_v35 = vor.u32 %v5572_v22, %v5571_v50  ;;  %v5576_v54 = vrot.slane %v5571_v50, 4  ;;  %v6558_v30 = vld [vmem:[#allocation3 + $0x2c] sm:$0x1]  ;;  %v8607_v22 = vld [vmem:[#allocation3 + $0x3c] sm:$0xe] }
 0x336   : > { %v9910_v7 = vcombine.low %v6087_v45, %v6097_v58  ;;  %v10071_v19 = vcombine.low %v8711_v32, %v8714_v38  ;;  %v7671_v40 = vrot.slane %v7669_v41, 4  ;;  %v6674_v60 = vsel %vm11529_vm0, %v9929_v56, %v6673_v8  ;;  %v8608_v61 = vld [vmem:[#allocation3 + $0x40] sm:$0xf]  ;;  %v8060_v58 = vld [vmem:[#allocation3 + $0x30] sm:$0xf] }
 0x337   : > { %v5802_v16 = vsel %vm11268_vm9, %v5566_v26, %v5801_v47  ;;  %v5575_v21 = vsel %vm11195_vm6, %v5567_v24, %v5574_v35  ;;  %v5806_v46 = vsel %vm11259_vm8, %v5576_v54, %v5805_v18  ;;  %v6675_v45 = vrot.slane %v6673_v8, 4  ;;  %v8609_v18 = vld [vmem:[#allocation3 + $0x44] sm:$0x1]  ;;  %v8061_v26 = vld [vmem:[#allocation3 + $0x34] sm:$0xf]  ;;  %v10748_v24 = vld [vmem:[#allocation3 + $0x48] sm:$0xff]  }
 0x338   : > { %5803 = vst [vmem:[#allocation3 + $0x6c] sm:$0xf] %v5802_v16  ;;  %5804 = vst.msk [vmem:[#allocation3 + $0x70] sm:$0xf] %vm683_vm3, %v5575_v21  ;;  %6484 = vrot.lane.b32.xlu1 %v9910_v7, %s10870_s14  ;;  %v7673_v33 = vsel %vm11529_vm0, %v7671_v40, %v7672_v12  ;;  %v6676_v3 = vrot.slane %v6561_v1, 5  ;;  %v10344_v32 = vadd.f32 %v13626_v28, %v13621_v55  ;;  %v9928_v41 = vrot.slane %v6556_v49, 9 }
 0x339   : > { %5807 = vst [vmem:[#allocation3 + $0x74] sm:$0x1] %v5806_v46  ;;  %8872 = vst.msk [vmem:[#allocation5 + $0x40] sm:$0xff] %vm5985_vm7, %v10071_v19  ;;  %v10007_v2 = vcombine.low %v7670_v37, %v7673_v33  ;;  %v10347_v50 = vadd.f32 %v13633_v43, %v13628_v17  ;;  %v6666_v47 = vrot.slane %v6557_v51, 5  ;;  %v6669_v12 = vrot.slane %v6558_v30, 5  ;;  %v13734_v35 = vpop.f32.mrb[49].mxu1 }
 0x33a   : > { %v6677_v38 = vsel %vm11529_vm0, %v6675_v45, %v6676_v3  ;;  %v5026_v56 = vadd.f32 %v10344_v32, %v13403_v36  ;;  %v10056_v8 = vrot.slane %v8607_v22, 9  ;;  %v8717_v1 = vrot.slane %v8608_v61, 5  ;;  %v13737_v19 = vpop.f32.mrb[50].mxu1  ;;  %v8062_v40 = vld [vmem:[#allocation3 + $0x38] sm:$0x1] }
 0x33b   : > { %7817 = vrot.lane.b32.xlu0 %v10007_v2, %s10870_s14  ;;  %v9945_v55 = vcombine.low %v6674_v60, %v6677_v38  ;;  %v5029_v28 = vadd.f32 %v10347_v50, %v13407_v4  ;;  %v6667_v17 = vsel %vm11529_vm0, %v9928_v41, %v6666_v47  ;;  %v6668_v43 = vrot.slane %v6666_v47, 4  ;;  %v13743_v16 = vpop.f32.mrb[51].mxu1 }
 0x33c   : > { %v5187_v54 = vadd.f32 %v13500_v14, %v5026_v56  ;;  %v8720_v7 = vrot.slane %v8609_v18, 5  ;;  %v8151_v36 = vshrl.u32 %v8060_v58, 16  ;;  %v8154_v49 = vshll.u32 %v8060_v58, 16  ;;  %v10765_v14 = vld [vmem:[%s14891_s4 + $0x10] sm:$0xff]   ;;  %v13751_v32 = vpop.f32.mrb[52].mxu1 }
 0x33d   : > { %6811 = vrot.lane.b32.xlu1 %v9945_v55, %s10871_s18  ;;  %v5190_v37 = vadd.f32 %v13520_v52, %v5029_v28  ;;  %v6670_v4 = vsel %vm11529_vm0, %v6668_v43, %v6669_v12  ;;  %v8160_v51 = vshll.u32 %v8061_v26, 16  ;;  %v8718_v60 = vsel %vm11529_vm0, %v10056_v8, %v8717_v1  ;;  %10409 = vmatpush3.bf16.msra.mxu1 %v10765_v14  ;;  %v6014_v56 = vld [vmem:[#allocation3 + $0x30] sm:$0xf]  ;;  %v6015_v14 = vld [vmem:[#allocation3 + $0x34] sm:$0xf] }
 0x33e   : > { %v5259_v21 = vmax.f32 %v5187_v54, 0.0  ;;  %v9944_v46 = vcombine.low %v6667_v17, %v6670_v4  ;;  %v8719_v30 = vrot.slane %v8717_v1, 4  ;;  %v8153_v33 = vrot.slane %v8151_v36, 4  ;;  %v5808_v17 = vld [vmem:[#allocation3 + $0x78] sm:$0xf] }
 0x33f   : > { %v5260_v52 = vmax.f32 %v5190_v37, 0.0  ;;  %7998 = vrot.lane.b32.xlu0 %v10748_v24, %s10871_s18  ;;  %v8156_v45 = vrot.slane %v8154_v49, 5  ;;  %v8162_v3 = vrot.slane %v8160_v51, 5  ;;  %v8164_v50 = vshrl.u32 %v8061_v26, 16  ;;  %v10749_v24 = vld [vmem:[#allocation3 + $0x48] sm:$0xff]  }
 0x340   : > { %v8894_v22 = vld [vmem:[#allocation5 + $0x40] sm:$0xff]  ;;  %v10145_v61 = vpack.c.bf16 %v5259_v21, %v5259_v21  ;;  %v8721_v2 = vsel %vm11529_vm0, %v8719_v30, %v8720_v7  ;;  %v8170_v41 = vshll.u32 %v8062_v40, 16  ;;  %v10350_v38 = vadd.f32 %v13663_v23, %v13656_v63  ;;  %v13761_v7 = vpop.f32.mrb[53].mxu1  ;;  %v5812_v37 = vld [vmem:[#allocation3 + $0x80] sm:$0x1] }
 0x341   : > { %10582 = vmatprep.mubr.msk.bf16.mxu0 %vm5985_vm7, %v8894_v22  ;;  %v10146_v47 = vpack.c.bf16 %v5260_v52, %v5260_v52  ;;  %6809 = vrot.lane.b32.xlu1 %v9944_v46, %s10871_s18  ;;  %v10072_v18 = vcombine.low %v8718_v60, %v8721_v2  ;;  %v8157_v58 = vor.u32 %v8156_v45, %v8153_v33  ;;  %v8166_v55 = vrot.slane %v8164_v50, 4  ;;  %v6016_v50 = vld [vmem:[#allocation3 + $0x38] sm:$0x1] }
 0x342   : > { %v5578_v12 = vshrl.u32 %v10145_v61, 16  ;;  %v5581_v8 = vshll.u32 %v10145_v61, 16  ;;  %v8172_v28 = vrot.slane %v8170_v41, 5  ;;  %v5034_v1 = vadd.f32 %v10350_v38, %v13411_v6  ;;  %v13769_v6 = vpop.f32.mrb[54].mxu1 }
 0x343   : > { %v5586_v43 = vshrl.u32 %v10146_v47, 16  ;;  %v5589_v54 = vshll.u32 %v10146_v47, 16  ;;  %8873 = vst.msk [vmem:[#allocation5 + $0x58] sm:$0xff] %vm5985_vm7, %v10072_v18  ;;  %v8158_v26 = vrot.slane %v8157_v58, 4  ;;  %v8167_v4 = vor.u32 %v8166_v55, %v8162_v3  ;;  %v13772_v52 = vpop.f32.mrb[55].mxu1 }
 0x344   : > { %v5580_v36 = vrot.slane %v5578_v12, 7  ;;  %v10353_v63 = vadd.f32 %v13676_v48, %v13670_v44  ;;  %v6147_v23 = vshrl.u32 %v6014_v56, 16  ;;  %v5195_v51 = vadd.f32 %v13550_v27, %v5034_v1  ;;  %v8610_v47 = vld [vmem:[#allocation3 + $0x48] sm:$0xe]  ;;  %v8611_v12 = vld [vmem:[#allocation3 + $0x4c] sm:$0xf] }
 0x345   : > { %v5588_v40 = vrot.slane %v5586_v43, 7  ;;  %v8163_v49 = vsel %vm11387_vm12, %v8158_v26, %v8162_v3  ;;  %6990 = vrot.lane.b32.xlu1 %v10749_v24, %s10872_s29  ;;  %v6150_v21 = vshll.u32 %v6014_v56, 16  ;;  %v8168_v30 = vrot.slane %v8167_v4, 4  ;;  %v10766_v3 = vld [vmem:[#allocation3] sm:$0xff]  }
 0x346   : > { %v5583_v46 = vor.u32 %v5581_v8, %v5580_v36  ;;  %v5584_v60 = vrot.slane %v5580_v36, 4  ;;  %v5037_v22 = vadd.f32 %v10353_v63, %v13417_v5  ;;  %v5261_v33 = vmax.f32 %v5195_v51, 0.0  ;;  %v10769_v5 = vld [vmem:[%s14891_s4 + $0x58] sm:$0xff]   ;;  %5986 = vst.msk [vmem:[#allocation5] sm:$0xff] %vm5985_vm7, %v10766_v3 }
 0x347   : > { %v5591_v44 = vor.u32 %v5589_v54, %v5588_v40  ;;  %v5593_v48 = vrot.slane %v5588_v40, 4  ;;  %v6149_v45 = vrot.slane %v6147_v23, 4  ;;  %v8173_v27 = vsel %vm11387_vm12, %v8168_v30, %v8172_v28  ;;  %10410 = vmatprep.subr.bf16.mxu1 %v10769_v5  ;;  %v10750_v26 = vld [vmem:[#allocation3 + $0x3c] sm:$0xff]   ;;  %v8058_v30 = vld [vmem:[#allocation3 + $0x28] sm:$0xf] }
 0x348   : > { %v5809_v61 = vsel %vm11268_vm9, %v5583_v46, %v5808_v17  ;;  %v5198_v2 = vadd.f32 %v13563_v57, %v5037_v22  ;;  %v6152_v41 = vrot.slane %v6150_v21, 5  ;;  %v10039_v38 = vcombine.low %v8163_v49, %v8173_v27  ;;  %v8612_v17 = vld [vmem:[#allocation3 + $0x50] sm:$0x1]  ;;  %v8057_v49 = vld [vmem:[#allocation3 + $0x24] sm:$0xf] }
 0x349   : > { %5810 = vst [vmem:[#allocation3 + $0x78] sm:$0xf] %v5809_v61  ;;  %v5592_v18 = vsel %vm11195_vm6, %v5584_v60, %v5591_v44  ;;  %v5813_v58 = vsel %vm11259_vm8, %v5593_v48, %v5812_v37  ;;  %v10147_v56 = vpack.c.bf16 %v5261_v33, %v5261_v33  ;;  %v6156_v28 = vshll.u32 %v6015_v14, 16  ;;  %v5815_v37 = vld [vmem:[#allocation3 + $0x84] sm:$0xf] }
 0x34a   : > { %5811 = vst.msk [vmem:[#allocation3 + $0x7c] sm:$0xf] %vm683_vm3, %v5592_v18  ;;  %5814 = vst [vmem:[#allocation3 + $0x80] sm:$0x1] %v5813_v58  ;;  %v8897_v57 = vld [vmem:[#allocation5 + $0x58] sm:$0xff]  ;;  %v5262_v8 = vmax.f32 %v5198_v2, 0.0  ;;  %v6153_v55 = vor.u32 %v6152_v41, %v6149_v45  ;;  %8538 = vrot.lane.b32.xlu0 %v10039_v38, %s10872_s29 }
 0x34b   : > { %v6160_v24 = vshrl.u32 %v6015_v14, 16  ;;  %10583 = vmatmul.mubr.msk.bf16.gmra.mrb[100].mxu0 %vm5985_vm7, %v8897_v57  ;;  %v5595_v43 = vshrl.u32 %v10147_v56, 16  ;;  %v5598_v54 = vshll.u32 %v10147_v56, 16  ;;  %v6166_v1 = vshll.u32 %v6016_v50, 16  ;;  %v10770_v51 = vld [vmem:[%s14891_s4 + $0x18] sm:$0xff]  }
 0x34c   : > { %v10057_v36 = vrot.slane %v8610_v47, 9  ;;  %v10148_v4 = vpack.c.bf16 %v5262_v8, %v5262_v8  ;;  %v6154_v63 = vrot.slane %v6153_v55, 4  ;;  %v6158_v23 = vrot.slane %v6156_v28, 5  ;;  %10411 = vmatpush3.bf16.msra.mxu1 %v10770_v51  ;;  %v5819_v18 = vld [vmem:[#allocation3 + $0x8c] sm:$0x1] }
 0x34d   : > { %v6162_v40 = vrot.slane %v6160_v24, 4  ;;  %v5597_v14 = vrot.slane %v5595_v43, 7  ;;  %v6168_v21 = vrot.slane %v6166_v1, 5  ;;  %v8724_v46 = vrot.slane %v8611_v12, 5  ;;  %v8059_v38 = vld [vmem:[#allocation3 + $0x2c] sm:$0x1] }
 0x34e   : > { %v8727_v60 = vrot.slane %v8612_v17, 5  ;;  %v5603_v22 = vshrl.u32 %v10148_v4, 16  ;;  %v5606_v44 = vshll.u32 %v10148_v4, 16  ;;  %v6159_v48 = vsel %vm11387_vm12, %v6154_v63, %v6158_v23  ;;  %7996 = vrot.lane.b32.xlu0 %v10750_v26, %s10871_s18  ;;  %v7572_v24 = vld [vmem:[#allocation3 + $0x48] sm:$0xe] }
 0x34f   : > { %v6163_v33 = vor.u32 %v6162_v40, %v6158_v23  ;;  %v5600_v45 = vor.u32 %v5598_v54, %v5597_v14  ;;  %v5601_v3 = vrot.slane %v5597_v14, 4  ;;  %v8725_v61 = vsel %vm11529_vm0, %v10057_v36, %v8724_v46  ;;  %v7573_v17 = vld [vmem:[#allocation3 + $0x4c] sm:$0xf]  ;;  %v7574_v36 = vld [vmem:[#allocation3 + $0x50] sm:$0x1] }
 0x350   : > { %v8726_v27 = vrot.slane %v8724_v46, 4  ;;  %v5605_v2 = vrot.slane %v5603_v22, 7  ;;  %v8127_v41 = vshrl.u32 %v8057_v49, 16  ;;  %v8130_v47 = vshll.u32 %v8057_v49, 16  ;;  %v6011_v40 = vld [vmem:[#allocation3 + $0x24] sm:$0xf] }
 0x351   : > { %v6164_v50 = vrot.slane %v6163_v33, 4  ;;  %v5816_v5 = vsel %vm11268_vm9, %v5600_v45, %v5815_v37  ;;  %v8136_v56 = vshll.u32 %v8058_v30, 16  ;;  %v8140_v12 = vshrl.u32 %v8058_v30, 16  ;;  %v13815_v46 = vpop.f32.mrb[92].mxu0  ;;  %v10751_v45 = vld [vmem:[#allocation3 + $0x3c] sm:$0xff]  }
 0x352   : > { %v8728_v58 = vsel %vm11529_vm0, %v8726_v27, %v8727_v60  ;;  %5817 = vst [vmem:[#allocation3 + $0x84] sm:$0xf] %v5816_v5  ;;  %v5608_v57 = vor.u32 %v5606_v44, %v5605_v2  ;;  %v5610_v8 = vrot.slane %v5605_v2, 4  ;;  %v8129_v54 = vrot.slane %v8127_v41, 4  ;;  %v6012_v27 = vld [vmem:[#allocation3 + $0x28] sm:$0xf] }
 0x353   : > { %v6169_v55 = vsel %vm11387_vm12, %v6164_v50, %v6168_v21  ;;  %v10073_v28 = vcombine.low %v8725_v61, %v8728_v58  ;;  %v8132_v26 = vrot.slane %v8130_v47, 5  ;;  %v8138_v1 = vrot.slane %v8136_v56, 5 }
 0x354   : > { %v9913_v43 = vcombine.low %v6159_v48, %v6169_v55  ;;  %v5609_v37 = vsel %vm11195_vm6, %v5601_v3, %v5608_v57  ;;  %v5820_v4 = vsel %vm11259_vm8, %v5610_v8, %v5819_v18  ;;  %v8142_v63 = vrot.slane %v8140_v12, 4  ;;  %v13817_v48 = vpop.f32.mrb[93].mxu0  ;;  %v8613_v57 = vld [vmem:[#allocation3 + $0x54] sm:$0xe]  ;;  %v8614_v8 = vld [vmem:[#allocation3 + $0x58] sm:$0xf] }
 0x355   : > { %8874 = vst.msk [vmem:[#allocation5 + $0x70] sm:$0xff] %vm5985_vm7, %v10073_v28  ;;  %v8146_v23 = vshll.u32 %v8059_v38, 16  ;;  %5821 = vst [vmem:[#allocation3 + $0x8c] sm:$0x1] %v5820_v4  ;;  %v8133_v49 = vor.u32 %v8132_v26, %v8129_v54  ;;  %v10356_v51 = vadd.f32 %v13689_v15, %v13687_v13  ;;  %v10359_v14 = vadd.f32 %v13700_v39, %v13698_v9  ;;  %v13823_v50 = vpop.f32.mrb[94].mxu0 }
 0x356   : > { %5818 = vst.msk [vmem:[#allocation3 + $0x88] sm:$0xf] %vm683_vm3, %v5609_v37  ;;  %6490 = vrot.lane.b32.xlu1 %v9913_v43, %s10870_s14  ;;  %v9994_v21 = vrot.slane %v7572_v24, 9  ;;  %v8143_v60 = vor.u32 %v8142_v63, %v8138_v1  ;;  %v7690_v22 = vrot.slane %v7573_v17, 5  ;;  %v7693_v44 = vrot.slane %v7574_v36, 5  ;;  %v13830_v18 = vpop.f32.mrb[95].mxu0 }
 0x357   : > { %v8148_v30 = vrot.slane %v8146_v23, 5  ;;  %v8134_v33 = vrot.slane %v8133_v49, 4  ;;  %v5042_v3 = vadd.f32 %v10356_v51, %v13442_v53  ;;  %v5045_v61 = vadd.f32 %v10359_v14, %v13446_v31  ;;  %v6013_v31 = vld [vmem:[#allocation3 + $0x2c] sm:$0x1]  ;;  %v10778_v43 = vld [vmem:[#allocation3 + $0x18] sm:$0xff]  }
 0x358   : > { %v6123_v13 = vshrl.u32 %v6011_v40, 16  ;;  %v8144_v15 = vrot.slane %v8143_v60, 4  ;;  %v7691_v9 = vsel %vm11529_vm0, %v9994_v21, %v7690_v22  ;;  %v7692_v39 = vrot.slane %v7690_v22, 4  ;;  %v7570_v49 = vld [vmem:[#allocation3 + $0x40] sm:$0xf]  ;;  %5988 = vst.msk [vmem:[#allocation5 + $0x30] sm:$0xff] %vm5985_vm7, %v10778_v43 }
 0x359   : > { %v6126_v2 = vshll.u32 %v6011_v40, 16  ;;  %v8139_v41 = vsel %vm11387_vm12, %v8134_v33, %v8138_v1  ;;  %v5203_v47 = vadd.f32 %v13546_v20, %v5042_v3  ;;  %v5206_v53 = vadd.f32 %v13556_v29, %v5045_v61  ;;  %v8615_v29 = vld [vmem:[#allocation3 + $0x5c] sm:$0x1]  ;;  %v7569_v40 = vld [vmem:[#allocation3 + $0x3c] sm:$0xe] }
 0x35a   : > { %6988 = vrot.lane.b32.xlu1 %v10751_v45, %s10872_s29  ;;  %v6125_v5 = vrot.slane %v6123_v13, 4  ;;  %v8149_v58 = vsel %vm11387_vm12, %v8144_v15, %v8148_v30  ;;  %v7694_v38 = vsel %vm11529_vm0, %v7692_v39, %v7693_v44  ;;  %v6132_v12 = vshll.u32 %v6012_v27, 16  ;;  %v7571_v30 = vld [vmem:[#allocation3 + $0x44] sm:$0x1]  ;;  %v6565_v3 = vld [vmem:[#allocation3 + $0x48] sm:$0xe] }
 0x35b   : > { %v6128_v56 = vrot.slane %v6126_v2, 5  ;;  %v10038_v28 = vcombine.low %v8139_v41, %v8149_v58  ;;  %v5263_v24 = vmax.f32 %v5203_v47, 0.0  ;;  %v5264_v20 = vmax.f32 %v5206_v53, 0.0  ;;  %v5822_v61 = vld [vmem:[#allocation3 + $0x90] sm:$0xf] }
 0x35c   : > { %v8900_v55 = vld [vmem:[#allocation5 + $0x70] sm:$0xff]  ;;  %v10010_v17 = vcombine.low %v7691_v9, %v7694_v38  ;;  %v6134_v26 = vrot.slane %v6132_v12, 5  ;;  %v6136_v1 = vshrl.u32 %v6012_v27, 16  ;;  %v6142_v36 = vshll.u32 %v6013_v31, 16  ;;  %v5826_v27 = vld [vmem:[#allocation3 + $0x98] sm:$0x1] }
 0x35d   : > { %10586 = vmatprep.mubr.msk.bf16.mxu0 %vm5985_vm7, %v8900_v55  ;;  %v6129_v54 = vor.u32 %v6128_v56, %v6125_v5  ;;  %8536 = vrot.lane.b32.xlu0 %v10038_v28, %s10872_s29  ;;  %v10149_v37 = vpack.c.bf16 %v5263_v24, %v5263_v24  ;;  %v10150_v4 = vpack.c.bf16 %v5264_v20, %v5264_v20  ;;  %v10058_v63 = vrot.slane %v8613_v57, 9  ;;  %v10773_v56 = vld [vmem:[%s14891_s4 + $0x60] sm:$0xff]   ;;  %v6567_v24 = vld [vmem:[#allocation3 + $0x50] sm:$0x1] }
 0x35e   : > { %v8731_v23 = vrot.slane %v8614_v8, 5  ;;  %v6138_v14 = vrot.slane %v6136_v1, 4  ;;  %v6144_v21 = vrot.slane %v6142_v36, 5  ;;  %v8734_v60 = vrot.slane %v8615_v29, 5  ;;  %v6566_v28 = vld [vmem:[#allocation3 + $0x4c] sm:$0xf]  ;;  %10412 = vmatprep.subr.bf16.mxu1 %v10773_v56 }
 0x35f   : > { %v6130_v51 = vrot.slane %v6129_v54, 4  ;;  %v5612_v22 = vshrl.u32 %v10149_v37, 16  ;;  %v5615_v44 = vshll.u32 %v10149_v37, 16  ;;  %v5620_v33 = vshrl.u32 %v10150_v4, 16  ;;  %v6562_v54 = vld [vmem:[#allocation3 + $0x3c] sm:$0xe] }
 0x360   : > { %v5623_v45 = vshll.u32 %v10150_v4, 16  ;;  %v6139_v15 = vor.u32 %v6138_v14, %v6134_v26  ;;  %v8732_v9 = vsel %vm11529_vm0, %v10058_v63, %v8731_v23  ;;  %v8733_v39 = vrot.slane %v8731_v23, 4  ;;  %v10774_v1 = vld [vmem:[%s14891_s4 + $0x20] sm:$0xff]   ;;  %v6564_v23 = vld [vmem:[#allocation3 + $0x44] sm:$0x1] }
 0x361   : > { %v6135_v13 = vsel %vm11387_vm12, %v6130_v51, %v6134_v26  ;;  %v5614_v2 = vrot.slane %v5612_v22, 7  ;;  %v5622_v41 = vrot.slane %v5620_v33, 7  ;;  %7823 = vrot.lane.b32.xlu0 %v10010_v17, %s10870_s14  ;;  %v9993_v47 = vrot.slane %v7569_v40, 9  ;;  %v6563_v26 = vld [vmem:[#allocation3 + $0x40] sm:$0xf]  ;;  %10413 = vmatpush3.bf16.msra.mxu1 %v10774_v1 }
 0x362   : > { %v7683_v53 = vrot.slane %v7570_v49, 5  ;;  %v6140_v31 = vrot.slane %v6139_v15, 4  ;;  %v8735_v5 = vsel %vm11529_vm0, %v8733_v39, %v8734_v60  ;;  %v7686_v58 = vrot.slane %v7571_v30, 5  ;;  %v8617_v33 = vld [vmem:[#allocation3 + $0x64] sm:$0xf] }
 0x363   : > { %v9931_v38 = vrot.slane %v6565_v3, 9  ;;  %v5617_v12 = vor.u32 %v5615_v44, %v5614_v2  ;;  %v5618_v57 = vrot.slane %v5614_v2, 4  ;;  %v5625_v8 = vor.u32 %v5623_v45, %v5622_v41  ;;  %v8618_v45 = vld [vmem:[#allocation3 + $0x68] sm:$0x1] }
 0x364   : > { %v5627_v55 = vrot.slane %v5622_v41, 4  ;;  %v6145_v20 = vsel %vm11387_vm12, %v6140_v31, %v6144_v21  ;;  %v10074_v17 = vcombine.low %v8732_v9, %v8735_v5  ;;  %v7684_v29 = vsel %vm11529_vm0, %v9993_v47, %v7683_v53  ;;  %v8616_v21 = vld [vmem:[#allocation3 + $0x60] sm:$0xe]  ;;  %v8067_v31 = vld [vmem:[#allocation3 + $0x4c] sm:$0xf] }
 0x365   : > { %v7685_v43 = vrot.slane %v7683_v53, 4  ;;  %v5823_v36 = vsel %vm11268_vm9, %v5617_v12, %v5822_v61  ;;  %v5626_v37 = vsel %vm11195_vm6, %v5618_v57, %v5625_v8  ;;  %v9912_v63 = vcombine.low %v6135_v13, %v6145_v20  ;;  %v8068_v12 = vld [vmem:[#allocation3 + $0x50] sm:$0x1] }
 0x366   : > { %v5827_v4 = vsel %vm11259_vm8, %v5627_v55, %v5826_v27  ;;  %5824 = vst [vmem:[#allocation3 + $0x90] sm:$0xf] %v5823_v36  ;;  %5825 = vst.msk [vmem:[#allocation3 + $0x94] sm:$0xf] %vm683_vm3, %v5626_v37  ;;  %v6687_v49 = vrot.slane %v6566_v28, 5  ;;  %v6690_v51 = vrot.slane %v6567_v24, 5  ;;  %v10362_v14 = vadd.f32 %v13734_v35, %v13708_v25 }
 0x367   : > { %5828 = vst [vmem:[#allocation3 + $0x98] sm:$0x1] %v5827_v4  ;;  %8875 = vst.msk [vmem:[#allocation5 + $0x88] sm:$0xff] %vm5985_vm7, %v10074_v17  ;;  %v7687_v40 = vsel %vm11529_vm0, %v7685_v43, %v7686_v58  ;;  %6488 = vrot.lane.b32.xlu1 %v9912_v63, %s10870_s14  ;;  %v10365_v30 = vadd.f32 %v13743_v16, %v13737_v19  ;;  %v9930_v22 = vrot.slane %v6562_v54, 9  ;;  %v6680_v44 = vrot.slane %v6563_v26, 5  ;;  %v15034_v27 = vld [vmem:[#allocation12_spill] sm:$0xff] }
 0x368   : > { %v10009_v60 = vcombine.low %v7684_v29, %v7687_v40  ;;  %v6688_v3 = vsel %vm11529_vm0, %v9931_v38, %v6687_v49  ;;  %v6689_v61 = vrot.slane %v6687_v49, 4  ;;  %v5050_v13 = vadd.f32 %v10362_v14, %v15034_v27  ;;  %v8066_v25 = vld [vmem:[#allocation3 + $0x48] sm:$0xf]  ;;  %v10752_v38 = vld [vmem:[#allocation3 + $0x60] sm:$0xff]   ;;  %v10775_v8 = vld [vmem:[%s14891_s4 + $0x68] sm:$0xff]  }
 0x369   : > { %v6683_v15 = vrot.slane %v6564_v23, 5  ;;  %v15035_v35 = vld [vmem:[#allocation15_spill] sm:$0xff]  ;;  %v6681_v39 = vsel %vm11529_vm0, %v9930_v22, %v6680_v44  ;;  %v6682_v19 = vrot.slane %v6680_v44, 4  ;;  %v10059_v16 = vrot.slane %v8616_v21, 9  ;;  %10414 = vmatprep.subr.bf16.mxu1 %v10775_v8  ;;  %v15039_v8 = vld [vmem:[#allocation26_spill] sm:$0xff] }
 0x36a   : > { %7821 = vrot.lane.b32.xlu0 %v10009_v60, %s10870_s14  ;;  %v5053_v9 = vadd.f32 %v10365_v30, %v15035_v35  ;;  %v6691_v2 = vsel %vm11529_vm0, %v6689_v61, %v6690_v51  ;;  %v5211_v41 = vadd.f32 %v13583_v59, %v5050_v13  ;;  %v8738_v47 = vrot.slane %v8617_v33, 5  ;;  %v6020_v40 = vld [vmem:[#allocation3 + $0x48] sm:$0xf]  ;;  %v10753_v35 = vld [vmem:[#allocation3 + $0x60] sm:$0xff]  }
 0x36b   : > { %v8741_v53 = vrot.slane %v8618_v45, 5  ;;  %v9947_v5 = vcombine.low %v6688_v3, %v6691_v2  ;;  %v6684_v56 = vsel %vm11529_vm0, %v6682_v19, %v6683_v15  ;;  %v8199_v57 = vshrl.u32 %v8066_v25, 16  ;;  %v5829_v45 = vld [vmem:[#allocation3 + $0x9c] sm:$0xf]  ;;  %v5833_v3 = vld [vmem:[#allocation3 + $0xa4] sm:$0x1] }
 0x36c   : > { %v5214_v58 = vadd.f32 %v13590_v34, %v5053_v9  ;;  %v5265_v55 = vmax.f32 %v5211_v41, 0.0  ;;  %v9946_v28 = vcombine.low %v6681_v39, %v6684_v56  ;;  %v8739_v59 = vsel %vm11529_vm0, %v10059_v16, %v8738_v47  ;;  %v15036_v9 = vld [vmem:[#allocation16_spill] sm:$0xff]  ;;  %v6021_v19 = vld [vmem:[#allocation3 + $0x4c] sm:$0xf] }
 0x36d   : > { %v8740_v24 = vrot.slane %v8738_v47, 4  ;;  %6815 = vrot.lane.b32.xlu1 %v9947_v5, %s10871_s18  ;;  %v8201_v17 = vrot.slane %v8199_v57, 4  ;;  %v8202_v29 = vshll.u32 %v8066_v25, 16  ;;  %v8208_v43 = vshll.u32 %v8067_v31, 16 }
 0x36e   : > { %v8903_v20 = vld [vmem:[#allocation5 + $0x88] sm:$0xff]  ;;  %v5266_v34 = vmax.f32 %v5214_v58, 0.0  ;;  %8002 = vrot.lane.b32.xlu0 %v10752_v38, %s10871_s18  ;;  %v10151_v54 = vpack.c.bf16 %v5265_v55, %v5265_v55  ;;  %v8212_v1 = vshrl.u32 %v8067_v31, 16  ;;  %v8218_v36 = vshll.u32 %v8068_v12, 16  ;;  %v13906_v38 = vpop.permute.xlu1 %6482  ;;  %v13908_v56 = vpop.f32.mrb[56].mxu1 }
 0x36f   : > { %10587 = vmatmul.mubr.msk.bf16.gmra.mrb[104].mxu0 %vm5985_vm7, %v8903_v20  ;;  %v8742_v26 = vsel %vm11529_vm0, %v8740_v24, %v8741_v53  ;;  %v8204_v63 = vrot.slane %v8202_v29, 5  ;;  %v8210_v23 = vrot.slane %v8208_v43, 5  ;;  %v10368_v44 = vadd.f32 %v13761_v7, %v13751_v32  ;;  %v15037_v53 = vld [vmem:[#allocation20_spill] sm:$0xff]  ;;  %v13915_v20 = vpop.f32.mrb[57].mxu1  ;;  %6531 = vst.msk [vmem:[#allocation5] sm:$0xff] %vm6530_vm11, %v13906_v38 }
 0x370   : > { %v10152_v37 = vpack.c.bf16 %v5266_v34, %v5266_v34  ;;  %v10075_v4 = vcombine.low %v8739_v59, %v8742_v26  ;;  %v5629_v49 = vshrl.u32 %v10151_v54, 16  ;;  %v5632_v51 = vshll.u32 %v10151_v54, 16  ;;  %v6022_v7 = vld [vmem:[#allocation3 + $0x50] sm:$0x1]  ;;  %v8619_v59 = vld [vmem:[#allocation3 + $0x6c] sm:$0xe] }
 0x371   : > { %v8214_v14 = vrot.slane %v8212_v1, 4  ;;  %v8220_v21 = vrot.slane %v8218_v36, 5  ;;  %6813 = vrot.lane.b32.xlu1 %v9946_v28, %s10871_s18  ;;  %v8205_v22 = vor.u32 %v8204_v63, %v8201_v17  ;;  %v10371_v27 = vadd.f32 %v13772_v52, %v13769_v6  ;;  %v15038_v6 = vld [vmem:[#allocation28_spill] sm:$0xff]  ;;  %v13921_v54 = vpop.f32.mrb[58].mxu1 }
 0x372   : > { %v5637_v60 = vshrl.u32 %v10152_v37, 16  ;;  %v5640_v30 = vshll.u32 %v10152_v37, 16  ;;  %8876 = vst.msk [vmem:[#allocation5 + $0xa0] sm:$0xff] %vm5985_vm7, %v10075_v4  ;;  %v5631_v33 = vrot.slane %v5629_v49, 7  ;;  %v6195_v13 = vshrl.u32 %v6020_v40, 16  ;;  %v13924_v63 = vpop.f32.mrb[59].mxu1 }
 0x373   : > { %v8215_v61 = vor.u32 %v8214_v14, %v8210_v23  ;;  %v8206_v25 = vrot.slane %v8205_v22, 4  ;;  %v5058_v39 = vadd.f32 %v10368_v44, %v15036_v9  ;;  %v6198_v16 = vshll.u32 %v6020_v40, 16  ;;  %v8620_v24 = vld [vmem:[#allocation3 + $0x70] sm:$0xf]  ;;  %v8621_v44 = vld [vmem:[#allocation3 + $0x74] sm:$0x1] }
 0x374   : > { %v5639_v15 = vrot.slane %v5637_v60, 7  ;;  %v5634_v2 = vor.u32 %v5632_v51, %v5631_v33  ;;  %v5635_v41 = vrot.slane %v5631_v33, 4  ;;  %v5061_v32 = vadd.f32 %v10371_v27, %v15037_v53  ;;  %v8063_v33 = vld [vmem:[#allocation3 + $0x3c] sm:$0xf] }
 0x375   : > { %v8216_v47 = vrot.slane %v8215_v61, 4  ;;  %v8211_v58 = vsel %vm11387_vm12, %v8206_v25, %v8210_v23  ;;  %6994 = vrot.lane.b32.xlu1 %v10753_v35, %s10872_s29  ;;  %v5219_v52 = vadd.f32 %v15038_v6, %v5058_v39  ;;  %v6197_v28 = vrot.slane %v6195_v13, 4  ;;  %v10756_v61 = vld [vmem:[#allocation3 + $0x54] sm:$0xff]   ;;  %v5836_v35 = vld [vmem:[#allocation3 + $0xa8] sm:$0xf] }
 0x376   : > { %v5642_v31 = vor.u32 %v5640_v30, %v5639_v15  ;;  %v5644_v5 = vrot.slane %v5639_v15, 4  ;;  %v5830_v12 = vsel %vm11268_vm9, %v5634_v2, %v5829_v45  ;;  %v5222_v55 = vadd.f32 %v15039_v8, %v5061_v32  ;;  %v13928_v14 = vpop.f32.mrb[60].mxu1  ;;  %v13932_v15 = vpop.permute.xlu1 %6803  ;;  %v8064_v6 = vld [vmem:[#allocation3 + $0x40] sm:$0xf] }
 0x377   : > { %v8221_v57 = vsel %vm11387_vm12, %v8216_v47, %v8220_v21  ;;  %5831 = vst [vmem:[#allocation3 + $0x9c] sm:$0xf] %v5830_v12  ;;  %v5267_v43 = vmax.f32 %v5219_v52, 0.0  ;;  %v6200_v36 = vrot.slane %v6198_v16, 5  ;;  %v6204_v37 = vshll.u32 %v6021_v19, 16  ;;  %v13934_v25 = vpop.f32.mrb[61].mxu1 }
 0x378   : > { %v5643_v34 = vsel %vm11195_vm6, %v5635_v41, %v5642_v31  ;;  %v5834_v17 = vsel %vm11259_vm8, %v5644_v5, %v5833_v3  ;;  %v10041_v29 = vcombine.low %v8211_v58, %v8221_v57  ;;  %v5268_v1 = vmax.f32 %v5222_v55, 0.0  ;;  %v13936_v2 = vpop.f32.mrb[62].mxu1  ;;  %v5840_v47 = vld [vmem:[#allocation3 + $0xb0] sm:$0x1]  ;;  %6852 = vst.msk [vmem:[#allocation5] sm:$0xff] %vm6851_vm13, %v13932_v15 }
 0x379   : > { %5832 = vst.msk [vmem:[#allocation3 + $0xa0] sm:$0xf] %vm683_vm3, %v5643_v34  ;;  %5835 = vst [vmem:[#allocation3 + $0xa4] sm:$0x1] %v5834_v17  ;;  %v8906_v26 = vld [vmem:[#allocation5 + $0xa0] sm:$0xff]  ;;  %v6208_v4 = vshrl.u32 %v6021_v19, 16  ;;  %v10153_v23 = vpack.c.bf16 %v5267_v43, %v5267_v43  ;;  %v6201_v60 = vor.u32 %v6200_v36, %v6197_v28 }
 0x37a   : > { %10590 = vmatprep.mubr.msk.bf16.mxu0 %vm5985_vm7, %v8906_v26  ;;  %8542 = vrot.lane.b32.xlu0 %v10041_v29, %s10872_s29  ;;  %v6214_v40 = vshll.u32 %v6022_v7, 16  ;;  %v10060_v49 = vrot.slane %v8619_v59, 9  ;;  %v8745_v51 = vrot.slane %v8620_v24, 5  ;;  %v10154_v21 = vpack.c.bf16 %v5268_v1, %v5268_v1  ;;  %v13941_v12 = vpop.f32.mrb[63].mxu1  ;;  %v8065_v28 = vld [vmem:[#allocation3 + $0x44] sm:$0x1] }
 0x37b   : > { %v6206_v30 = vrot.slane %v6204_v37, 5  ;;  %v6210_v22 = vrot.slane %v6208_v4, 4  ;;  %v5646_v45 = vshrl.u32 %v10153_v23, 16  ;;  %v5649_v3 = vshll.u32 %v10153_v23, 16  ;;  %v7578_v24 = vld [vmem:[#allocation3 + $0x60] sm:$0xe] }
 0x37c   : > { %v6216_v27 = vrot.slane %v6214_v40, 5  ;;  %v8746_v13 = vsel %vm11529_vm0, %v10060_v49, %v8745_v51  ;;  %v5654_v9 = vshrl.u32 %v10154_v21, 16  ;;  %v5657_v39 = vshll.u32 %v10154_v21, 16  ;;  %v7579_v26 = vld [vmem:[#allocation3 + $0x64] sm:$0xf]  ;;  %v10777_v1 = vld [vmem:[%s14891_s4 + $0x28] sm:$0xff]  }
 0x37d   : > { %v6202_v19 = vrot.slane %v6201_v60, 4  ;;  %v6211_v16 = vor.u32 %v6210_v22, %v6206_v30  ;;  %v5648_v41 = vrot.slane %v5646_v45, 7  ;;  %v8747_v53 = vrot.slane %v8745_v51, 4  ;;  %v7580_v40 = vld [vmem:[#allocation3 + $0x68] sm:$0x1]  ;;  %v13952_v51 = vpop.permute.xlu1 %6982  ;;  %10415 = vmatpush3.bf16.msra.mxu1 %v10777_v1 }
 0x37e   : > { %8000 = vrot.lane.b32.xlu0 %v10756_v61, %s10871_s18  ;;  %v8748_v32 = vrot.slane %v8621_v44, 5  ;;  %v8175_v7 = vshrl.u32 %v8063_v33, 16  ;;  %v5656_v31 = vrot.slane %v5654_v9, 7  ;;  %v8178_v52 = vshll.u32 %v8063_v33, 16  ;;  %v6017_v49 = vld [vmem:[#allocation3 + $0x3c] sm:$0xf] }
 0x37f   : > { %v6207_v5 = vsel %vm11387_vm12, %v6202_v19, %v6206_v30  ;;  %v6212_v58 = vrot.slane %v6211_v16, 4  ;;  %v5651_v57 = vor.u32 %v5649_v3, %v5648_v41  ;;  %v5652_v8 = vrot.slane %v5648_v41, 4  ;;  %v6018_v44 = vld [vmem:[#allocation3 + $0x40] sm:$0xf]  ;;  %v10757_v3 = vld [vmem:[#allocation3 + $0x54] sm:$0xff]  }
 0x380   : > { %v8749_v55 = vsel %vm11529_vm0, %v8747_v53, %v8748_v32  ;;  %v8177_v59 = vrot.slane %v8175_v7, 4  ;;  %v5659_v34 = vor.u32 %v5657_v39, %v5656_v31  ;;  %v5661_v17 = vrot.slane %v5656_v31, 4  ;;  %v8622_v41 = vld [vmem:[#allocation3 + $0x78] sm:$0xe]  ;;  %v8623_v31 = vld [vmem:[#allocation3 + $0x7c] sm:$0xf] }
 0x381   : > { %v6217_v29 = vsel %vm11387_vm12, %v6212_v58, %v6216_v27  ;;  %v10076_v43 = vcombine.low %v8746_v13, %v8749_v55  ;;  %v5837_v36 = vsel %vm11268_vm9, %v5651_v57, %v5836_v35  ;;  %v8180_v4 = vrot.slane %v8178_v52, 5  ;;  %v6019_v13 = vld [vmem:[#allocation3 + $0x44] sm:$0x1]  ;;  %v10779_v35 = vld [vmem:[%s14891_s4 + $0x70] sm:$0xff]  }
 0x382   : > { %v9915_v37 = vcombine.low %v6207_v5, %v6217_v29  ;;  %v8184_v23 = vshll.u32 %v8064_v6, 16  ;;  %5838 = vst [vmem:[#allocation3 + $0xa8] sm:$0xf] %v5837_v36  ;;  %v5660_v21 = vsel %vm11195_vm6, %v5652_v8, %v5659_v34  ;;  %v5841_v60 = vsel %vm11259_vm8, %v5661_v17, %v5840_v47  ;;  %10416 = vmatprep.subr.bf16.mxu1 %v10779_v35  ;;  %v10780_v5 = vld [vmem:[%s14891_s4 + $0x30] sm:$0xff]   ;;  %v8624_v8 = vld [vmem:[#allocation3 + $0x80] sm:$0x1] }
 0x383   : > { %8877 = vst.msk [vmem:[#allocation5 + $0xb8] sm:$0xff] %vm5985_vm7, %v10076_v43  ;;  %v8188_v30 = vshrl.u32 %v8064_v6, 16  ;;  %v8194_v22 = vshll.u32 %v8065_v28, 16  ;;  %5842 = vst [vmem:[#allocation3 + $0xb0] sm:$0x1] %v5841_v60  ;;  %v8181_v33 = vor.u32 %v8180_v4, %v8177_v59  ;;  %v9996_v61 = vrot.slane %v7578_v24, 9  ;;  %v13979_v43 = vpop.permute.xlu1 %6980  ;;  %10417 = vmatpush3.bf16.msra.mxu1 %v10780_v5 }
 0x384   : > { %5839 = vst.msk [vmem:[#allocation3 + $0xac] sm:$0xf] %vm683_vm3, %v5660_v21  ;;  %6494 = vrot.lane.b32.xlu1 %v9915_v37, %s10870_s14  ;;  %v8186_v45 = vrot.slane %v8184_v23, 5  ;;  %v7704_v27 = vrot.slane %v7579_v26, 5  ;;  %v7707_v19 = vrot.slane %v7580_v40, 5  ;;  %v6171_v16 = vshrl.u32 %v6017_v49, 16 }
 0x385   : > { %v8190_v9 = vrot.slane %v8188_v30, 4  ;;  %v8196_v39 = vrot.slane %v8194_v22, 5  ;;  %v8182_v47 = vrot.slane %v8181_v33, 4  ;;  %v6174_v7 = vshll.u32 %v6017_v49, 16  ;;  %v10781_v55 = vld [vmem:[%s14891_s4 + $0x78] sm:$0xff]   ;;  %7029 = vst.msk [vmem:[#allocation5] sm:$0xff] %vm7028_vm14, %v13979_v43 }
 0x386   : > { %v13966_v53 = vsel %vm11529_vm0, %v9996_v61, %v7704_v27  ;;  %v7706_v32 = vrot.slane %v7704_v27, 4  ;;  %v6173_v6 = vrot.slane %v6171_v16, 4  ;;  %v6180_v52 = vshll.u32 %v6018_v44, 16  ;;  %v7575_v17 = vld [vmem:[#allocation3 + $0x54] sm:$0xe]  ;;  %10418 = vmatprep.subr.bf16.mxu1 %v10781_v55 }
 0x387   : > { %v8191_v58 = vor.u32 %v8190_v9, %v8186_v45  ;;  %v6184_v57 = vshrl.u32 %v6018_v44, 16  ;;  %v8187_v28 = vsel %vm11387_vm12, %v8182_v47, %v8186_v45  ;;  %v6176_v24 = vrot.slane %v6174_v7, 5  ;;  %v7576_v29 = vld [vmem:[#allocation3 + $0x58] sm:$0xf]  ;;  %v7577_v4 = vld [vmem:[#allocation3 + $0x5c] sm:$0x1] }
 0x388   : > { %6992 = vrot.lane.b32.xlu1 %v10757_v3, %s10872_s29  ;;  %v7708_v59 = vsel %vm11529_vm0, %v7706_v32, %v7707_v19  ;;  %v6190_v34 = vshll.u32 %v6019_v13, 16  ;;  %v6182_v36 = vrot.slane %v6180_v52, 5  ;;  %v10061_v21 = vrot.slane %v8622_v41, 9  ;;  %v6571_v30 = vld [vmem:[#allocation3 + $0x60] sm:$0xe] }
 0x389   : > { %v8192_v26 = vrot.slane %v8191_v58, 4  ;;  %v10012_v1 = vcombine.low %v13966_v53, %v7708_v59  ;;  %v6186_v37 = vrot.slane %v6184_v57, 4  ;;  %v6177_v40 = vor.u32 %v6176_v24, %v6173_v6  ;;  %v6572_v3 = vld [vmem:[#allocation3 + $0x64] sm:$0xf]  ;;  %v6573_v61 = vld [vmem:[#allocation3 + $0x68] sm:$0x1]  ;;  %v13992_v57 = vpop.permute.xlu1 %6807 }
 0x38a   : > { %v8909_v23 = vld [vmem:[#allocation5 + $0xb8] sm:$0xff]  ;;  %v6192_v49 = vrot.slane %v6190_v34, 5  ;;  %v8752_v60 = vrot.slane %v8623_v31, 5  ;;  %v8755_v33 = vrot.slane %v8624_v8, 5  ;;  %v9995_v45 = vrot.slane %v7575_v17, 9 }
 0x38b   : > { %10591 = vmatmul.mubr.msk.bf16.gmra.mrb[108].mxu0 %vm5985_vm7, %v8909_v23  ;;  %v8197_v22 = vsel %vm11387_vm12, %v8192_v26, %v8196_v39  ;;  %v6187_v44 = vor.u32 %v6186_v37, %v6182_v36  ;;  %v6178_v13 = vrot.slane %v6177_v40, 4  ;;  %v6568_v19 = vld [vmem:[#allocation3 + $0x54] sm:$0xe]  ;;  %v6569_v16 = vld [vmem:[#allocation3 + $0x58] sm:$0xf]  ;;  %v7697_v47 = vrot.slane %v7576_v29, 5 }
 0x38c   : > { %v10040_v27 = vcombine.low %v8187_v28, %v8197_v22  ;;  %v8753_v35 = vsel %vm11529_vm0, %v10061_v21, %v8752_v60  ;;  %v8754_v9 = vrot.slane %v8752_v60, 4  ;;  %v7700_v53 = vrot.slane %v7577_v4, 5  ;;  %v6570_v7 = vld [vmem:[#allocation3 + $0x5c] sm:$0x1]  ;;  %v8625_v6 = vld [vmem:[#allocation3 + $0x84] sm:$0xe] }
 0x38d   : > { %v6188_v41 = vrot.slane %v6187_v44, 4  ;;  %v9933_v32 = vrot.slane %v6571_v30, 9  ;;  %v6183_v39 = vsel %vm11387_vm12, %v6178_v13, %v6182_v36  ;;  %v6701_v5 = vrot.slane %v6572_v3, 5  ;;  %v8626_v52 = vld [vmem:[#allocation3 + $0x88] sm:$0xf] }
 0x38e   : > { %8540 = vrot.lane.b32.xlu0 %v10040_v27, %s10872_s29  ;;  %v8756_v31 = vsel %vm11529_vm0, %v8754_v9, %v8755_v33  ;;  %v6704_v58 = vrot.slane %v6573_v61, 5  ;;  %v7698_v28 = vsel %vm11529_vm0, %v9995_v45, %v7697_v47  ;;  %v7699_v59 = vrot.slane %v7697_v47, 4  ;;  %v8627_v24 = vld [vmem:[#allocation3 + $0x8c] sm:$0x1]  ;;  %v8072_v34 = vld [vmem:[#allocation3 + $0x60] sm:$0xf]  ;;  %v14007_v33 = vpop.permute.xlu0 %7990 }
 0x38f   : > { %v6193_v8 = vsel %vm11387_vm12, %v6188_v41, %v6192_v49  ;;  %v10077_v55 = vcombine.low %v8753_v35, %v8756_v31  ;;  %v6702_v29 = vsel %vm11529_vm0, %v9933_v32, %v6701_v5  ;;  %v6703_v26 = vrot.slane %v6701_v5, 4  ;;  %v8073_v49 = vld [vmem:[#allocation3 + $0x64] sm:$0xf]  ;;  %v8074_v44 = vld [vmem:[#allocation3 + $0x68] sm:$0x1]  ;;  %v10785_v31 = vld [vmem:[#allocation3 + $0xc] sm:$0xff]  }
 0x390   : > { %v9914_v17 = vcombine.low %v6183_v39, %v6193_v8  ;;  %v9932_v36 = vrot.slane %v6568_v19, 9  ;;  %v7701_v37 = vsel %vm11529_vm0, %v7699_v59, %v7700_v53  ;;  %v6694_v4 = vrot.slane %v6569_v16, 5  ;;  %v6026_v19 = vld [vmem:[#allocation3 + $0x60] sm:$0xf]  ;;  %v14013_v16 = vpop.permute.xlu1 %6805  ;;  %v6027_v39 = vld [vmem:[#allocation3 + $0x64] sm:$0xf] }
 0x391   : > { %8878 = vst.msk [vmem:[#allocation5 + $0xd0] sm:$0xff] %vm5985_vm7, %v10077_v55  ;;  %v6697_v23 = vrot.slane %v6570_v7, 5  ;;  %v10062_v40 = vrot.slane %v8625_v6, 9  ;;  %v10011_v21 = vcombine.low %v7698_v28, %v7701_v37  ;;  %v6705_v60 = vsel %vm11529_vm0, %v6703_v26, %v6704_v58  ;;  %v10784_v41 = vld [vmem:[%s14891_s4 + $0x38] sm:$0xff]   ;;  %v6028_v8 = vld [vmem:[#allocation3 + $0x68] sm:$0x1] }
 0x392   : > { %7827 = vrot.lane.b32.xlu0 %v10012_v1, %s10870_s14  ;;  %6492 = vrot.lane.b32.xlu1 %v9914_v17, %s10870_s14  ;;  %v8759_v30 = vrot.slane %v8626_v52, 5  ;;  %v8762_v22 = vrot.slane %v8627_v24, 5  ;;  %v9949_v45 = vcombine.low %v6702_v29, %v6705_v60  ;;  %v6695_v3 = vsel %vm11529_vm0, %v9932_v36, %v6694_v4  ;;  %v8628_v55 = vld [vmem:[#allocation3 + $0x90] sm:$0xe]  ;;  %v14024_v28 = vpop.permute.xlu0 %7815  ;;  %v10760_v59 = vld [vmem:[#allocation3 + $0x78] sm:$0xff]   ;;  %5987 = vst.msk [vmem:[#allocation5 + $0x18] sm:$0xff] %vm5985_vm7, %v10785_v31 }
 0x393   : > { %v6696_v61 = vrot.slane %v6694_v4, 4  ;;  %v8247_v27 = vshrl.u32 %v8072_v34, 16  ;;  %v8250_v35 = vshll.u32 %v8072_v34, 16  ;;  %v8256_v9 = vshll.u32 %v8073_v49, 16  ;;  %v8629_v26 = vld [vmem:[#allocation3 + $0x94] sm:$0xf]  ;;  %10419 = vmatpush3.bf16.msra.mxu1 %v10784_v41 }
 0x394   : > { %v8760_v1 = vsel %vm11529_vm0, %v10062_v40, %v8759_v30  ;;  %v8761_v13 = vrot.slane %v8759_v30, 4  ;;  %v8260_v32 = vshrl.u32 %v8073_v49, 16  ;;  %v8266_v7 = vshll.u32 %v8074_v44, 16  ;;  %v8069_v36 = vld [vmem:[#allocation3 + $0x54] sm:$0xf] }
 0x395   : > { %v6698_v47 = vsel %vm11529_vm0, %v6696_v61, %v6697_v23  ;;  %v8249_v53 = vrot.slane %v8247_v27, 4  ;;  %v8252_v6 = vrot.slane %v8250_v35, 5  ;;  %v8258_v52 = vrot.slane %v8256_v9, 5  ;;  %v10761_v61 = vld [vmem:[#allocation3 + $0x78] sm:$0xff]   ;;  %v14031_v9 = vpop.permute.xlu1 %6986 }
 0x396   : > { %7825 = vrot.lane.b32.xlu0 %v10011_v21, %s10870_s14  ;;  %6819 = vrot.lane.b32.xlu1 %v9949_v45, %s10871_s18  ;;  %v9948_v5 = vcombine.low %v6695_v3, %v6698_v47  ;;  %v8763_v58 = vsel %vm11529_vm0, %v8761_v13, %v8762_v22  ;;  %v8262_v34 = vrot.slane %v8260_v32, 4  ;;  %v8268_v17 = vrot.slane %v8266_v7, 5  ;;  %v8630_v21 = vld [vmem:[#allocation3 + $0x98] sm:$0x1]  ;;  %v10787_v45 = vld [vmem:[#allocation3 + $0x30] sm:$0xff]  }
 0x397   : > { %v10078_v24 = vcombine.low %v8760_v1, %v8763_v58  ;;  %v6243_v29 = vshrl.u32 %v6026_v19, 16  ;;  %v8253_v4 = vor.u32 %v8252_v6, %v8249_v53  ;;  %v6246_v23 = vshll.u32 %v6026_v19, 16  ;;  %v8070_v35 = vld [vmem:[#allocation3 + $0x58] sm:$0xf]  ;;  %5990 = vst.msk [vmem:[#allocation5 + $0x60] sm:$0xff] %vm5985_vm7, %v10787_v45  ;;  %v14036_v58 = vpop.permute.xlu0 %7813  ;;  %v10789_v6 = vld [vmem:[#allocation3 + $0x24] sm:$0xff]  }
 0x398   : > { %v8912_v37 = vld [vmem:[#allocation5 + $0xd0] sm:$0xff]  ;;  %v6252_v40 = vshll.u32 %v6027_v39, 16  ;;  %v6256_v49 = vshrl.u32 %v6027_v39, 16  ;;  %v8263_v60 = vor.u32 %v8262_v34, %v8258_v52  ;;  %v6262_v22 = vshll.u32 %v6028_v8, 16  ;;  %v8071_v31 = vld [vmem:[#allocation3 + $0x5c] sm:$0x1] }
 0x399   : > { %10594 = vmatprep.mubr.msk.bf16.mxu0 %vm5985_vm7, %v8912_v37  ;;  %8879 = vst.msk [vmem:[#allocation5 + $0xe8] sm:$0xff] %vm5985_vm7, %v10078_v24  ;;  %v6245_v30 = vrot.slane %v6243_v29, 4  ;;  %v10063_v44 = vrot.slane %v8628_v55, 9  ;;  %v8254_v3 = vrot.slane %v8253_v4, 4  ;;  %v6248_v27 = vrot.slane %v6246_v23, 5  ;;  %5989 = vst.msk [vmem:[#allocation5 + $0x48] sm:$0xff] %vm5985_vm7, %v10789_v6 }
 0x39a   : > { %8006 = vrot.lane.b32.xlu0 %v10760_v59, %s10871_s18  ;;  %6817 = vrot.lane.b32.xlu1 %v9948_v5, %s10871_s18  ;;  %v6254_v1 = vrot.slane %v6252_v40, 5  ;;  %v6258_v13 = vrot.slane %v6256_v49, 4  ;;  %v8264_v19 = vrot.slane %v8263_v60, 4  ;;  %v6264_v41 = vrot.slane %v6262_v22, 5  ;;  %v7584_v34 = vld [vmem:[#allocation3 + $0x78] sm:$0xe] }
 0x39b   : > { %v8766_v47 = vrot.slane %v8629_v26, 5  ;;  %v8769_v53 = vrot.slane %v8630_v21, 5  ;;  %v8259_v32 = vsel %vm11387_vm12, %v8254_v3, %v8258_v52  ;;  %v6249_v7 = vor.u32 %v6248_v27, %v6245_v30  ;;  %v7585_v29 = vld [vmem:[#allocation3 + $0x7c] sm:$0xf]  ;;  %v7586_v26 = vld [vmem:[#allocation3 + $0x80] sm:$0x1] }
 0x39c   : > { %v6259_v39 = vor.u32 %v6258_v13, %v6254_v1  ;;  %v8223_v5 = vshrl.u32 %v8069_v36, 16  ;;  %v8269_v8 = vsel %vm11387_vm12, %v8264_v19, %v8268_v17  ;;  %v8226_v24 = vshll.u32 %v8069_v36, 16  ;;  %v10795_v40 = vld [vmem:[#allocation3 + $0x3c] sm:$0xff]   ;;  %v6023_v3 = vld [vmem:[#allocation3 + $0x54] sm:$0xf] }
 0x39d   : > { %v8767_v55 = vsel %vm11529_vm0, %v10063_v44, %v8766_v47  ;;  %v8768_v59 = vrot.slane %v8766_v47, 4  ;;  %v10043_v37 = vcombine.low %v8259_v32, %v8269_v8  ;;  %v6250_v52 = vrot.slane %v6249_v7, 4  ;;  %5991 = vst.msk [vmem:[#allocation5 + $0x78] sm:$0xff] %vm5985_vm7, %v10795_v40  ;;  %v6025_v6 = vld [vmem:[#allocation3 + $0x5c] sm:$0x1] }
 0x39e   : > { %6998 = vrot.lane.b32.xlu1 %v10761_v61, %s10872_s29  ;;  %v6260_v4 = vrot.slane %v6259_v39, 4  ;;  %v8225_v23 = vrot.slane %v8223_v5, 4  ;;  %v8228_v49 = vrot.slane %v8226_v24, 5  ;;  %v8232_v21 = vshll.u32 %v8070_v35, 16  ;;  %v14051_v61 = vpop.permute.xlu0 %7994  ;;  %v14053_v27 = vpop.permute.xlu1 %6486 }
 0x39f   : > { %v8770_v17 = vsel %vm11529_vm0, %v8768_v59, %v8769_v53  ;;  %v8236_v60 = vshrl.u32 %v8070_v35, 16  ;;  %8546 = vrot.lane.b32.xlu0 %v10043_v37, %s10872_s29  ;;  %v6255_v36 = vsel %vm11387_vm12, %v6250_v52, %v6254_v1  ;;  %v8242_v45 = vshll.u32 %v8071_v31, 16  ;;  %v6024_v53 = vld [vmem:[#allocation3 + $0x58] sm:$0xf]  ;;  %v10762_v1 = vld [vmem:[#allocation3 + $0x6c] sm:$0xff]   ;;  %6533 = vst.msk [vmem:[#allocation5 + $0x30] sm:$0xff] %vm6530_vm11, %v14053_v27 }
 0x3a0   : > { %v8915_v30 = vld [vmem:[#allocation5 + $0xe8] sm:$0xff]  ;;  %v6265_v22 = vsel %vm11387_vm12, %v6260_v4, %v6264_v41  ;;  %v10079_v44 = vcombine.low %v8767_v55, %v8770_v17  ;;  %v8229_v35 = vor.u32 %v8228_v49, %v8225_v23  ;;  %v8234_v19 = vrot.slane %v8232_v21, 5  ;;  %v10793_v59 = vld [vmem:[#allocation3 + $0x48] sm:$0xff]   ;;  %6854 = vst.msk [vmem:[#allocation5 + $0x30] sm:$0xff] %vm6851_vm13, %v13992_v57  ;;  %v10767_v57 = vld [vmem:[#allocation3 + $0x90] sm:$0xff]  }
 0x3a1   : > { %10595 = vmatmul.mubr.msk.bf16.gmra.mrb[112].mxu0 %vm5985_vm7, %v8915_v30  ;;  %v9917_v13 = vcombine.low %v6255_v36, %v6265_v22  ;;  %v8238_v47 = vrot.slane %v8236_v60, 4  ;;  %v8244_v41 = vrot.slane %v8242_v45, 5  ;;  %v9998_v32 = vrot.slane %v7584_v34, 9  ;;  %v8631_v34 = vld [vmem:[#allocation3 + $0x9c] sm:$0xe]  ;;  %v10763_v17 = vld [vmem:[#allocation3 + $0x6c] sm:$0xff]  }
 0x3a2   : > { %8880 = vst.msk [vmem:[#allocation5 + $0x100] sm:$0xff] %vm5985_vm7, %v10079_v44  ;;  %v7718_v7 = vrot.slane %v7585_v29, 5  ;;  %v7721_v39 = vrot.slane %v7586_v26, 5  ;;  %v8230_v31 = vrot.slane %v8229_v35, 4  ;;  %v6219_v8 = vshrl.u32 %v6023_v3, 16  ;;  %v14066_v30 = vpop.permute.xlu1 %6984  ;;  %5992 = vst.msk [vmem:[#allocation5 + $0x90] sm:$0xff] %vm5985_vm7, %v10793_v59 }
 0x3a3   : > { %6498 = vrot.lane.b32.xlu1 %v9917_v13, %s10870_s14  ;;  %v8239_v5 = vor.u32 %v8238_v47, %v8234_v19  ;;  %v6222_v55 = vshll.u32 %v6023_v3, 16  ;;  %8004 = vrot.lane.b32.xlu0 %v10762_v1, %s10871_s18  ;;  %v6228_v52 = vshll.u32 %v6024_v53, 16  ;;  %v6232_v4 = vshrl.u32 %v6024_v53, 16  ;;  %v7581_v29 = vld [vmem:[#allocation3 + $0x6c] sm:$0xe]  ;;  %v14071_v13 = vpop.permute.xlu0 %8534  ;;  %7031 = vst.msk [vmem:[#allocation5 + $0x30] sm:$0xff] %vm7028_vm14, %v14066_v30 }
 0x3a4   : > { %v14062_v24 = vsel %vm11529_vm0, %v9998_v32, %v7718_v7  ;;  %v7720_v37 = vrot.slane %v7718_v7, 4  ;;  %v7582_v26 = vld [vmem:[#allocation3 + $0x70] sm:$0xf]  ;;  %v8235_v23 = vsel %vm11387_vm12, %v8230_v31, %v8234_v19  ;;  %v6221_v49 = vrot.slane %v6219_v8, 4  ;;  %v8632_v60 = vld [vmem:[#allocation3 + $0xa0] sm:$0xf] }
 0x3a5   : > { %v8240_v40 = vrot.slane %v8239_v5, 4  ;;  %v6224_v21 = vrot.slane %v6222_v55, 5  ;;  %v6230_v22 = vrot.slane %v6228_v52, 5  ;;  %v6234_v44 = vrot.slane %v6232_v4, 4  ;;  %v8633_v3 = vld [vmem:[#allocation3 + $0xa4] sm:$0x1] }
 0x3a6   : > { %v7722_v36 = vsel %vm11529_vm0, %v7720_v37, %v7721_v39  ;;  %v6238_v45 = vshll.u32 %v6025_v6, 16  ;;  %v10064_v53 = vrot.slane %v8631_v34, 9  ;;  %v7583_v1 = vld [vmem:[#allocation3 + $0x74] sm:$0x1]  ;;  %v6577_v32 = vld [vmem:[#allocation3 + $0x78] sm:$0xe] }
 0x3a7   : > { %v8245_v35 = vsel %vm11387_vm12, %v8240_v40, %v8244_v41  ;;  %6996 = vrot.lane.b32.xlu1 %v10763_v17, %s10872_s29  ;;  %v10014_v19 = vcombine.low %v14062_v24, %v7722_v36  ;;  %v6225_v47 = vor.u32 %v6224_v21, %v6221_v49  ;;  %v6235_v31 = vor.u32 %v6234_v44, %v6230_v22  ;;  %v6578_v8 = vld [vmem:[#allocation3 + $0x7c] sm:$0xf]  ;;  %v6579_v6 = vld [vmem:[#allocation3 + $0x80] sm:$0x1]  ;;  %v6574_v41 = vld [vmem:[#allocation3 + $0x6c] sm:$0xe] }
 0x3a8   : > { %v10042_v7 = vcombine.low %v8235_v23, %v8245_v35  ;;  %v6240_v39 = vrot.slane %v6238_v45, 5  ;;  %v8773_v5 = vrot.slane %v8632_v60, 5  ;;  %v8776_v37 = vrot.slane %v8633_v3, 5  ;;  %v6575_v17 = vld [vmem:[#allocation3 + $0x70] sm:$0xf]  ;;  %v10797_v30 = vld [vmem:[#allocation3 + $0x54] sm:$0xff]  }
 0x3a9   : > { %v8918_v55 = vld [vmem:[#allocation5 + $0x100] sm:$0xff]  ;;  %v6226_v59 = vrot.slane %v6225_v47, 4  ;;  %v9997_v52 = vrot.slane %v7581_v29, 9  ;;  %v7711_v4 = vrot.slane %v7582_v26, 5  ;;  %v6236_v24 = vrot.slane %v6235_v31, 4  ;;  %v14089_v31 = vpop.permute.xlu0 %7992  ;;  %5993 = vst.msk [vmem:[#allocation5 + $0xa8] sm:$0xff] %vm5985_vm7, %v10797_v30 }
 0x3aa   : > { %10598 = vmatprep.mubr.msk.bf16.mxu0 %vm5985_vm7, %v8918_v55  ;;  %8544 = vrot.lane.b32.xlu0 %v10042_v7, %s10872_s29  ;;  %v8774_v34 = vsel %vm11529_vm0, %v10064_v53, %v8773_v5  ;;  %v8775_v23 = vrot.slane %v8773_v5, 4  ;;  %v7714_v40 = vrot.slane %v7583_v1, 5  ;;  %v6576_v49 = vld [vmem:[#allocation3 + $0x74] sm:$0x1]  ;;  %v9935_v60 = vrot.slane %v6577_v32, 9  ;;  %v6485_v45 = vpop.permute.xlu1 %6484 }
 0x3ab   : > { %v6231_v21 = vsel %vm11387_vm12, %v6226_v59, %v6230_v22  ;;  %v7712_v29 = vsel %vm11529_vm0, %v9997_v52, %v7711_v4  ;;  %v7713_v26 = vrot.slane %v7711_v4, 4  ;;  %v8634_v36 = vld [vmem:[#allocation3 + $0xa8] sm:$0xe]  ;;  %v8078_v44 = vld [vmem:[#allocation3 + $0x78] sm:$0xf]  ;;  %v6241_v3 = vsel %vm11387_vm12, %v6236_v24, %v6240_v39  ;;  %6532 = vst.msk [vmem:[#allocation5 + $0x18] sm:$0xff] %vm6530_vm11, %v6485_v45 }
 0x3ac   : > { %v8777_v35 = vsel %vm11529_vm0, %v8775_v23, %v8776_v37  ;;  %v6715_v47 = vrot.slane %v6578_v8, 5  ;;  %v6718_v53 = vrot.slane %v6579_v6, 5  ;;  %v8635_v1 = vld [vmem:[#allocation3 + $0xac] sm:$0xf]  ;;  %v8636_v7 = vld [vmem:[#allocation3 + $0xb0] sm:$0x1]  ;;  %v9916_v22 = vcombine.low %v6231_v21, %v6241_v3 }
 0x3ad   : > { %v10080_v5 = vcombine.low %v8774_v34, %v8777_v35  ;;  %v7715_v32 = vsel %vm11529_vm0, %v7713_v26, %v7714_v40  ;;  %v9934_v8 = vrot.slane %v6574_v41, 9  ;;  %v8079_v6 = vld [vmem:[#allocation3 + $0x7c] sm:$0xf]  ;;  %v6711_v37 = vrot.slane %v6576_v49, 5  ;;  %v8080_v24 = vld [vmem:[#allocation3 + $0x80] sm:$0x1]  ;;  %v14116_v45 = vpop.permute.xlu0 %7819 }
 0x3ae   : > { %7831 = vrot.lane.b32.xlu0 %v10014_v19, %s10870_s14  ;;  %v10013_v55 = vcombine.low %v7712_v29, %v7715_v32  ;;  %v6716_v39 = vsel %vm11529_vm0, %v9935_v60, %v6715_v47  ;;  %v6717_v59 = vrot.slane %v6715_v47, 4  ;;  %6496 = vrot.lane.b32.xlu1 %v9916_v22, %s10870_s14  ;;  %v6708_v19 = vrot.slane %v6575_v17, 5  ;;  %v6032_v23 = vld [vmem:[#allocation3 + $0x78] sm:$0xf]  ;;  %v6033_v17 = vld [vmem:[#allocation3 + $0x7c] sm:$0xf] }
 0x3af   : > { %8881 = vst.msk [vmem:[#allocation5 + $0x118] sm:$0xff] %vm5985_vm7, %v10080_v5  ;;  %v10065_v52 = vrot.slane %v8634_v36, 9  ;;  %v8780_v4 = vrot.slane %v8635_v1, 5  ;;  %v8783_v38 = vrot.slane %v8636_v7, 5  ;;  %v8295_v41 = vshrl.u32 %v8078_v44, 16 }
 0x3b0   : > { %v6719_v34 = vsel %vm11529_vm0, %v6717_v59, %v6718_v53  ;;  %v6709_v27 = vsel %vm11529_vm0, %v9934_v8, %v6708_v19  ;;  %v6710_v21 = vrot.slane %v6708_v19, 4  ;;  %6853 = vst.msk [vmem:[#allocation5 + $0x18] sm:$0xff] %vm6851_vm13, %v14013_v16  ;;  %v8298_v60 = vshll.u32 %v8078_v44, 16  ;;  %v6034_v22 = vld [vmem:[#allocation3 + $0x80] sm:$0x1] }
 0x3b1   : > { %v9951_v40 = vcombine.low %v6716_v39, %v6719_v34  ;;  %v8781_v29 = vsel %vm11529_vm0, %v10065_v52, %v8780_v4  ;;  %v8782_v49 = vrot.slane %v8780_v4, 4  ;;  %v8297_v26 = vrot.slane %v8295_v41, 4  ;;  %v14124_v52 = vpop.permute.xlu1 %6811  ;;  %7030 = vst.msk [vmem:[#allocation5 + $0x18] sm:$0xff] %vm7028_vm14, %v13952_v51 }
 0x3b2   : > { %7829 = vrot.lane.b32.xlu0 %v10013_v55, %s10870_s14  ;;  %v8304_v36 = vshll.u32 %v8079_v6, 16  ;;  %v6712_v15 = vsel %vm11529_vm0, %v6710_v21, %v6711_v37  ;;  %v8308_v3 = vshrl.u32 %v8079_v6, 16  ;;  %v8314_v35 = vshll.u32 %v8080_v24, 16  ;;  %v7049_v37 = vld [vmem:[#allocation3 + $0x1c] sm:$0xf] }
 0x3b3   : > { %6823 = vrot.lane.b32.xlu1 %v9951_v40, %s10871_s18  ;;  %v6291_v47 = vshrl.u32 %v6032_v23, 16  ;;  %v9950_v53 = vcombine.low %v6709_v27, %v6712_v15  ;;  %v8784_v16 = vsel %vm11529_vm0, %v8782_v49, %v8783_v38  ;;  %v8300_v1 = vrot.slane %v8298_v60, 5  ;;  %v7050_v38 = vld [vmem:[#allocation3 + $0x20] sm:$0x1]  ;;  %v7048_v21 = vld [vmem:[#allocation3 + $0x18] sm:$0xf] }
 0x3b4   : > { %v8306_v7 = vrot.slane %v8304_v36, 5  ;;  %v10081_v44 = vcombine.low %v8781_v29, %v8784_v16  ;;  %v8310_v5 = vrot.slane %v8308_v3, 4  ;;  %v8316_v32 = vrot.slane %v8314_v35, 5  ;;  %v14137_v29 = vpop.permute.xlu0 %7817  ;;  %v8075_v3 = vld [vmem:[#allocation3 + $0x6c] sm:$0xf] }
 0x3b5   : > { %v6293_v55 = vrot.slane %v6291_v47, 4  ;;  %v8301_v59 = vor.u32 %v8300_v1, %v8297_v26  ;;  %v6294_v8 = vshll.u32 %v6032_v23, 16  ;;  %v6300_v6 = vshll.u32 %v6033_v17, 16 }
 0x3b6   : > { %v8921_v39 = vld [vmem:[#allocation5 + $0x118] sm:$0xff]  ;;  %8010 = vrot.lane.b32.xlu0 %v10767_v57, %s10871_s18  ;;  %v6304_v19 = vshrl.u32 %v6033_v17, 16  ;;  %8882 = vst.msk [vmem:[#allocation5 + $0x130] sm:$0xff] %vm5985_vm7, %v10081_v44  ;;  %v8311_v4 = vor.u32 %v8310_v5, %v8306_v7  ;;  %v6310_v24 = vshll.u32 %v6034_v22, 16  ;;  %v10374_v34 = vadd.f32 %v13915_v20, %v13908_v56  ;;  %v14148_v22 = vpop.permute.xlu1 %6809 }
 0x3b7   : > { %10599 = vmatmul.mubr.msk.bf16.gmra.mrb[116].mxu0 %vm5985_vm7, %v8921_v39  ;;  %6821 = vrot.lane.b32.xlu1 %v9950_v53, %s10871_s18  ;;  %v8302_v41 = vrot.slane %v8301_v59, 4  ;;  %v6296_v23 = vrot.slane %v6294_v8, 5  ;;  %v6302_v40 = vrot.slane %v6300_v6, 5  ;;  %v10768_v56 = vld [vmem:[#allocation3 + $0x90] sm:$0xff]   ;;  %v10377_v49 = vadd.f32 %v13924_v63, %v13921_v54 }
 0x3b8   : > { %v6306_v27 = vrot.slane %v6304_v19, 4  ;;  %v8312_v17 = vrot.slane %v8311_v4, 4  ;;  %v6312_v20 = vrot.slane %v6310_v24, 5  ;;  %v7127_v26 = vshll.u32 %v7049_v37, 16  ;;  %v8076_v53 = vld [vmem:[#allocation3 + $0x70] sm:$0xf] }
 0x3b9   : > { %v8307_v60 = vsel %vm11387_vm12, %v8302_v41, %v8306_v7  ;;  %v6297_v43 = vor.u32 %v6296_v23, %v6293_v55  ;;  %v7131_v15 = vshrl.u32 %v7049_v37, 16  ;;  %v7137_v47 = vshll.u32 %v7050_v38, 16  ;;  %v8077_v7 = vld [vmem:[#allocation3 + $0x74] sm:$0x1]  ;;  %v14157_v37 = vpop.permute.xlu0 %7998  ;;  %v10771_v4 = vld [vmem:[#allocation3 + $0x84] sm:$0xff]  }
 0x3ba   : > { %v6307_v36 = vor.u32 %v6306_v27, %v6302_v40  ;;  %v8317_v51 = vsel %vm11387_vm12, %v8312_v17, %v8316_v32  ;;  %v14146_v35 = vrot.slane %v7127_v26, 5  ;;  %v7118_v57 = vshrl.u32 %v7048_v21, 16 }
 0x3bb   : > { %7002 = vrot.lane.b32.xlu1 %v10768_v56, %s10872_s29  ;;  %v10045_v54 = vcombine.low %v8307_v60, %v8317_v51  ;;  %v6298_v63 = vrot.slane %v6297_v43, 4  ;;  %v7133_v1 = vrot.slane %v7131_v15, 4  ;;  %v7139_v44 = vrot.slane %v7137_v47, 5  ;;  %v15040_v60 = vld [vmem:[#allocation13_spill] sm:$0xff] }
 0x3bc   : > { %v6308_v16 = vrot.slane %v6307_v36, 4  ;;  %v7120_v5 = vrot.slane %v7118_v57, 4  ;;  %v7121_v55 = vshll.u32 %v7048_v21, 16  ;;  %v8271_v32 = vshrl.u32 %v8075_v3, 16  ;;  %v15041_v36 = vld [vmem:[#allocation17_spill] sm:$0xff] }
 0x3bd   : > { %v8924_v39 = vld [vmem:[#allocation5 + $0x130] sm:$0xff]  ;;  %8550 = vrot.lane.b32.xlu0 %v10045_v54, %s10872_s29  ;;  %v6303_v59 = vsel %vm11387_vm12, %v6298_v63, %v6302_v40  ;;  %v7134_v6 = vor.u32 %v7133_v1, %v14146_v35  ;;  %v8274_v19 = vshll.u32 %v8075_v3, 16  ;;  %v8280_v23 = vshll.u32 %v8076_v53, 16  ;;  %v7046_v3 = vld [vmem:[#allocation3 + $0x10] sm:$0xf]  ;;  %v14166_v54 = vpop.permute.xlu1 %6990 }
 0x3be   : > { %v6313_v8 = vsel %vm11387_vm12, %v6308_v16, %v6312_v20  ;;  %10602 = vmatprep.mubr.msk.bf16.mxu0 %vm5985_vm7, %v8924_v39  ;;  %v7123_v38 = vrot.slane %v7121_v55, 5  ;;  %v8273_v41 = vrot.slane %v8271_v32, 4  ;;  %v8284_v17 = vshrl.u32 %v8076_v53, 16  ;;  %v7045_v40 = vld [vmem:[#allocation3 + $0xc] sm:$0xf]  ;;  %v10772_v53 = vld [vmem:[#allocation3 + $0x84] sm:$0xff]  }
 0x3bf   : > { %v9919_v24 = vcombine.low %v6303_v59, %v6313_v8  ;;  %v7135_v27 = vrot.slane %v7134_v6, 4  ;;  %v8276_v21 = vrot.slane %v8274_v19, 5  ;;  %v8290_v56 = vshll.u32 %v8077_v7, 16  ;;  %v10796_v59 = vld [vmem:[#allocation3 + $0x60] sm:$0xff]  }
 0x3c0   : > { %v7124_v20 = vor.u32 %v7123_v38, %v7120_v5  ;;  %v8282_v26 = vrot.slane %v8280_v23, 5  ;;  %v5066_v43 = vadd.f32 %v10374_v34, %v15040_v60  ;;  %v5069_v15 = vadd.f32 %v10377_v49, %v15041_v36  ;;  %v7047_v34 = vld [vmem:[#allocation3 + $0x14] sm:$0x1]  ;;  %v14170_v49 = vld [vmem:[#allocation3 + $0x90] sm:$0xe]  ;;  %5994 = vst.msk [vmem:[#allocation5 + $0xc0] sm:$0xff] %vm5985_vm7, %v10796_v59 }
 0x3c1   : > { %6502 = vrot.lane.b32.xlu1 %v9919_v24, %s10870_s14  ;;  %8008 = vrot.lane.b32.xlu0 %v10771_v4, %s10871_s18  ;;  %v7140_v30 = vsel %vm11387_vm12, %v7135_v27, %v7139_v44  ;;  %v8277_v51 = vor.u32 %v8276_v21, %v8273_v41  ;;  %v8286_v47 = vrot.slane %v8284_v17, 4  ;;  %v8292_v57 = vrot.slane %v8290_v56, 5  ;;  %v14172_v44 = vpop.permute.xlu0 %8538  ;;  %v7591_v17 = vld [vmem:[#allocation3 + $0x94] sm:$0xf]  ;;  %v6029_v60 = vld [vmem:[#allocation3 + $0x6c] sm:$0xf] }
 0x3c2   : > { %v7125_v63 = vrot.slane %v7124_v20, 4  ;;  %v5227_v16 = vadd.f32 %v13817_v48, %v5066_v43  ;;  %v5230_v1 = vadd.f32 %v13830_v18, %v5069_v15  ;;  %v7094_v7 = vshrl.u32 %v7045_v40, 16  ;;  %v7592_v20 = vld [vmem:[#allocation3 + $0x98] sm:$0x1] }
 0x3c3   : > { %v8278_v5 = vrot.slane %v8277_v51, 4  ;;  %v8287_v55 = vor.u32 %v8286_v47, %v8282_v26  ;;  %v7097_v32 = vshll.u32 %v7045_v40, 16  ;;  %v7103_v39 = vshll.u32 %v7046_v3, 16  ;;  %v10799_v51 = vld [vmem:[#allocation3 + $0x6c] sm:$0xff]   ;;  %v5843_v47 = vld [vmem:[#allocation3 + $0xb4] sm:$0xf] }
 0x3c4   : > { %v7130_v8 = vsel %vm11387_vm12, %v7125_v63, %v14146_v35  ;;  %v5269_v48 = vmax.f32 %v5227_v16, 0.0  ;;  %v5270_v6 = vmax.f32 %v5230_v1, 0.0  ;;  %v7096_v18 = vrot.slane %v7094_v7, 4  ;;  %v5847_v7 = vld [vmem:[#allocation3 + $0xbc] sm:$0x1]  ;;  %5995 = vst.msk [vmem:[#allocation5 + $0xd8] sm:$0xff] %vm5985_vm7, %v10799_v51 }
 0x3c5   : > { %7000 = vrot.lane.b32.xlu1 %v10772_v53, %s10872_s29  ;;  %v9974_v19 = vcombine.low %v7130_v8, %v7140_v30  ;;  %v8283_v4 = vsel %vm11387_vm12, %v8278_v5, %v8282_v26  ;;  %v8288_v24 = vrot.slane %v8287_v55, 4  ;;  %v7099_v38 = vrot.slane %v7097_v32, 5  ;;  %v14192_v1 = vpop.permute.xlu0 %7996  ;;  %v6030_v32 = vld [vmem:[#allocation3 + $0x70] sm:$0xf] }
 0x3c6   : > { %v10155_v41 = vpack.c.bf16 %v5269_v48, %v5269_v48  ;;  %v10156_v23 = vpack.c.bf16 %v5270_v6, %v5270_v6  ;;  %v14181_v27 = vrot.slane %v7103_v39, 5  ;;  %v7107_v21 = vshrl.u32 %v7046_v3, 16  ;;  %v6031_v39 = vld [vmem:[#allocation3 + $0x74] sm:$0x1] }
 0x3c7   : > { %7542 = vst.msk [vmem:[#allocation5 + $0x20] sm:$0xff] %vm5985_vm7, %v9974_v19  ;;  %v8293_v35 = vsel %vm11387_vm12, %v8288_v24, %v8292_v57  ;;  %v7100_v56 = vor.u32 %v7099_v38, %v7096_v18  ;;  %v7113_v40 = vshll.u32 %v7047_v34, 16  ;;  %v10000_v26 = vrot.slane %v14170_v49, 9 }
 0x3c8   : > { %v6491_v43 = vpop.permute.xlu1 %6490  ;;  %7862 = vst.msk [vmem:[#allocation5 + $0x20] sm:$0xff] %vm6530_vm11, %v14024_v28  ;;  %v10044_v36 = vcombine.low %v8283_v4, %v8293_v35  ;;  %v5663_v15 = vshrl.u32 %v10155_v41, 16  ;;  %v5666_v30 = vshll.u32 %v10155_v41, 16  ;;  %v5671_v3 = vshrl.u32 %v10156_v23, 16 }
 0x3c9   : > { %6535 = vst.msk [vmem:[#allocation5 + $0x60] sm:$0xff] %vm6530_vm11, %v6491_v43  ;;  %v5674_v53 = vshll.u32 %v10156_v23, 16  ;;  %v7101_v57 = vrot.slane %v7100_v56, 4  ;;  %v7109_v63 = vrot.slane %v7107_v21, 4  ;;  %v7115_v16 = vrot.slane %v7113_v40, 5  ;;  %v10798_v21 = vld [vmem:[#allocation3 + $0x78] sm:$0xff]  }
 0x3ca   : > { %8039 = vst.msk [vmem:[#allocation5 + $0x20] sm:$0xff] %vm6851_vm13, %v14089_v31  ;;  %6856 = vst.msk [vmem:[#allocation5 + $0x60] sm:$0xff] %vm6851_vm13, %v14124_v52  ;;  %8548 = vrot.lane.b32.xlu0 %v10044_v36, %s10872_s29  ;;  %v5665_v28 = vrot.slane %v5663_v15, 7  ;;  %v5673_v34 = vrot.slane %v5671_v3, 7  ;;  %v7732_v49 = vrot.slane %v7591_v17, 5  ;;  %v7735_v5 = vrot.slane %v7592_v20, 5 }
 0x3cb   : > { %v7106_v55 = vsel %vm11387_vm12, %v7101_v57, %v14181_v27  ;;  %v7110_v31 = vor.u32 %v7109_v63, %v14181_v27  ;;  %v6267_v59 = vshrl.u32 %v6029_v60, 16  ;;  %v6270_v8 = vshll.u32 %v6029_v60, 16  ;;  %v7587_v23 = vld [vmem:[#allocation3 + $0x84] sm:$0xe]  ;;  %v7588_v40 = vld [vmem:[#allocation3 + $0x88] sm:$0xf] }
 0x3cc   : > { %v6989_v52 = vpop.permute.xlu1 %6988  ;;  %v5668_v48 = vor.u32 %v5666_v30, %v5665_v28  ;;  %v5669_v6 = vrot.slane %v5665_v28, 4  ;;  %v5676_v18 = vor.u32 %v5674_v53, %v5673_v34  ;;  %v5678_v19 = vrot.slane %v5673_v34, 4  ;;  %v7589_v20 = vld [vmem:[#allocation3 + $0x8c] sm:$0x1]  ;;  %5996 = vst.msk [vmem:[#allocation5 + $0xf0] sm:$0xff] %vm5985_vm7, %v10798_v21 }
 0x3cd   : > { %7033 = vst.msk [vmem:[#allocation5 + $0x60] sm:$0xff] %vm7028_vm14, %v6989_v52  ;;  %v7111_v4 = vrot.slane %v7110_v31, 4  ;;  %v7733_v24 = vsel %vm11529_vm0, %v10000_v26, %v7732_v49  ;;  %v7734_v38 = vrot.slane %v7732_v49, 4  ;;  %v6269_v41 = vrot.slane %v6267_v59, 4  ;;  %v6583_v53 = vld [vmem:[#allocation3 + $0x90] sm:$0xe] }
 0x3ce   : > { %v5844_v27 = vsel %vm11268_vm9, %v5668_v48, %v5843_v47  ;;  %v5677_v17 = vsel %vm11195_vm6, %v5669_v6, %v5676_v18  ;;  %v5848_v35 = vsel %vm11259_vm8, %v5678_v19, %v5847_v7  ;;  %v6272_v56 = vrot.slane %v6270_v8, 5  ;;  %v6584_v57 = vld [vmem:[#allocation3 + $0x94] sm:$0xf]  ;;  %v6585_v7 = vld [vmem:[#allocation3 + $0x98] sm:$0x1] }
 0x3cf   : > { %5845 = vst [vmem:[#allocation3 + $0xb4] sm:$0xf] %v5844_v27  ;;  %5846 = vst.msk [vmem:[#allocation3 + $0xb8] sm:$0xf] %vm683_vm3, %v5677_v17  ;;  %v7116_v26 = vsel %vm11387_vm12, %v7111_v4, %v7115_v16  ;;  %v7736_v60 = vsel %vm11529_vm0, %v7734_v38, %v7735_v5  ;;  %v6276_v43 = vshll.u32 %v6030_v32, 16  ;;  %v6280_v36 = vshrl.u32 %v6030_v32, 16  ;;  %v8537_v15 = vpop.permute.xlu0 %8536 }
 0x3d0   : > { %5849 = vst [vmem:[#allocation3 + $0xbc] sm:$0x1] %v5848_v35  ;;  %v9973_v30 = vcombine.low %v7106_v55, %v7116_v26  ;;  %v10016_v3 = vcombine.low %v7733_v24, %v7736_v60  ;;  %v6273_v51 = vor.u32 %v6272_v56, %v6269_v41  ;;  %v6286_v47 = vshll.u32 %v6031_v39, 16  ;;  %8583 = vst.msk [vmem:[#allocation5 + $0x20] sm:$0xff] %vm7028_vm14, %v8537_v15  ;;  %v15042_v39 = vld [vmem:[#allocation18_spill] sm:$0xff]  ;;  %v15043_v8 = vld [vmem:[#allocation21_spill] sm:$0xff] }
 0x3d1   : > { %v6278_v63 = vrot.slane %v6276_v43, 5  ;;  %v6282_v28 = vrot.slane %v6280_v36, 4  ;;  %v10380_v16 = vadd.f32 %v13934_v25, %v13928_v14  ;;  %v10383_v34 = vadd.f32 %v13941_v12, %v13936_v2  ;;  %v6580_v52 = vld [vmem:[#allocation3 + $0x84] sm:$0xe]  ;;  %v6581_v2 = vld [vmem:[#allocation3 + $0x88] sm:$0xf] }
 0x3d2   : > { %7541 = vst.msk [vmem:[#allocation5 + $0x8] sm:$0xff] %vm5985_vm7, %v9973_v30  ;;  %7835 = vrot.lane.b32.xlu0 %v10016_v3, %s10870_s14  ;;  %v6274_v49 = vrot.slane %v6273_v51, 4  ;;  %v6288_v5 = vrot.slane %v6286_v47, 5  ;;  %v9999_v55 = vrot.slane %v7587_v23, 9  ;;  %v7725_v31 = vrot.slane %v7588_v40, 5  ;;  %v10776_v51 = vld [vmem:[#allocation3 + $0xa8] sm:$0xff]  }
 0x3d3   : > { %7861 = vst.msk [vmem:[#allocation5 + $0x8] sm:$0xff] %vm6530_vm11, %v14036_v58  ;;  %v6283_v32 = vor.u32 %v6282_v28, %v6278_v63  ;;  %v5074_v59 = vadd.f32 %v10380_v16, %v15042_v39  ;;  %v5077_v14 = vadd.f32 %v10383_v34, %v15043_v8  ;;  %v7728_v25 = vrot.slane %v7589_v20, 5  ;;  %v6582_v41 = vld [vmem:[#allocation3 + $0x8c] sm:$0x1]  ;;  %v8085_v40 = vld [vmem:[#allocation3 + $0x94] sm:$0xf] }
 0x3d4   : > { %8038 = vst.msk [vmem:[#allocation5 + $0x8] sm:$0xff] %vm6851_vm13, %v14007_v33  ;;  %v6279_v12 = vsel %vm11387_vm12, %v6274_v49, %v6278_v63  ;;  %v7726_v48 = vsel %vm11529_vm0, %v9999_v55, %v7725_v31  ;;  %v7727_v6 = vrot.slane %v7725_v31, 4  ;;  %v9937_v18 = vrot.slane %v6583_v53, 9  ;;  %v8086_v47 = vld [vmem:[#allocation3 + $0x98] sm:$0x1] }
 0x3d5   : > { %v6284_v58 = vrot.slane %v6283_v32, 4  ;;  %v5235_v19 = vadd.f32 %v13815_v46, %v5074_v59  ;;  %v5238_v4 = vadd.f32 %v13823_v50, %v5077_v14  ;;  %v6729_v24 = vrot.slane %v6584_v57, 5  ;;  %8582 = vst.msk [vmem:[#allocation5 + $0x8] sm:$0xff] %vm7028_vm14, %v14071_v13  ;;  %v8084_v46 = vld [vmem:[#allocation3 + $0x90] sm:$0xf] }
 0x3d6   : > { %v7729_v33 = vsel %vm11529_vm0, %v7727_v6, %v7728_v25  ;;  %v6732_v38 = vrot.slane %v6585_v7, 5  ;;  %v9936_v23 = vrot.slane %v6580_v52, 9  ;;  %v6722_v21 = vrot.slane %v6581_v2, 5  ;;  %v6038_v49 = vld [vmem:[#allocation3 + $0x90] sm:$0xf] }
 0x3d7   : > { %v6289_v27 = vsel %vm11387_vm12, %v6284_v58, %v6288_v5  ;;  %v5271_v17 = vmax.f32 %v5235_v19, 0.0  ;;  %v5272_v35 = vmax.f32 %v5238_v4, 0.0  ;;  %v10015_v56 = vcombine.low %v7726_v48, %v7729_v33  ;;  %v5850_v5 = vld [vmem:[#allocation3 + $0xc0] sm:$0xf]  ;;  %v8890_v8 = vld [vmem:[#allocation5 + $0x20] sm:$0xff]  ;;  %v10800_v14 = vld [vmem:[#allocation3 + $0x90] sm:$0xff]  }
 0x3d8   : > { %v9918_v50 = vcombine.low %v6279_v12, %v6289_v27  ;;  %v6730_v20 = vsel %vm11529_vm0, %v9937_v18, %v6729_v24  ;;  %v6731_v13 = vrot.slane %v6729_v24, 4  ;;  %v14246_v26 = vsel %vm11529_vm0, %v9936_v23, %v6722_v21  ;;  %v8886_v12 = vld [vmem:[#allocation5] sm:$0xff]  ;;  %v10801_v48 = vld [vmem:[#allocation3 + $0x84] sm:$0xff]   ;;  %5998 = vst.msk [vmem:[#allocation5 + $0x120] sm:$0xff] %vm5985_vm7, %v10800_v14 }
 0x3d9   : > { %v10157_v60 = vpack.c.bf16 %v5271_v17, %v5271_v17  ;;  %v10158_v43 = vpack.c.bf16 %v5272_v35, %v5272_v35  ;;  %7833 = vrot.lane.b32.xlu0 %v10015_v56, %s10870_s14  ;;  %v6724_v36 = vrot.slane %v6722_v21, 4  ;;  %v6725_v15 = vrot.slane %v6582_v41, 5  ;;  %v6489_v30 = vpop.permute.xlu1 %6488  ;;  %v5854_v6 = vld [vmem:[#allocation3 + $0xc8] sm:$0x1]  ;;  %v6039_v41 = vld [vmem:[#allocation3 + $0x94] sm:$0xf] }
 0x3da   : > { %6500 = vrot.lane.b32.xlu1 %v9918_v50, %s10870_s14  ;;  %v6733_v3 = vsel %vm11529_vm0, %v6731_v13, %v6732_v38  ;;  %v8343_v53 = vshrl.u32 %v8084_v46, 16  ;;  %v8346_v57 = vshll.u32 %v8084_v46, 16  ;;  %v8352_v63 = vshll.u32 %v8085_v40, 16  ;;  %6534 = vst.msk [vmem:[#allocation5 + $0x48] sm:$0xff] %vm6530_vm11, %v6489_v30  ;;  %v6040_v23 = vld [vmem:[#allocation3 + $0x98] sm:$0x1] }
 0x3db   : > { %v5680_v28 = vshrl.u32 %v10157_v60, 16  ;;  %v5683_v16 = vshll.u32 %v10157_v60, 16  ;;  %v5688_v34 = vshrl.u32 %v10158_v43, 16  ;;  %v5691_v7 = vshll.u32 %v10158_v43, 16  ;;  %6855 = vst.msk [vmem:[#allocation5 + $0x48] sm:$0xff] %vm6851_vm13, %v14148_v22 }
 0x3dc   : > { %v9953_v55 = vcombine.low %v6730_v20, %v6733_v3  ;;  %v6726_v31 = vsel %vm11529_vm0, %v6724_v36, %v6725_v15  ;;  %v8345_v32 = vrot.slane %v8343_v53, 4  ;;  %v8348_v39 = vrot.slane %v8346_v57, 5  ;;  %v8887_v59 = vld [vmem:[#allocation5 + $0x8] sm:$0xff]  ;;  %7032 = vst.msk [vmem:[#allocation5 + $0x48] sm:$0xff] %vm7028_vm14, %v14031_v9  ;;  %v7054_v56 = vld [vmem:[#allocation3 + $0x30] sm:$0xf] }
 0x3dd   : > { %v5682_v25 = vrot.slane %v5680_v28, 7  ;;  %v5690_v52 = vrot.slane %v5688_v34, 7  ;;  %8014 = vrot.lane.b32.xlu0 %v10776_v51, %s10871_s18  ;;  %v9952_v2 = vcombine.low %v14246_v26, %v6726_v31  ;;  %v14261_v22 = vrot.slane %v8352_v63, 5  ;;  %9165 = vmatprep.mubr.bf16.mxu1 %v8887_v59  ;;  %5997 = vst.msk [vmem:[#allocation5 + $0x108] sm:$0xff] %vm5985_vm7, %v10801_v48  ;;  %v7055_v13 = vld [vmem:[#allocation3 + $0x34] sm:$0xf]  ;;  %v14272_v26 = vpop.permute.xlu0 %7823 }
 0x3de   : > { %6827 = vrot.lane.b32.xlu1 %v9953_v55, %s10871_s18  ;;  %v8349_v18 = vor.u32 %v8348_v39, %v8345_v32  ;;  %v8356_v58 = vshrl.u32 %v8085_v40, 16  ;;  %v8362_v19 = vshll.u32 %v8086_v47, 16  ;;  %v6339_v9 = vshrl.u32 %v6038_v49, 16  ;;  %9166 = vmatmul.mubr.bf16.vlgmr.msra.gmra.mrb[64].mxu1 %v8886_v12  ;;  %v8081_v51 = vld [vmem:[#allocation3 + $0x84] sm:$0xf]  ;;  %v10803_v55 = vld [vmem:[#allocation3 + $0x9c] sm:$0xff]  }
 0x3df   : > { %v5685_v4 = vor.u32 %v5683_v16, %v5682_v25  ;;  %v5686_v24 = vrot.slane %v5682_v25, 4  ;;  %v5693_v33 = vor.u32 %v5691_v7, %v5690_v52  ;;  %v5695_v38 = vrot.slane %v5690_v52, 4  ;;  %9173 = vmatprep.mubr.bf16.mxu1 %v8890_v8  ;;  %v14280_v47 = vpop.permute.xlu1 %6815  ;;  %v8082_v8 = vld [vmem:[#allocation3 + $0x88] sm:$0xf]  ;;  %5999 = vst.msk [vmem:[#allocation5 + $0x138] sm:$0xff] %vm5985_vm7, %v10803_v55 }
 0x3e0   : > { %v8350_v21 = vrot.slane %v8349_v18, 4  ;;  %v8358_v27 = vrot.slane %v8356_v58, 4  ;;  %v8364_v17 = vrot.slane %v8362_v19, 5  ;;  %v6341_v35 = vrot.slane %v6339_v9, 4 }
 0x3e1   : > { %v5851_v46 = vsel %vm11268_vm9, %v5685_v4, %v5850_v5  ;;  %v5694_v40 = vsel %vm11195_vm6, %v5686_v24, %v5693_v33  ;;  %v5855_v50 = vsel %vm11259_vm8, %v5695_v38, %v5854_v6  ;;  %v6342_v20 = vshll.u32 %v6038_v49, 16  ;;  %v8889_v5 = vld [vmem:[#allocation5 + $0x18] sm:$0xff]  ;;  %v14284_v12 = vpop.permute.xlu0 %7821  ;;  %v6035_v33 = vld [vmem:[#allocation3 + $0x84] sm:$0xf] }
 0x3e2   : > { %5852 = vst [vmem:[#allocation3 + $0xc0] sm:$0xf] %v5851_v46  ;;  %5853 = vst.msk [vmem:[#allocation3 + $0xc4] sm:$0xf] %vm683_vm3, %v5694_v40  ;;  %6825 = vrot.lane.b32.xlu1 %v9952_v2, %s10871_s18  ;;  %v8355_v10 = vsel %vm11387_vm12, %v8350_v21, %v14261_v22  ;;  %v8359_v0 = vor.u32 %v8358_v27, %v14261_v22  ;;  %v6348_v60 = vshll.u32 %v6039_v41, 16  ;;  %v6352_v43 = vshrl.u32 %v6039_v41, 16 }
 0x3e3   : > { %5856 = vst [vmem:[#allocation3 + $0xc8] sm:$0x1] %v5855_v50  ;;  %v6344_v36 = vrot.slane %v6342_v20, 5  ;;  %v6358_v15 = vshll.u32 %v6040_v23, 16  ;;  %v7166_v30 = vshrl.u32 %v7054_v56, 16  ;;  %v7169_v3 = vshll.u32 %v7054_v56, 16  ;;  %v14290_v38 = vpop.permute.xlu1 %6813 }
 0x3e4   : > { %v8360_v53 = vrot.slane %v8359_v0, 4  ;;  %v6350_v57 = vrot.slane %v6348_v60, 5  ;;  %v6354_v63 = vrot.slane %v6352_v43, 4  ;;  %v7175_v28 = vshll.u32 %v7055_v13, 16  ;;  %v8083_v22 = vld [vmem:[#allocation3 + $0x8c] sm:$0x1] }
 0x3e5   : > { %v6345_v16 = vor.u32 %v6344_v36, %v6341_v35  ;;  %v6360_v34 = vrot.slane %v6358_v15, 5  ;;  %v7168_v7 = vrot.slane %v7166_v30, 4  ;;  %v7171_v49 = vrot.slane %v7169_v3, 5  ;;  %v10782_v23 = vld [vmem:[#allocation3 + $0x9c] sm:$0xff]   ;;  %v6036_v35 = vld [vmem:[#allocation3 + $0x88] sm:$0xf] }
 0x3e6   : > { %v8365_v31 = vsel %vm11387_vm12, %v8360_v53, %v8364_v17  ;;  %v6355_v32 = vor.u32 %v6354_v63, %v6350_v57  ;;  %v7177_v39 = vrot.slane %v7175_v28, 5  ;;  %v7179_v59 = vshrl.u32 %v7055_v13, 16  ;;  %9174 = vmatmul.mubr.bf16.gmra.mrb[68].mxu1 %v8889_v5  ;;  %v6037_v0 = vld [vmem:[#allocation3 + $0x8c] sm:$0x1]  ;;  %v10783_v43 = vld [vmem:[#allocation3 + $0x9c] sm:$0xff]  }
 0x3e7   : > { %v10047_v14 = vcombine.low %v8355_v10, %v8365_v31  ;;  %v6346_v25 = vrot.slane %v6345_v16, 4  ;;  %v7172_v52 = vor.u32 %v7171_v49, %v7168_v7  ;;  %v7185_v2 = vshll.u32 %v7056_v62, 16  ;;  %v7051_v3 = vld [vmem:[#allocation3 + $0x24] sm:$0xf]  ;;  %v7052_v16 = vld [vmem:[#allocation3 + $0x28] sm:$0xf] }
 0x3e8   : > { %v6356_v48 = vrot.slane %v6355_v32, 4  ;;  %v7181_v6 = vrot.slane %v7179_v59, 4  ;;  %v8319_v18 = vshrl.u32 %v8081_v51, 16  ;;  %v8322_v58 = vshll.u32 %v8081_v51, 16  ;;  %v14298_v51 = vpop.permute.xlu0 %8002  ;;  %v7053_v31 = vld [vmem:[#allocation3 + $0x2c] sm:$0x1]  ;;  %v14302_v32 = vpop.permute.xlu1 %6994 }
 0x3e9   : > { %8554 = vrot.lane.b32.xlu0 %v10047_v14, %s10872_s29  ;;  %v6351_v19 = vsel %vm11387_vm12, %v6346_v25, %v6350_v57  ;;  %v7173_v9 = vrot.slane %v7172_v52, 4  ;;  %v7187_v4 = vrot.slane %v7185_v2, 5  ;;  %v8328_v24 = vshll.u32 %v8082_v8, 16  ;;  %v7596_v25 = vld [vmem:[#allocation3 + $0xa8] sm:$0xe] }
 0x3ea   : > { %v6361_v41 = vsel %vm11387_vm12, %v6356_v48, %v6360_v34  ;;  %v7182_v21 = vor.u32 %v7181_v6, %v7177_v39  ;;  %v8321_v27 = vrot.slane %v8319_v18, 4  ;;  %v8324_v17 = vrot.slane %v8322_v58, 5  ;;  %v10802_v34 = vld [vmem:[#allocation3 + $0xa8] sm:$0xff]  }
 0x3eb   : > { %v9921_v56 = vcombine.low %v6351_v19, %v6361_v41  ;;  %v7178_v46 = vsel %vm11387_vm12, %v7173_v9, %v7177_v39  ;;  %v8330_v40 = vrot.slane %v8328_v24, 5  ;;  %v8332_v50 = vshrl.u32 %v8082_v8, 16  ;;  %6000 = vst.msk [vmem:[#allocation5 + $0x150] sm:$0xff] %vm5985_vm7, %v10802_v34  ;;  %v7597_v6 = vld [vmem:[#allocation3 + $0xac] sm:$0xf] }
 0x3ec   : > { %v7183_v20 = vrot.slane %v7182_v21, 4  ;;  %v8325_v13 = vor.u32 %v8324_v17, %v8321_v27  ;;  %v8338_v10 = vshll.u32 %v8083_v22, 16  ;;  %v6315_v60 = vshrl.u32 %v6035_v33, 16  ;;  %v6586_v21 = vld [vmem:[#allocation3 + $0x9c] sm:$0xe] }
 0x3ed   : > { %6506 = vrot.lane.b32.xlu1 %v9921_v56, %s10870_s14  ;;  %8012 = vrot.lane.b32.xlu0 %v10782_v23, %s10871_s18  ;;  %v8334_v62 = vrot.slane %v8332_v50, 4  ;;  %v6318_v36 = vshll.u32 %v6035_v33, 16  ;;  %v6324_v15 = vshll.u32 %v6036_v35, 16  ;;  %v6328_v30 = vshrl.u32 %v6036_v35, 16  ;;  %v6587_v27 = vld [vmem:[#allocation3 + $0xa0] sm:$0xf]  ;;  %v14315_v35 = vpop.permute.xlu0 %8542 }
 0x3ee   : > { %v7188_v53 = vsel %vm11387_vm12, %v7183_v20, %v7187_v4  ;;  %v8326_v57 = vrot.slane %v8325_v13, 4  ;;  %v8340_v63 = vrot.slane %v8338_v10, 5  ;;  %v6317_v28 = vrot.slane %v6315_v60, 4  ;;  %v7598_v4 = vld [vmem:[#allocation3 + $0xb0] sm:$0x1] }
 0x3ef   : > { %v9976_v7 = vcombine.low %v7178_v46, %v7188_v53  ;;  %v8335_v49 = vor.u32 %v8334_v62, %v8330_v40  ;;  %v6320_v5 = vrot.slane %v6318_v36, 5  ;;  %v6326_v55 = vrot.slane %v6324_v15, 5  ;;  %v6588_v17 = vld [vmem:[#allocation3 + $0xa4] sm:$0x1]  ;;  %v7593_v50 = vld [vmem:[#allocation3 + $0x9c] sm:$0xe] }
 0x3f0   : > { %v8331_v39 = vsel %vm11387_vm12, %v8326_v57, %v8330_v40  ;;  %v6330_v59 = vrot.slane %v6328_v30, 4  ;;  %v6334_v8 = vshll.u32 %v6037_v0, 16  ;;  %v7142_v14 = vshrl.u32 %v7051_v3, 16  ;;  %v7594_v60 = vld [vmem:[#allocation3 + $0xa0] sm:$0xf] }
 0x3f1   : > { %7004 = vrot.lane.b32.xlu1 %v10783_v43, %s10872_s29  ;;  %7544 = vst.msk [vmem:[#allocation5 + $0x50] sm:$0xff] %vm5985_vm7, %v9976_v7  ;;  %v8336_v52 = vrot.slane %v8335_v49, 4  ;;  %v6321_v2 = vor.u32 %v6320_v5, %v6317_v28  ;;  %v7145_v22 = vshll.u32 %v7051_v3, 16  ;;  %v7151_v48 = vshll.u32 %v7052_v16, 16  ;;  %v7595_v7 = vld [vmem:[#allocation3 + $0xa4] sm:$0x1] }
 0x3f2   : > { %7864 = vst.msk [vmem:[#allocation5 + $0x50] sm:$0xff] %vm6530_vm11, %v14116_v45  ;;  %v6331_v18 = vor.u32 %v6330_v59, %v6326_v55  ;;  %v6336_v58 = vrot.slane %v6334_v8, 5  ;;  %v7144_v19 = vrot.slane %v7142_v14, 4  ;;  %v7155_v9 = vshrl.u32 %v7052_v16, 16  ;;  %v8091_v59 = vld [vmem:[#allocation3 + $0xac] sm:$0xf]  ;;  %v14332_v8 = vpop.permute.xlu0 %8000 }
 0x3f3   : > { %v8341_v24 = vsel %vm11387_vm12, %v8336_v52, %v8340_v63  ;;  %v6322_v33 = vrot.slane %v6321_v2, 4  ;;  %v7147_v41 = vrot.slane %v7145_v22, 5  ;;  %v7153_v23 = vrot.slane %v7151_v48, 5  ;;  %8041 = vst.msk [vmem:[#allocation5 + $0x50] sm:$0xff] %vm6851_vm13, %v14192_v1  ;;  %v8092_v22 = vld [vmem:[#allocation3 + $0xb0] sm:$0x1] }
 0x3f4   : > { %v10046_v45 = vcombine.low %v8331_v39, %v8341_v24  ;;  %v6332_v56 = vrot.slane %v6331_v18, 4  ;;  %v7157_v46 = vrot.slane %v7155_v9, 4  ;;  %v7161_v40 = vshll.u32 %v7053_v31, 16  ;;  %v8090_v39 = vld [vmem:[#allocation3 + $0xa8] sm:$0xf] }
 0x3f5   : > { %v6327_v20 = vsel %vm11387_vm12, %v6322_v33, %v6326_v55  ;;  %v7148_v13 = vor.u32 %v7147_v41, %v7144_v19  ;;  %v10002_v10 = vrot.slane %v7596_v25, 9  ;;  %v7746_v0 = vrot.slane %v7597_v6, 5  ;;  %v6044_v33 = vld [vmem:[#allocation3 + $0xa8] sm:$0xf] }
 0x3f6   : > { %v6495_v43 = vpop.permute.xlu1 %6494  ;;  %8552 = vrot.lane.b32.xlu0 %v10046_v45, %s10872_s29  ;;  %v6337_v1 = vsel %vm11387_vm12, %v6332_v56, %v6336_v58  ;;  %v7158_v62 = vor.u32 %v7157_v46, %v7153_v23  ;;  %v7163_v36 = vrot.slane %v7161_v40, 5  ;;  %v7749_v15 = vrot.slane %v7598_v4, 5  ;;  %v6046_v45 = vld [vmem:[#allocation3 + $0xb0] sm:$0x1] }
 0x3f7   : > { %6537 = vst.msk [vmem:[#allocation5 + $0x90] sm:$0xff] %vm6530_vm11, %v6495_v43  ;;  %v9920_v30 = vcombine.low %v6327_v20, %v6337_v1  ;;  %v7149_v3 = vrot.slane %v7148_v13, 4  ;;  %v7747_v53 = vsel %vm11529_vm0, %v10002_v10, %v7746_v0  ;;  %v7748_v57 = vrot.slane %v7746_v0, 4  ;;  %v8637_v20 = vld [vmem:[#allocation3 + $0xb4] sm:$0xe] }
 0x3f8   : > { %6858 = vst.msk [vmem:[#allocation5 + $0x90] sm:$0xff] %vm6851_vm13, %v14280_v47  ;;  %v7159_v63 = vrot.slane %v7158_v62, 4  ;;  %v9938_v28 = vrot.slane %v6586_v21, 9  ;;  %v6736_v16 = vrot.slane %v6587_v27, 5  ;;  %v6739_v34 = vrot.slane %v6588_v17, 5 }
 0x3f9   : > { %6504 = vrot.lane.b32.xlu1 %v9920_v30, %s10870_s14  ;;  %v7154_v49 = vsel %vm11387_vm12, %v7149_v3, %v7153_v23  ;;  %v7750_v5 = vsel %vm11529_vm0, %v7748_v57, %v7749_v15  ;;  %v10001_v55 = vrot.slane %v7593_v50, 9  ;;  %v7739_v31 = vrot.slane %v7594_v60, 5  ;;  %v6045_v17 = vld [vmem:[#allocation3 + $0xac] sm:$0xf]  ;;  %v8638_v43 = vld [vmem:[#allocation3 + $0xb8] sm:$0xf] }
 0x3fa   : > { %v6993_v47 = vpop.permute.xlu1 %6992  ;;  %v7164_v14 = vsel %vm11387_vm12, %v7159_v63, %v7163_v36  ;;  %v10018_v25 = vcombine.low %v7747_v53, %v7750_v5  ;;  %v6737_v52 = vsel %vm11529_vm0, %v9938_v28, %v6736_v16  ;;  %v6738_v2 = vrot.slane %v6736_v16, 4  ;;  %v8639_v30 = vld [vmem:[#allocation3 + $0xbc] sm:$0x1] }
 0x3fb   : > { %7035 = vst.msk [vmem:[#allocation5 + $0x90] sm:$0xff] %vm7028_vm14, %v6993_v47  ;;  %v9975_v48 = vcombine.low %v7154_v49, %v7164_v14  ;;  %v7740_v6 = vsel %vm11529_vm0, %v10001_v55, %v7739_v31  ;;  %v7741_v18 = vrot.slane %v7739_v31, 4  ;;  %v7742_v58 = vrot.slane %v7595_v7, 5  ;;  %v8087_v28 = vld [vmem:[#allocation3 + $0x9c] sm:$0xf] }
 0x3fc   : > { %7839 = vrot.lane.b32.xlu0 %v10018_v25, %s10870_s14  ;;  %v6740_v19 = vsel %vm11529_vm0, %v6738_v2, %v6739_v34  ;;  %v8391_v9 = vshrl.u32 %v8090_v39, 16  ;;  %v8394_v4 = vshll.u32 %v8090_v39, 16  ;;  %v8400_v24 = vshll.u32 %v8091_v59, 16  ;;  %v8088_v39 = vld [vmem:[#allocation3 + $0xa0] sm:$0xf] }
 0x3fd   : > { %7543 = vst.msk [vmem:[#allocation5 + $0x38] sm:$0xff] %vm5985_vm7, %v9975_v48  ;;  %v9954_v41 = vcombine.low %v6737_v52, %v6740_v19  ;;  %v7743_v23 = vsel %vm11529_vm0, %v7741_v18, %v7742_v58  ;;  %v8404_v21 = vshrl.u32 %v8091_v59, 16  ;;  %v8410_v27 = vshll.u32 %v8092_v22, 16  ;;  %v8089_v52 = vld [vmem:[#allocation3 + $0xa4] sm:$0x1] }
 0x3fe   : > { %7863 = vst.msk [vmem:[#allocation5 + $0x38] sm:$0xff] %vm6530_vm11, %v14137_v29  ;;  %v10017_v56 = vcombine.low %v7740_v6, %v7743_v23  ;;  %v8393_v46 = vrot.slane %v8391_v9, 4  ;;  %v8396_v40 = vrot.slane %v8394_v4, 5  ;;  %v8402_v50 = vrot.slane %v8400_v24, 5  ;;  %v6041_v9 = vld [vmem:[#allocation3 + $0x9c] sm:$0xf] }
 0x3ff   : > { %8040 = vst.msk [vmem:[#allocation5 + $0x38] sm:$0xff] %vm6851_vm13, %v14051_v61  ;;  %6829 = vrot.lane.b32.xlu1 %v9954_v41, %s10871_s18  ;;  %v8406_v13 = vrot.slane %v8404_v21, 4  ;;  %v8412_v10 = vrot.slane %v8410_v27, 5  ;;  %v6387_v0 = vshrl.u32 %v6044_v33, 16  ;;  %v6390_v60 = vshll.u32 %v6044_v33, 16  ;;  %v10786_v61 = vld [vmem:[#allocation3 + $0xa8] sm:$0xff]  }
 0x400   : > { %v8541_v1 = vpop.permute.xlu0 %8540  ;;  %7837 = vrot.lane.b32.xlu0 %v10017_v56, %s10870_s14  ;;  %8584 = vst.msk [vmem:[#allocation5 + $0x38] sm:$0xff] %vm7028_vm14, %v14172_v44  ;;  %v8397_v29 = vor.u32 %v8396_v40, %v8393_v46  ;;  %v6396_v62 = vshll.u32 %v6045_v17, 16  ;;  %v6400_v36 = vshrl.u32 %v6045_v17, 16  ;;  %v6406_v15 = vshll.u32 %v6046_v45, 16  ;;  %v6042_v21 = vld [vmem:[#allocation3 + $0xa0] sm:$0xf] }
 0x401   : > { %8585 = vst.msk [vmem:[#allocation5 + $0x50] sm:$0xff] %vm7028_vm14, %v8541_v1  ;;  %v8407_v3 = vor.u32 %v8406_v13, %v8402_v50  ;;  %v6389_v53 = vrot.slane %v6387_v0, 4  ;;  %v6392_v57 = vrot.slane %v6390_v60, 5  ;;  %v10066_v63 = vrot.slane %v8637_v20, 9  ;;  %v6043_v46 = vld [vmem:[#allocation3 + $0xa4] sm:$0x1] }
 0x402   : > { %v8398_v16 = vrot.slane %v8397_v29, 4  ;;  %v6398_v34 = vrot.slane %v6396_v62, 5  ;;  %v6402_v7 = vrot.slane %v6400_v36, 4  ;;  %v6408_v49 = vrot.slane %v6406_v15, 5  ;;  %v8892_v1 = vld [vmem:[#allocation5 + $0x30] sm:$0xff] }
 0x403   : > { %7006 = vrot.lane.b32.xlu1 %v10786_v61, %s10872_s29  ;;  %v8408_v44 = vrot.slane %v8407_v3, 4  ;;  %v6393_v5 = vor.u32 %v6392_v57, %v6389_v53  ;;  %v8787_v55 = vrot.slane %v8638_v43, 5  ;;  %v8790_v31 = vrot.slane %v8639_v30, 5  ;;  %v6589_v43 = vld [vmem:[#allocation3 + $0xa8] sm:$0xe] }
 0x404   : > { %v14357_v59 = vpop.permute.xlu0 %7827  ;;  %v6493_v47 = vpop.permute.xlu1 %6492  ;;  %v8403_v14 = vsel %vm11387_vm12, %v8398_v16, %v8402_v50  ;;  %v6403_v25 = vor.u32 %v6402_v7, %v6398_v34  ;;  %v8367_v2 = vshrl.u32 %v8087_v28, 16  ;;  %v8370_v22 = vshll.u32 %v8087_v28, 16  ;;  %v6590_v61 = vld [vmem:[#allocation3 + $0xac] sm:$0xf]  ;;  %v6591_v28 = vld [vmem:[#allocation3 + $0xb0] sm:$0x1] }
 0x405   : > { %6536 = vst.msk [vmem:[#allocation5 + $0x78] sm:$0xff] %vm6530_vm11, %v6493_v47  ;;  %v8413_v6 = vsel %vm11387_vm12, %v8408_v44, %v8412_v10  ;;  %v6394_v18 = vrot.slane %v6393_v5, 4  ;;  %v8788_v58 = vsel %vm11529_vm0, %v10066_v63, %v8787_v55  ;;  %v8789_v19 = vrot.slane %v8787_v55, 4  ;;  %v7060_v44 = vld [vmem:[#allocation3 + $0x48] sm:$0xf] }
 0x406   : > { %v14362_v48 = vpop.f32.mrb[96].mxu0  ;;  %6857 = vst.msk [vmem:[#allocation5 + $0x78] sm:$0xff] %vm6851_vm13, %v14290_v38  ;;  %v10049_v24 = vcombine.low %v8403_v14, %v8413_v6  ;;  %v6404_v33 = vrot.slane %v6403_v25, 4  ;;  %v8369_v41 = vrot.slane %v8367_v2, 4  ;;  %v8372_v23 = vrot.slane %v8370_v22, 5 }
 0x407   : > { %v14370_v4 = vpop.f32.mrb[97].mxu0  ;;  %7034 = vst.msk [vmem:[#allocation5 + $0x78] sm:$0xff] %vm7028_vm14, %v14166_v54  ;;  %v6399_v17 = vsel %vm11387_vm12, %v6394_v18, %v6398_v34  ;;  %v8791_v45 = vsel %vm11529_vm0, %v8789_v19, %v8790_v31  ;;  %v8376_v56 = vshll.u32 %v8088_v39, 16  ;;  %v8380_v38 = vshrl.u32 %v8088_v39, 16  ;;  %v8893_v40 = vld [vmem:[#allocation5 + $0x38] sm:$0xff] }
 0x408   : > { %v14374_v27 = vpop.f32.mrb[98].mxu0  ;;  %v14380_v50 = vpop.permute.xlu0 %7825  ;;  %v8896_v13 = vld [vmem:[#allocation5 + $0x50] sm:$0xff]  ;;  %8558 = vrot.lane.b32.xlu0 %v10049_v24, %s10872_s29  ;;  %v6409_v54 = vsel %vm11387_vm12, %v6404_v33, %v6408_v49  ;;  %v10082_v10 = vcombine.low %v8788_v58, %v8791_v45  ;;  %v8373_v0 = vor.u32 %v8372_v23, %v8369_v41  ;;  %v8386_v60 = vshll.u32 %v8089_v52, 16  ;;  %9181 = vmatprep.mubr.bf16.mxu1 %v8893_v40  ;;  %v8640_v40 = vld [vmem:[#allocation3 + $0xc0] sm:$0xe] }
 0x409   : > { %v14382_v20 = vpop.permute.xlu1 %6819  ;;  %v14387_v29 = vpop.f32.mrb[99].mxu0  ;;  %v9923_v62 = vcombine.low %v6399_v17, %v6409_v54  ;;  %v8378_v36 = vrot.slane %v8376_v56, 5  ;;  %v8382_v15 = vrot.slane %v8380_v38, 4  ;;  %v6363_v30 = vshrl.u32 %v6041_v9, 16  ;;  %9182 = vmatmul.mubr.bf16.gmra.mrb[72].mxu1 %v8892_v1  ;;  %v7061_v58 = vld [vmem:[#allocation3 + $0x4c] sm:$0xf] }
 0x40a   : > { %8883 = vst.msk [vmem:[#allocation5 + $0x148] sm:$0xff] %vm5985_vm7, %v10082_v10  ;;  %v8374_v3 = vrot.slane %v8373_v0, 4  ;;  %v8388_v53 = vrot.slane %v8386_v60, 5  ;;  %v6366_v57 = vshll.u32 %v6041_v9, 16  ;;  %v6372_v63 = vshll.u32 %v6042_v21, 16  ;;  %9189 = vmatprep.mubr.bf16.mxu1 %v8896_v13  ;;  %v8895_v13 = vld [vmem:[#allocation5 + $0x48] sm:$0xff] }
 0x40b   : > { %6510 = vrot.lane.b32.xlu1 %v9923_v62, %s10870_s14  ;;  %v8383_v16 = vor.u32 %v8382_v15, %v8378_v36  ;;  %v6365_v34 = vrot.slane %v6363_v30, 4  ;;  %v6376_v7 = vshrl.u32 %v6042_v21, 16  ;;  %v6382_v49 = vshll.u32 %v6043_v46, 16  ;;  %v7062_v21 = vld [vmem:[#allocation3 + $0x50] sm:$0x1] }
 0x40c   : > { %v14391_v5 = vpop.permute.xlu0 %8006  ;;  %v8379_v31 = vsel %vm11387_vm12, %v8374_v3, %v8378_v36  ;;  %v6368_v39 = vrot.slane %v6366_v57, 5  ;;  %v6374_v47 = vrot.slane %v6372_v63, 5  ;;  %v9939_v14 = vrot.slane %v6589_v43, 9  ;;  %v8641_v1 = vld [vmem:[#allocation3 + $0xc4] sm:$0xf] }
 0x40d   : > { %v14393_v55 = vpop.permute.xlu1 %6817  ;;  %v8384_v25 = vrot.slane %v8383_v16, 4  ;;  %v6378_v52 = vrot.slane %v6376_v7, 4  ;;  %v6384_v2 = vrot.slane %v6382_v49, 5  ;;  %v6743_v22 = vrot.slane %v6590_v61, 5  ;;  %v8642_v3 = vld [vmem:[#allocation3 + $0xc8] sm:$0x1] }
 0x40e   : > { %v6369_v6 = vor.u32 %v6368_v39, %v6365_v34  ;;  %v6746_v18 = vrot.slane %v6591_v28, 5  ;;  %v7214_v19 = vshrl.u32 %v7060_v44, 16  ;;  %v7217_v9 = vshll.u32 %v7060_v44, 16  ;;  %v7058_v34 = vld [vmem:[#allocation3 + $0x40] sm:$0xf]  ;;  %v10788_v49 = vld [vmem:[#allocation3 + $0xb4] sm:$0xff]  }
 0x40f   : > { %v8389_v24 = vsel %vm11387_vm12, %v8384_v25, %v8388_v53  ;;  %v6379_v33 = vor.u32 %v6378_v52, %v6374_v47  ;;  %v14401_v41 = vsel %vm11529_vm0, %v9939_v14, %v6743_v22  ;;  %v6745_v23 = vrot.slane %v6743_v22, 4  ;;  %v7057_v53 = vld [vmem:[#allocation3 + $0x3c] sm:$0xf]  ;;  %v7059_v14 = vld [vmem:[#allocation3 + $0x44] sm:$0x1] }
 0x410   : > { %v10048_v45 = vcombine.low %v8379_v31, %v8389_v24  ;;  %v6370_v56 = vrot.slane %v6369_v6, 4  ;;  %v7216_v38 = vrot.slane %v7214_v19, 4  ;;  %v7219_v46 = vrot.slane %v7217_v9, 5 }
 0x411   : > { %v14403_v17 = vpop.permute.xlu1 %6998  ;;  %v8927_v54 = vld [vmem:[#allocation5 + $0x148] sm:$0xff]  ;;  %v6380_v10 = vrot.slane %v6379_v33, 4  ;;  %v6747_v0 = vsel %vm11529_vm0, %v6745_v23, %v6746_v18  ;;  %v7223_v60 = vshll.u32 %v7061_v58, 16  ;;  %v7227_v43 = vshrl.u32 %v7061_v58, 16  ;;  %9190 = vmatmul.mubr.bf16.gmra.mrb[76].mxu1 %v8895_v13  ;;  %v14407_v62 = vpop.permute.xlu0 %8546  ;;  %v7599_v18 = vld [vmem:[#allocation3 + $0xb4] sm:$0xe] }
 0x412   : > { %10603 = vmatmul.mubr.msk.bf16.gmra.mrb[120].mxu0 %vm5985_vm7, %v8927_v54  ;;  %8556 = vrot.lane.b32.xlu0 %v10048_v45, %s10872_s29  ;;  %v6375_v36 = vsel %vm11387_vm12, %v6370_v56, %v6374_v47  ;;  %v9955_v15 = vcombine.low %v14401_v41, %v6747_v0  ;;  %v7220_v30 = vor.u32 %v7219_v46, %v7216_v38  ;;  %v7233_v61 = vshll.u32 %v7062_v21, 16  ;;  %v7600_v33 = vld [vmem:[#allocation3 + $0xb8] sm:$0xf]  ;;  %v7601_v41 = vld [vmem:[#allocation3 + $0xbc] sm:$0x1] }
 0x413   : > { %v6385_v57 = vsel %vm11387_vm12, %v6380_v10, %v6384_v2  ;;  %v7225_v63 = vrot.slane %v7223_v60, 5  ;;  %v7229_v28 = vrot.slane %v7227_v43, 4  ;;  %v10067_v16 = vrot.slane %v8640_v40, 9  ;;  %v6592_v38 = vld [vmem:[#allocation3 + $0xb4] sm:$0xe]  ;;  %v10790_v40 = vld [vmem:[#allocation3 + $0xc0] sm:$0xff]  }
 0x414   : > { %v9922_v7 = vcombine.low %v6375_v36, %v6385_v57  ;;  %v7221_v44 = vrot.slane %v7220_v30, 4  ;;  %v7235_v31 = vrot.slane %v7233_v61, 5  ;;  %v8794_v39 = vrot.slane %v8641_v1, 5  ;;  %v6593_v0 = vld [vmem:[#allocation3 + $0xb8] sm:$0xf] }
 0x415   : > { %v6499_v47 = vpop.permute.xlu1 %6498  ;;  %v7230_v25 = vor.u32 %v7229_v28, %v7225_v63  ;;  %v8797_v52 = vrot.slane %v8642_v3, 5  ;;  %v7190_v22 = vshrl.u32 %v7057_v53, 16  ;;  %v7193_v6 = vshll.u32 %v7057_v53, 16  ;;  %v14416_v58 = vpop.permute.xlu0 %8004  ;;  %v6594_v30 = vld [vmem:[#allocation3 + $0xbc] sm:$0x1] }
 0x416   : > { %6539 = vst.msk [vmem:[#allocation5 + $0xc0] sm:$0xff] %vm6530_vm11, %v6499_v47  ;;  %6508 = vrot.lane.b32.xlu1 %v9922_v7, %s10870_s14  ;;  %8016 = vrot.lane.b32.xlu0 %v10788_v49, %s10871_s18  ;;  %v7226_v2 = vsel %vm11387_vm12, %v7221_v44, %v7225_v63  ;;  %v8795_v19 = vsel %vm11529_vm0, %v10067_v16, %v8794_v39  ;;  %v8796_v9 = vrot.slane %v8794_v39, 4  ;;  %v7199_v24 = vshll.u32 %v7058_v34, 16  ;;  %v8093_v61 = vld [vmem:[#allocation3 + $0xb4] sm:$0xf] }
 0x417   : > { %6860 = vst.msk [vmem:[#allocation5 + $0xc0] sm:$0xff] %vm6851_vm13, %v14382_v20  ;;  %v7231_v23 = vrot.slane %v7230_v25, 4  ;;  %v7192_v21 = vrot.slane %v7190_v22, 4  ;;  %v7195_v45 = vrot.slane %v7193_v6, 5  ;;  %v7203_v56 = vshrl.u32 %v7058_v34, 16 }
 0x418   : > { %v8798_v46 = vsel %vm11529_vm0, %v8796_v9, %v8797_v52  ;;  %v7201_v13 = vrot.slane %v7199_v24, 5  ;;  %v7209_v54 = vshll.u32 %v7059_v14, 16  ;;  %v10003_v10 = vrot.slane %v7599_v18, 9  ;;  %v8094_v49 = vld [vmem:[#allocation3 + $0xb8] sm:$0xf] }
 0x419   : > { %v6997_v60 = vpop.permute.xlu1 %6996  ;;  %v7236_v43 = vsel %vm11387_vm12, %v7231_v23, %v7235_v31  ;;  %v10083_v1 = vcombine.low %v8795_v19, %v8798_v46  ;;  %v7196_v36 = vor.u32 %v7195_v45, %v7192_v21  ;;  %v7205_v20 = vrot.slane %v7203_v56, 4  ;;  %v10791_v31 = vld [vmem:[#allocation3 + $0xb4] sm:$0xff]   ;;  %v8095_v18 = vld [vmem:[#allocation3 + $0xbc] sm:$0x1] }
 0x41a   : > { %7037 = vst.msk [vmem:[#allocation5 + $0xc0] sm:$0xff] %vm7028_vm14, %v6997_v60  ;;  %6831 = vrot.lane.b32.xlu1 %v9955_v15, %s10871_s18  ;;  %v9978_v3 = vcombine.low %v7226_v2, %v7236_v43  ;;  %8018 = vrot.lane.b32.xlu0 %v10790_v40, %s10871_s18  ;;  %v7211_v53 = vrot.slane %v7209_v54, 5  ;;  %v7753_v57 = vrot.slane %v7600_v33, 5  ;;  %v7756_v63 = vrot.slane %v7601_v41, 5  ;;  %v10804_v2 = vld [vmem:[#allocation3 + $0xb4] sm:$0xff]  }
 0x41b   : > { %8884 = vst.msk [vmem:[#allocation5 + $0x160] sm:$0xff] %vm5985_vm7, %v10083_v1  ;;  %v7197_v28 = vrot.slane %v7196_v36, 4  ;;  %v7206_v16 = vor.u32 %v7205_v20, %v7201_v13  ;;  %v9940_v34 = vrot.slane %v6592_v38, 9  ;;  %v6750_v7 = vrot.slane %v6593_v0, 5  ;;  %v6047_v41 = vld [vmem:[#allocation3 + $0xb4] sm:$0xf] }
 0x41c   : > { %v8545_v44 = vpop.permute.xlu0 %8544  ;;  %7546 = vst.msk [vmem:[#allocation5 + $0x80] sm:$0xff] %vm5985_vm7, %v9978_v3  ;;  %v7754_v15 = vsel %vm11529_vm0, %v10003_v10, %v7753_v57  ;;  %v7755_v39 = vrot.slane %v7753_v57, 4  ;;  %v6753_v14 = vrot.slane %v6594_v30, 5  ;;  %v8415_v47 = vshrl.u32 %v8093_v61, 16  ;;  %v6048_v38 = vld [vmem:[#allocation3 + $0xb8] sm:$0xf] }
 0x41d   : > { %7866 = vst.msk [vmem:[#allocation5 + $0x80] sm:$0xff] %vm6530_vm11, %v14272_v26  ;;  %v7202_v25 = vsel %vm11387_vm12, %v7197_v28, %v7201_v13  ;;  %v7207_v52 = vrot.slane %v7206_v16, 4  ;;  %v6751_v22 = vsel %vm11529_vm0, %v9940_v34, %v6750_v7  ;;  %v6752_v6 = vrot.slane %v6750_v7, 4  ;;  %v6049_v46 = vld [vmem:[#allocation3 + $0xbc] sm:$0x1] }
 0x41e   : > { %7008 = vrot.lane.b32.xlu1 %v10791_v31, %s10872_s29  ;;  %v7757_v19 = vsel %vm11529_vm0, %v7755_v39, %v7756_v63  ;;  %v8417_v9 = vrot.slane %v8415_v47, 4  ;;  %v8418_v24 = vshll.u32 %v8093_v61, 16  ;;  %v8424_v33 = vshll.u32 %v8094_v49, 16  ;;  %8043 = vst.msk [vmem:[#allocation5 + $0x80] sm:$0xff] %vm6851_vm13, %v14332_v8  ;;  %v14449_v26 = vpop.f32.mrb[100].mxu0 }
 0x41f   : > { %v7212_v23 = vsel %vm11387_vm12, %v7207_v52, %v7211_v53  ;;  %v10019_v21 = vcombine.low %v7754_v15, %v7757_v19  ;;  %v6754_v45 = vsel %vm11529_vm0, %v6752_v6, %v6753_v14  ;;  %v8428_v56 = vshrl.u32 %v8094_v49, 16  ;;  %8587 = vst.msk [vmem:[#allocation5 + $0x80] sm:$0xff] %vm7028_vm14, %v8545_v44  ;;  %v14458_v13 = vpop.f32.mrb[101].mxu0  ;;  %v8096_v16 = vld [vmem:[#allocation3 + $0xc0] sm:$0xf] }
 0x420   : > { %v14456_v40 = vpop.permute.xlu0 %7831  ;;  %6001 = vst.msk [vmem:[#allocation5 + $0x168] sm:$0xff] %vm5985_vm7, %v10804_v2  ;;  %v9977_v8 = vcombine.low %v7202_v25, %v7212_v23  ;;  %v9956_v54 = vcombine.low %v6751_v22, %v6754_v45  ;;  %v8420_v10 = vrot.slane %v8418_v24, 5  ;;  %v8426_v0 = vrot.slane %v8424_v33, 5  ;;  %v6497_v60 = vpop.permute.xlu1 %6496  ;;  %v8097_v31 = vld [vmem:[#allocation3 + $0xc4] sm:$0xf] }
 0x421   : > { %v14461_v43 = vpop.f32.mrb[102].mxu0  ;;  %7841 = vrot.lane.b32.xlu0 %v10019_v21, %s10870_s14  ;;  %v8430_v1 = vrot.slane %v8428_v56, 4  ;;  %v8434_v36 = vshll.u32 %v8095_v18, 16  ;;  %v6411_v20 = vshrl.u32 %v6047_v41, 16  ;;  %v6414_v30 = vshll.u32 %v6047_v41, 16  ;;  %6538 = vst.msk [vmem:[#allocation5 + $0xa8] sm:$0xff] %vm6530_vm11, %v6497_v60 }
 0x422   : > { %v14465_v61 = vpop.f32.mrb[103].mxu0  ;;  %v8930_v3 = vld [vmem:[#allocation5 + $0x160] sm:$0xff]  ;;  %7545 = vst.msk [vmem:[#allocation5 + $0x68] sm:$0xff] %vm5985_vm7, %v9977_v8  ;;  %6833 = vrot.lane.b32.xlu1 %v9956_v54, %s10871_s18  ;;  %v8421_v53 = vor.u32 %v8420_v10, %v8417_v9  ;;  %v6420_v57 = vshll.u32 %v6048_v38, 16  ;;  %v6424_v63 = vshrl.u32 %v6048_v38, 16  ;;  %v6430_v28 = vshll.u32 %v6049_v46, 16 }
 0x423   : > { %6859 = vst.msk [vmem:[#allocation5 + $0xa8] sm:$0xff] %vm6851_vm13, %v14393_v55  ;;  %10606 = vmatprep.mubr.msk.bf16.mxu0 %vm5985_vm7, %v8930_v3  ;;  %v8431_v34 = vor.u32 %v8430_v1, %v8426_v0  ;;  %v8436_v7 = vrot.slane %v8434_v36, 5  ;;  %v6413_v49 = vrot.slane %v6411_v20, 4  ;;  %v6416_v44 = vrot.slane %v6414_v30, 5  ;;  %v8098_v22 = vld [vmem:[#allocation3 + $0xc8] sm:$0x1] }
 0x424   : > { %7865 = vst.msk [vmem:[#allocation5 + $0x68] sm:$0xff] %vm6530_vm11, %v14284_v12  ;;  %v8422_v15 = vrot.slane %v8421_v53, 4  ;;  %v6422_v39 = vrot.slane %v6420_v57, 5  ;;  %v6426_v14 = vrot.slane %v6424_v63, 4  ;;  %v6432_v55 = vrot.slane %v6430_v28, 5  ;;  %v14478_v47 = vpop.permute.xlu0 %7829 }
 0x425   : > { %7036 = vst.msk [vmem:[#allocation5 + $0xa8] sm:$0xff] %vm7028_vm14, %v14302_v32  ;;  %v14480_v25 = vpop.permute.xlu1 %6823  ;;  %v8432_v12 = vrot.slane %v8431_v34, 4  ;;  %v6417_v52 = vor.u32 %v6416_v44, %v6413_v49  ;;  %v8439_v6 = vshrl.u32 %v8096_v16, 16  ;;  %v8442_v18 = vshll.u32 %v8096_v16, 16  ;;  %v7602_v9 = vld [vmem:[#allocation3 + $0xc0] sm:$0xe] }
 0x426   : > { %8042 = vst.msk [vmem:[#allocation5 + $0x68] sm:$0xff] %vm6851_vm13, %v14157_v37  ;;  %v8427_v32 = vsel %vm11387_vm12, %v8422_v15, %v8426_v0  ;;  %v6427_v37 = vor.u32 %v6426_v14, %v6422_v39  ;;  %v8448_v2 = vshll.u32 %v8097_v31, 16  ;;  %v8452_v19 = vshrl.u32 %v8097_v31, 16  ;;  %v7603_v24 = vld [vmem:[#allocation3 + $0xc4] sm:$0xf]  ;;  %v8902_v14 = vld [vmem:[#allocation5 + $0x80] sm:$0xff] }
 0x427   : > { %8586 = vst.msk [vmem:[#allocation5 + $0x68] sm:$0xff] %vm7028_vm14, %v14315_v35  ;;  %v8437_v33 = vsel %vm11387_vm12, %v8432_v12, %v8436_v7  ;;  %v6418_v41 = vrot.slane %v6417_v52, 4  ;;  %v8441_v23 = vrot.slane %v8439_v6, 4  ;;  %v8444_v21 = vrot.slane %v8442_v18, 5  ;;  %v7604_v45 = vld [vmem:[#allocation3 + $0xc8] sm:$0x1] }
 0x428   : > { %v10050_v56 = vcombine.low %v8427_v32, %v8437_v33  ;;  %v6428_v35 = vrot.slane %v6427_v37, 4  ;;  %v8450_v38 = vrot.slane %v8448_v2, 5  ;;  %v8454_v46 = vrot.slane %v8452_v19, 4  ;;  %v7066_v8 = vld [vmem:[#allocation3 + $0x60] sm:$0xf]  ;;  %v14495_v57 = vpop.permute.xlu0 %8010  ;;  %v8898_v32 = vld [vmem:[#allocation5 + $0x60] sm:$0xff] }
 0x429   : > { %v14488_v54 = vpop.permute.xlu1 %6821  ;;  %v6423_v10 = vsel %vm11387_vm12, %v6418_v41, %v6422_v39  ;;  %v8445_v0 = vor.u32 %v8444_v21, %v8441_v23  ;;  %v8458_v60 = vshll.u32 %v8098_v22, 16  ;;  %v10004_v1 = vrot.slane %v7602_v9, 9  ;;  %v7067_v53 = vld [vmem:[#allocation3 + $0x64] sm:$0xf]  ;;  %v7068_v34 = vld [vmem:[#allocation3 + $0x68] sm:$0x1] }
 0x42a   : > { %8560 = vrot.lane.b32.xlu0 %v10050_v56, %s10872_s29  ;;  %v6433_v36 = vsel %vm11387_vm12, %v6428_v35, %v6432_v55  ;;  %v8455_v20 = vor.u32 %v8454_v46, %v8450_v38  ;;  %v7760_v30 = vrot.slane %v7603_v24, 5  ;;  %v7763_v3 = vrot.slane %v7604_v45, 5  ;;  %v8099_v18 = vld [vmem:[#allocation3 + $0xcc] sm:$0xf]  ;;  %v8100_v24 = vld [vmem:[#allocation3 + $0xd0] sm:$0xf] }
 0x42b   : > { %v9924_v63 = vcombine.low %v6423_v10, %v6433_v36  ;;  %v8446_v28 = vrot.slane %v8445_v0, 4  ;;  %v8460_v16 = vrot.slane %v8458_v60, 5  ;;  %v7262_v7 = vshrl.u32 %v7066_v8, 16  ;;  %v8101_v33 = vld [vmem:[#allocation3 + $0xd4] sm:$0x1]  ;;  %v10792_v23 = vld [vmem:[#allocation3 + $0xc0] sm:$0xff]  }
 0x42c   : > { %v8456_v49 = vrot.slane %v8455_v20, 4  ;;  %v7761_v44 = vsel %vm11529_vm0, %v10004_v1, %v7760_v30  ;;  %v7762_v31 = vrot.slane %v7760_v30, 4  ;;  %v7265_v15 = vshll.u32 %v7066_v8, 16  ;;  %v7063_v35 = vld [vmem:[#allocation3 + $0x54] sm:$0xf] }
 0x42d   : > { %v14499_v55 = vpop.permute.xlu1 %7002  ;;  %6512 = vrot.lane.b32.xlu1 %v9924_v63, %s10870_s14  ;;  %v8451_v12 = vsel %vm11387_vm12, %v8446_v28, %v8450_v38  ;;  %v7264_v52 = vrot.slane %v7262_v7, 4  ;;  %v7271_v22 = vshll.u32 %v7067_v53, 16  ;;  %v7275_v6 = vshrl.u32 %v7067_v53, 16  ;;  %v7064_v63 = vld [vmem:[#allocation3 + $0x58] sm:$0xf] }
 0x42e   : > { %v8899_v39 = vld [vmem:[#allocation5 + $0x68] sm:$0xff]  ;;  %v8461_v37 = vsel %vm11387_vm12, %v8456_v49, %v8460_v16  ;;  %v7764_v2 = vsel %vm11529_vm0, %v7762_v31, %v7763_v3  ;;  %v7267_v19 = vrot.slane %v7265_v15, 5  ;;  %v7281_v9 = vshll.u32 %v7068_v34, 16  ;;  %v7065_v31 = vld [vmem:[#allocation3 + $0x5c] sm:$0x1] }
 0x42f   : > { %9197 = vmatprep.mubr.bf16.mxu1 %v8899_v39  ;;  %v10051_v41 = vcombine.low %v8451_v12, %v8461_v37  ;;  %v10020_v21 = vcombine.low %v7761_v44, %v7764_v2  ;;  %v7273_v45 = vrot.slane %v7271_v22, 5  ;;  %v7277_v56 = vrot.slane %v7275_v6, 4  ;;  %v14508_v0 = vpop.permute.xlu0 %8550  ;;  %v10794_v22 = vld [vmem:[#allocation3 + $0xcc] sm:$0xff]  }
 0x430   : > { %9198 = vmatmul.mubr.bf16.gmra.mrb[80].mxu1 %v8898_v32  ;;  %v7268_v38 = vor.u32 %v7267_v19, %v7264_v52  ;;  %v7283_v46 = vrot.slane %v7281_v9, 5  ;;  %v8463_v8 = vshrl.u32 %v8099_v18, 16  ;;  %v8466_v10 = vshll.u32 %v8099_v18, 16  ;;  %v7072_v52 = vld [vmem:[#allocation3 + $0x78] sm:$0xf]  ;;  %v8901_v2 = vld [vmem:[#allocation5 + $0x78] sm:$0xff] }
 0x431   : > { %9205 = vmatprep.mubr.bf16.mxu1 %v8902_v14  ;;  %8562 = vrot.lane.b32.xlu0 %v10051_v41, %s10872_s29  ;;  %v7278_v60 = vor.u32 %v7277_v56, %v7273_v45  ;;  %v8472_v1 = vshll.u32 %v8100_v24, 16  ;;  %v8476_v36 = vshrl.u32 %v8100_v24, 16  ;;  %v8482_v20 = vshll.u32 %v8101_v33, 16  ;;  %v7073_v41 = vld [vmem:[#allocation3 + $0x7c] sm:$0xf] }
 0x432   : > { %7010 = vrot.lane.b32.xlu1 %v10792_v23, %s10872_s29  ;;  %v7269_v30 = vrot.slane %v7268_v38, 4  ;;  %v8465_v3 = vrot.slane %v8463_v8, 4  ;;  %v8468_v53 = vrot.slane %v8466_v10, 5  ;;  %v7238_v28 = vshrl.u32 %v7063_v35, 16  ;;  %v7074_v10 = vld [vmem:[#allocation3 + $0x80] sm:$0x1] }
 0x433   : > { %v6503_v16 = vpop.permute.xlu1 %6502  ;;  %v7279_v34 = vrot.slane %v7278_v60, 4  ;;  %v8474_v7 = vrot.slane %v8472_v1, 5  ;;  %v8478_v49 = vrot.slane %v8476_v36, 4  ;;  %v8484_v44 = vrot.slane %v8482_v20, 5  ;;  %v14520_v23 = vpop.permute.xlu0 %8008  ;;  %v7069_v1 = vld [vmem:[#allocation3 + $0x6c] sm:$0xf] }
 0x434   : > { %6541 = vst.msk [vmem:[#allocation5 + $0xf0] sm:$0xff] %vm6530_vm11, %v6503_v16  ;;  %v7274_v15 = vsel %vm11387_vm12, %v7269_v30, %v7273_v45  ;;  %v8469_v39 = vor.u32 %v8468_v53, %v8465_v3  ;;  %v7240_v14 = vrot.slane %v7238_v28, 4  ;;  %v7241_v12 = vshll.u32 %v7063_v35, 16 }
 0x435   : > { %6862 = vst.msk [vmem:[#allocation5 + $0xf0] sm:$0xff] %vm6851_vm13, %v14480_v25  ;;  %7843 = vrot.lane.b32.xlu0 %v10020_v21, %s10870_s14  ;;  %v7284_v6 = vsel %vm11387_vm12, %v7279_v34, %v7283_v46  ;;  %v8479_v18 = vor.u32 %v8478_v49, %v8474_v7  ;;  %v7247_v32 = vshll.u32 %v7064_v63, 16  ;;  %v7251_v37 = vshrl.u32 %v7064_v63, 16  ;;  %v7070_v34 = vld [vmem:[#allocation3 + $0x70] sm:$0xf]  ;;  %s257_s14 = sand.u32 1, %s10859_s22  }
 0x436   : > { %v9980_v19 = vcombine.low %v7274_v15, %v7284_v6  ;;  %v8470_v9 = vrot.slane %v8469_v39, 4  ;;  %v7243_v24 = vrot.slane %v7241_v12, 5  ;;  %v7257_v33 = vshll.u32 %v7065_v31, 16  ;;  %s9611_s19 = sshll.u32 %s257_s14, 8  ;;  %s14846_s25 = scalar_lea.sflag [#allocation7], %s257_s14 }
 0x437   : > { %v7001_v45 = vpop.permute.xlu1 %7000  ;;  %v8480_v25 = vrot.slane %v8479_v18, 4  ;;  %v7249_v56 = vrot.slane %v7247_v32, 5  ;;  %v7253_v21 = vrot.slane %v7251_v37, 4  ;;  %v7310_v35 = vshrl.u32 %v7072_v52, 16  ;;  %s14693_s20 = scalar_lea.vmem [#allocation6], %s9611_s19 }
 0x438   : > { %9206 = vmatmul.mubr.bf16.gmra.mrb[84].mxu1 %v8901_v2  ;;  %7039 = vst.msk [vmem:[#allocation5 + $0xf0] sm:$0xff] %vm7028_vm14, %v7001_v45  ;;  %v8475_v38 = vsel %vm11387_vm12, %v8470_v9, %v8474_v7  ;;  %v7244_v46 = vor.u32 %v7243_v24, %v7240_v14  ;;  %v7259_v8 = vrot.slane %v7257_v33, 5  ;;  %v7313_v60 = vshll.u32 %v7072_v52, 16  ;;  %v7071_v14 = vld [vmem:[#allocation3 + $0x74] sm:$0x1]  ;;  %s9533_s28 = sshll.u32 %s14693_s20, 4  ;;  %s14838_s28 = int_to_ptr.vmem [resolvable:$true] %s9533_s28 }
 0x439   : > { %7548 = vst.msk [vmem:[#allocation5 + $0xb0] sm:$0xff] %vm5985_vm7, %v9980_v19  ;;  %8020 = vrot.lane.b32.xlu0 %v10794_v22, %s10871_s18  ;;  %v8485_v36 = vsel %vm11387_vm12, %v8480_v25, %v8484_v44  ;;  %v7254_v20 = vor.u32 %v7253_v21, %v7249_v56  ;;  %v7312_v30 = vrot.slane %v7310_v35, 4  ;;  %v7319_v3 = vshll.u32 %v7073_v41, 16  ;;  %v7078_v22 = vld [vmem:[#allocation3 + $0x90] sm:$0xf]  ;;  %s10805_s12 = scalar_lea.vmem %s14838_s28, 4096  ;;  %p10812_p0 = scmp.lt.s32.totalorder %s14838_s28, %s10810_s13 }
 0x43a   : > { %7868 = vst.msk [vmem:[#allocation5 + $0xb0] sm:$0xff] %vm6530_vm11, %v14357_v59  ;;  %v10052_v53 = vcombine.low %v8475_v38, %v8485_v36  ;;  %v7245_v63 = vrot.slane %v7244_v46, 4  ;;  %v7315_v28 = vrot.slane %v7313_v60, 5  ;;  %v7323_v16 = vshrl.u32 %v7073_v41, 16  ;;  %v7079_v24 = vld [vmem:[#allocation3 + $0x94] sm:$0xf]  ;;  %p10806_p11 = scmp.ne.s32.totalorder %s14838_s28, %s10805_s12  ;;  %p10813_p1 = scmp.lt.s32.totalorder %s10811_s16, %s10805_s12 }
 0x43b   : > { %8045 = vst.msk [vmem:[#allocation5 + $0xb0] sm:$0xff] %vm6851_vm13, %v14416_v58  ;;  %v7255_v7 = vrot.slane %v7254_v20, 4  ;;  %v7321_v49 = vrot.slane %v7319_v3, 5  ;;  %v7329_v31 = vshll.u32 %v7074_v10, 16  ;;  %v7286_v15 = vshrl.u32 %v7069_v1, 16 }
 0x43c   : > { %v7250_v59 = vsel %vm11387_vm12, %v7245_v63, %v7249_v56  ;;  %v7316_v39 = vor.u32 %v7315_v28, %v7312_v30  ;;  %v7325_v44 = vrot.slane %v7323_v16, 4  ;;  %v7289_v12 = vshll.u32 %v7069_v1, 16  ;;  %v8549_v52 = vpop.permute.xlu0 %8548  ;;  %v7080_v38 = vld [vmem:[#allocation3 + $0x98] sm:$0x1]  ;;  %v7076_v28 = vld [vmem:[#allocation3 + $0x88] sm:$0xf]  ;;  %p10807_p12 = pnand %p10806_p11, %p10949_p5  ;;  %p10814_p2 = por %p10813_p1, %p10812_p0 }
 0x43d   : > { %8564 = vrot.lane.b32.xlu0 %v10052_v53, %s10872_s29  ;;  %v7260_v58 = vsel %vm11387_vm12, %v7255_v7, %v7259_v8  ;;  %v7331_v6 = vrot.slane %v7329_v31, 5  ;;  %v7288_v18 = vrot.slane %v7286_v15, 4  ;;  %v7295_v32 = vshll.u32 %v7070_v34, 16  ;;  %8589 = vst.msk [vmem:[#allocation5 + $0xb0] sm:$0xff] %vm7028_vm14, %v8549_v52  ;;  %v7075_v8 = vld [vmem:[#allocation3 + $0x84] sm:$0xf] }
 0x43e   : > { %v9979_v37 = vcombine.low %v7250_v59, %v7260_v58  ;;  %v7317_v2 = vrot.slane %v7316_v39, 4  ;;  %v7326_v19 = vor.u32 %v7325_v44, %v7321_v49  ;;  %v7291_v9 = vrot.slane %v7289_v12, 5  ;;  %v7077_v39 = vld [vmem:[#allocation3 + $0x8c] sm:$0x1]  ;;  %p10808_p13 = pneg %p10807_p12 }
 0x43f   : > { %v7297_v33 = vrot.slane %v7295_v32, 5  ;;  %v7299_v41 = vshrl.u32 %v7070_v34, 16  ;;  %v7305_v45 = vshll.u32 %v7071_v14, 16  ;;  %v7358_v25 = vshrl.u32 %v7078_v22, 16 }
 0x440   : > { %7547 = vst.msk [vmem:[#allocation5 + $0x98] sm:$0xff] %vm5985_vm7, %v9979_v37  ;;  %v7322_v56 = vsel %vm11387_vm12, %v7317_v2, %v7321_v49  ;;  %v7327_v21 = vrot.slane %v7326_v19, 4  ;;  %v7292_v35 = vor.u32 %v7291_v9, %v7288_v18  ;;  %v7361_v46 = vshll.u32 %v7078_v22, 16  ;;  %v7084_v37 = vld [vmem:[#allocation3 + $0xa8] sm:$0xf]  ;;  %p10815_p3 = pnand %p10814_p2, %p10808_p13 }
 0x441   : > { %7867 = vst.msk [vmem:[#allocation5 + $0x98] sm:$0xff] %vm6530_vm11, %v14380_v50  ;;  %v7301_v10 = vrot.slane %v7299_v41, 4  ;;  %v7307_v60 = vrot.slane %v7305_v45, 5  ;;  %v7360_v1 = vrot.slane %v7358_v25, 4  ;;  %v7367_v36 = vshll.u32 %v7079_v24, 16 }
 0x442   : > { %v14544_v20 = vpop.f32.mrb[104].mxu0  ;;  %8044 = vst.msk [vmem:[#allocation5 + $0x98] sm:$0xff] %vm6851_vm13, %v14298_v51  ;;  %v7332_v30 = vsel %vm11387_vm12, %v7327_v21, %v7331_v6  ;;  %v7293_v3 = vrot.slane %v7292_v35, 4  ;;  %v7363_v53 = vrot.slane %v7361_v46, 5  ;;  %v7371_v63 = vshrl.u32 %v7079_v24, 16 }
 0x443   : > { %v14550_v16 = vpop.f32.mrb[105].mxu0  ;;  %8588 = vst.msk [vmem:[#allocation5 + $0x98] sm:$0xff] %vm7028_vm14, %v14407_v62  ;;  %v9982_v50 = vcombine.low %v7322_v56, %v7332_v30  ;;  %v7302_v34 = vor.u32 %v7301_v10, %v7297_v33  ;;  %v7369_v7 = vrot.slane %v7367_v36, 5  ;;  %v7377_v49 = vshll.u32 %v7080_v38, 16  ;;  %v7086_v38 = vld [vmem:[#allocation3 + $0xb0] sm:$0x1] }
 0x444   : > { %v14554_v31 = vpop.f32.mrb[106].mxu0  ;;  %v7298_v51 = vsel %vm11387_vm12, %v7293_v3, %v7297_v33  ;;  %v7364_v15 = vor.u32 %v7363_v53, %v7360_v1  ;;  %v7373_v59 = vrot.slane %v7371_v63, 4  ;;  %v7334_v44 = vshrl.u32 %v7075_v8, 16  ;;  %v7085_v33 = vld [vmem:[#allocation3 + $0xac] sm:$0xf]  ;;  %v7836_v56 = vpop.permute.xlu0 %7835 }
 0x445   : > { %v14558_v14 = vpop.f32.mrb[107].mxu0  ;;  %7550 = vst.msk [vmem:[#allocation5 + $0xe0] sm:$0xff] %vm5985_vm7, %v9982_v50  ;;  %v7303_v12 = vrot.slane %v7302_v34, 4  ;;  %v7379_v52 = vrot.slane %v7377_v49, 5  ;;  %v7337_v62 = vshll.u32 %v7075_v8, 16  ;;  %v7343_v22 = vshll.u32 %v7076_v28, 16 }
 0x446   : > { %7870 = vst.msk [vmem:[#allocation5 + $0xe0] sm:$0xff] %vm6530_vm11, %v14456_v40  ;;  %v7365_v58 = vrot.slane %v7364_v15, 4  ;;  %v7374_v6 = vor.u32 %v7373_v59, %v7369_v7  ;;  %v7336_v18 = vrot.slane %v7334_v44, 4  ;;  %v7347_v32 = vshrl.u32 %v7076_v28, 16  ;;  %v8908_v1 = vld [vmem:[#allocation5 + $0xb0] sm:$0xff] }
 0x447   : > { %v7308_v2 = vsel %vm11387_vm12, %v7303_v12, %v7307_v60  ;;  %8047 = vst.msk [vmem:[#allocation5 + $0xe0] sm:$0xff] %vm6851_vm13, %v14520_v23  ;;  %v7339_v19 = vrot.slane %v7337_v62, 5  ;;  %v7345_v9 = vrot.slane %v7343_v22, 5  ;;  %v7353_v24 = vshll.u32 %v7077_v39, 16  ;;  %v7081_v3 = vld [vmem:[#allocation3 + $0x9c] sm:$0xf] }
 0x448   : > { %v9981_v41 = vcombine.low %v7298_v51, %v7308_v2  ;;  %v7370_v45 = vsel %vm11387_vm12, %v7365_v58, %v7369_v7  ;;  %v7375_v40 = vrot.slane %v7374_v6, 4  ;;  %v7349_v25 = vrot.slane %v7347_v32, 4  ;;  %v8904_v53 = vld [vmem:[#allocation5 + $0x90] sm:$0xff]  ;;  %v7082_v7 = vld [vmem:[#allocation3 + $0xa0] sm:$0xf] }
 0x449   : > { %v7340_v21 = vor.u32 %v7339_v19, %v7336_v18  ;;  %v7355_v35 = vrot.slane %v7353_v24, 5  ;;  %v7406_v46 = vshrl.u32 %v7084_v37, 16  ;;  %v7409_v8 = vshll.u32 %v7084_v37, 16  ;;  %v7083_v62 = vld [vmem:[#allocation3 + $0xa4] sm:$0x1] }
 0x44a   : > { %7549 = vst.msk [vmem:[#allocation5 + $0xc8] sm:$0xff] %vm5985_vm7, %v9981_v41  ;;  %v8905_v10 = vld [vmem:[#allocation5 + $0x98] sm:$0xff]  ;;  %v7380_v23 = vsel %vm11387_vm12, %v7375_v40, %v7379_v52  ;;  %v7350_v60 = vor.u32 %v7349_v25, %v7345_v9  ;;  %v7415_v36 = vshll.u32 %v7085_v33, 16  ;;  %v7419_v30 = vshrl.u32 %v7085_v33, 16  ;;  %v7088_v19 = vld [vmem:[#allocation3 + $0xb8] sm:$0xf] }
 0x44b   : > { %7869 = vst.msk [vmem:[#allocation5 + $0xc8] sm:$0xff] %vm6530_vm11, %v14478_v47  ;;  %9213 = vmatprep.mubr.bf16.mxu1 %v8905_v10  ;;  %v9984_v63 = vcombine.low %v7370_v45, %v7380_v23  ;;  %v7341_v28 = vrot.slane %v7340_v21, 4  ;;  %v7408_v50 = vrot.slane %v7406_v46, 4  ;;  %v7411_v34 = vrot.slane %v7409_v8, 5  ;;  %v7087_v58 = vld [vmem:[#allocation3 + $0xb4] sm:$0xf]  ;;  %v7834_v18 = vpop.permute.xlu0 %7833 }
 0x44c   : > { %8046 = vst.msk [vmem:[#allocation5 + $0xc8] sm:$0xff] %vm6851_vm13, %v14391_v5  ;;  %9214 = vmatmul.mubr.bf16.gmra.mrb[88].mxu1 %v8904_v53  ;;  %v6501_v49 = vpop.permute.xlu1 %6500  ;;  %v7351_v51 = vrot.slane %v7350_v60, 4  ;;  %v7417_v15 = vrot.slane %v7415_v36, 5  ;;  %v7421_v59 = vrot.slane %v7419_v30, 4  ;;  %v7425_v39 = vshll.u32 %v7086_v38, 16  ;;  %v8907_v10 = vld [vmem:[#allocation5 + $0xa8] sm:$0xff] }
 0x44d   : > { %8590 = vst.msk [vmem:[#allocation5 + $0xc8] sm:$0xff] %vm7028_vm14, %v14508_v0  ;;  %9221 = vmatprep.mubr.bf16.mxu1 %v8908_v1  ;;  %v7412_v47 = vor.u32 %v7411_v34, %v7408_v50  ;;  %v7382_v44 = vshrl.u32 %v7081_v3, 16  ;;  %v7385_v12 = vshll.u32 %v7081_v3, 16  ;;  %v7346_v5 = vsel %vm11387_vm12, %v7341_v28, %v7345_v9  ;;  %v7090_v46 = vld [vmem:[#allocation3 + $0xc0] sm:$0xf] }
 0x44e   : > { %7552 = vst.msk [vmem:[#allocation5 + $0x110] sm:$0xff] %vm5985_vm7, %v9984_v63  ;;  %v7356_v52 = vsel %vm11387_vm12, %v7351_v51, %v7355_v35  ;;  %v7422_v0 = vor.u32 %v7421_v59, %v7417_v15  ;;  %v7391_v22 = vshll.u32 %v7082_v7, 16  ;;  %v7427_v24 = vrot.slane %v7425_v39, 5  ;;  %v7089_v35 = vld [vmem:[#allocation3 + $0xbc] sm:$0x1] }
 0x44f   : > { %6540 = vst.msk [vmem:[#allocation5 + $0xd8] sm:$0xff] %vm6530_vm11, %v6501_v49  ;;  %7872 = vst.msk [vmem:[#allocation5 + $0x110] sm:$0xff] %vm6530_vm11, %v7836_v56  ;;  %v9983_v6 = vcombine.low %v7346_v5, %v7356_v52  ;;  %v7413_v32 = vrot.slane %v7412_v47, 4  ;;  %v7384_v37 = vrot.slane %v7382_v44, 4  ;;  %v7387_v2 = vrot.slane %v7385_v12, 5  ;;  %v14599_v50 = vpop.permute.xlu0 %8014 }
 0x450   : > { %6861 = vst.msk [vmem:[#allocation5 + $0xd8] sm:$0xff] %vm6851_vm13, %v14488_v54  ;;  %v7423_v54 = vrot.slane %v7422_v0, 4  ;;  %v7393_v33 = vrot.slane %v7391_v22, 5  ;;  %v7395_v9 = vshrl.u32 %v7082_v7, 16  ;;  %v7401_v45 = vshll.u32 %v7083_v62, 16  ;;  %v14597_v8 = vpop.permute.xlu1 %6827 }
 0x451   : > { %7038 = vst.msk [vmem:[#allocation5 + $0xd8] sm:$0xff] %vm7028_vm14, %v14403_v17  ;;  %v7388_v41 = vor.u32 %v7387_v2, %v7384_v37  ;;  %v7430_v40 = vshrl.u32 %v7087_v58, 16  ;;  %v7433_v25 = vshll.u32 %v7087_v58, 16  ;;  %v7418_v17 = vsel %vm11387_vm12, %v7413_v32, %v7417_v15  ;;  %v7091_v30 = vld [vmem:[#allocation3 + $0xc4] sm:$0xf] }
 0x452   : > { %7551 = vst.msk [vmem:[#allocation5 + $0xf8] sm:$0xff] %vm5985_vm7, %v9983_v6  ;;  %v7428_v56 = vsel %vm11387_vm12, %v7423_v54, %v7427_v24  ;;  %v7397_v21 = vrot.slane %v7395_v9, 4  ;;  %v7439_v38 = vshll.u32 %v7088_v19, 16  ;;  %v7443_v28 = vshrl.u32 %v7088_v19, 16  ;;  %v7092_v7 = vld [vmem:[#allocation3 + $0xc8] sm:$0x1] }
 0x453   : > { %7871 = vst.msk [vmem:[#allocation5 + $0xf8] sm:$0xff] %vm6530_vm11, %v7834_v18  ;;  %v9986_v23 = vcombine.low %v7418_v17, %v7428_v56  ;;  %v7389_v60 = vrot.slane %v7388_v41, 4  ;;  %v7432_v1 = vrot.slane %v7430_v40, 4  ;;  %v7435_v36 = vrot.slane %v7433_v25, 5  ;;  %v8643_v44 = vld [vmem:[#allocation3 + $0xcc] sm:$0xe] }
 0x454   : > { %8048 = vst.msk [vmem:[#allocation5 + $0xf8] sm:$0xff] %vm6851_vm13, %v14495_v57  ;;  %9222 = vmatmul.mubr.bf16.gmra.mrb[92].mxu1 %v8907_v10  ;;  %v8911_v3 = vld [vmem:[#allocation5 + $0xc8] sm:$0xff]  ;;  %v7398_v53 = vor.u32 %v7397_v21, %v7393_v33  ;;  %v7441_v63 = vrot.slane %v7439_v38, 5  ;;  %v7403_v34 = vrot.slane %v7401_v45, 5  ;;  %v7454_v49 = vshrl.u32 %v7090_v46, 16  ;;  %v6826_v37 = vpop.permute.xlu1 %6825  ;;  %v8910_v25 = vld [vmem:[#allocation5 + $0xc0] sm:$0xff] }
 0x455   : > { %9229 = vmatprep.mubr.bf16.mxu1 %v8911_v3  ;;  %7554 = vst.msk [vmem:[#allocation5 + $0x140] sm:$0xff] %vm5985_vm7, %v9986_v23  ;;  %v7436_v57 = vor.u32 %v7435_v36, %v7432_v1  ;;  %v7457_v51 = vshll.u32 %v7090_v46, 16  ;;  %v7445_v59 = vrot.slane %v7443_v28, 4  ;;  %v7449_v39 = vshll.u32 %v7089_v35, 16  ;;  %v8644_v62 = vld [vmem:[#allocation3 + $0xd0] sm:$0xf] }
 0x456   : > { %v7399_v15 = vrot.slane %v7398_v53, 4  ;;  %v7463_v47 = vshll.u32 %v7091_v30, 16  ;;  %v7394_v12 = vsel %vm11387_vm12, %v7389_v60, %v7393_v33  ;;  %v7456_v5 = vrot.slane %v7454_v49, 4  ;;  %v8645_v32 = vld [vmem:[#allocation3 + $0xd4] sm:$0x1] }
 0x457   : > { %v7459_v52 = vrot.slane %v7457_v51, 5  ;;  %v7467_v0 = vshrl.u32 %v7091_v30, 16  ;;  %v7437_v58 = vrot.slane %v7436_v57, 4  ;;  %v7446_v6 = vor.u32 %v7445_v59, %v7441_v63 }
 0x458   : > { %v7404_v22 = vsel %vm11387_vm12, %v7399_v15, %v7403_v34  ;;  %v7465_v18 = vrot.slane %v7463_v47, 5  ;;  %v7473_v24 = vshll.u32 %v7092_v7, 16  ;;  %v7451_v41 = vrot.slane %v7449_v39, 5 }
 0x459   : > { %v9985_v2 = vcombine.low %v7394_v12, %v7404_v22  ;;  %v7460_v19 = vor.u32 %v7459_v52, %v7456_v5  ;;  %v7469_v54 = vrot.slane %v7467_v0, 4  ;;  %v7447_v9 = vrot.slane %v7446_v6, 4 }
 0x45a   : > { %v10068_v45 = vrot.slane %v8643_v44, 9  ;;  %v8801_v33 = vrot.slane %v8644_v62, 5  ;;  %v8804_v21 = vrot.slane %v8645_v32, 5  ;;  %v7442_v35 = vsel %vm11387_vm12, %v7437_v58, %v7441_v63  ;;  %v8913_v44 = vld [vmem:[#allocation5 + $0xd8] sm:$0xff]  ;;  %v8916_v58 = vld [vmem:[#allocation5 + $0xf0] sm:$0xff] }
 0x45b   : > { %v8555_v40 = vpop.permute.xlu0 %8554  ;;  %7553 = vst.msk [vmem:[#allocation5 + $0x128] sm:$0xff] %vm5985_vm7, %v9985_v2  ;;  %v7461_v17 = vrot.slane %v7460_v19, 4  ;;  %v7470_v56 = vor.u32 %v7469_v54, %v7465_v18  ;;  %v7452_v38 = vsel %vm11387_vm12, %v7447_v9, %v7451_v41  ;;  %v7475_v36 = vrot.slane %v7473_v24, 5 }
 0x45c   : > { %8592 = vst.msk [vmem:[#allocation5 + $0xf8] sm:$0xff] %vm7028_vm14, %v8555_v40  ;;  %9230 = vmatmul.mubr.bf16.gmra.mrb[96].mxu1 %v8910_v25  ;;  %v8802_v46 = vsel %vm11529_vm0, %v10068_v45, %v8801_v33  ;;  %v8803_v10 = vrot.slane %v8801_v33, 4  ;;  %v9987_v60 = vcombine.low %v7442_v35, %v7452_v38 }
 0x45d   : > { %v7471_v1 = vrot.slane %v7470_v56, 4  ;;  %v7466_v63 = vsel %vm11387_vm12, %v7461_v17, %v7465_v18 }
 0x45e   : > { %v14614_v23 = vpop.f32.mrb[108].mxu0  ;;  %v8805_v3 = vsel %vm11529_vm0, %v8803_v10, %v8804_v21  ;;  %7555 = vst.msk [vmem:[#allocation5 + $0x158] sm:$0xff] %vm5985_vm7, %v9987_v60 }
 0x45f   : > { %v14616_v30 = vpop.f32.mrb[109].mxu0  ;;  %v6507_v53 = vpop.permute.xlu1 %6506  ;;  %v7476_v34 = vsel %vm11387_vm12, %v7471_v1, %v7475_v36  ;;  %v10084_v57 = vcombine.low %v8802_v46, %v8805_v3 }
 0x460   : > { %v8013_v28 = vpop.permute.xlu0 %8012  ;;  %6543 = vst.msk [vmem:[#allocation5 + $0x120] sm:$0xff] %vm6530_vm11, %v6507_v53  ;;  %v14627_v7 = vpop.f32.mrb[110].mxu0  ;;  %v9988_v49 = vcombine.low %v7466_v63, %v7476_v34 }
 0x461   : > { %8049 = vst.msk [vmem:[#allocation5 + $0x110] sm:$0xff] %vm6851_vm13, %v8013_v28  ;;  %6864 = vst.msk [vmem:[#allocation5 + $0x120] sm:$0xff] %vm6851_vm13, %v14597_v8  ;;  %v14631_v11 = vpop.f32.mrb[111].mxu0 }
 0x462   : > { %8885 = vst.msk [vmem:[#allocation5 + $0x178] sm:$0xff] %vm5985_vm7, %v10084_v57  ;;  %7556 = vst.msk [vmem:[#allocation5 + $0x170] sm:$0xff] %vm5985_vm7, %v9988_v49  ;;  %v14685_v57 = vld [vmem:[%s14892_s5] ss:$0 sm:$0xff] }
 0x463   : > { %v7005_v51 = vpop.permute.xlu1 %7004  ;;  %v8917_v5 = vld [vmem:[#allocation5 + $0xf8] sm:$0xff] }
 0x464   : > { %7041 = vst.msk [vmem:[#allocation5 + $0x120] sm:$0xff] %vm7028_vm14, %v7005_v51 }
 0x468   : > { %v8553_v42 = vpop.permute.xlu0 %8552 }
 0x469   : > { %v8933_v15 = vld [vmem:[#allocation5 + $0x178] sm:$0xff]  ;;  %8591 = vst.msk [vmem:[#allocation5 + $0xe0] sm:$0xff] %vm7028_vm14, %v8553_v42 }
 0x46a   : > { %10607 = vmatmul.mubr.msk.bf16.gmra.mrb[124].mxu0 %vm5985_vm7, %v8933_v15 }
 0x46b   : > { %v6505_v59 = vpop.permute.xlu1 %6504  ;;  %v8922_v56 = vld [vmem:[#allocation5 + $0x120] sm:$0xff] }
 0x46c   : > { %6542 = vst.msk [vmem:[#allocation5 + $0x108] sm:$0xff] %vm6530_vm11, %v6505_v59 }
 0x46d   : > { %6863 = vst.msk [vmem:[#allocation5 + $0x108] sm:$0xff] %vm6851_vm13, %v6826_v37 }
 0x46e   : > { %7040 = vst.msk [vmem:[#allocation5 + $0x108] sm:$0xff] %vm7028_vm14, %v14499_v55  ;;  %v7840_v8 = vpop.permute.xlu0 %7839 }
 0x46f   : > { %7874 = vst.msk [vmem:[#allocation5 + $0x140] sm:$0xff] %vm6530_vm11, %v7840_v8 }
 0x470   : > { %v8914_v39 = vld [vmem:[#allocation5 + $0xe0] sm:$0xff] }
 0x471   : > { %v6830_v47 = vpop.permute.xlu1 %6829  ;;  %9237 = vmatprep.mubr.bf16.mxu1 %v8914_v39 }
 0x472   : > { %v7838_v12 = vpop.permute.xlu0 %7837  ;;  %9238 = vmatmul.mubr.bf16.gmra.mrb[100].mxu1 %v8913_v44 }
 0x473   : > { %7873 = vst.msk [vmem:[#allocation5 + $0x128] sm:$0xff] %vm6530_vm11, %v7838_v12  ;;  %9245 = vmatprep.mubr.bf16.mxu1 %v8917_v5 }
 0x474   : > { %v14644_v52 = vpop.f32.mrb[112].mxu0  ;;  %8050 = vst.msk [vmem:[#allocation5 + $0x128] sm:$0xff] %vm6851_vm13, %v14599_v50 }
 0x475   : > { %v14648_v0 = vpop.f32.mrb[113].mxu0  ;;  %v7007_v22 = vpop.permute.xlu1 %7006  ;;  %v8919_v45 = vld [vmem:[#allocation5 + $0x108] sm:$0xff] }
 0x476   : > { %v14650_v55 = vpop.f32.mrb[114].mxu0 }
 0x477   : > { %v14652_v62 = vpop.f32.mrb[115].mxu0 }
 0x47a   : > { %v8559_v6 = vpop.permute.xlu0 %8558  ;;  %9246 = vmatmul.mubr.bf16.gmra.mrb[104].mxu1 %v8916_v58 }
 0x47b   : > { %8594 = vst.msk [vmem:[#allocation5 + $0x128] sm:$0xff] %vm7028_vm14, %v8559_v6 }
 0x47d   : > { %v6511_v18 = vpop.permute.xlu1 %6510 }
 0x47e   : > { %6545 = vst.msk [vmem:[#allocation5 + $0x150] sm:$0xff] %vm6530_vm11, %v6511_v18 }
 0x482   : > { %v8923_v40 = vld [vmem:[#allocation5 + $0x128] sm:$0xff] }
 0x484   : > { %v8557_v32 = vpop.permute.xlu0 %8556 }
 0x485   : > { %8593 = vst.msk [vmem:[#allocation5 + $0x110] sm:$0xff] %vm7028_vm14, %v8557_v32 }
 0x488   : > { %v6509_v37 = vpop.permute.xlu1 %6508  ;;  %v8017_v50 = vpop.permute.xlu0 %8016 }
 0x489   : > { %6544 = vst.msk [vmem:[#allocation5 + $0x138] sm:$0xff] %vm6530_vm11, %v6509_v37 }
 0x48a   : > { %8051 = vst.msk [vmem:[#allocation5 + $0x140] sm:$0xff] %vm6851_vm13, %v8017_v50  ;;  %v14659_v2 = vpop.f32.mrb[116].mxu0  ;;  %6865 = vst.msk [vmem:[#allocation5 + $0x138] sm:$0xff] %vm6851_vm13, %v6830_v47 }
 0x48b   : > { %v14662_v19 = vpop.f32.mrb[117].mxu0  ;;  %7042 = vst.msk [vmem:[#allocation5 + $0x138] sm:$0xff] %vm7028_vm14, %v7007_v22 }
 0x48c   : > { %v14665_v54 = vpop.f32.mrb[118].mxu0  ;;  %v6832_v24 = vpop.permute.xlu1 %6831  ;;  %v8920_v9 = vld [vmem:[#allocation5 + $0x110] sm:$0xff] }
 0x48d   : > { %6866 = vst.msk [vmem:[#allocation5 + $0x150] sm:$0xff] %vm6851_vm13, %v6832_v24  ;;  %v8019_v41 = vpop.permute.xlu0 %8018  ;;  %9253 = vmatprep.mubr.bf16.mxu1 %v8920_v9  ;;  %v14668_v33 = vpop.f32.mrb[119].mxu0 }
 0x48e   : > { %9254 = vmatmul.mubr.bf16.gmra.mrb[108].mxu1 %v8919_v45 }
 0x48f   : > { %9261 = vmatprep.mubr.bf16.mxu1 %v8923_v40 }
 0x490   : > { %v7009_v25 = vpop.permute.xlu1 %7008 }
 0x491   : > { %7043 = vst.msk [vmem:[#allocation5 + $0x150] sm:$0xff] %vm7028_vm14, %v7009_v25 }
 0x492   : > { %v8925_v1 = vld [vmem:[#allocation5 + $0x138] sm:$0xff] }
 0x493   : > { %v7842_v17 = vpop.permute.xlu0 %7841 }
 0x494   : > { %7875 = vst.msk [vmem:[#allocation5 + $0x158] sm:$0xff] %vm6530_vm11, %v7842_v17  ;;  %v6834_v21 = vpop.permute.xlu1 %6833 }
 0x495   : > { %8052 = vst.msk [vmem:[#allocation5 + $0x158] sm:$0xff] %vm6851_vm13, %v8019_v41 }
 0x496   : > { %9262 = vmatmul.mubr.bf16.gmra.mrb[112].mxu1 %v8922_v56 }
 0x498   : > { %v8928_v28 = vld [vmem:[#allocation5 + $0x150] sm:$0xff] }
 0x49c   : > { %v8561_v35 = vpop.permute.xlu0 %8560 }
 0x49d   : > { %8595 = vst.msk [vmem:[#allocation5 + $0x140] sm:$0xff] %vm7028_vm14, %v8561_v35 }
 0x49f   : > { %v6513_v38 = vpop.permute.xlu1 %6512 }
 0x4a0   : > { %6546 = vst.msk [vmem:[#allocation5 + $0x168] sm:$0xff] %vm6530_vm11, %v6513_v38 }
 0x4a1   : > { %6867 = vst.msk [vmem:[#allocation5 + $0x168] sm:$0xff] %vm6851_vm13, %v6834_v21 }
 0x4a3   : > { %v8563_v46 = vpop.permute.xlu0 %8562 }
 0x4a4   : > { %v7011_v10 = vpop.permute.xlu1 %7010  ;;  %8596 = vst.msk [vmem:[#allocation5 + $0x158] sm:$0xff] %vm7028_vm14, %v8563_v46  ;;  %v8926_v60 = vld [vmem:[#allocation5 + $0x140] sm:$0xff] }
 0x4a5   : > { %7044 = vst.msk [vmem:[#allocation5 + $0x168] sm:$0xff] %vm7028_vm14, %v7011_v10  ;;  %9269 = vmatprep.mubr.bf16.mxu1 %v8926_v60 }
 0x4a6   : > { %9270 = vmatmul.mubr.bf16.gmra.mrb[116].mxu1 %v8925_v1 }
 0x4a7   : > { %v7844_v36 = vpop.permute.xlu0 %7843 }
 0x4a8   : > { %7876 = vst.msk [vmem:[#allocation5 + $0x170] sm:$0xff] %vm6530_vm11, %v7844_v36 }
 0x4ab   : > { %v8021_v3 = vpop.permute.xlu0 %8020  ;;  %v8929_v53 = vld [vmem:[#allocation5 + $0x158] sm:$0xff] }
 0x4ac   : > { %8053 = vst.msk [vmem:[#allocation5 + $0x170] sm:$0xff] %vm6851_vm13, %v8021_v3  ;;  %9277 = vmatprep.mubr.bf16.mxu1 %v8929_v53  ;;  %v8931_v12 = vld [vmem:[#allocation5 + $0x168] sm:$0xff] }
 0x4ae   : > { %9278 = vmatmul.mubr.bf16.gmra.mrb[120].mxu1 %v8928_v28 }
 0x4af   : > { %v8565_v63 = vpop.permute.xlu0 %8564 }
 0x4b0   : > { %8597 = vst.msk [vmem:[#allocation5 + $0x170] sm:$0xff] %vm7028_vm14, %v8565_v63 }
 0x4b1   : > { %v10420_v34 = vpop.f32.mrb[64].mxu1 }
 0x4b2   : > { %v10421_v49 = vpop.f32.mrb[65].mxu1 }
 0x4b3   : > { %v10422_v51 = vadd.f32 %v10421_v49, %v10420_v34  ;;  %v10423_v42 = vpop.f32.mrb[66].mxu1 }
 0x4b4   : > { %v10424_v15 = vpop.f32.mrb[67].mxu1 }
 0x4b5   : > { %v9168_v59 = vadd.f32 %v10422_v51, %v14685_v57  ;;  %v10425_v8 = vadd.f32 %v10424_v15, %v10423_v42 }
 0x4b7   : > { %v8932_v39 = vld [vmem:[#allocation5 + $0x170] sm:$0xff]  ;;  %v9329_v47 = vadd.f32 %v14370_v4, %v9168_v59  ;;  %v9171_v44 = vadd.f32 %v10425_v8, %v14685_v57 }
 0x4b8   : > { %9285 = vmatprep.mubr.bf16.mxu1 %v8932_v39 }
 0x4b9   : > { %9286 = vmatmul.mubr.bf16.gmra.mrb[124].mxu1 %v8931_v12  ;;  %v9455_v5 = vmax.f32 %v9329_v47, 0.0  ;;  %v9332_v22 = vadd.f32 %v14387_v29, %v9171_v44  ;;  %v10426_v58 = vpop.f32.mrb[68].mxu1 }
 0x4ba   : > { %v10427_v6 = vpop.f32.mrb[69].mxu1 }
 0x4bb   : > { %9487 = vst.msk [vmem:[%s14693_s20] sm:$0xff] %vm5985_vm7, %v9455_v5  ;;  %v9456_v18 = vmax.f32 %v9332_v22, 0.0  ;;  %v10428_v4 = vadd.f32 %v10427_v6, %v10426_v58  ;;  %v10429_v32 = vpop.f32.mrb[70].mxu1 }
 0x4bc   : > { %v10430_v37 = vpop.f32.mrb[71].mxu1 }
 0x4bd   : > { %9488 = vst.msk [vmem:[%s14693_s20 + $0x8] sm:$0xff] %vm5985_vm7, %v9456_v18  ;;  %v9176_v50 = vadd.f32 %v10428_v4, %v14685_v57  ;;  %v10431_v24 = vadd.f32 %v10430_v37, %v10429_v32 }
 0x4bf   : > { %v9337_v29 = vadd.f32 %v14362_v48, %v9176_v50  ;;  %v9179_v9 = vadd.f32 %v10431_v24, %v14685_v57 }
 0x4c1   : > { %v9457_v41 = vmax.f32 %v9337_v29, 0.0  ;;  %v9340_v45 = vadd.f32 %v14374_v27, %v9179_v9 }
 0x4c3   : > { %9489 = vst.msk [vmem:[%s14693_s20 + $0x10] sm:$0xff] %vm5985_vm7, %v9457_v41  ;;  %v9458_v40 = vmax.f32 %v9340_v45, 0.0 }
 0x4c5   : > { %9490 = vst.msk [vmem:[%s14693_s20 + $0x18] sm:$0xff] %vm5985_vm7, %v9458_v40 }
 0x4dc   : > { %v10432_v25 = vpop.f32.mrb[72].mxu1 }
 0x4dd   : > { %v10433_v17 = vpop.f32.mrb[73].mxu1 }
 0x4de   : > { %v10434_v56 = vadd.f32 %v10433_v17, %v10432_v25  ;;  %v10435_v21 = vpop.f32.mrb[74].mxu1 }
 0x4df   : > { %v10436_v35 = vpop.f32.mrb[75].mxu1 }
 0x4e0   : > { %v9184_v38 = vadd.f32 %v10434_v56, %v14685_v57  ;;  %v10437_v46 = vadd.f32 %v10436_v35, %v10435_v21 }
 0x4e2   : > { %v9345_v48 = vadd.f32 %v14458_v13, %v9184_v38  ;;  %v9187_v10 = vadd.f32 %v10437_v46, %v14685_v57 }
 0x4e4   : > { %v9459_v27 = vmax.f32 %v9345_v48, 0.0  ;;  %v9348_v60 = vadd.f32 %v14465_v61, %v9187_v10  ;;  %v10438_v1 = vpop.f32.mrb[76].mxu1 }
 0x4e5   : > { %v14711_v36 = vpop.f32.mrb[120].mxu0  ;;  %v10439_v3 = vpop.f32.mrb[77].mxu1 }
 0x4e6   : > { %v14713_v53 = vpop.f32.mrb[121].mxu0  ;;  %9491 = vst.msk [vmem:[%s14693_s20 + $0x20] sm:$0xff] %vm5985_vm7, %v9459_v27  ;;  %v9460_v28 = vmax.f32 %v9348_v60, 0.0  ;;  %v10440_v63 = vadd.f32 %v10439_v3, %v10438_v1  ;;  %v10441_v34 = vpop.f32.mrb[78].mxu1 }
 0x4e7   : > { %v14717_v49 = vpop.f32.mrb[122].mxu0  ;;  %v10442_v13 = vpop.f32.mrb[79].mxu1 }
 0x4e8   : > { %v14719_v51 = vpop.f32.mrb[123].mxu0  ;;  %9492 = vst.msk [vmem:[%s14693_s20 + $0x28] sm:$0xff] %vm5985_vm7, %v9460_v28  ;;  %v9192_v61 = vadd.f32 %v10440_v63, %v14685_v57  ;;  %v10443_v42 = vadd.f32 %v10442_v13, %v10441_v34 }
 0x4ea   : > { %v9353_v15 = vadd.f32 %v14449_v26, %v9192_v61  ;;  %v9195_v59 = vadd.f32 %v10443_v42, %v14685_v57 }
 0x4ec   : > { %v9461_v8 = vmax.f32 %v9353_v15, 0.0  ;;  %v9356_v39 = vadd.f32 %v14461_v43, %v9195_v59 }
 0x4ee   : > { %9493 = vst.msk [vmem:[%s14693_s20 + $0x30] sm:$0xff] %vm5985_vm7, %v9461_v8  ;;  %v9462_v47 = vmax.f32 %v9356_v39, 0.0 }
 0x4f0   : > { %9494 = vst.msk [vmem:[%s14693_s20 + $0x38] sm:$0xff] %vm5985_vm7, %v9462_v47 }
 0x503   : > { %v10444_v44 = vpop.f32.mrb[80].mxu1 }
 0x504   : > { %v10445_v12 = vpop.f32.mrb[81].mxu1 }
 0x505   : > { %v10446_v5 = vadd.f32 %v10445_v12, %v10444_v44  ;;  %v10447_v22 = vpop.f32.mrb[82].mxu1 }
 0x506   : > { %v10448_v58 = vpop.f32.mrb[83].mxu1 }
 0x507   : > { %v9200_v6 = vadd.f32 %v10446_v5, %v14685_v57  ;;  %v10449_v26 = vadd.f32 %v10448_v58, %v10447_v22 }
 0x509   : > { %v9361_v18 = vadd.f32 %v14550_v16, %v9200_v6  ;;  %v9203_v4 = vadd.f32 %v10449_v26, %v14685_v57 }
 0x50b   : > { %v9463_v43 = vmax.f32 %v9361_v18, 0.0  ;;  %v9364_v32 = vadd.f32 %v14558_v14, %v9203_v4  ;;  %v10450_v37 = vpop.f32.mrb[84].mxu1 }
 0x50c   : > { %v10451_v50 = vpop.f32.mrb[85].mxu1 }
 0x50d   : > { %9495 = vst.msk [vmem:[%s14693_s20 + $0x40] sm:$0xff] %vm5985_vm7, %v9463_v43  ;;  %v9464_v24 = vmax.f32 %v9364_v32, 0.0  ;;  %v10452_v29 = vadd.f32 %v10451_v50, %v10450_v37  ;;  %v10453_v9 = vpop.f32.mrb[86].mxu1 }
 0x50e   : > { %v10454_v41 = vpop.f32.mrb[87].mxu1 }
 0x50f   : > { %9496 = vst.msk [vmem:[%s14693_s20 + $0x48] sm:$0xff] %vm5985_vm7, %v9464_v24  ;;  %v9208_v45 = vadd.f32 %v10452_v29, %v14685_v57  ;;  %v10455_v16 = vadd.f32 %v10454_v41, %v10453_v9 }
 0x511   : > { %v9369_v40 = vadd.f32 %v14544_v20, %v9208_v45  ;;  %v9211_v25 = vadd.f32 %v10455_v16, %v14685_v57 }
 0x513   : > { %v9465_v17 = vmax.f32 %v9369_v40, 0.0  ;;  %v9372_v14 = vadd.f32 %v14554_v31, %v9211_v25 }
 0x515   : > { %9497 = vst.msk [vmem:[%s14693_s20 + $0x50] sm:$0xff] %vm5985_vm7, %v9465_v17  ;;  %v9466_v56 = vmax.f32 %v9372_v14, 0.0 }
 0x517   : > { %9498 = vst.msk [vmem:[%s14693_s20 + $0x58] sm:$0xff] %vm5985_vm7, %v9466_v56 }
 0x51f   : > { %v10456_v21 = vpop.f32.mrb[88].mxu1 }
 0x520   : > { %v10457_v35 = vpop.f32.mrb[89].mxu1 }
 0x521   : > { %v10458_v38 = vadd.f32 %v10457_v35, %v10456_v21  ;;  %v10459_v46 = vpop.f32.mrb[90].mxu1 }
 0x522   : > { %v10460_v48 = vpop.f32.mrb[91].mxu1 }
 0x523   : > { %v9216_v10 = vadd.f32 %v10458_v38, %v14685_v57  ;;  %v10461_v20 = vadd.f32 %v10460_v48, %v10459_v46 }
 0x525   : > { %v9377_v27 = vadd.f32 %v14616_v30, %v9216_v10  ;;  %v9219_v60 = vadd.f32 %v10461_v20, %v14685_v57 }
 0x527   : > { %v9467_v31 = vmax.f32 %v9377_v27, 0.0  ;;  %v9380_v1 = vadd.f32 %v14631_v11, %v9219_v60  ;;  %v10462_v3 = vpop.f32.mrb[92].mxu1 }
 0x528   : > { %v10463_v28 = vpop.f32.mrb[93].mxu1 }
 0x529   : > { %9499 = vst.msk [vmem:[%s14693_s20 + $0x60] sm:$0xff] %vm5985_vm7, %v9467_v31  ;;  %v9468_v63 = vmax.f32 %v9380_v1, 0.0  ;;  %v10464_v34 = vadd.f32 %v10463_v28, %v10462_v3  ;;  %v10465_v13 = vpop.f32.mrb[94].mxu1 }
 0x52a   : > { %v10466_v61 = vpop.f32.mrb[95].mxu1 }
 0x52b   : > { %9500 = vst.msk [vmem:[%s14693_s20 + $0x68] sm:$0xff] %vm5985_vm7, %v9468_v63  ;;  %v9224_v42 = vadd.f32 %v10464_v34, %v14685_v57  ;;  %v10467_v30 = vadd.f32 %v10466_v61, %v10465_v13 }
 0x52d   : > { %v9385_v15 = vadd.f32 %v14614_v23, %v9224_v42  ;;  %v9227_v59 = vadd.f32 %v10467_v30, %v14685_v57 }
 0x52f   : > { %v9469_v11 = vmax.f32 %v9385_v15, 0.0  ;;  %v9388_v8 = vadd.f32 %v14627_v7, %v9227_v59  ;;  %v10468_v39 = vpop.f32.mrb[96].mxu1 }
 0x530   : > { %v10469_v47 = vpop.f32.mrb[97].mxu1 }
 0x531   : > { %9501 = vst.msk [vmem:[%s14693_s20 + $0x70] sm:$0xff] %vm5985_vm7, %v9469_v11  ;;  %v9470_v44 = vmax.f32 %v9388_v8, 0.0  ;;  %v10470_v12 = vadd.f32 %v10469_v47, %v10468_v39  ;;  %v10471_v5 = vpop.f32.mrb[98].mxu1 }
 0x532   : > { %v10472_v22 = vpop.f32.mrb[99].mxu1 }
 0x533   : > { %9502 = vst.msk [vmem:[%s14693_s20 + $0x78] sm:$0xff] %vm5985_vm7, %v9470_v44  ;;  %v9232_v58 = vadd.f32 %v10470_v12, %v14685_v57  ;;  %v10473_v23 = vadd.f32 %v10472_v22, %v10471_v5 }
 0x535   : > { %v9393_v6 = vadd.f32 %v14648_v0, %v9232_v58  ;;  %v9235_v26 = vadd.f32 %v10473_v23, %v14685_v57 }
 0x537   : > { %v9471_v18 = vmax.f32 %v9393_v6, 0.0  ;;  %v9396_v7 = vadd.f32 %v14652_v62, %v9235_v26 }
 0x539   : > { %9503 = vst.msk [vmem:[%s14693_s20 + $0x80] sm:$0xff] %vm5985_vm7, %v9471_v18  ;;  %v9472_v4 = vmax.f32 %v9396_v7, 0.0 }
 0x53b   : > { %9504 = vst.msk [vmem:[%s14693_s20 + $0x88] sm:$0xff] %vm5985_vm7, %v9472_v4 }
 0x53d   : > { %v14771_v43 = vpop.f32.mrb[124].mxu0 }
 0x53e   : > { %v14773_v32 = vpop.f32.mrb[125].mxu0 }
 0x53f   : > { %v14775_v37 = vpop.f32.mrb[126].mxu0 }
 0x540   : > { %v14777_v50 = vpop.f32.mrb[127].mxu0 }
 0x545   : > { %v10474_v0 = vpop.f32.mrb[100].mxu1 }
 0x546   : > { %v10475_v24 = vpop.f32.mrb[101].mxu1 }
 0x547   : > { %v10476_v29 = vadd.f32 %v10475_v24, %v10474_v0  ;;  %v10477_v9 = vpop.f32.mrb[102].mxu1 }
 0x548   : > { %v10478_v62 = vpop.f32.mrb[103].mxu1 }
 0x549   : > { %v9240_v41 = vadd.f32 %v10476_v29, %v14685_v57  ;;  %v10479_v45 = vadd.f32 %v10478_v62, %v10477_v9 }
 0x54b   : > { %v9401_v16 = vadd.f32 %v14644_v52, %v9240_v41  ;;  %v9243_v40 = vadd.f32 %v10479_v45, %v14685_v57 }
 0x54d   : > { %v9473_v25 = vmax.f32 %v9401_v16, 0.0  ;;  %v9404_v17 = vadd.f32 %v14650_v55, %v9243_v40  ;;  %v10480_v14 = vpop.f32.mrb[104].mxu1 }
 0x54e   : > { %v10481_v56 = vpop.f32.mrb[105].mxu1 }
 0x54f   : > { %9505 = vst.msk [vmem:[%s14693_s20 + $0x90] sm:$0xff] %vm5985_vm7, %v9473_v25  ;;  %v9474_v21 = vmax.f32 %v9404_v17, 0.0  ;;  %v10482_v35 = vadd.f32 %v10481_v56, %v10480_v14  ;;  %v10483_v38 = vpop.f32.mrb[106].mxu1 }
 0x550   : > { %v10484_v46 = vpop.f32.mrb[107].mxu1 }
 0x551   : > { %9506 = vst.msk [vmem:[%s14693_s20 + $0x98] sm:$0xff] %vm5985_vm7, %v9474_v21  ;;  %v9248_v48 = vadd.f32 %v10482_v35, %v14685_v57  ;;  %v10485_v52 = vadd.f32 %v10484_v46, %v10483_v38 }
 0x553   : > { %v9409_v10 = vadd.f32 %v14662_v19, %v9248_v48  ;;  %v9251_v20 = vadd.f32 %v10485_v52, %v14685_v57 }
 0x555   : > { %v9475_v27 = vmax.f32 %v9409_v10, 0.0  ;;  %v9412_v55 = vadd.f32 %v14668_v33, %v9251_v20 }
 0x557   : > { %9507 = vst.msk [vmem:[%s14693_s20 + $0xa0] sm:$0xff] %vm5985_vm7, %v9475_v27  ;;  %v9476_v60 = vmax.f32 %v9412_v55, 0.0 }
 0x559   : > { %9508 = vst.msk [vmem:[%s14693_s20 + $0xa8] sm:$0xff] %vm5985_vm7, %v9476_v60 }
 0x561   : > { %v10486_v31 = vpop.f32.mrb[108].mxu1 }
 0x562   : > { %v10487_v1 = vpop.f32.mrb[109].mxu1 }
 0x563   : > { %v10488_v3 = vadd.f32 %v10487_v1, %v10486_v31  ;;  %v10489_v28 = vpop.f32.mrb[110].mxu1 }
 0x564   : > { %v10490_v63 = vpop.f32.mrb[111].mxu1 }
 0x565   : > { %v9256_v34 = vadd.f32 %v10488_v3, %v14685_v57  ;;  %v10491_v19 = vadd.f32 %v10490_v63, %v10489_v28 }
 0x567   : > { %v9417_v13 = vadd.f32 %v14659_v2, %v9256_v34  ;;  %v9259_v61 = vadd.f32 %v10491_v19, %v14685_v57 }
 0x569   : > { %v9477_v33 = vmax.f32 %v9417_v13, 0.0  ;;  %v9420_v42 = vadd.f32 %v14665_v54, %v9259_v61  ;;  %v10492_v30 = vpop.f32.mrb[112].mxu1 }
 0x56a   : > { %v10493_v15 = vpop.f32.mrb[113].mxu1 }
 0x56b   : > { %9509 = vst.msk [vmem:[%s14693_s20 + $0xb0] sm:$0xff] %vm5985_vm7, %v9477_v33  ;;  %v9478_v59 = vmax.f32 %v9420_v42, 0.0  ;;  %v10494_v11 = vadd.f32 %v10493_v15, %v10492_v30  ;;  %v10495_v8 = vpop.f32.mrb[114].mxu1 }
 0x56c   : > { %v10496_v39 = vpop.f32.mrb[115].mxu1 }
 0x56d   : > { %9510 = vst.msk [vmem:[%s14693_s20 + $0xb8] sm:$0xff] %vm5985_vm7, %v9478_v59  ;;  %v9264_v47 = vadd.f32 %v10494_v11, %v14685_v57  ;;  %v10497_v2 = vadd.f32 %v10496_v39, %v10495_v8 }
 0x56f   : > { %v9425_v44 = vadd.f32 %v14713_v53, %v9264_v47  ;;  %v9267_v12 = vadd.f32 %v10497_v2, %v14685_v57 }
 0x571   : > { %v9479_v5 = vmax.f32 %v9425_v44, 0.0  ;;  %v9428_v54 = vadd.f32 %v14719_v51, %v9267_v12 }
 0x573   : > { %9511 = vst.msk [vmem:[%s14693_s20 + $0xc0] sm:$0xff] %vm5985_vm7, %v9479_v5  ;;  %v9480_v22 = vmax.f32 %v9428_v54, 0.0 }
 0x575   : > { %9512 = vst.msk [vmem:[%s14693_s20 + $0xc8] sm:$0xff] %vm5985_vm7, %v9480_v22 }
 0x579   : > { %v10498_v58 = vpop.f32.mrb[116].mxu1 }
 0x57a   : > { %v10499_v23 = vpop.f32.mrb[117].mxu1 }
 0x57b   : > { %v10500_v6 = vadd.f32 %v10499_v23, %v10498_v58  ;;  %v10501_v26 = vpop.f32.mrb[118].mxu1 }
 0x57c   : > { %v10502_v18 = vpop.f32.mrb[119].mxu1 }
 0x57d   : > { %v9272_v7 = vadd.f32 %v10500_v6, %v14685_v57  ;;  %v10503_v53 = vadd.f32 %v10502_v18, %v10501_v26 }
 0x57f   : > { %v9433_v4 = vadd.f32 %v14711_v36, %v9272_v7  ;;  %v9275_v0 = vadd.f32 %v10503_v53, %v14685_v57 }
 0x581   : > { %v9481_v51 = vmax.f32 %v9433_v4, 0.0  ;;  %v9436_v24 = vadd.f32 %v14717_v49, %v9275_v0  ;;  %v10504_v29 = vpop.f32.mrb[120].mxu1 }
 0x582   : > { %v10505_v9 = vpop.f32.mrb[121].mxu1 }
 0x583   : > { %9513 = vst.msk [vmem:[%s14693_s20 + $0xd0] sm:$0xff] %vm5985_vm7, %v9481_v51  ;;  %v9482_v62 = vmax.f32 %v9436_v24, 0.0  ;;  %v10506_v41 = vadd.f32 %v10505_v9, %v10504_v29  ;;  %v10507_v45 = vpop.f32.mrb[122].mxu1 }
 0x584   : > { %v10508_v16 = vpop.f32.mrb[123].mxu1 }
 0x585   : > { %9514 = vst.msk [vmem:[%s14693_s20 + $0xd8] sm:$0xff] %vm5985_vm7, %v9482_v62  ;;  %v10509_v40 = vadd.f32 %v10508_v16, %v10507_v45  ;;  %v9280_v36 = vadd.f32 %v10506_v41, %v14685_v57 }
 0x587   : > { %v9441_v25 = vadd.f32 %v14773_v32, %v9280_v36  ;;  %v9283_v17 = vadd.f32 %v10509_v40, %v14685_v57 }
 0x589   : > { %v9483_v49 = vmax.f32 %v9441_v25, 0.0  ;;  %v9444_v14 = vadd.f32 %v14777_v50, %v9283_v17 }
 0x58b   : > { %9515 = vst.msk [vmem:[%s14693_s20 + $0xe0] sm:$0xff] %vm5985_vm7, %v9483_v49  ;;  %v9484_v56 = vmax.f32 %v9444_v14, 0.0 }
 0x58c   : > { %v10510_v21 = vpop.f32.mrb[124].mxu1 }
 0x58d   : > { %9516 = vst.msk [vmem:[%s14693_s20 + $0xe8] sm:$0xff] %vm5985_vm7, %v9484_v56  ;;  %v10511_v35 = vpop.f32.mrb[125].mxu1 }
 0x58e   : > { %v10512_v38 = vadd.f32 %v10511_v35, %v10510_v21  ;;  %v10513_v46 = vpop.f32.mrb[126].mxu1 }
 0x58f   : > { %v10514_v32 = vpop.f32.mrb[127].mxu1 }
 0x590   : > { %v9288_v48 = vadd.f32 %v10512_v38, %v14685_v57  ;;  %v10515_v52 = vadd.f32 %v10514_v32, %v10513_v46 }
 0x592   : > { %v9449_v10 = vadd.f32 %v14771_v43, %v9288_v48  ;;  %v9291_v50 = vadd.f32 %v10515_v52, %v14685_v57 }
 0x594   : > { %v9485_v20 = vmax.f32 %v9449_v10, 0.0  ;;  %v9452_v27 = vadd.f32 %v14775_v37, %v9291_v50 }
 0x596   : > { %9517 = vst.msk [vmem:[%s14693_s20 + $0xf0] sm:$0xff] %vm5985_vm7, %v9485_v20  ;;  %v9486_v43 = vmax.f32 %v9452_v27, 0.0 }
 0x598   : > { %9518 = vst.msk [vmem:[%s14693_s20 + $0xf8] sm:$0xff] %vm5985_vm7, %v9486_v43 }
 0x599   : > { %10818 = shalt.err (!%p10815_p3)
}
 0x59a   : > { %s10819_s17 = scalar_lea.hbm %s14836_s11, 4096  ;;  %s10823_s29 = scalar_lea.hbm %s14893_s6, 8192 }
 0x59b   : > { %p10820_p4 = scmp.ne.s32.totalorder %s14836_s11, %s10819_s17  ;;  %p10824_p9 = scmp.lt.u32.totalorder %s14836_s11, %s14893_s6 }
 0x59c   : > { %p10825_p10 = scmp.lt.u32.totalorder %s10823_s29, %s10819_s17  ;;  %p10827_p12 = scmp.lt.u32.totalorder %s10819_s17, %s14836_s11 }
 0x59d   : > { %p10821_p7 = pnand %p10820_p4, %p10949_p5 }
 0x59e   : > { %p10826_p11 = por %p10825_p10, %p10824_p9 }
 0x59f   : > { %p10822_p8 = pneg %p10821_p7 }
 0x5a0   : > { %p10828_p13 = por %p10827_p12, %p10826_p11 }
 0x5a2   : > { %p10829_p0 = pnand %p10828_p13, %p10822_p8 }
 0x5a4   : > { %10832 = shalt.err (!%p10829_p0)
}
 0x5a5   : > { %s10874_s26 = smov 128   ;;  %s10875_s9 = smov 8  }
 0x5a6   : > { %10610 = dma.vmem_to_hbm [thread:$0]  (%p10949_p5), %s14838_s28, 4096, %s14836_s11, %s14846_s25, %s10874_s26, %s10874_s26, %s10875_s9  }
 0x5a7 PF: > { %p10616_p1 = scmp.ge.s32.totalorder %s10867_s24, 2  ;;  %s9548_s10 = sand.u32 1, %s10855_s21  }
 0x5a8   : > { %s9549_s12 = scalar_lea.sflag [#allocation7], %s9548_s10 }
 0x5a9   : > { %p10613_p2 = pnand %p10616_p1, %p10953_p6 }
 0x5ab   : > { %10850 = dma.done.wait (!%p10613_p2), %s9549_s12, 4096  }
 0x5ac   : > { %10852 = vsyncadd (!%p10613_p2), %s9549_s12, 4294963200  ;;  %p16_p3 = scmp.ge.s32.totalorder %s10936_s27, 4   ;;  %s15044_s21 = smov %s10859_s22 }
 0x5ad   : > { %s15045_s22 = smov %s10863_s23  ;;  %s15046_s23 = smov %s10947_s30 }
 0x5ae   : > { %s15047_s24 = smov %s10936_s27  ;;  %18 = sbr.rel (!%p16_p3) target bundleno = 3 (0x3), region = 86 }
 0x5b5   :  { %9554 = vsyncpa [#allocation7], 1 }
 0x5b6   :  { %9556 = vsyncpa [#allocation7 + $0x1], 1 }

</bundles_post_ra>
